<compile_context>
chip_gen: v5e
topology: v5e:2x2
jax: 0.10.0
libtpu: 0.0.40
codegen_flags: <defaults>
</compile_context>

<pallas_src>
import functools

import jax
import jax.numpy as jnp
from jax.experimental import pallas as pl
from jax.experimental.pallas import tpu as pltpu


# --------------------------------------------------------------------------
# small helpers
# --------------------------------------------------------------------------
def _ceil_to(x, m):
    return ((x + m - 1) // m) * m


def _pad_last(x, new_c):
    c = x.shape[-1]
    if new_c == c:
        return x
    pad = [(0, 0)] * (x.ndim - 1) + [(0, new_c - c)]
    return jnp.pad(x, pad)


def _pad_rows(w, new_r):
    r = w.shape[0]
    if new_r == r:
        return w
    return jnp.pad(w, ((0, new_r - r), (0, 0)))


def _dtype_bytes(dt):
    return 2 if dt == jnp.bfloat16 else 4


def _choose_row_tile(total, max_tile, min_grid=2):
    """Pick a row tile; rows are zero-padded up to a multiple of it.
    128-aligned (MXU/lane friendly on all generations) whenever total > 128;
    halves the tile while the grid would have fewer than `min_grid` steps so
    v7x's two TensorCores both get work along the 'parallel' axis."""
    if total <= 128:
        return _ceil_to(total, 16)
    t = max((min(max_tile, total) // 128) * 128, 128)
    while t > 128 and -(-total // t) < min_grid:     # cdiv(total, t)
        t = max(((t // 2) // 128) * 128, 128)
    return t


def _prep_split_first_layer(streams, w0, pad_mult=16):
    """Pad each stream's channel dim up to `pad_mult` (zero channels) and split
    the first-layer weight rows per stream (zero-padding the extra rows).
    Streams keep their native dtype (bf16 if the producer kernel already
    emitted bf16, f32 for geometry-derived inputs); the cast to bf16 happens
    inside the kernel so no extra HBM pass is spent on a wrapper cast."""
    xs, w0s = [], []
    off = 0
    for s in streams:
        c = s.shape[-1]
        cp = _ceil_to(c, pad_mult)
        xs.append(_pad_last(s, cp))
        w0s.append(_pad_rows(w0[off:off + c], cp).astype(jnp.bfloat16))
        off += c
    return xs, w0s


@functools.lru_cache(maxsize=None)
def _vmem_budget_bytes():
    """~75% of physical VMEM: ~96 MiB on 128 MiB parts (v5e/v6e), ~48 MiB on
    v7x.  Falls back to the v7x-safe 48 MiB if the query fails."""
    cap = 64 * 1024 * 1024
    try:
        info = pltpu.get_tpu_info()
        v = int(getattr(info, "vmem_capacity_bytes", cap))
        if v >= 32 * 1024 * 1024:
            cap = v
    except Exception:
        pass
    return min(cap * 3 // 4, 100 * 1024 * 1024)


def _compiler_params():
    # One grid axis over independent row tiles -> "parallel" (lets v7x shard
    # it across its two TensorCores).
    return pltpu.CompilerParams(
        dimension_semantics=("parallel",),
        vmem_limit_bytes=int(_vmem_budget_bytes()),
    )


# --------------------------------------------------------------------------
# Pallas kernels
# --------------------------------------------------------------------------
def _pointwise_mlp_kernel(nstreams, nlayers, relu_flags, *refs):
    """refs = (x_0..x_{S-1}, w0_0..w0_{S-1}, b0, w1, b1, ..., o_ref).

    Streams are the channel-split pieces of the (conceptually concatenated)
    input, DMA'd in their native dtype and cast to bf16 in-kernel; the MXU
    accumulates in f32; biases are f32; output dtype is whatever the consumer
    wants (bf16 for chained MLPs, f32 for returned tensors).
    """
    o_ref = refs[-1]
    pos = nstreams
    h = None
    for s in range(nstreams):
        w = refs[pos][...]
        pos += 1
        x = refs[s][...].astype(jnp.bfloat16)
        part = jnp.dot(x, w, preferred_element_type=jnp.float32)
        h = part if h is None else h + part
    h = h + refs[pos][...]
    pos += 1
    if relu_flags[0]:
        h = jnp.maximum(h, 0.0)
    for li in range(1, nlayers):
        w = refs[pos][...]
        b = refs[pos + 1][...]
        pos += 2
        h = jnp.dot(h.astype(jnp.bfloat16), w,
                    preferred_element_type=jnp.float32) + b
        if relu_flags[li]:
            h = jnp.maximum(h, 0.0)
    o_ref[...] = h.astype(o_ref.dtype)


def _sa_mlp_max_kernel(nstreams, nlayers, *refs):
    """Shared MLP + max-pool over the K neighbours for one SA module.

    x stream blocks are (K, T, C_s) with the neighbour index k slowest; layers
    0..L-2 run as one big (K*T)-row matmul per layer.  The last layer is fused
    with the max: per k, a (T, Chid) x (Chid, Cout) matmul max-accumulates into
    a (T, Cout) f32 accumulator, so the (K*T, Cout) hidden slab never exists
    and there is no long serial slab-max chain over re-loaded VMEM.
    Bias + ReLU commute with the max (monotone), so they are applied once at
    the end — numerically identical to per-k bias/ReLU followed by max.
    """
    o_ref = refs[-1]
    K, T, _ = refs[0].shape
    w0s = [refs[nstreams + s][...] for s in range(nstreams)]
    b0 = refs[2 * nstreams][...]
    pos = 2 * nstreams + 1
    wbs = []
    for _ in range(1, nlayers):
        wbs.append((refs[pos][...], refs[pos + 1][...]))
        pos += 2

    if nlayers == 1:
        m = None
        for k in range(K):
            hk = None
            for s in range(nstreams):
                xk = refs[s][k].astype(jnp.bfloat16)
                p = jnp.dot(xk, w0s[s], preferred_element_type=jnp.float32)
                hk = p if hk is None else hk + p
            m = hk if m is None else jnp.maximum(m, hk)
        o_ref[...] = jnp.maximum(m + b0, 0.0).astype(o_ref.dtype)
        return

    # layer 0 over all K*T rows
    h = None
    for s in range(nstreams):
        x2 = refs[s][...].astype(jnp.bfloat16).reshape(K * T, refs[s].shape[2])
        part = jnp.dot(x2, w0s[s], preferred_element_type=jnp.float32)
        h = part if h is None else h + part
    h = jnp.maximum(h + b0, 0.0)

    # middle layers
    for li in range(nlayers - 2):
        w, b = wbs[li]
        h = jnp.maximum(
            jnp.dot(h.astype(jnp.bfloat16), w,
                    preferred_element_type=jnp.float32) + b, 0.0)

    # last layer fused with the max over K
    w_last, b_last = wbs[-1]
    hb = h.astype(jnp.bfloat16)
    m = None
    for k in range(K):
        ok = jnp.dot(hb[k * T:(k + 1) * T, :], w_last,
                     preferred_element_type=jnp.float32)
        m = ok if m is None else jnp.maximum(m, ok)
    o_ref[...] = jnp.maximum(m + b_last, 0.0).astype(o_ref.dtype)


# --------------------------------------------------------------------------
# Pallas wrappers
# --------------------------------------------------------------------------
def pointwise_mlp(streams, weights, biases, relu_flags,
                  out_dtype=jnp.float32, row_tile_max=2048):
    """Shared 1x1-conv MLP over flattened rows.
    streams: list of (R, C_s) arrays (channel-split input, same row dim).
    Returns (R, C_out) in out_dtype."""
    R = streams[0].shape[0]
    Cout = weights[-1].shape[1]
    nlayers = len(weights)
    nstreams = len(streams)
    T = _choose_row_tile(R, row_tile_max)
    R_pad = _ceil_to(R, T)

    xs, w0s = _prep_split_first_layer(streams, weights[0])
    if R_pad != R:
        xs = [jnp.pad(x, ((0, R_pad - R), (0, 0))) for x in xs]

    args, in_specs = [], []
    for x in xs:
        args.append(x)
        in_specs.append(pl.BlockSpec((T, x.shape[1]), lambda i: (i, 0)))
    for w in w0s:
        args.append(w)
        in_specs.append(pl.BlockSpec(w.shape, lambda i: (0, 0)))
    b0 = biases[0].reshape(1, -1).astype(jnp.float32)
    args.append(b0)
    in_specs.append(pl.BlockSpec(b0.shape, lambda i: (0, 0)))
    for w, bvec in zip(weights[1:], biases[1:]):
        wb = w.astype(jnp.bfloat16)
        b2 = bvec.reshape(1, -1).astype(jnp.float32)
        args += [wb, b2]
        in_specs.append(pl.BlockSpec(wb.shape, lambda i: (0, 0)))
        in_specs.append(pl.BlockSpec(b2.shape, lambda i: (0, 0)))

    flops = 2 * R_pad * sum(int(w.shape[0]) * int(w.shape[1]) for w in weights)
    bytes_acc = sum(int(a.size) * _dtype_bytes(a.dtype) for a in args) \
        + R_pad * Cout * _dtype_bytes(out_dtype)

    kernel = functools.partial(_pointwise_mlp_kernel, nstreams, nlayers,
                               tuple(relu_flags))
    out = pl.pallas_call(
        kernel,
        out_shape=jax.ShapeDtypeStruct((R_pad, Cout), out_dtype),
        grid=(R_pad // T,),
        in_specs=in_specs,
        out_specs=pl.BlockSpec((T, Cout), lambda i: (i, 0)),
        compiler_params=_compiler_params(),
        cost_estimate=pl.CostEstimate(flops=int(flops), transcendentals=0,
                                      bytes_accessed=int(bytes_acc)),
    )(*args)
    return out[:R] if R_pad != R else out


def sa_mlp_max(streams, weights, biases,
               out_dtype=jnp.bfloat16, row_tile_max=512):
    """streams: list of (K, R, C_s) with neighbour index k slowest and
    R = B*npoint centroid rows.  Shared MLP over all K*R rows, max over K
    fused into the last layer.  Returns (R, C_out) in out_dtype."""
    K, R, _ = streams[0].shape
    Cout = weights[-1].shape[1]
    nlayers = len(weights)
    nstreams = len(streams)
    T = _choose_row_tile(R, row_tile_max)
    R_pad = _ceil_to(R, T)

    xs, w0s = _prep_split_first_layer(streams, weights[0])
    if R_pad != R:
        xs = [jnp.pad(x, ((0, 0), (0, R_pad - R), (0, 0))) for x in xs]

    args, in_specs = [], []
    for x in xs:
        args.append(x)
        in_specs.append(pl.BlockSpec((K, T, x.shape[2]), lambda i: (0, i, 0)))
    for w in w0s:
        args.append(w)
        in_specs.append(pl.BlockSpec(w.shape, lambda i: (0, 0)))
    b0 = biases[0].reshape(1, -1).astype(jnp.float32)
    args.append(b0)
    in_specs.append(pl.BlockSpec(b0.shape, lambda i: (0, 0)))
    for w, bvec in zip(weights[1:], biases[1:]):
        wb = w.astype(jnp.bfloat16)
        b2 = bvec.reshape(1, -1).astype(jnp.float32)
        args += [wb, b2]
        in_specs.append(pl.BlockSpec(wb.shape, lambda i: (0, 0)))
        in_specs.append(pl.BlockSpec(b2.shape, lambda i: (0, 0)))

    flops = 2 * K * R_pad * sum(int(w.shape[0]) * int(w.shape[1])
                                for w in weights)
    bytes_acc = sum(int(a.size) * _dtype_bytes(a.dtype) for a in args) \
        + R_pad * Cout * _dtype_bytes(out_dtype)

    kernel = functools.partial(_sa_mlp_max_kernel, nstreams, nlayers)
    out = pl.pallas_call(
        kernel,
        out_shape=jax.ShapeDtypeStruct((R_pad, Cout), out_dtype),
        grid=(R_pad // T,),
        in_specs=in_specs,
        out_specs=pl.BlockSpec((T, Cout), lambda i: (i, 0)),
        compiler_params=_compiler_params(),
        cost_estimate=pl.CostEstimate(flops=int(flops), transcendentals=0,
                                      bytes_accessed=int(bytes_acc)),
    )(*args)
    return out[:R] if R_pad != R else out


# --------------------------------------------------------------------------
# Geometric glue (plain JAX)
# TODO(synk): FPS / ball-query / three-NN are data-dependent gathers with no
# rectangular-tile Pallas equivalent; a PrefetchScalarGridSpec row-DMA gather
# inside the SA kernel is the next structural step at real sizes.
# --------------------------------------------------------------------------
def _batched_gather(x, idx):
    """x: (B, N, ...), idx: (B, ...) int -> x gathered along axis 1 per batch."""
    return jax.vmap(lambda xb, ib: xb[ib])(x, idx)


def _group_kmajor(x, idx):
    """x: (B, N, C), idx: (B, S, K) int -> (K, B, S, C).
    Gathers with a k-major index so the big grouped tensor is produced
    directly in the layout the SA kernel wants (no full-tensor transpose)."""
    idx_km = jnp.transpose(idx, (2, 0, 1))                 # tiny int transpose
    return jax.vmap(lambda ik: _batched_gather(x, ik))(idx_km)


def farthest_point_sample(xyz, npoint):
    """xyz: (B, N, 3) -> (B, npoint) int32 indices (deterministic, start at 0)."""
    B, N, _ = xyz.shape
    first = jnp.zeros((B,), jnp.int32)
    dist0 = jnp.full((B, N), 1e10, xyz.dtype)

    def body(carry, _):
        dist, last = carry
        last_pt = jax.vmap(lambda xb, ib: xb[ib])(xyz, last)          # (B, 3)
        d = jnp.sum((xyz - last_pt[:, None, :]) ** 2, axis=-1)        # (B, N)
        dist = jnp.minimum(dist, d)
        nxt = jnp.argmax(dist, axis=-1).astype(jnp.int32)
        return (dist, nxt), nxt

    (_, _), rest = jax.lax.scan(body, (dist0, first), xs=None, length=npoint - 1)
    return jnp.concatenate([first[None, :], rest], axis=0).T          # (B, npoint)


def ball_query(xyz, new_xyz, radius, nsample):
    """Emulates the CUDA ball_query: first `nsample` in-radius indices
    (in increasing index order), padded with the first found index."""
    N = xyz.shape[1]
    d2 = jnp.sum((new_xyz[:, :, None, :] - xyz[:, None, :, :]) ** 2, axis=-1)
    in_ball = d2 < radius * radius
    idx_or_big = jnp.where(in_ball, jnp.arange(N)[None, None, :], N)
    sorted_idx = jnp.sort(idx_or_big, axis=-1)[..., :nsample]
    first = sorted_idx[..., :1]
    idx = jnp.where(sorted_idx >= N, first, sorted_idx)
    idx = jnp.where(idx >= N, 0, idx)
    return idx.astype(jnp.int32)


def three_interpolate(unknown, known, known_feats):
    """unknown (B,n,3), known (B,m,3), known_feats (B,m,C) -> (B,n,C) f32."""
    d2 = jnp.sum((unknown[:, :, None, :] - known[:, None, :, :]) ** 2, axis=-1)
    neg_d2, idx = jax.lax.top_k(-d2, 3)                               # (B,n,3)
    dist = jnp.sqrt(jnp.maximum(-neg_d2, 0.0))
    recip = 1.0 / (dist + 1e-8)
    weight = recip / jnp.sum(recip, axis=-1, keepdims=True)           # (B,n,3)
    gathered = _batched_gather(known_feats, idx)                      # (B,n,3,C)
    return jnp.sum(gathered.astype(jnp.float32) * weight[..., None], axis=2)


# --------------------------------------------------------------------------
# PointNet2 modules
# --------------------------------------------------------------------------
def sa_module(xyz, feats, npoint, radius, nsample, params, use_xyz=True,
              out_dtype=jnp.bfloat16):
    ws, bs = params
    fps_idx = farthest_point_sample(xyz, npoint)                      # (B, S)
    new_xyz = _batched_gather(xyz, fps_idx)                           # (B, S, 3)
    idx = ball_query(xyz, new_xyz, radius, nsample)                   # (B, S, K)

    # gather directly in k-major layout: (K, B, S, C)
    grouped_xyz = _group_kmajor(xyz, idx) - new_xyz[None, :, :, :]
    streams = []
    if use_xyz:
        streams.append(grouped_xyz)
    if feats is not None:
        streams.append(_group_kmajor(feats, idx))                     # (K,B,S,C)

    K, B, S, _ = grouped_xyz.shape
    flat = [s.reshape(K, B * S, s.shape[-1]) for s in streams]
    new_feats = sa_mlp_max(flat, ws, bs, out_dtype=out_dtype)         # (B*S, Cout)
    return new_xyz, new_feats.reshape(B, S, -1)


def fp_module(unknown_xyz, known_xyz, unknown_feats, known_feats, params,
              out_dtype=jnp.bfloat16):
    ws, bs = params
    interp = three_interpolate(unknown_xyz, known_xyz, known_feats)   # (B,n,C2)
    B, n, _ = interp.shape
    streams = [interp.reshape(B * n, -1)]
    if unknown_feats is not None:
        streams.append(unknown_feats.reshape(B * n, -1))              # skip feats
    out = pointwise_mlp(streams, ws, bs, [True] * len(ws),
                        out_dtype=out_dtype)                          # (B*n, C)
    return out.reshape(B, n, -1)


def pointnet2_forward(pointcloud, numpoints, params):
    """pointcloud: (B, N, 3 + input_channels); numpoints: list of 3 ints."""
    xyz = pointcloud[..., 0:3]
    feats = pointcloud[..., 3:] if pointcloud.shape[-1] > 3 else None  # channels-last
    l_xyz, l_feats = [xyz], [feats]
    sa_cfg = [(0.3, 32), (0.5, 32), (0.7, 32)]
    for i in range(3):
        radius, nsample = sa_cfg[i]
        # SA outputs feed more MLP kernels only -> keep them bf16 in HBM.
        nx, nf = sa_module(l_xyz[i], l_feats[i], numpoints[i], radius, nsample,
                           params['sa'][i], out_dtype=jnp.bfloat16)
        l_xyz.append(nx)
        l_feats.append(nf)

    tw, tb = params['trans']
    B, S3, C3 = l_feats[-1].shape
    mid_feat = pointwise_mlp([l_feats[-1].reshape(B * S3, C3)],
                             [tw], [tb], [False],
                             out_dtype=jnp.float32).reshape(B, S3, -1)
    mid_xyz = l_xyz[-1]

    for i in range(3):
        j = -(i + 1)
        od = jnp.float32 if i == 2 else jnp.bfloat16   # only the returned feats stay f32
        l_feats[j - 1] = fp_module(l_xyz[j - 1], l_xyz[j],
                                   l_feats[j - 1], l_feats[j],
                                   params['fp'][i], out_dtype=od)

    # match PyTorch output layout exactly: features as (B, C, N)
    return (l_xyz[0],
            jnp.transpose(l_feats[0], (0, 2, 1)),
            mid_xyz,
            jnp.transpose(mid_feat, (0, 2, 1)))


# --------------------------------------------------------------------------
# Deterministic synthetic parameters
# (BatchNorm is folded as identity into the 1x1-conv weights.)
# --------------------------------------------------------------------------
def init_params(key, input_channels=3, use_xyz=True):
    state = {'key': key}

    def lin(cin, cout):
        state['key'], kw, kb = jax.random.split(state['key'], 3)
        w = jax.random.normal(kw, (cin, cout), jnp.float32) * 0.05
        b = jax.random.normal(kb, (cout,), jnp.float32) * 0.05
        return w, b

    sa_mlps = [[input_channels, 64, 64, 128],
               [128, 128, 128, 256],
               [256, 256, 256, 256]]
    if use_xyz:
        sa_mlps = [[m[0] + 3] + m[1:] for m in sa_mlps]
    skip = [input_channels, 128, 256, 256]
    fp_mlps = [[256 + skip[-2], 128, 128],
               [128 + skip[-3], 256, 256],
               [256 + skip[-4], 256, 256]]

    params = {'sa': [], 'fp': []}
    for m in sa_mlps:
        ws, bs = [], []
        for cin, cout in zip(m[:-1], m[1:]):
            w, b = lin(cin, cout)
            ws.append(w)
            bs.append(b)
        params['sa'].append((ws, bs))
    params['trans'] = lin(256, 256)
    for m in fp_mlps:
        ws, bs = [], []
        for cin, cout in zip(m[:-1], m[1:]):
            w, b = lin(cin, cout)
            ws.append(w)
            bs.append(b)
        params['fp'].append((ws, bs))
    return params


# --------------------------------------------------------------------------
if __name__ == "__main__":
    key = jax.random.PRNGKey(0)
    kp, kd = jax.random.split(key)

    B, N, IC = 2, 64, 3                        # pointcloud: (B, N, 3 + IC)
    numpoints = [32, 16, 8]

    params = init_params(kp, input_channels=IC, use_xyz=True)
    pointcloud = jax.random.normal(kd, (B, N, 3 + IC), jnp.float32)

    outs = pointnet2_forward(pointcloud, numpoints, params)
    outs = jax.block_until_ready(outs)

    l0_xyz, l0_feat, mid_xyz, mid_feat = outs
    assert l0_xyz.shape == (B, N, 3)
    assert l0_feat.shape == (B, 256, N)
    assert mid_xyz.shape == (B, numpoints[-1], 3)
    assert mid_feat.shape == (B, 256, numpoints[-1])
    assert all(bool(jnp.all(jnp.isfinite(o.astype(jnp.float32)))) for o in outs)

    print("KERNEL_OK")
</pallas_src>

<mosaic_0001>
module attributes {stable_mosaic.version = 11 : i64} {
  func.func @_sa_mlp_max_kernel(%arg0: i32, %arg1: memref<32x64x16xf32, #tpu.memory_space<vmem>>, %arg2: memref<32x64x16xf32, #tpu.memory_space<vmem>>, %arg3: memref<16x64xbf16, #tpu.memory_space<vmem>>, %arg4: memref<16x64xbf16, #tpu.memory_space<vmem>>, %arg5: memref<1x64xf32, #tpu.memory_space<vmem>>, %arg6: memref<64x64xbf16, #tpu.memory_space<vmem>>, %arg7: memref<1x64xf32, #tpu.memory_space<vmem>>, %arg8: memref<64x128xbf16, #tpu.memory_space<vmem>>, %arg9: memref<1x128xf32, #tpu.memory_space<vmem>>, %arg10: memref<64x128xbf16, #tpu.memory_space<vmem>>) attributes {dimension_semantics = [#tpu.dimension_semantics<parallel>], iteration_bounds = array<i64: 1>, scalar_prefetch = 0 : i64, scratch_operands = 0 : i64, tpu.core_type = #tpu.core_type<tc>, window_params = [{transform_indices = @transform_0, window_bounds = array<i64: 32, 64, 16>}, {transform_indices = @transform_1, window_bounds = array<i64: 32, 64, 16>}, {pipeline_mode = #tpu.pipeline_mode<synchronous>, transform_indices = @transform_2, window_bounds = array<i64: 16, 64>}, {pipeline_mode = #tpu.pipeline_mode<synchronous>, transform_indices = @transform_3, window_bounds = array<i64: 16, 64>}, {pipeline_mode = #tpu.pipeline_mode<synchronous>, transform_indices = @transform_4, window_bounds = array<i64: 1, 64>}, {pipeline_mode = #tpu.pipeline_mode<synchronous>, transform_indices = @transform_5, window_bounds = array<i64: 64, 64>}, {pipeline_mode = #tpu.pipeline_mode<synchronous>, transform_indices = @transform_6, window_bounds = array<i64: 1, 64>}, {pipeline_mode = #tpu.pipeline_mode<synchronous>, transform_indices = @transform_7, window_bounds = array<i64: 64, 128>}, {pipeline_mode = #tpu.pipeline_mode<synchronous>, transform_indices = @transform_8, window_bounds = array<i64: 1, 128>}, {transform_indices = @transform_9, window_bounds = array<i64: 64, 128>}]} {
    %c0 = arith.constant 0 : index
    %c0_0 = arith.constant 0 : index
    %0 = vector.load %arg3[%c0, %c0_0] : memref<16x64xbf16, #tpu.memory_space<vmem>>, vector<16x64xbf16>
    %c0_1 = arith.constant 0 : index
    %c0_2 = arith.constant 0 : index
    %1 = vector.load %arg4[%c0_1, %c0_2] : memref<16x64xbf16, #tpu.memory_space<vmem>>, vector<16x64xbf16>
    %c0_3 = arith.constant 0 : index
    %c0_4 = arith.constant 0 : index
    %2 = vector.load %arg5[%c0_3, %c0_4] : memref<1x64xf32, #tpu.memory_space<vmem>>, vector<1x64xf32>
    %c0_5 = arith.constant 0 : index
    %c0_6 = arith.constant 0 : index
    %3 = vector.load %arg6[%c0_5, %c0_6] : memref<64x64xbf16, #tpu.memory_space<vmem>>, vector<64x64xbf16>
    %c0_7 = arith.constant 0 : index
    %c0_8 = arith.constant 0 : index
    %4 = vector.load %arg7[%c0_7, %c0_8] : memref<1x64xf32, #tpu.memory_space<vmem>>, vector<1x64xf32>
    %c0_9 = arith.constant 0 : index
    %c0_10 = arith.constant 0 : index
    %5 = vector.load %arg8[%c0_9, %c0_10] : memref<64x128xbf16, #tpu.memory_space<vmem>>, vector<64x128xbf16>
    %c0_11 = arith.constant 0 : index
    %c0_12 = arith.constant 0 : index
    %6 = vector.load %arg9[%c0_11, %c0_12] : memref<1x128xf32, #tpu.memory_space<vmem>>, vector<1x128xf32>
    %c0_13 = arith.constant 0 : index
    %c0_14 = arith.constant 0 : index
    %c0_15 = arith.constant 0 : index
    %7 = vector.load %arg1[%c0_13, %c0_14, %c0_15] : memref<32x64x16xf32, #tpu.memory_space<vmem>>, vector<32x64x16xf32>
    %8 = arith.truncf %7 : vector<32x64x16xf32> to vector<32x64x16xbf16>
    %9 = vector.shape_cast %8 : vector<32x64x16xbf16> to vector<2048x16xbf16>
    %cst = arith.constant dense<0.000000e+00> : vector<2048x64xf32>
    %10 = tpu.matmul %9, %0, %cst {dimension_numbers = #tpu.dot_dimension_numbers<[1], [0], [0], [1], [0, 0, 1, 1], [], []>} : vector<2048x16xbf16>, vector<16x64xbf16>, vector<2048x64xf32> -> vector<2048x64xf32>
    %c0_16 = arith.constant 0 : index
    %c0_17 = arith.constant 0 : index
    %c0_18 = arith.constant 0 : index
    %11 = vector.load %arg2[%c0_16, %c0_17, %c0_18] : memref<32x64x16xf32, #tpu.memory_space<vmem>>, vector<32x64x16xf32>
    %12 = arith.truncf %11 : vector<32x64x16xf32> to vector<32x64x16xbf16>
    %13 = vector.shape_cast %12 : vector<32x64x16xbf16> to vector<2048x16xbf16>
    %cst_19 = arith.constant dense<0.000000e+00> : vector<2048x64xf32>
    %14 = tpu.matmul %13, %1, %cst_19 {dimension_numbers = #tpu.dot_dimension_numbers<[1], [0], [0], [1], [0, 0, 1, 1], [], []>} : vector<2048x16xbf16>, vector<16x64xbf16>, vector<2048x64xf32> -> vector<2048x64xf32>
    %15 = arith.addf %10, %14 : vector<2048x64xf32>
    %16 = vector.broadcast %2 : vector<1x64xf32> to vector<2048x64xf32>
    %17 = arith.addf %15, %16 : vector<2048x64xf32>
    %cst_20 = arith.constant 0.000000e+00 : f32
    %18 = vector.broadcast %cst_20 : f32 to vector<2048x64xf32>
    %19 = arith.maximumf %17, %18 : vector<2048x64xf32>
    %20 = arith.truncf %19 : vector<2048x64xf32> to vector<2048x64xbf16>
    %cst_21 = arith.constant dense<0.000000e+00> : vector<2048x64xf32>
    %21 = tpu.matmul %20, %3, %cst_21 {dimension_numbers = #tpu.dot_dimension_numbers<[1], [0], [0], [1], [0, 0, 1, 1], [], []>} : vector<2048x64xbf16>, vector<64x64xbf16>, vector<2048x64xf32> -> vector<2048x64xf32>
    %22 = vector.broadcast %4 : vector<1x64xf32> to vector<2048x64xf32>
    %23 = arith.addf %21, %22 : vector<2048x64xf32>
    %cst_22 = arith.constant 0.000000e+00 : f32
    %24 = vector.broadcast %cst_22 : f32 to vector<2048x64xf32>
    %25 = arith.maximumf %23, %24 : vector<2048x64xf32>
    %26 = arith.truncf %25 : vector<2048x64xf32> to vector<2048x64xbf16>
    %27 = vector.extract_strided_slice %26 {offsets = [0, 0], sizes = [64, 64], strides = [1, 1]} : vector<2048x64xbf16> to vector<64x64xbf16>
    %cst_23 = arith.constant dense<0.000000e+00> : vector<64x128xf32>
    %28 = tpu.matmul %27, %5, %cst_23 {dimension_numbers = #tpu.dot_dimension_numbers<[1], [0], [0], [1], [0, 0, 1, 1], [], []>} : vector<64x64xbf16>, vector<64x128xbf16>, vector<64x128xf32> -> vector<64x128xf32>
    %29 = vector.extract_strided_slice %26 {offsets = [64, 0], sizes = [64, 64], strides = [1, 1]} : vector<2048x64xbf16> to vector<64x64xbf16>
    %cst_24 = arith.constant dense<0.000000e+00> : vector<64x128xf32>
    %30 = tpu.matmul %29, %5, %cst_24 {dimension_numbers = #tpu.dot_dimension_numbers<[1], [0], [0], [1], [0, 0, 1, 1], [], []>} : vector<64x64xbf16>, vector<64x128xbf16>, vector<64x128xf32> -> vector<64x128xf32>
    %31 = arith.maximumf %28, %30 : vector<64x128xf32>
    %32 = vector.extract_strided_slice %26 {offsets = [128, 0], sizes = [64, 64], strides = [1, 1]} : vector<2048x64xbf16> to vector<64x64xbf16>
    %cst_25 = arith.constant dense<0.000000e+00> : vector<64x128xf32>
    %33 = tpu.matmul %32, %5, %cst_25 {dimension_numbers = #tpu.dot_dimension_numbers<[1], [0], [0], [1], [0, 0, 1, 1], [], []>} : vector<64x64xbf16>, vector<64x128xbf16>, vector<64x128xf32> -> vector<64x128xf32>
    %34 = arith.maximumf %31, %33 : vector<64x128xf32>
    %35 = vector.extract_strided_slice %26 {offsets = [192, 0], sizes = [64, 64], strides = [1, 1]} : vector<2048x64xbf16> to vector<64x64xbf16>
    %cst_26 = arith.constant dense<0.000000e+00> : vector<64x128xf32>
    %36 = tpu.matmul %35, %5, %cst_26 {dimension_numbers = #tpu.dot_dimension_numbers<[1], [0], [0], [1], [0, 0, 1, 1], [], []>} : vector<64x64xbf16>, vector<64x128xbf16>, vector<64x128xf32> -> vector<64x128xf32>
    %37 = arith.maximumf %34, %36 : vector<64x128xf32>
    %38 = vector.extract_strided_slice %26 {offsets = [256, 0], sizes = [64, 64], strides = [1, 1]} : vector<2048x64xbf16> to vector<64x64xbf16>
    %cst_27 = arith.constant dense<0.000000e+00> : vector<64x128xf32>
    %39 = tpu.matmul %38, %5, %cst_27 {dimension_numbers = #tpu.dot_dimension_numbers<[1], [0], [0], [1], [0, 0, 1, 1], [], []>} : vector<64x64xbf16>, vector<64x128xbf16>, vector<64x128xf32> -> vector<64x128xf32>
    %40 = arith.maximumf %37, %39 : vector<64x128xf32>
    %41 = vector.extract_strided_slice %26 {offsets = [320, 0], sizes = [64, 64], strides = [1, 1]} : vector<2048x64xbf16> to vector<64x64xbf16>
    %cst_28 = arith.constant dense<0.000000e+00> : vector<64x128xf32>
    %42 = tpu.matmul %41, %5, %cst_28 {dimension_numbers = #tpu.dot_dimension_numbers<[1], [0], [0], [1], [0, 0, 1, 1], [], []>} : vector<64x64xbf16>, vector<64x128xbf16>, vector<64x128xf32> -> vector<64x128xf32>
    %43 = arith.maximumf %40, %42 : vector<64x128xf32>
    %44 = vector.extract_strided_slice %26 {offsets = [384, 0], sizes = [64, 64], strides = [1, 1]} : vector<2048x64xbf16> to vector<64x64xbf16>
    %cst_29 = arith.constant dense<0.000000e+00> : vector<64x128xf32>
    %45 = tpu.matmul %44, %5, %cst_29 {dimension_numbers = #tpu.dot_dimension_numbers<[1], [0], [0], [1], [0, 0, 1, 1], [], []>} : vector<64x64xbf16>, vector<64x128xbf16>, vector<64x128xf32> -> vector<64x128xf32>
    %46 = arith.maximumf %43, %45 : vector<64x128xf32>
    %47 = vector.extract_strided_slice %26 {offsets = [448, 0], sizes = [64, 64], strides = [1, 1]} : vector<2048x64xbf16> to vector<64x64xbf16>
    %cst_30 = arith.constant dense<0.000000e+00> : vector<64x128xf32>
    %48 = tpu.matmul %47, %5, %cst_30 {dimension_numbers = #tpu.dot_dimension_numbers<[1], [0], [0], [1], [0, 0, 1, 1], [], []>} : vector<64x64xbf16>, vector<64x128xbf16>, vector<64x128xf32> -> vector<64x128xf32>
    %49 = arith.maximumf %46, %48 : vector<64x128xf32>
    %50 = vector.extract_strided_slice %26 {offsets = [512, 0], sizes = [64, 64], strides = [1, 1]} : vector<2048x64xbf16> to vector<64x64xbf16>
    %cst_31 = arith.constant dense<0.000000e+00> : vector<64x128xf32>
    %51 = tpu.matmul %50, %5, %cst_31 {dimension_numbers = #tpu.dot_dimension_numbers<[1], [0], [0], [1], [0, 0, 1, 1], [], []>} : vector<64x64xbf16>, vector<64x128xbf16>, vector<64x128xf32> -> vector<64x128xf32>
    %52 = arith.maximumf %49, %51 : vector<64x128xf32>
    %53 = vector.extract_strided_slice %26 {offsets = [576, 0], sizes = [64, 64], strides = [1, 1]} : vector<2048x64xbf16> to vector<64x64xbf16>
    %cst_32 = arith.constant dense<0.000000e+00> : vector<64x128xf32>
    %54 = tpu.matmul %53, %5, %cst_32 {dimension_numbers = #tpu.dot_dimension_numbers<[1], [0], [0], [1], [0, 0, 1, 1], [], []>} : vector<64x64xbf16>, vector<64x128xbf16>, vector<64x128xf32> -> vector<64x128xf32>
    %55 = arith.maximumf %52, %54 : vector<64x128xf32>
    %56 = vector.extract_strided_slice %26 {offsets = [640, 0], sizes = [64, 64], strides = [1, 1]} : vector<2048x64xbf16> to vector<64x64xbf16>
    %cst_33 = arith.constant dense<0.000000e+00> : vector<64x128xf32>
    %57 = tpu.matmul %56, %5, %cst_33 {dimension_numbers = #tpu.dot_dimension_numbers<[1], [0], [0], [1], [0, 0, 1, 1], [], []>} : vector<64x64xbf16>, vector<64x128xbf16>, vector<64x128xf32> -> vector<64x128xf32>
    %58 = arith.maximumf %55, %57 : vector<64x128xf32>
    %59 = vector.extract_strided_slice %26 {offsets = [704, 0], sizes = [64, 64], strides = [1, 1]} : vector<2048x64xbf16> to vector<64x64xbf16>
    %cst_34 = arith.constant dense<0.000000e+00> : vector<64x128xf32>
    %60 = tpu.matmul %59, %5, %cst_34 {dimension_numbers = #tpu.dot_dimension_numbers<[1], [0], [0], [1], [0, 0, 1, 1], [], []>} : vector<64x64xbf16>, vector<64x128xbf16>, vector<64x128xf32> -> vector<64x128xf32>
    %61 = arith.maximumf %58, %60 : vector<64x128xf32>
    %62 = vector.extract_strided_slice %26 {offsets = [768, 0], sizes = [64, 64], strides = [1, 1]} : vector<2048x64xbf16> to vector<64x64xbf16>
    %cst_35 = arith.constant dense<0.000000e+00> : vector<64x128xf32>
    %63 = tpu.matmul %62, %5, %cst_35 {dimension_numbers = #tpu.dot_dimension_numbers<[1], [0], [0], [1], [0, 0, 1, 1], [], []>} : vector<64x64xbf16>, vector<64x128xbf16>, vector<64x128xf32> -> vector<64x128xf32>
    %64 = arith.maximumf %61, %63 : vector<64x128xf32>
    %65 = vector.extract_strided_slice %26 {offsets = [832, 0], sizes = [64, 64], strides = [1, 1]} : vector<2048x64xbf16> to vector<64x64xbf16>
    %cst_36 = arith.constant dense<0.000000e+00> : vector<64x128xf32>
    %66 = tpu.matmul %65, %5, %cst_36 {dimension_numbers = #tpu.dot_dimension_numbers<[1], [0], [0], [1], [0, 0, 1, 1], [], []>} : vector<64x64xbf16>, vector<64x128xbf16>, vector<64x128xf32> -> vector<64x128xf32>
    %67 = arith.maximumf %64, %66 : vector<64x128xf32>
    %68 = vector.extract_strided_slice %26 {offsets = [896, 0], sizes = [64, 64], strides = [1, 1]} : vector<2048x64xbf16> to vector<64x64xbf16>
    %cst_37 = arith.constant dense<0.000000e+00> : vector<64x128xf32>
    %69 = tpu.matmul %68, %5, %cst_37 {dimension_numbers = #tpu.dot_dimension_numbers<[1], [0], [0], [1], [0, 0, 1, 1], [], []>} : vector<64x64xbf16>, vector<64x128xbf16>, vector<64x128xf32> -> vector<64x128xf32>
    %70 = arith.maximumf %67, %69 : vector<64x128xf32>
    %71 = vector.extract_strided_slice %26 {offsets = [960, 0], sizes = [64, 64], strides = [1, 1]} : vector<2048x64xbf16> to vector<64x64xbf16>
    %cst_38 = arith.constant dense<0.000000e+00> : vector<64x128xf32>
    %72 = tpu.matmul %71, %5, %cst_38 {dimension_numbers = #tpu.dot_dimension_numbers<[1], [0], [0], [1], [0, 0, 1, 1], [], []>} : vector<64x64xbf16>, vector<64x128xbf16>, vector<64x128xf32> -> vector<64x128xf32>
    %73 = arith.maximumf %70, %72 : vector<64x128xf32>
    %74 = vector.extract_strided_slice %26 {offsets = [1024, 0], sizes = [64, 64], strides = [1, 1]} : vector<2048x64xbf16> to vector<64x64xbf16>
    %cst_39 = arith.constant dense<0.000000e+00> : vector<64x128xf32>
    %75 = tpu.matmul %74, %5, %cst_39 {dimension_numbers = #tpu.dot_dimension_numbers<[1], [0], [0], [1], [0, 0, 1, 1], [], []>} : vector<64x64xbf16>, vector<64x128xbf16>, vector<64x128xf32> -> vector<64x128xf32>
    %76 = arith.maximumf %73, %75 : vector<64x128xf32>
    %77 = vector.extract_strided_slice %26 {offsets = [1088, 0], sizes = [64, 64], strides = [1, 1]} : vector<2048x64xbf16> to vector<64x64xbf16>
    %cst_40 = arith.constant dense<0.000000e+00> : vector<64x128xf32>
    %78 = tpu.matmul %77, %5, %cst_40 {dimension_numbers = #tpu.dot_dimension_numbers<[1], [0], [0], [1], [0, 0, 1, 1], [], []>} : vector<64x64xbf16>, vector<64x128xbf16>, vector<64x128xf32> -> vector<64x128xf32>
    %79 = arith.maximumf %76, %78 : vector<64x128xf32>
    %80 = vector.extract_strided_slice %26 {offsets = [1152, 0], sizes = [64, 64], strides = [1, 1]} : vector<2048x64xbf16> to vector<64x64xbf16>
    %cst_41 = arith.constant dense<0.000000e+00> : vector<64x128xf32>
    %81 = tpu.matmul %80, %5, %cst_41 {dimension_numbers = #tpu.dot_dimension_numbers<[1], [0], [0], [1], [0, 0, 1, 1], [], []>} : vector<64x64xbf16>, vector<64x128xbf16>, vector<64x128xf32> -> vector<64x128xf32>
    %82 = arith.maximumf %79, %81 : vector<64x128xf32>
    %83 = vector.extract_strided_slice %26 {offsets = [1216, 0], sizes = [64, 64], strides = [1, 1]} : vector<2048x64xbf16> to vector<64x64xbf16>
    %cst_42 = arith.constant dense<0.000000e+00> : vector<64x128xf32>
    %84 = tpu.matmul %83, %5, %cst_42 {dimension_numbers = #tpu.dot_dimension_numbers<[1], [0], [0], [1], [0, 0, 1, 1], [], []>} : vector<64x64xbf16>, vector<64x128xbf16>, vector<64x128xf32> -> vector<64x128xf32>
    %85 = arith.maximumf %82, %84 : vector<64x128xf32>
    %86 = vector.extract_strided_slice %26 {offsets = [1280, 0], sizes = [64, 64], strides = [1, 1]} : vector<2048x64xbf16> to vector<64x64xbf16>
    %cst_43 = arith.constant dense<0.000000e+00> : vector<64x128xf32>
    %87 = tpu.matmul %86, %5, %cst_43 {dimension_numbers = #tpu.dot_dimension_numbers<[1], [0], [0], [1], [0, 0, 1, 1], [], []>} : vector<64x64xbf16>, vector<64x128xbf16>, vector<64x128xf32> -> vector<64x128xf32>
    %88 = arith.maximumf %85, %87 : vector<64x128xf32>
    %89 = vector.extract_strided_slice %26 {offsets = [1344, 0], sizes = [64, 64], strides = [1, 1]} : vector<2048x64xbf16> to vector<64x64xbf16>
    %cst_44 = arith.constant dense<0.000000e+00> : vector<64x128xf32>
    %90 = tpu.matmul %89, %5, %cst_44 {dimension_numbers = #tpu.dot_dimension_numbers<[1], [0], [0], [1], [0, 0, 1, 1], [], []>} : vector<64x64xbf16>, vector<64x128xbf16>, vector<64x128xf32> -> vector<64x128xf32>
    %91 = arith.maximumf %88, %90 : vector<64x128xf32>
    %92 = vector.extract_strided_slice %26 {offsets = [1408, 0], sizes = [64, 64], strides = [1, 1]} : vector<2048x64xbf16> to vector<64x64xbf16>
    %cst_45 = arith.constant dense<0.000000e+00> : vector<64x128xf32>
    %93 = tpu.matmul %92, %5, %cst_45 {dimension_numbers = #tpu.dot_dimension_numbers<[1], [0], [0], [1], [0, 0, 1, 1], [], []>} : vector<64x64xbf16>, vector<64x128xbf16>, vector<64x128xf32> -> vector<64x128xf32>
    %94 = arith.maximumf %91, %93 : vector<64x128xf32>
    %95 = vector.extract_strided_slice %26 {offsets = [1472, 0], sizes = [64, 64], strides = [1, 1]} : vector<2048x64xbf16> to vector<64x64xbf16>
    %cst_46 = arith.constant dense<0.000000e+00> : vector<64x128xf32>
    %96 = tpu.matmul %95, %5, %cst_46 {dimension_numbers = #tpu.dot_dimension_numbers<[1], [0], [0], [1], [0, 0, 1, 1], [], []>} : vector<64x64xbf16>, vector<64x128xbf16>, vector<64x128xf32> -> vector<64x128xf32>
    %97 = arith.maximumf %94, %96 : vector<64x128xf32>
    %98 = vector.extract_strided_slice %26 {offsets = [1536, 0], sizes = [64, 64], strides = [1, 1]} : vector<2048x64xbf16> to vector<64x64xbf16>
    %cst_47 = arith.constant dense<0.000000e+00> : vector<64x128xf32>
    %99 = tpu.matmul %98, %5, %cst_47 {dimension_numbers = #tpu.dot_dimension_numbers<[1], [0], [0], [1], [0, 0, 1, 1], [], []>} : vector<64x64xbf16>, vector<64x128xbf16>, vector<64x128xf32> -> vector<64x128xf32>
    %100 = arith.maximumf %97, %99 : vector<64x128xf32>
    %101 = vector.extract_strided_slice %26 {offsets = [1600, 0], sizes = [64, 64], strides = [1, 1]} : vector<2048x64xbf16> to vector<64x64xbf16>
    %cst_48 = arith.constant dense<0.000000e+00> : vector<64x128xf32>
    %102 = tpu.matmul %101, %5, %cst_48 {dimension_numbers = #tpu.dot_dimension_numbers<[1], [0], [0], [1], [0, 0, 1, 1], [], []>} : vector<64x64xbf16>, vector<64x128xbf16>, vector<64x128xf32> -> vector<64x128xf32>
    %103 = arith.maximumf %100, %102 : vector<64x128xf32>
    %104 = vector.extract_strided_slice %26 {offsets = [1664, 0], sizes = [64, 64], strides = [1, 1]} : vector<2048x64xbf16> to vector<64x64xbf16>
    %cst_49 = arith.constant dense<0.000000e+00> : vector<64x128xf32>
    %105 = tpu.matmul %104, %5, %cst_49 {dimension_numbers = #tpu.dot_dimension_numbers<[1], [0], [0], [1], [0, 0, 1, 1], [], []>} : vector<64x64xbf16>, vector<64x128xbf16>, vector<64x128xf32> -> vector<64x128xf32>
    %106 = arith.maximumf %103, %105 : vector<64x128xf32>
    %107 = vector.extract_strided_slice %26 {offsets = [1728, 0], sizes = [64, 64], strides = [1, 1]} : vector<2048x64xbf16> to vector<64x64xbf16>
    %cst_50 = arith.constant dense<0.000000e+00> : vector<64x128xf32>
    %108 = tpu.matmul %107, %5, %cst_50 {dimension_numbers = #tpu.dot_dimension_numbers<[1], [0], [0], [1], [0, 0, 1, 1], [], []>} : vector<64x64xbf16>, vector<64x128xbf16>, vector<64x128xf32> -> vector<64x128xf32>
    %109 = arith.maximumf %106, %108 : vector<64x128xf32>
    %110 = vector.extract_strided_slice %26 {offsets = [1792, 0], sizes = [64, 64], strides = [1, 1]} : vector<2048x64xbf16> to vector<64x64xbf16>
    %cst_51 = arith.constant dense<0.000000e+00> : vector<64x128xf32>
    %111 = tpu.matmul %110, %5, %cst_51 {dimension_numbers = #tpu.dot_dimension_numbers<[1], [0], [0], [1], [0, 0, 1, 1], [], []>} : vector<64x64xbf16>, vector<64x128xbf16>, vector<64x128xf32> -> vector<64x128xf32>
    %112 = arith.maximumf %109, %111 : vector<64x128xf32>
    %113 = vector.extract_strided_slice %26 {offsets = [1856, 0], sizes = [64, 64], strides = [1, 1]} : vector<2048x64xbf16> to vector<64x64xbf16>
    %cst_52 = arith.constant dense<0.000000e+00> : vector<64x128xf32>
    %114 = tpu.matmul %113, %5, %cst_52 {dimension_numbers = #tpu.dot_dimension_numbers<[1], [0], [0], [1], [0, 0, 1, 1], [], []>} : vector<64x64xbf16>, vector<64x128xbf16>, vector<64x128xf32> -> vector<64x128xf32>
    %115 = arith.maximumf %112, %114 : vector<64x128xf32>
    %116 = vector.extract_strided_slice %26 {offsets = [1920, 0], sizes = [64, 64], strides = [1, 1]} : vector<2048x64xbf16> to vector<64x64xbf16>
    %cst_53 = arith.constant dense<0.000000e+00> : vector<64x128xf32>
    %117 = tpu.matmul %116, %5, %cst_53 {dimension_numbers = #tpu.dot_dimension_numbers<[1], [0], [0], [1], [0, 0, 1, 1], [], []>} : vector<64x64xbf16>, vector<64x128xbf16>, vector<64x128xf32> -> vector<64x128xf32>
    %118 = arith.maximumf %115, %117 : vector<64x128xf32>
    %119 = vector.extract_strided_slice %26 {offsets = [1984, 0], sizes = [64, 64], strides = [1, 1]} : vector<2048x64xbf16> to vector<64x64xbf16>
    %cst_54 = arith.constant dense<0.000000e+00> : vector<64x128xf32>
    %120 = tpu.matmul %119, %5, %cst_54 {dimension_numbers = #tpu.dot_dimension_numbers<[1], [0], [0], [1], [0, 0, 1, 1], [], []>} : vector<64x64xbf16>, vector<64x128xbf16>, vector<64x128xf32> -> vector<64x128xf32>
    %121 = arith.maximumf %118, %120 : vector<64x128xf32>
    %122 = vector.broadcast %6 : vector<1x128xf32> to vector<64x128xf32>
    %123 = arith.addf %121, %122 : vector<64x128xf32>
    %cst_55 = arith.constant 0.000000e+00 : f32
    %124 = vector.broadcast %cst_55 : f32 to vector<64x128xf32>
    %125 = arith.maximumf %123, %124 : vector<64x128xf32>
    %126 = arith.truncf %125 : vector<64x128xf32> to vector<64x128xbf16>
    %c0_56 = arith.constant 0 : index
    %c0_57 = arith.constant 0 : index
    %127 = vector.load %arg10[%c0_56, %c0_57] : memref<64x128xbf16, #tpu.memory_space<vmem>>, vector<64x128xbf16>
    tpu.vector_store %arg10[%c0_56, %c0_57], %126 {strides = array<i32>} : memref<64x128xbf16, #tpu.memory_space<vmem>>, vector<64x128xbf16>,
    return
  }
  func.func @transform_0(%arg0: i32) -> (i32, i32, i32) {
    %c0_i32 = arith.constant 0 : i32
    %c0_i32_0 = arith.constant 0 : i32
    %c0_i32_1 = arith.constant 0 : i32
    return %c0_i32, %arg0, %c0_i32_0 : i32, i32, i32
  }
  func.func @transform_1(%arg0: i32) -> (i32, i32, i32) {
    %c0_i32 = arith.constant 0 : i32
    %c0_i32_0 = arith.constant 0 : i32
    %c0_i32_1 = arith.constant 0 : i32
    return %c0_i32, %arg0, %c0_i32_0 : i32, i32, i32
  }
  func.func @transform_2(%arg0: i32) -> (i32, i32) {
    %c0_i32 = arith.constant 0 : i32
    %c0_i32_0 = arith.constant 0 : i32
    %c0_i32_1 = arith.constant 0 : i32
    return %c0_i32, %c0_i32_0 : i32, i32
  }
  func.func @transform_3(%arg0: i32) -> (i32, i32) {
    %c0_i32 = arith.constant 0 : i32
    %c0_i32_0 = arith.constant 0 : i32
    %c0_i32_1 = arith.constant 0 : i32
    return %c0_i32, %c0_i32_0 : i32, i32
  }
  func.func @transform_4(%arg0: i32) -> (i32, i32) {
    %c0_i32 = arith.constant 0 : i32
    %c0_i32_0 = arith.constant 0 : i32
    %c0_i32_1 = arith.constant 0 : i32
    return %c0_i32, %c0_i32_0 : i32, i32
  }
  func.func @transform_5(%arg0: i32) -> (i32, i32) {
    %c0_i32 = arith.constant 0 : i32
    %c0_i32_0 = arith.constant 0 : i32
    %c0_i32_1 = arith.constant 0 : i32
    return %c0_i32, %c0_i32_0 : i32, i32
  }
  func.func @transform_6(%arg0: i32) -> (i32, i32) {
    %c0_i32 = arith.constant 0 : i32
    %c0_i32_0 = arith.constant 0 : i32
    %c0_i32_1 = arith.constant 0 : i32
    return %c0_i32, %c0_i32_0 : i32, i32
  }
  func.func @transform_7(%arg0: i32) -> (i32, i32) {
    %c0_i32 = arith.constant 0 : i32
    %c0_i32_0 = arith.constant 0 : i32
    %c0_i32_1 = arith.constant 0 : i32
    return %c0_i32, %c0_i32_0 : i32, i32
  }
  func.func @transform_8(%arg0: i32) -> (i32, i32) {
    %c0_i32 = arith.constant 0 : i32
    %c0_i32_0 = arith.constant 0 : i32
    %c0_i32_1 = arith.constant 0 : i32
    return %c0_i32, %c0_i32_0 : i32, i32
  }
  func.func @transform_9(%arg0: i32) -> (i32, i32) {
    %c0_i32 = arith.constant 0 : i32
    %c0_i32_0 = arith.constant 0 : i32
    return %arg0, %c0_i32 : i32, i32
  }
}

</mosaic_0001>

<bundles_post_ra>
// kernel: tpu_custom_call.1
= control target key start
LH: loop header
LB: loop body
LE: loop exit
PB: predicated region body
PF: predicated region fallthrough
CT: control target
= control target key end

     0   :  { %vm1727_vm0 = vcmask 130048   ;;  %s13713_s0 = inlined_call_operand.vmem [shape: f32[32,64,16], index: 0, kind: input, shape index: {}]   ;;  %s13714_s1 = inlined_call_operand.vmem [shape: f32[32,64,16], index: 1, kind: input, shape index: {}]   ;;  %s13715_s2 = inlined_call_operand.vmem [shape: bf16[16,64], index: 2, kind: input, shape index: {}]   ;;  %s13716_s3 = inlined_call_operand.vmem [shape: bf16[16,64], index: 3, kind: input, shape index: {}]   ;;  %s13717_s4 = inlined_call_operand.vmem [shape: f32[1,64], index: 4, kind: input, shape index: {}]   ;;  %s13718_s5 = inlined_call_operand.vmem [shape: bf16[64,64], index: 5, kind: input, shape index: {}]   ;;  %s13719_s6 = inlined_call_operand.vmem [shape: f32[1,64], index: 6, kind: input, shape index: {}]   ;;  %s13720_s7 = inlined_call_operand.vmem [shape: bf16[64,128], index: 7, kind: input, shape index: {}]   ;;  %s13721_s8 = inlined_call_operand.vmem [shape: f32[1,128], index: 8, kind: input, shape index: {}]   ;;  %s13722_s9 = inlined_call_operand.hbm [shape: bf16[64,128], index: 9, kind: output, shape index: {}]  }
   0x1   :  { %v9486_v0 = vld [vmem:[%s13716_s3] sm:$0xff]  ;;  %v570_v3 = vld [vmem:[%s13714_s1 + $0x8] sm:$0xff] }
   0x2   :  { %v9485_v1 = vld [vmem:[%s13715_s2] sm:$0xff]  ;;  %v58_v6 = vld [vmem:[%s13713_s0 + $0x8] sm:$0xff]  ;;  %2119 = vmatpush.bf16.msra.mxu0 %v9486_v0  ;;  %v826_v7 = vpack.c.bf16 %v570_v3, %v570_v3 }
   0x3   :  { %v569_v2 = vld [vmem:[%s13714_s1] sm:$0xff]  ;;  %3798 = vmatpush.bf16.msra.mxu1 %v9485_v1  ;;  %v314_v9 = vpack.c.bf16 %v58_v6, %v58_v6 }
   0x4   :  { %v825_v4 = vpack.c.bf16 %v569_v2, %v569_v2  ;;  %v57_v5 = vld [vmem:[%s13713_s0] sm:$0xff]  ;;  %v1338_v11 = vunpack.c.l.b16 %v826_v7 }
   0x5   :  { %v313_v8 = vpack.c.bf16 %v57_v5, %v57_v5  ;;  %v3018_v13 = vunpack.c.l.b16 %v314_v9 }
   0x6   :  { %v1337_v10 = vunpack.c.l.b16 %v825_v4 }
   0x7   :  { %v3017_v12 = vunpack.c.l.b16 %v313_v8 }
   0x8   :  { %14 = vsyncpa [#allocation3], 0  ;;  %v1593_v14 = vpack.c.b16 %v1338_v11, %v1337_v10  ;;  %v571_v16 = vld [vmem:[%s13714_s1 + $0x10] sm:$0xff]  ;;  %v572_v17 = vld [vmem:[%s13714_s1 + $0x18] sm:$0xff]  ;;  %vm5110_vm1 = vcmask 523264   ;;  %s8921_s20 = sshll.u32 %s13722_s9, 4  ;;  %s8922_s20 = int_to_ptr.hbm [resolvable:$true] %s8921_s20 }
   0x9   :  { %v3273_v15 = vpack.c.b16 %v3018_v13, %v3017_v12  ;;  %v59_v18 = vld [vmem:[%s13713_s0 + $0x10] sm:$0xff]  ;;  %v60_v19 = vld [vmem:[%s13713_s0 + $0x18] sm:$0xff]  ;;  %v827_v20 = vpack.c.bf16 %v571_v16, %v571_v16  ;;  %v828_v21 = vpack.c.bf16 %v572_v17, %v572_v17  ;;  %v573_v30 = vld [vmem:[%s13714_s1 + $0x20] sm:$0xff]  ;;  %s9607_s2 = smov 64  }
   0xa   :  { %8937 = vmatmul.msk.bf16.vlgmr.msra.gmra.mxu0 %vm1727_vm0, %v1593_v14  ;;  %v315_v22 = vpack.c.bf16 %v59_v18, %v59_v18  ;;  %v316_v23 = vpack.c.bf16 %v60_v19, %v60_v19  ;;  %v574_v31 = vld [vmem:[%s13714_s1 + $0x28] sm:$0xff]  ;;  %v61_v32 = vld [vmem:[%s13713_s0 + $0x20] sm:$0xff]  ;;  %v829_v34 = vpack.c.bf16 %v573_v30, %v573_v30  ;;  %v575_v44 = vld [vmem:[%s13714_s1 + $0x30] sm:$0xff] }
   0xb   :  { %9069 = vmatmul.msk.bf16.vlgmr.msra.gmra.mxu1 %vm1727_vm0, %v3273_v15  ;;  %v1339_v24 = vunpack.c.l.b16 %v827_v20  ;;  %v1340_v25 = vunpack.c.l.b16 %v828_v21  ;;  %v62_v33 = vld [vmem:[%s13713_s0 + $0x28] sm:$0xff]  ;;  %v830_v35 = vpack.c.bf16 %v574_v31, %v574_v31  ;;  %v317_v36 = vpack.c.bf16 %v61_v32, %v61_v32  ;;  %v576_v45 = vld [vmem:[%s13714_s1 + $0x38] sm:$0xff]  ;;  %v63_v46 = vld [vmem:[%s13713_s0 + $0x30] sm:$0xff] }
   0xc   :  { %v3019_v26 = vunpack.c.l.b16 %v315_v22  ;;  %v3020_v27 = vunpack.c.l.b16 %v316_v23  ;;  %v318_v37 = vpack.c.bf16 %v62_v33, %v62_v33  ;;  %v1341_v38 = vunpack.c.l.b16 %v829_v34  ;;  %v64_v47 = vld [vmem:[%s13713_s0 + $0x38] sm:$0xff]  ;;  %v577_v58 = vld [vmem:[%s13714_s1 + $0x40] sm:$0xff]  ;;  %v578_v59 = vld [vmem:[%s13714_s1 + $0x48] sm:$0xff] }
   0xd   :  { %v1594_v28 = vpack.c.b16 %v1340_v25, %v1339_v24  ;;  %v1342_v39 = vunpack.c.l.b16 %v830_v35  ;;  %v3021_v40 = vunpack.c.l.b16 %v317_v36  ;;  %v831_v48 = vpack.c.bf16 %v575_v44, %v575_v44  ;;  %v65_v60 = vld [vmem:[%s13713_s0 + $0x40] sm:$0xff]  ;;  %v66_v61 = vld [vmem:[%s13713_s0 + $0x48] sm:$0xff]  ;;  %v579_v8 = vld [vmem:[%s13714_s1 + $0x50] sm:$0xff] }
   0xe   :  { %v3274_v29 = vpack.c.b16 %v3020_v27, %v3019_v26  ;;  %v3022_v41 = vunpack.c.l.b16 %v318_v37  ;;  %v832_v49 = vpack.c.bf16 %v576_v45, %v576_v45  ;;  %v319_v50 = vpack.c.bf16 %v63_v46, %v63_v46  ;;  %v580_v9 = vld [vmem:[%s13714_s1 + $0x58] sm:$0xff]  ;;  %v67_v10 = vld [vmem:[%s13713_s0 + $0x50] sm:$0xff]  ;;  %v581_v22 = vld [vmem:[%s13714_s1 + $0x60] sm:$0xff] }
   0xf   :  { %v1595_v42 = vpack.c.b16 %v1342_v39, %v1341_v38  ;;  %v320_v51 = vpack.c.bf16 %v64_v47, %v64_v47  ;;  %v1343_v52 = vunpack.c.l.b16 %v831_v48  ;;  %v833_v62 = vpack.c.bf16 %v577_v58, %v577_v58  ;;  %v68_v11 = vld [vmem:[%s13713_s0 + $0x58] sm:$0xff]  ;;  %v582_v23 = vld [vmem:[%s13714_s1 + $0x68] sm:$0xff]  ;;  %v69_v24 = vld [vmem:[%s13713_s0 + $0x60] sm:$0xff] }
  0x10   :  { %v3275_v43 = vpack.c.b16 %v3022_v41, %v3021_v40  ;;  %v1344_v53 = vunpack.c.l.b16 %v832_v49  ;;  %v3023_v54 = vunpack.c.l.b16 %v319_v50  ;;  %v834_v63 = vpack.c.bf16 %v578_v59, %v578_v59  ;;  %v70_v25 = vld [vmem:[%s13713_s0 + $0x68] sm:$0xff]  ;;  %v9490_v36 = vld [vmem:[%s13718_s5 + $0x18] sm:$0xff]  ;;  %v583_v37 = vld [vmem:[%s13714_s1 + $0x70] sm:$0xff] }
  0x11   :  { %v3024_v55 = vunpack.c.l.b16 %v320_v51  ;;  %v321_v0 = vpack.c.bf16 %v65_v60, %v65_v60  ;;  %v322_v1 = vpack.c.bf16 %v66_v61, %v66_v61  ;;  %v1345_v2 = vunpack.c.l.b16 %v833_v62  ;;  %5499 = vmatpush.bf16.msra.mxu2 %v9490_v36  ;;  %v584_v38 = vld [vmem:[%s13714_s1 + $0x78] sm:$0xff]  ;;  %v71_v39 = vld [vmem:[%s13713_s0 + $0x70] sm:$0xff]  ;;  %v9488_v46 = vld [vmem:[%s13718_s5 + $0x8] sm:$0xff] }
  0x12   :  { %v1596_v56 = vpack.c.b16 %v1344_v53, %v1343_v52  ;;  %v1346_v3 = vunpack.c.l.b16 %v834_v63  ;;  %v835_v12 = vpack.c.bf16 %v579_v8, %v579_v8  ;;  %v836_v13 = vpack.c.bf16 %v580_v9, %v580_v9  ;;  %v72_v40 = vld [vmem:[%s13713_s0 + $0x78] sm:$0xff]  ;;  %v9489_v41 = vld [vmem:[%s13718_s5 + $0x10] sm:$0xff]  ;;  %v9487_v51 = vld [vmem:[%s13718_s5] sm:$0xff]  ;;  %s9608_s5 = smov 4  }
  0x13   :  { %v3276_v57 = vpack.c.b16 %v3024_v55, %v3023_v54  ;;  %v3025_v4 = vunpack.c.l.b16 %v321_v0  ;;  %v3026_v5 = vunpack.c.l.b16 %v322_v1  ;;  %v323_v14 = vpack.c.bf16 %v67_v10, %v67_v10  ;;  %v585_v54 = vld [vmem:[%s13714_s1 + $0x80] sm:$0xff]  ;;  %v586_v55 = vld [vmem:[%s13714_s1 + $0x88] sm:$0xff]  ;;  %v75_v8 = vld [vmem:[%s13713_s0 + $0x90] sm:$0xff] }
  0x14   :  { %v1597_v6 = vpack.c.b16 %v1346_v3, %v1345_v2  ;;  %v324_v15 = vpack.c.bf16 %v68_v11, %v68_v11  ;;  %v1347_v16 = vunpack.c.l.b16 %v835_v12  ;;  %v1348_v17 = vunpack.c.l.b16 %v836_v13  ;;  %v76_v9 = vld [vmem:[%s13713_s0 + $0x98] sm:$0xff]  ;;  %v9818_v11 = vld [vmem:[%s13717_s4] ss:$0 sm:$0xff] }
  0x15   :  { %v3277_v7 = vpack.c.b16 %v3026_v5, %v3025_v4  ;;  %v3027_v18 = vunpack.c.l.b16 %v323_v14  ;;  %v837_v26 = vpack.c.bf16 %v581_v22, %v581_v22  ;;  %v838_v27 = vpack.c.bf16 %v582_v23, %v582_v23  ;;  %5500 = vmatpush.bf16.msra.mxu2 %v9489_v41 }
  0x16   :  { %v3028_v19 = vunpack.c.l.b16 %v324_v15  ;;  %v1598_v20 = vpack.c.b16 %v1348_v17, %v1347_v16  ;;  %v327_v44 = vpack.c.bf16 %v71_v39, %v71_v39  ;;  %v328_v45 = vpack.c.bf16 %v72_v40, %v72_v40 }
  0x17   :  { %v1349_v30 = vunpack.c.l.b16 %v837_v26  ;;  %v1350_v31 = vunpack.c.l.b16 %v838_v27  ;;  %v841_v58 = vpack.c.bf16 %v585_v54, %v585_v54  ;;  %v842_v59 = vpack.c.bf16 %v586_v55, %v586_v55 }
  0x18   :  { %v3278_v21 = vpack.c.b16 %v3028_v19, %v3027_v18  ;;  %v3031_v49 = vunpack.c.l.b16 %v327_v44  ;;  %v3032_v50 = vunpack.c.l.b16 %v328_v45  ;;  %v331_v14 = vpack.c.bf16 %v75_v8, %v75_v8 }
  0x19   :  { %v1599_v34 = vpack.c.b16 %v1350_v31, %v1349_v30  ;;  %5501 = vmatpush.bf16.msra.mxu2 %v9488_v46  ;;  %v1353_v62 = vunpack.c.l.b16 %v841_v58  ;;  %v1354_v63 = vunpack.c.l.b16 %v842_v59  ;;  %v332_v15 = vpack.c.bf16 %v76_v9, %v76_v9  ;;  %v592_v58 = vld [vmem:[%s13714_s1 + $0xb8] sm:$0xff]  ;;  %v79_v59 = vld [vmem:[%s13713_s0 + $0xb0] sm:$0xff] }
  0x1a   :  { %8938 = vmatmul.msk.bf16.gmra.mxu0 %vm1727_vm0, %v1594_v28  ;;  %v325_v28 = vpack.c.bf16 %v69_v24, %v69_v24  ;;  %v3280_v53 = vpack.c.b16 %v3032_v50, %v3031_v49  ;;  %v3035_v23 = vunpack.c.l.b16 %v331_v14 }
  0x1b   :  { %9070 = vmatmul.msk.bf16.gmra.mxu1 %vm1727_vm0, %v3274_v29  ;;  %v326_v29 = vpack.c.bf16 %v70_v25, %v70_v25  ;;  %v1601_v2 = vpack.c.b16 %v1354_v63, %v1353_v62  ;;  %v3036_v24 = vunpack.c.l.b16 %v332_v15  ;;  %v848_v63 = vpack.c.bf16 %v592_v58, %v592_v58 }
  0x1c   :  { %v3029_v32 = vunpack.c.l.b16 %v325_v28 }
  0x1d   :  { %v3030_v33 = vunpack.c.l.b16 %v326_v29  ;;  %5502 = vmatpush.bf16.msra.mxu2 %v9487_v51  ;;  %v3282_v29 = vpack.c.b16 %v3036_v24, %v3035_v23  ;;  %v1360_v8 = vunpack.c.l.b16 %v848_v63 }
  0x1f   :  { %v3279_v35 = vpack.c.b16 %v3030_v33, %v3029_v32  ;;  %v589_v32 = vld [vmem:[%s13714_s1 + $0xa0] sm:$0xff]  ;;  %v590_v33 = vld [vmem:[%s13714_s1 + $0xa8] sm:$0xff] }
  0x2a   :  { %8939 = vmatmul.msk.bf16.gmra.mxu0 %vm1727_vm0, %v1595_v42  ;;  %v839_v42 = vpack.c.bf16 %v583_v37, %v583_v37  ;;  %v845_v37 = vpack.c.bf16 %v589_v32, %v589_v32 }
  0x2b   :  { %9071 = vmatmul.msk.bf16.gmra.mxu1 %vm1727_vm0, %v3275_v43  ;;  %v840_v43 = vpack.c.bf16 %v584_v38, %v584_v38  ;;  %v846_v38 = vpack.c.bf16 %v590_v33, %v590_v33 }
  0x2c   :  { %v1351_v47 = vunpack.c.l.b16 %v839_v42  ;;  %v1357_v45 = vunpack.c.l.b16 %v845_v37 }
  0x2d   :  { %v1352_v48 = vunpack.c.l.b16 %v840_v43 }
  0x2f   :  { %v1600_v52 = vpack.c.b16 %v1352_v48, %v1351_v47  ;;  %v1358_v47 = vunpack.c.l.b16 %v846_v38 }
  0x3a   :  { %8940 = vmatmul.msk.bf16.gmra.mxu0 %vm1727_vm0, %v1596_v56  ;;  %v73_v56 = vld [vmem:[%s13713_s0 + $0x80] sm:$0xff] }
  0x3b   :  { %9072 = vmatmul.msk.bf16.gmra.mxu1 %vm1727_vm0, %v3276_v57  ;;  %v74_v57 = vld [vmem:[%s13713_s0 + $0x88] sm:$0xff]  ;;  %v329_v60 = vpack.c.bf16 %v73_v56, %v73_v56 }
  0x3c   :  { %v330_v61 = vpack.c.bf16 %v74_v57, %v74_v57  ;;  %v591_v57 = vld [vmem:[%s13714_s1 + $0xb0] sm:$0xff] }
  0x3d   :  { %v3033_v0 = vunpack.c.l.b16 %v329_v60  ;;  %v80_v60 = vld [vmem:[%s13713_s0 + $0xb8] sm:$0xff]  ;;  %v847_v62 = vpack.c.bf16 %v591_v57, %v591_v57 }
  0x3e   :  { %v3034_v1 = vunpack.c.l.b16 %v330_v61 }
  0x40   :  { %v3281_v3 = vpack.c.b16 %v3034_v1, %v3033_v0  ;;  %v335_v0 = vpack.c.bf16 %v79_v59, %v79_v59  ;;  %v336_v1 = vpack.c.bf16 %v80_v60, %v80_v60 }
  0x42   :  { %v3039_v9 = vunpack.c.l.b16 %v335_v0 }
  0x4a   :  { %8941 = vmatmul.msk.bf16.gmra.mxu0 %vm1727_vm0, %v1597_v6  ;;  %v587_v6 = vld [vmem:[%s13714_s1 + $0x90] sm:$0xff] }
  0x4b   :  { %9073 = vmatmul.msk.bf16.gmra.mxu1 %vm1727_vm0, %v3277_v7  ;;  %v588_v7 = vld [vmem:[%s13714_s1 + $0x98] sm:$0xff]  ;;  %v843_v12 = vpack.c.bf16 %v587_v6, %v587_v6  ;;  %v1359_v6 = vunpack.c.l.b16 %v847_v62 }
  0x4c   :  { %v844_v13 = vpack.c.bf16 %v588_v7, %v588_v7 }
  0x4d   :  { %v1604_v15 = vpack.c.b16 %v1360_v8, %v1359_v6  ;;  %v598_v6 = vld [vmem:[%s13714_s1 + $0xe8] sm:$0xff] }
  0x4e   :  { %v1356_v22 = vunpack.c.l.b16 %v844_v13  ;;  %v86_v8 = vld [vmem:[%s13713_s0 + $0xe8] sm:$0xff] }
  0x5a   :  { %8942 = vmatmul.msk.bf16.gmra.mxu0 %vm1727_vm0, %v1598_v20  ;;  %v1355_v20 = vunpack.c.l.b16 %v843_v12 }
  0x5b   :  { %9074 = vmatmul.msk.bf16.gmra.mxu1 %vm1727_vm0, %v3278_v21 }
  0x5c   :  { %v1602_v28 = vpack.c.b16 %v1356_v22, %v1355_v20  ;;  %v594_v20 = vld [vmem:[%s13714_s1 + $0xc8] sm:$0xff] }
  0x5d   :  { %v82_v22 = vld [vmem:[%s13713_s0 + $0xc8] sm:$0xff] }
  0x6a   :  { %8943 = vmatmul.msk.bf16.gmra.mxu0 %vm1727_vm0, %v1599_v34  ;;  %v77_v34 = vld [vmem:[%s13713_s0 + $0xa0] sm:$0xff] }
  0x6b   :  { %9075 = vmatmul.msk.bf16.gmra.mxu1 %vm1727_vm0, %v3279_v35  ;;  %v78_v35 = vld [vmem:[%s13713_s0 + $0xa8] sm:$0xff]  ;;  %v333_v39 = vpack.c.bf16 %v77_v34, %v77_v34 }
  0x6c   :  { %v334_v40 = vpack.c.bf16 %v78_v35, %v78_v35 }
  0x6d   :  { %v3037_v48 = vunpack.c.l.b16 %v333_v39 }
  0x6e   :  { %v3038_v49 = vunpack.c.l.b16 %v334_v40 }
  0x70   :  { %v3283_v54 = vpack.c.b16 %v3038_v49, %v3037_v48 }
  0x7a   :  { %8944 = vmatmul.msk.bf16.gmra.mxu0 %vm1727_vm0, %v1600_v52 }
  0x7b   :  { %9076 = vmatmul.msk.bf16.gmra.mxu1 %vm1727_vm0, %v3280_v53  ;;  %v1603_v53 = vpack.c.b16 %v1358_v47, %v1357_v45  ;;  %v596_v45 = vld [vmem:[%s13714_s1 + $0xd8] sm:$0xff] }
  0x7c   :  { %v84_v47 = vld [vmem:[%s13713_s0 + $0xd8] sm:$0xff] }
  0x87   :  { %v2121_v4 = vpop.f32.mrf.mxu0 }
  0x88   :  { %v3800_v5 = vpop.f32.mrf.mxu1 }
  0x89   :  { %v3801_v10 = vadd.f32 %v3800_v5, %v2121_v4 }
  0x8a   :  { %8945 = vmatmul.msk.bf16.gmra.mxu0 %vm1727_vm0, %v1601_v2 }
  0x8b   :  { %9077 = vmatmul.msk.bf16.gmra.mxu1 %vm1727_vm0, %v3281_v3  ;;  %v4443_v18 = vadd.f32 %v9818_v11, %v3801_v10  ;;  %v3040_v10 = vunpack.c.l.b16 %v336_v1 }
  0x8d   :  { %v4699_v25 = vmax.f32 %v4443_v18, 0.0 }
  0x8f   :  { %v2123_v16 = vpop.f32.mrf.mxu0 }
  0x90   :  { %v3802_v17 = vpop.f32.mrf.mxu1 }
  0x91   :  { %v3803_v19 = vadd.f32 %v3802_v17, %v2123_v16  ;;  %v3284_v16 = vpack.c.b16 %v3040_v10, %v3039_v9 }
  0x93   :  { %v4444_v21 = vadd.f32 %v9818_v11, %v3803_v19  ;;  %v593_v19 = vld [vmem:[%s13714_s1 + $0xc0] sm:$0xff] }
  0x94   :  { %v849_v24 = vpack.c.bf16 %v593_v19, %v593_v19 }
  0x95   :  { %v4700_v26 = vmax.f32 %v4444_v21, 0.0  ;;  %v81_v21 = vld [vmem:[%s13713_s0 + $0xc0] sm:$0xff] }
  0x96   :  { %v1361_v32 = vunpack.c.l.b16 %v849_v24 }
  0x97   :  { %v4955_v27 = vpack.c.bf16 %v4700_v26, %v4699_v25  ;;  %v2126_v30 = vpop.f32.mrf.mxu0  ;;  %v850_v25 = vpack.c.bf16 %v594_v20, %v594_v20  ;;  %v337_v26 = vpack.c.bf16 %v81_v21, %v81_v21 }
  0x98   :  { %v3805_v31 = vpop.f32.mrf.mxu1 }
  0x99   :  { %9213 = vmatmul.msk.bf16.vlgmr.msra.gmra.mxu2 %vm5110_vm1, %v4955_v27  ;;  %v3806_v36 = vadd.f32 %v3805_v31, %v2126_v30  ;;  %v338_v27 = vpack.c.bf16 %v82_v22, %v82_v22  ;;  %v1362_v34 = vunpack.c.l.b16 %v850_v25  ;;  %v3041_v35 = vunpack.c.l.b16 %v337_v26 }
  0x9a   :  { %8946 = vmatmul.msk.bf16.gmra.mxu0 %vm1727_vm0, %v1602_v28 }
  0x9b   :  { %9078 = vmatmul.msk.bf16.gmra.mxu1 %vm1727_vm0, %v3282_v29  ;;  %v4445_v43 = vadd.f32 %v9818_v11, %v3806_v36  ;;  %v3042_v36 = vunpack.c.l.b16 %v338_v27  ;;  %v1605_v40 = vpack.c.b16 %v1362_v34, %v1361_v32  ;;  %v600_v32 = vld [vmem:[%s13714_s1 + $0xf8] sm:$0xff] }
  0x9c   :  { %v88_v34 = vld [vmem:[%s13713_s0 + $0xf8] sm:$0xff] }
  0x9d   :  { %v4701_v50 = vmax.f32 %v4445_v43, 0.0 }
  0x9f   :  { %v2128_v41 = vpop.f32.mrf.mxu0 }
  0xa0   :  { %v3807_v42 = vpop.f32.mrf.mxu1 }
  0xa1   :  { %v3808_v44 = vadd.f32 %v3807_v42, %v2128_v41  ;;  %v3285_v41 = vpack.c.b16 %v3042_v36, %v3041_v35 }
  0xa3   :  { %v4446_v46 = vadd.f32 %v9818_v11, %v3808_v44  ;;  %v595_v44 = vld [vmem:[%s13714_s1 + $0xd0] sm:$0xff] }
  0xa4   :  { %v851_v49 = vpack.c.bf16 %v595_v44, %v595_v44 }
  0xa5   :  { %v4702_v51 = vmax.f32 %v4446_v46, 0.0  ;;  %v83_v46 = vld [vmem:[%s13713_s0 + $0xd0] sm:$0xff] }
  0xa6   :  { %v1363_v57 = vunpack.c.l.b16 %v851_v49 }
  0xa7   :  { %v4956_v52 = vpack.c.bf16 %v4702_v51, %v4701_v50  ;;  %v2131_v55 = vpop.f32.mrf.mxu0  ;;  %v852_v50 = vpack.c.bf16 %v596_v45, %v596_v45  ;;  %v339_v51 = vpack.c.bf16 %v83_v46, %v83_v46 }
  0xa8   :  { %v3810_v56 = vpop.f32.mrf.mxu1 }
  0xa9   :  { %9214 = vmatmul.msk.bf16.gmra.mxu2 %vm5110_vm1, %v4956_v52  ;;  %v3811_v61 = vadd.f32 %v3810_v56, %v2131_v55  ;;  %v340_v52 = vpack.c.bf16 %v84_v47, %v84_v47  ;;  %v1364_v59 = vunpack.c.l.b16 %v852_v50  ;;  %v3043_v60 = vunpack.c.l.b16 %v339_v51 }
  0xaa   :  { %8947 = vmatmul.msk.bf16.gmra.mxu0 %vm1727_vm0, %v1603_v53 }
  0xab   :  { %9079 = vmatmul.msk.bf16.gmra.mxu1 %vm1727_vm0, %v3283_v54  ;;  %v4447_v4 = vadd.f32 %v9818_v11, %v3811_v61  ;;  %v3044_v61 = vunpack.c.l.b16 %v340_v52  ;;  %v1606_v1 = vpack.c.b16 %v1364_v59, %v1363_v57  ;;  %v602_v57 = vld [vmem:[%s13714_s1 + $0x108] sm:$0xff] }
  0xac   :  { %v90_v59 = vld [vmem:[%s13713_s0 + $0x108] sm:$0xff] }
  0xad   :  { %v4703_v12 = vmax.f32 %v4447_v4, 0.0 }
  0xaf   :  { %v2133_v2 = vpop.f32.mrf.mxu0 }
  0xb0   :  { %v3812_v3 = vpop.f32.mrf.mxu1 }
  0xb1   :  { %v3813_v5 = vadd.f32 %v3812_v3, %v2133_v2  ;;  %v3286_v2 = vpack.c.b16 %v3044_v61, %v3043_v60 }
  0xb3   :  { %v4448_v7 = vadd.f32 %v9818_v11, %v3813_v5  ;;  %v597_v5 = vld [vmem:[%s13714_s1 + $0xe0] sm:$0xff] }
  0xb4   :  { %v853_v10 = vpack.c.bf16 %v597_v5, %v597_v5 }
  0xb5   :  { %v4704_v13 = vmax.f32 %v4448_v7, 0.0  ;;  %v85_v7 = vld [vmem:[%s13713_s0 + $0xe0] sm:$0xff] }
  0xb6   :  { %v1365_v19 = vunpack.c.l.b16 %v853_v10 }
  0xb7   :  { %v4957_v14 = vpack.c.bf16 %v4704_v13, %v4703_v12  ;;  %v2136_v17 = vpop.f32.mrf.mxu0  ;;  %v854_v12 = vpack.c.bf16 %v598_v6, %v598_v6  ;;  %v341_v13 = vpack.c.bf16 %v85_v7, %v85_v7  ;;  %v9949_v7 = vld [vmem:[%s13720_s7 + $0x10] sm:$0xff] }
  0xb8   :  { %v3815_v18 = vpop.f32.mrf.mxu1 }
  0xb9   :  { %9215 = vmatmul.msk.bf16.gmra.mxu2 %vm5110_vm1, %v4957_v14  ;;  %v3816_v23 = vadd.f32 %v3815_v18, %v2136_v17  ;;  %v342_v14 = vpack.c.bf16 %v86_v8, %v86_v8  ;;  %v1366_v21 = vunpack.c.l.b16 %v854_v12  ;;  %v3045_v22 = vunpack.c.l.b16 %v341_v13 }
  0xba   :  { %8948 = vmatmul.msk.bf16.gmra.mxu0 %vm1727_vm0, %v1604_v15 }
  0xbb   :  { %9080 = vmatmul.msk.bf16.gmra.mxu1 %vm1727_vm0, %v3284_v16  ;;  %v4449_v30 = vadd.f32 %v9818_v11, %v3816_v23  ;;  %v3046_v23 = vunpack.c.l.b16 %v342_v14  ;;  %v1607_v27 = vpack.c.b16 %v1366_v21, %v1365_v19  ;;  %v9963_v21 = vld [vmem:[%s13720_s7] sm:$0xff] }
  0xbd   :  { %v4705_v37 = vmax.f32 %v4449_v30, 0.0 }
  0xbf   :  { %v2138_v28 = vpop.f32.mrf.mxu0 }
  0xc0   :  { %v3817_v29 = vpop.f32.mrf.mxu1 }
  0xc1   :  { %v3818_v31 = vadd.f32 %v3817_v29, %v2138_v28  ;;  %v3287_v28 = vpack.c.b16 %v3046_v23, %v3045_v22  ;;  %v603_v22 = vld [vmem:[%s13714_s1 + $0x110] sm:$0xff]  ;;  %v604_v23 = vld [vmem:[%s13714_s1 + $0x118] sm:$0xff] }
  0xc3   :  { %v4450_v33 = vadd.f32 %v9818_v11, %v3818_v31  ;;  %v599_v31 = vld [vmem:[%s13714_s1 + $0xf0] sm:$0xff] }
  0xc4   :  { %v855_v36 = vpack.c.bf16 %v599_v31, %v599_v31 }
  0xc5   :  { %v4706_v38 = vmax.f32 %v4450_v33, 0.0  ;;  %v87_v33 = vld [vmem:[%s13713_s0 + $0xf0] sm:$0xff] }
  0xc6   :  { %v1367_v44 = vunpack.c.l.b16 %v855_v36 }
  0xc7   :  { %v4958_v39 = vpack.c.bf16 %v4706_v38, %v4705_v37  ;;  %v2141_v42 = vpop.f32.mrf.mxu0  ;;  %v856_v37 = vpack.c.bf16 %v600_v32, %v600_v32  ;;  %v343_v38 = vpack.c.bf16 %v87_v33, %v87_v33 }
  0xc8   :  { %v3820_v43 = vpop.f32.mrf.mxu1 }
  0xc9   :  { %9216 = vmatmul.msk.bf16.gmra.mxu2 %vm5110_vm1, %v4958_v39  ;;  %v3821_v48 = vadd.f32 %v3820_v43, %v2141_v42  ;;  %v344_v39 = vpack.c.bf16 %v88_v34, %v88_v34  ;;  %v1368_v46 = vunpack.c.l.b16 %v856_v37  ;;  %v3047_v47 = vunpack.c.l.b16 %v343_v38 }
  0xca   :  { %8949 = vmatmul.msk.bf16.gmra.mxu0 %vm1727_vm0, %v1605_v40 }
  0xcb   :  { %9081 = vmatmul.msk.bf16.gmra.mxu1 %vm1727_vm0, %v3285_v41  ;;  %v4451_v55 = vadd.f32 %v9818_v11, %v3821_v48  ;;  %v3048_v48 = vunpack.c.l.b16 %v344_v39  ;;  %v1608_v52 = vpack.c.b16 %v1368_v46, %v1367_v44 }
  0xcd   :  { %v4707_v62 = vmax.f32 %v4451_v55, 0.0 }
  0xcf   :  { %v2143_v53 = vpop.f32.mrf.mxu0 }
  0xd0   :  { %v3822_v54 = vpop.f32.mrf.mxu1 }
  0xd1   :  { %v3823_v56 = vadd.f32 %v3822_v54, %v2143_v53  ;;  %v3288_v53 = vpack.c.b16 %v3048_v48, %v3047_v47  ;;  %v9992_v47 = vld [vmem:[%s13719_s6] ss:$0 sm:$0xff] }
  0xd2   :  { %v605_v48 = vld [vmem:[%s13714_s1 + $0x120] sm:$0xff] }
  0xd3   :  { %v4452_v58 = vadd.f32 %v9818_v11, %v3823_v56  ;;  %v601_v56 = vld [vmem:[%s13714_s1 + $0x100] sm:$0xff] }
  0xd4   :  { %v857_v61 = vpack.c.bf16 %v601_v56, %v601_v56 }
  0xd5   :  { %v4708_v63 = vmax.f32 %v4452_v58, 0.0  ;;  %v89_v58 = vld [vmem:[%s13713_s0 + $0x100] sm:$0xff] }
  0xd6   :  { %v1369_v6 = vunpack.c.l.b16 %v857_v61 }
  0xd7   :  { %v4959_v0 = vpack.c.bf16 %v4708_v63, %v4707_v62  ;;  %v2146_v3 = vpop.f32.mrf.mxu0  ;;  %v9942_v62 = vld [vmem:[%s13720_s7 + $0x18] sm:$0xff]  ;;  %v858_v63 = vpack.c.bf16 %v602_v57, %v602_v57 }
  0xd8   :  { %v3825_v4 = vpop.f32.mrf.mxu1  ;;  %6716 = vmatpush.bf16.msra.mxu3 %v9942_v62 }
  0xd9   :  { %9217 = vmatmul.msk.bf16.gmra.mxu2 %vm5110_vm1, %v4959_v0  ;;  %v3826_v9 = vadd.f32 %v3825_v4, %v2146_v3  ;;  %v345_v0 = vpack.c.bf16 %v89_v58, %v89_v58 }
  0xda   :  { %8950 = vmatmul.msk.bf16.gmra.mxu0 %vm1727_vm0, %v1606_v1  ;;  %v346_v1 = vpack.c.bf16 %v90_v59, %v90_v59 }
  0xdb   :  { %9082 = vmatmul.msk.bf16.gmra.mxu1 %vm1727_vm0, %v3286_v2  ;;  %v4453_v17 = vadd.f32 %v9818_v11, %v3826_v9  ;;  %v1370_v9 = vunpack.c.l.b16 %v858_v63  ;;  %v3049_v10 = vunpack.c.l.b16 %v345_v0 }
  0xdc   :  { %v3050_v12 = vunpack.c.l.b16 %v346_v1  ;;  %6717 = vmatpush.bf16.msra.mxu3 %v9949_v7 }
  0xdd   :  { %v4709_v24 = vmax.f32 %v4453_v17, 0.0  ;;  %v1609_v17 = vpack.c.b16 %v1370_v9, %v1369_v6 }
  0xdf   :  { %v2148_v15 = vpop.f32.mrf.mxu0 }
  0xe0   :  { %v3827_v16 = vpop.f32.mrf.mxu1 }
  0xe1   :  { %v3828_v18 = vadd.f32 %v3827_v16, %v2148_v15  ;;  %v9956_v15 = vld [vmem:[%s13720_s7 + $0x8] sm:$0xff] }
  0xe2   :  { %6718 = vmatpush.bf16.msra.mxu3 %v9956_v15 }
  0xe3   :  { %v4454_v20 = vadd.f32 %v9818_v11, %v3828_v18  ;;  %v3289_v18 = vpack.c.b16 %v3050_v12, %v3049_v10 }
  0xe5   :  { %v4710_v25 = vmax.f32 %v4454_v20, 0.0 }
  0xe6   :  { %6719 = vmatpush.bf16.msra.mxu3 %v9963_v21 }
  0xe7   :  { %v4960_v26 = vpack.c.bf16 %v4710_v25, %v4709_v24  ;;  %v2151_v29 = vpop.f32.mrf.mxu0  ;;  %v91_v24 = vld [vmem:[%s13713_s0 + $0x110] sm:$0xff]  ;;  %v92_v25 = vld [vmem:[%s13713_s0 + $0x118] sm:$0xff] }
  0xe8   :  { %v3830_v30 = vpop.f32.mrf.mxu1 }
  0xe9   :  { %9218 = vmatmul.msk.bf16.gmra.mxu2 %vm5110_vm1, %v4960_v26  ;;  %v3831_v35 = vadd.f32 %v3830_v30, %v2151_v29  ;;  %v347_v29 = vpack.c.bf16 %v91_v24, %v91_v24  ;;  %v348_v30 = vpack.c.bf16 %v92_v25, %v92_v25  ;;  %v607_v24 = vld [vmem:[%s13714_s1 + $0x130] sm:$0xff]  ;;  %v608_v25 = vld [vmem:[%s13714_s1 + $0x138] sm:$0xff] }
  0xea   :  { %8951 = vmatmul.msk.bf16.gmra.mxu0 %vm1727_vm0, %v1607_v27  ;;  %6777 = vmatpush.bf16.msrb.mxu3 %v9942_v62  ;;  %v859_v27 = vpack.c.bf16 %v603_v22, %v603_v22 }
  0xeb   :  { %9083 = vmatmul.msk.bf16.gmra.mxu1 %vm1727_vm0, %v3287_v28  ;;  %v4455_v42 = vadd.f32 %v9818_v11, %v3831_v35  ;;  %v860_v28 = vpack.c.bf16 %v604_v23, %v604_v23  ;;  %v3051_v38 = vunpack.c.l.b16 %v347_v29  ;;  %v3052_v39 = vunpack.c.l.b16 %v348_v30 }
  0xec   :  { %v1371_v35 = vunpack.c.l.b16 %v859_v27  ;;  %v95_v27 = vld [vmem:[%s13713_s0 + $0x130] sm:$0xff] }
  0xed   :  { %v4711_v49 = vmax.f32 %v4455_v42, 0.0  ;;  %v1372_v37 = vunpack.c.l.b16 %v860_v28  ;;  %v3290_v44 = vpack.c.b16 %v3052_v39, %v3051_v38  ;;  %v96_v28 = vld [vmem:[%s13713_s0 + $0x138] sm:$0xff] }
  0xee   :  { %6778 = vmatpush.bf16.msrb.mxu3 %v9949_v7 }
  0xef   :  { %v2153_v40 = vpop.f32.mrf.mxu0 }
  0xf0   :  { %v3832_v41 = vpop.f32.mrf.mxu1 }
  0xf1   :  { %v3833_v43 = vadd.f32 %v3832_v41, %v2153_v40 }
  0xf2   :  { %6779 = vmatpush.bf16.msrb.mxu3 %v9956_v15 }
  0xf3   :  { %v4456_v45 = vadd.f32 %v9818_v11, %v3833_v43  ;;  %v1610_v43 = vpack.c.b16 %v1372_v37, %v1371_v35  ;;  %v352_v35 = vpack.c.bf16 %v96_v28, %v96_v28 }
  0xf5   :  { %v4712_v50 = vmax.f32 %v4456_v45, 0.0 }
  0xf6   :  { %6780 = vmatpush.bf16.msrb.mxu3 %v9963_v21 }
  0xf7   :  { %v4961_v51 = vpack.c.bf16 %v4712_v50, %v4711_v49  ;;  %v2156_v54 = vpop.f32.mrf.mxu0  ;;  %v606_v49 = vld [vmem:[%s13714_s1 + $0x128] sm:$0xff] }
  0xf8   :  { %v3835_v55 = vpop.f32.mrf.mxu1 }
  0xf9   :  { %9219 = vmatmul.msk.bf16.gmra.mxu2 %vm5110_vm1, %v4961_v51  ;;  %v3836_v60 = vadd.f32 %v3835_v55, %v2156_v54  ;;  %v93_v51 = vld [vmem:[%s13713_s0 + $0x120] sm:$0xff]  ;;  %v861_v54 = vpack.c.bf16 %v605_v48, %v605_v48  ;;  %v862_v55 = vpack.c.bf16 %v606_v49, %v606_v49 }
  0xfa   :  { %8952 = vmatmul.msk.bf16.gmra.mxu0 %vm1727_vm0, %v1608_v52  ;;  %v94_v52 = vld [vmem:[%s13713_s0 + $0x128] sm:$0xff]  ;;  %v349_v57 = vpack.c.bf16 %v93_v51, %v93_v51 }
  0xfb   :  { %9084 = vmatmul.msk.bf16.gmra.mxu1 %vm1727_vm0, %v3288_v53  ;;  %v4457_v4 = vadd.f32 %v9818_v11, %v3836_v60  ;;  %v350_v58 = vpack.c.bf16 %v94_v52, %v94_v52  ;;  %v1373_v0 = vunpack.c.l.b16 %v861_v54  ;;  %v1374_v1 = vunpack.c.l.b16 %v862_v55 }
  0xfd   :  { %v4713_v13 = vmax.f32 %v4457_v4, 0.0  ;;  %v3053_v4 = vunpack.c.l.b16 %v349_v57  ;;  %v1611_v12 = vpack.c.b16 %v1374_v1, %v1373_v0  ;;  %v97_v1 = vld [vmem:[%s13713_s0 + $0x140] sm:$0xff] }
  0xff   :  { %v2158_v2 = vpop.f32.mrf.mxu0 }
 0x100   :  { %v3837_v3 = vpop.f32.mrf.mxu1 }
 0x101   :  { %v3838_v5 = vadd.f32 %v3837_v3, %v2158_v2 }
 0x103   :  { %v4458_v8 = vadd.f32 %v9818_v11, %v3838_v5  ;;  %v3054_v5 = vunpack.c.l.b16 %v350_v58 }
 0x105   :  { %v4714_v14 = vmax.f32 %v4458_v8, 0.0 }
 0x107   :  { %v4962_v16 = vpack.c.bf16 %v4714_v14, %v4713_v13  ;;  %v2161_v19 = vpop.f32.mrf.mxu0 }
 0x108   :  { %v3840_v20 = vpop.f32.mrf.mxu1 }
 0x109   :  { %9220 = vmatmul.msk.bf16.gmra.mxu2 %vm5110_vm1, %v4962_v16  ;;  %v3841_v26 = vadd.f32 %v3840_v20, %v2161_v19 }
 0x10a   :  { %8953 = vmatmul.msk.bf16.gmra.mxu0 %vm1727_vm0, %v1609_v17  ;;  %v3291_v17 = vpack.c.b16 %v3054_v5, %v3053_v4 }
 0x10b   :  { %9085 = vmatmul.msk.bf16.gmra.mxu1 %vm1727_vm0, %v3289_v18  ;;  %v4459_v33 = vadd.f32 %v9818_v11, %v3841_v26 }
 0x10d   :  { %v4715_v40 = vmax.f32 %v4459_v33, 0.0 }
 0x10f   :  { %v2163_v31 = vpop.f32.mrf.mxu0 }
 0x110   :  { %v3842_v32 = vpop.f32.mrf.mxu1 }
 0x111   :  { %v3843_v34 = vadd.f32 %v3842_v32, %v2163_v31  ;;  %v863_v31 = vpack.c.bf16 %v607_v24, %v607_v24  ;;  %v864_v32 = vpack.c.bf16 %v608_v25, %v608_v25 }
 0x113   :  { %v4460_v36 = vadd.f32 %v9818_v11, %v3843_v34  ;;  %v351_v34 = vpack.c.bf16 %v95_v27, %v95_v27 }
 0x115   :  { %v4716_v41 = vmax.f32 %v4460_v36, 0.0 }
 0x117   :  { %v4963_v42 = vpack.c.bf16 %v4716_v41, %v4715_v40  ;;  %v2166_v45 = vpop.f32.mrf.mxu0  ;;  %v1375_v40 = vunpack.c.l.b16 %v863_v31  ;;  %v1376_v41 = vunpack.c.l.b16 %v864_v32 }
 0x118   :  { %v3845_v46 = vpop.f32.mrf.mxu1 }
 0x119   :  { %9221 = vmatmul.msk.bf16.gmra.mxu2 %vm5110_vm1, %v4963_v42  ;;  %v3846_v53 = vadd.f32 %v3845_v46, %v2166_v45  ;;  %v3056_v45 = vunpack.c.l.b16 %v352_v35  ;;  %v1612_v51 = vpack.c.b16 %v1376_v41, %v1375_v40  ;;  %v99_v41 = vld [vmem:[%s13713_s0 + $0x150] sm:$0xff] }
 0x11a   :  { %8954 = vmatmul.msk.bf16.gmra.mxu0 %vm1727_vm0, %v1610_v43 }
 0x11b   :  { %9086 = vmatmul.msk.bf16.gmra.mxu1 %vm1727_vm0, %v3290_v44  ;;  %v4461_v61 = vadd.f32 %v9818_v11, %v3846_v53  ;;  %v3055_v44 = vunpack.c.l.b16 %v351_v34 }
 0x11c   :  { %v5504_v50 = vpop.f32.mrf.mxu2 }
 0x11d   :  { %v5505_v56 = vadd.f32 %v9992_v47, %v5504_v50  ;;  %v4717_v8 = vmax.f32 %v4461_v61, 0.0  ;;  %v3292_v55 = vpack.c.b16 %v3056_v45, %v3055_v44  ;;  %v609_v61 = vld [vmem:[%s13714_s1 + $0x140] sm:$0xff] }
 0x11e   :  { %v865_v5 = vpack.c.bf16 %v609_v61, %v609_v61 }
 0x11f   :  { %v2168_v59 = vpop.f32.mrf.mxu0  ;;  %v6144_v2 = vmax.f32 %v5505_v56, 0.0 }
 0x120   :  { %v3847_v60 = vpop.f32.mrf.mxu1 }
 0x121   :  { %v3848_v63 = vadd.f32 %v3847_v60, %v2168_v59  ;;  %v6400_v13 = vpack.c.bf16 %v6144_v2, %v6144_v2  ;;  %v98_v2 = vld [vmem:[%s13713_s0 + $0x148] sm:$0xff] }
 0x123   :  { %v4462_v3 = vadd.f32 %v9818_v11, %v3848_v63  ;;  %v6664_v22 = vunpack.c.l.b16 %v6400_v13  ;;  %v610_v63 = vld [vmem:[%s13714_s1 + $0x148] sm:$0xff] }
 0x124   :  { %v5506_v6 = vpop.f32.mrf.mxu2 }
 0x125   :  { %v4718_v9 = vmax.f32 %v4462_v3, 0.0  ;;  %v5507_v10 = vadd.f32 %v9992_v47, %v5506_v6  ;;  %v866_v6 = vpack.c.bf16 %v610_v63, %v610_v63 }
 0x127   :  { %v6145_v14 = vmax.f32 %v5507_v10, 0.0  ;;  %v4964_v16 = vpack.c.bf16 %v4718_v9, %v4717_v8  ;;  %v2171_v18 = vpop.f32.mrf.mxu0  ;;  %v353_v9 = vpack.c.bf16 %v97_v1, %v97_v1  ;;  %v354_v10 = vpack.c.bf16 %v98_v2, %v98_v2 }
 0x128   :  { %v3850_v19 = vpop.f32.mrf.mxu1 }
 0x129   :  { %v6401_v20 = vpack.c.bf16 %v6145_v14, %v6145_v14  ;;  %9222 = vmatmul.msk.bf16.gmra.mxu2 %vm5110_vm1, %v4964_v16  ;;  %v3851_v29 = vadd.f32 %v3850_v19, %v2171_v18  ;;  %v1378_v18 = vunpack.c.l.b16 %v866_v6 }
 0x12a   :  { %8955 = vmatmul.msk.bf16.gmra.mxu0 %vm1727_vm0, %v1611_v12 }
 0x12b   :  { %v6665_v23 = vunpack.c.l.b16 %v6401_v20  ;;  %9087 = vmatmul.msk.bf16.gmra.mxu1 %vm1727_vm0, %v3291_v17  ;;  %v4463_v38 = vadd.f32 %v9818_v11, %v3851_v29  ;;  %v1377_v17 = vunpack.c.l.b16 %v865_v5 }
 0x12c   :  { %v5509_v26 = vpop.f32.mrf.mxu2 }
 0x12d   :  { %v6672_v30 = vpack.c.b16 %v6665_v23, %v6664_v22  ;;  %v5510_v33 = vadd.f32 %v9992_v47, %v5509_v26  ;;  %v4719_v48 = vmax.f32 %v4463_v38, 0.0  ;;  %v3057_v22 = vunpack.c.l.b16 %v353_v9  ;;  %v611_v38 = vld [vmem:[%s13714_s1 + $0x150] sm:$0xff] }
 0x12e   :  { %v3058_v23 = vunpack.c.l.b16 %v354_v10  ;;  %v1613_v28 = vpack.c.b16 %v1378_v18, %v1377_v17  ;;  %v867_v45 = vpack.c.bf16 %v611_v38, %v611_v38  ;;  %v101_v18 = vld [vmem:[%s13713_s0 + $0x160] sm:$0xff] }
 0x12f   :  { %9357 = vmatmul.msk.bf16.vlgmr.msra.gmra.mxu3 %vm5110_vm1, %v6672_v30  ;;  %v2173_v36 = vpop.f32.mrf.mxu0  ;;  %v6146_v42 = vmax.f32 %v5510_v33, 0.0 }
 0x130   :  { %v3852_v37 = vpop.f32.mrf.mxu1  ;;  %6846 = vmatpush.bf16.msra.mxu3 %v9942_v62  ;;  %v3293_v32 = vpack.c.b16 %v3058_v23, %v3057_v22 }
 0x131   :  { %v3853_v39 = vadd.f32 %v3852_v37, %v2173_v36  ;;  %v6402_v52 = vpack.c.bf16 %v6146_v42, %v6146_v42  ;;  %v100_v42 = vld [vmem:[%s13713_s0 + $0x158] sm:$0xff] }
 0x133   :  { %v4464_v43 = vadd.f32 %v9818_v11, %v3853_v39  ;;  %v6666_v59 = vunpack.c.l.b16 %v6402_v52  ;;  %v612_v39 = vld [vmem:[%s13714_s1 + $0x158] sm:$0xff] }
 0x134   :  { %v5511_v46 = vpop.f32.mrf.mxu2  ;;  %6847 = vmatpush.bf16.msra.mxu3 %v9949_v7 }
 0x135   :  { %v4720_v49 = vmax.f32 %v4464_v43, 0.0  ;;  %v5512_v50 = vadd.f32 %v9992_v47, %v5511_v46  ;;  %v868_v46 = vpack.c.bf16 %v612_v39, %v612_v39 }
 0x137   :  { %v6147_v53 = vmax.f32 %v5512_v50, 0.0  ;;  %v4965_v54 = vpack.c.bf16 %v4720_v49, %v4719_v48  ;;  %v2176_v56 = vpop.f32.mrf.mxu0  ;;  %v355_v49 = vpack.c.bf16 %v99_v41, %v99_v41  ;;  %v356_v50 = vpack.c.bf16 %v100_v42, %v100_v42 }
 0x138   :  { %v3855_v57 = vpop.f32.mrf.mxu1  ;;  %6848 = vmatpush.bf16.msra.mxu3 %v9956_v15 }
 0x139   :  { %v6403_v58 = vpack.c.bf16 %v6147_v53, %v6147_v53  ;;  %9223 = vmatmul.msk.bf16.gmra.mxu2 %vm5110_vm1, %v4965_v54  ;;  %v3856_v3 = vadd.f32 %v3855_v57, %v2176_v56  ;;  %v1380_v56 = vunpack.c.l.b16 %v868_v46 }
 0x13a   :  { %8956 = vmatmul.msk.bf16.gmra.mxu0 %vm1727_vm0, %v1612_v51 }
 0x13b   :  { %v6667_v60 = vunpack.c.l.b16 %v6403_v58  ;;  %9088 = vmatmul.msk.bf16.gmra.mxu1 %vm1727_vm0, %v3292_v55  ;;  %v4465_v14 = vadd.f32 %v9818_v11, %v3856_v3  ;;  %v1379_v55 = vunpack.c.l.b16 %v867_v45 }
 0x13c   :  { %v5514_v0 = vpop.f32.mrf.mxu2  ;;  %6849 = vmatpush.bf16.msra.mxu3 %v9963_v21 }
 0x13d   :  { %v6673_v4 = vpack.c.b16 %v6667_v60, %v6666_v59  ;;  %v5515_v8 = vadd.f32 %v9992_v47, %v5514_v0  ;;  %v4721_v25 = vmax.f32 %v4465_v14, 0.0  ;;  %v3059_v59 = vunpack.c.l.b16 %v355_v49  ;;  %v613_v14 = vld [vmem:[%s13714_s1 + $0x160] sm:$0xff] }
 0x13e   :  { %v3060_v60 = vunpack.c.l.b16 %v356_v50  ;;  %v1614_v2 = vpack.c.b16 %v1380_v56, %v1379_v55  ;;  %v869_v23 = vpack.c.bf16 %v613_v14, %v613_v14  ;;  %v103_v56 = vld [vmem:[%s13713_s0 + $0x170] sm:$0xff] }
 0x13f   :  { %9358 = vmatmul.msk.bf16.gmra.mxu3 %vm5110_vm1, %v6673_v4  ;;  %v2178_v12 = vpop.f32.mrf.mxu0  ;;  %v6148_v19 = vmax.f32 %v5515_v8, 0.0 }
 0x140   :  { %v3857_v13 = vpop.f32.mrf.mxu1  ;;  %v3294_v6 = vpack.c.b16 %v3060_v60, %v3059_v59 }
 0x141   :  { %v3858_v16 = vadd.f32 %v3857_v13, %v2178_v12  ;;  %v6404_v29 = vpack.c.bf16 %v6148_v19, %v6148_v19  ;;  %v102_v19 = vld [vmem:[%s13713_s0 + $0x168] sm:$0xff] }
 0x143   :  { %v4466_v20 = vadd.f32 %v9818_v11, %v3858_v16  ;;  %v6668_v36 = vunpack.c.l.b16 %v6404_v29  ;;  %v614_v16 = vld [vmem:[%s13714_s1 + $0x168] sm:$0xff] }
 0x144   :  { %v5516_v24 = vpop.f32.mrf.mxu2 }
 0x145   :  { %v4722_v26 = vmax.f32 %v4466_v20, 0.0  ;;  %v5517_v27 = vadd.f32 %v9992_v47, %v5516_v24  ;;  %v870_v24 = vpack.c.bf16 %v614_v16, %v614_v16 }
 0x147   :  { %v6149_v30 = vmax.f32 %v5517_v27, 0.0  ;;  %v4966_v31 = vpack.c.bf16 %v4722_v26, %v4721_v25  ;;  %v2181_v33 = vpop.f32.mrf.mxu0  ;;  %v357_v26 = vpack.c.bf16 %v101_v18, %v101_v18  ;;  %v358_v27 = vpack.c.bf16 %v102_v19, %v102_v19 }
 0x148   :  { %v3860_v34 = vpop.f32.mrf.mxu1 }
 0x149   :  { %v6405_v35 = vpack.c.bf16 %v6149_v30, %v6149_v30  ;;  %9224 = vmatmul.msk.bf16.gmra.mxu2 %vm5110_vm1, %v4966_v31  ;;  %v3861_v43 = vadd.f32 %v3860_v34, %v2181_v33  ;;  %v1382_v33 = vunpack.c.l.b16 %v870_v24 }
 0x14a   :  { %8957 = vmatmul.msk.bf16.gmra.mxu0 %vm1727_vm0, %v1613_v28 }
 0x14b   :  { %v6669_v37 = vunpack.c.l.b16 %v6405_v35  ;;  %9089 = vmatmul.msk.bf16.gmra.mxu1 %vm1727_vm0, %v3293_v32  ;;  %v4467_v53 = vadd.f32 %v9818_v11, %v3861_v43  ;;  %v1381_v32 = vunpack.c.l.b16 %v869_v23 }
 0x14c   :  { %v5519_v40 = vpop.f32.mrf.mxu2 }
 0x14d   :  { %v6674_v44 = vpack.c.b16 %v6669_v37, %v6668_v36  ;;  %v5520_v48 = vadd.f32 %v9992_v47, %v5519_v40  ;;  %v4723_v63 = vmax.f32 %v4467_v53, 0.0  ;;  %v3061_v36 = vunpack.c.l.b16 %v357_v26  ;;  %v615_v53 = vld [vmem:[%s13714_s1 + $0x170] sm:$0xff] }
 0x14e   :  { %v3062_v37 = vunpack.c.l.b16 %v358_v27  ;;  %v1615_v42 = vpack.c.b16 %v1382_v33, %v1381_v32  ;;  %v871_v60 = vpack.c.bf16 %v615_v53, %v615_v53  ;;  %v105_v32 = vld [vmem:[%s13713_s0 + $0x180] sm:$0xff]  ;;  %v106_v33 = vld [vmem:[%s13713_s0 + $0x188] sm:$0xff] }
 0x14f   :  { %9359 = vmatmul.msk.bf16.gmra.mxu3 %vm5110_vm1, %v6674_v44  ;;  %v2183_v51 = vpop.f32.mrf.mxu0  ;;  %v6150_v57 = vmax.f32 %v5520_v48, 0.0 }
 0x150   :  { %v3862_v52 = vpop.f32.mrf.mxu1  ;;  %v3295_v46 = vpack.c.b16 %v3062_v37, %v3061_v36 }
 0x151   :  { %v3863_v54 = vadd.f32 %v3862_v52, %v2183_v51  ;;  %v6406_v3 = vpack.c.bf16 %v6150_v57, %v6150_v57  ;;  %v104_v57 = vld [vmem:[%s13713_s0 + $0x178] sm:$0xff] }
 0x153   :  { %v4468_v58 = vadd.f32 %v9818_v11, %v3863_v54  ;;  %v6670_v12 = vunpack.c.l.b16 %v6406_v3  ;;  %v616_v54 = vld [vmem:[%s13714_s1 + $0x178] sm:$0xff] }
 0x154   :  { %v5521_v61 = vpop.f32.mrf.mxu2 }
 0x155   :  { %v4724_v0 = vmax.f32 %v4468_v58, 0.0  ;;  %v5522_v1 = vadd.f32 %v9992_v47, %v5521_v61  ;;  %v872_v61 = vpack.c.bf16 %v616_v54, %v616_v54 }
 0x157   :  { %v4967_v4 = vpack.c.bf16 %v4724_v0, %v4723_v63  ;;  %v6151_v5 = vmax.f32 %v5522_v1, 0.0  ;;  %v2186_v8 = vpop.f32.mrf.mxu0  ;;  %v359_v0 = vpack.c.bf16 %v103_v56, %v103_v56  ;;  %v360_v1 = vpack.c.bf16 %v104_v57, %v104_v57 }
 0x158   :  { %v3865_v9 = vpop.f32.mrf.mxu1 }
 0x159   :  { %v6407_v10 = vpack.c.bf16 %v6151_v5, %v6151_v5  ;;  %9225 = vmatmul.msk.bf16.gmra.mxu2 %vm5110_vm1, %v4967_v4  ;;  %v3866_v20 = vadd.f32 %v3865_v9, %v2186_v8  ;;  %v1384_v8 = vunpack.c.l.b16 %v872_v61 }
 0x15a   :  { %8958 = vmatmul.msk.bf16.gmra.mxu0 %vm1727_vm0, %v1614_v2 }
 0x15b   :  { %v6671_v13 = vunpack.c.l.b16 %v6407_v10  ;;  %9090 = vmatmul.msk.bf16.gmra.mxu1 %vm1727_vm0, %v3294_v6  ;;  %v4469_v30 = vadd.f32 %v9818_v11, %v3866_v20  ;;  %v1383_v6 = vunpack.c.l.b16 %v871_v60 }
 0x15c   :  { %v5524_v17 = vpop.f32.mrf.mxu2 }
 0x15d   :  { %v6675_v22 = vpack.c.b16 %v6671_v13, %v6670_v12  ;;  %v5525_v25 = vadd.f32 %v9992_v47, %v5524_v17  ;;  %v4725_v39 = vmax.f32 %v4469_v30, 0.0  ;;  %v3063_v12 = vunpack.c.l.b16 %v359_v0  ;;  %v618_v30 = vld [vmem:[%s13714_s1 + $0x188] sm:$0xff] }
 0x15e   :  { %v3064_v13 = vunpack.c.l.b16 %v360_v1  ;;  %v1616_v19 = vpack.c.b16 %v1384_v8, %v1383_v6  ;;  %v874_v37 = vpack.c.bf16 %v618_v30, %v618_v30  ;;  %v107_v8 = vld [vmem:[%s13713_s0 + $0x190] sm:$0xff] }
 0x15f   :  { %9360 = vmatmul.msk.bf16.gmra.mxu3 %vm5110_vm1, %v6675_v22  ;;  %v2188_v28 = vpop.f32.mrf.mxu0  ;;  %v6152_v34 = vmax.f32 %v5525_v25, 0.0 }
 0x160   :  { %v3867_v29 = vpop.f32.mrf.mxu1  ;;  %v3296_v24 = vpack.c.b16 %v3064_v13, %v3063_v12 }
 0x161   :  { %v3868_v31 = vadd.f32 %v3867_v29, %v2188_v28  ;;  %v6408_v43 = vpack.c.bf16 %v6152_v34, %v6152_v34  ;;  %v617_v29 = vld [vmem:[%s13714_s1 + $0x180] sm:$0xff] }
 0x162   :  { %v873_v36 = vpack.c.bf16 %v617_v29, %v617_v29 }
 0x163   :  { %v4470_v35 = vadd.f32 %v9818_v11, %v3868_v31  ;;  %v6749_v51 = vunpack.c.l.b16 %v6408_v43  ;;  %v10138_v43 = vld [vmem:[%s13717_s4] ss:$0 sm:$0xff] }
 0x164   :  { %v5526_v38 = vpop.f32.mrf.mxu2 }
 0x165   :  { %v4726_v40 = vmax.f32 %v4470_v35, 0.0  ;;  %v5527_v41 = vadd.f32 %v9992_v47, %v5526_v38 }
 0x167   :  { %v4968_v44 = vpack.c.bf16 %v4726_v40, %v4725_v39  ;;  %v6153_v45 = vmax.f32 %v5527_v41, 0.0  ;;  %v2191_v48 = vpop.f32.mrf.mxu0  ;;  %v361_v39 = vpack.c.bf16 %v105_v32, %v105_v32  ;;  %v362_v40 = vpack.c.bf16 %v106_v33, %v106_v33 }
 0x168   :  { %v3870_v49 = vpop.f32.mrf.mxu1 }
 0x169   :  { %v6409_v50 = vpack.c.bf16 %v6153_v45, %v6153_v45  ;;  %9226 = vmatmul.msk.bf16.gmra.mxu2 %vm5110_vm1, %v4968_v44  ;;  %v3871_v59 = vadd.f32 %v3870_v49, %v2191_v48  ;;  %v1386_v48 = vunpack.c.l.b16 %v874_v37 }
 0x16a   :  { %8959 = vmatmul.msk.bf16.gmra.mxu0 %vm1727_vm0, %v1615_v42 }
 0x16b   :  { %v6750_v52 = vunpack.c.l.b16 %v6409_v50  ;;  %9091 = vmatmul.msk.bf16.gmra.mxu1 %vm1727_vm0, %v3295_v46  ;;  %v4471_v4 = vadd.f32 %v9818_v11, %v3871_v59  ;;  %v1385_v46 = vunpack.c.l.b16 %v873_v36 }
 0x16c   :  { %v5529_v55 = vpop.f32.mrf.mxu2 }
 0x16d   :  { %v6757_v58 = vpack.c.b16 %v6750_v52, %v6749_v51  ;;  %v5530_v63 = vadd.f32 %v9992_v47, %v5529_v55  ;;  %v4727_v16 = vmax.f32 %v4471_v4, 0.0  ;;  %v3065_v51 = vunpack.c.l.b16 %v361_v39  ;;  %v619_v4 = vld [vmem:[%s13714_s1 + $0x190] sm:$0xff] }
 0x16e   :  { %v3066_v52 = vunpack.c.l.b16 %v362_v40  ;;  %v1617_v57 = vpack.c.b16 %v1386_v48, %v1385_v46  ;;  %v875_v13 = vpack.c.bf16 %v619_v4, %v619_v4  ;;  %v109_v48 = vld [vmem:[%s13713_s0 + $0x1a0] sm:$0xff] }
 0x16f   :  { %9361 = vmatmul.msk.bf16.vlgmr.msrb.gmra.mxu3 %vm5110_vm1, %v6757_v58  ;;  %v2193_v2 = vpop.f32.mrf.mxu0  ;;  %v6154_v9 = vmax.f32 %v5530_v63, 0.0 }
 0x170   :  { %v3872_v3 = vpop.f32.mrf.mxu1  ;;  %6915 = vmatpush.bf16.msrb.mxu3 %v9942_v62  ;;  %v3297_v61 = vpack.c.b16 %v3066_v52, %v3065_v51 }
 0x171   :  { %v3873_v5 = vadd.f32 %v3872_v3, %v2193_v2  ;;  %v6410_v20 = vpack.c.bf16 %v6154_v9, %v6154_v9  ;;  %v108_v9 = vld [vmem:[%s13713_s0 + $0x198] sm:$0xff] }
 0x173   :  { %v4472_v10 = vadd.f32 %v9818_v11, %v3873_v5  ;;  %v6751_v11 = vunpack.c.l.b16 %v6410_v20  ;;  %v620_v5 = vld [vmem:[%s13714_s1 + $0x198] sm:$0xff] }
 0x174   :  { %v5531_v14 = vpop.f32.mrf.mxu2  ;;  %6916 = vmatpush.bf16.msrb.mxu3 %v9949_v7 }
 0x175   :  { %v4728_v17 = vmax.f32 %v4472_v10, 0.0  ;;  %v5532_v18 = vadd.f32 %v9992_v47, %v5531_v14  ;;  %v876_v14 = vpack.c.bf16 %v620_v5, %v620_v5 }
 0x177   :  { %v4969_v22 = vpack.c.bf16 %v4728_v17, %v4727_v16  ;;  %v6155_v23 = vmax.f32 %v5532_v18, 0.0  ;;  %v2196_v25 = vpop.f32.mrf.mxu0  ;;  %v363_v17 = vpack.c.bf16 %v107_v8, %v107_v8  ;;  %v364_v18 = vpack.c.bf16 %v108_v9, %v108_v9 }
 0x178   :  { %v3875_v26 = vpop.f32.mrf.mxu1  ;;  %6917 = vmatpush.bf16.msrb.mxu3 %v9956_v15 }
 0x179   :  { %v6411_v27 = vpack.c.bf16 %v6155_v23, %v6155_v23  ;;  %9227 = vmatmul.msk.bf16.gmra.mxu2 %vm5110_vm1, %v4969_v22  ;;  %v3876_v34 = vadd.f32 %v3875_v26, %v2196_v25  ;;  %v1388_v25 = vunpack.c.l.b16 %v876_v14 }
 0x17a   :  { %8960 = vmatmul.msk.bf16.gmra.mxu0 %vm1727_vm0, %v1616_v19 }
 0x17b   :  { %v6752_v28 = vunpack.c.l.b16 %v6411_v27  ;;  %9092 = vmatmul.msk.bf16.gmra.mxu1 %vm1727_vm0, %v3296_v24  ;;  %v4473_v44 = vadd.f32 %v10138_v43, %v3876_v34  ;;  %v1387_v24 = vunpack.c.l.b16 %v875_v13 }
 0x17c   :  { %v5534_v31 = vpop.f32.mrf.mxu2  ;;  %6918 = vmatpush.bf16.msrb.mxu3 %v9963_v21 }
 0x17d   :  { %v6758_v35 = vpack.c.b16 %v6752_v28, %v6751_v11  ;;  %v5535_v38 = vadd.f32 %v9992_v47, %v5534_v31  ;;  %v4729_v54 = vmax.f32 %v4473_v44, 0.0  ;;  %v3067_v11 = vunpack.c.l.b16 %v363_v17  ;;  %v621_v44 = vld [vmem:[%s13714_s1 + $0x1a0] sm:$0xff] }
 0x17e   :  { %v3068_v28 = vunpack.c.l.b16 %v364_v18  ;;  %v1618_v33 = vpack.c.b16 %v1388_v25, %v1387_v24  ;;  %v877_v52 = vpack.c.bf16 %v621_v44, %v621_v44  ;;  %v111_v25 = vld [vmem:[%s13713_s0 + $0x1b0] sm:$0xff] }
 0x17f   :  { %9362 = vmatmul.msk.bf16.gmra.mxu3 %vm5110_vm1, %v6758_v35  ;;  %v2198_v41 = vpop.f32.mrf.mxu0  ;;  %v6156_v49 = vmax.f32 %v5535_v38, 0.0 }
 0x180   :  { %v3877_v42 = vpop.f32.mrf.mxu1  ;;  %v3298_v37 = vpack.c.b16 %v3068_v28, %v3067_v11 }
 0x181   :  { %v3878_v45 = vadd.f32 %v3877_v42, %v2198_v41  ;;  %v6412_v58 = vpack.c.bf16 %v6156_v49, %v6156_v49  ;;  %v110_v49 = vld [vmem:[%s13713_s0 + $0x1a8] sm:$0xff] }
 0x183   :  { %v4474_v50 = vadd.f32 %v10138_v43, %v3878_v45  ;;  %v6753_v2 = vunpack.c.l.b16 %v6412_v58  ;;  %v622_v45 = vld [vmem:[%s13714_s1 + $0x1a8] sm:$0xff] }
 0x184   :  { %v5536_v53 = vpop.f32.mrf.mxu2 }
 0x185   :  { %v4730_v55 = vmax.f32 %v4474_v50, 0.0  ;;  %v5537_v56 = vadd.f32 %v9992_v47, %v5536_v53  ;;  %v878_v53 = vpack.c.bf16 %v622_v45, %v622_v45 }
 0x187   :  { %v4970_v59 = vpack.c.bf16 %v4730_v55, %v4729_v54  ;;  %v6157_v60 = vmax.f32 %v5537_v56, 0.0  ;;  %v2201_v63 = vpop.f32.mrf.mxu0  ;;  %v365_v55 = vpack.c.bf16 %v109_v48, %v109_v48  ;;  %v366_v56 = vpack.c.bf16 %v110_v49, %v110_v49 }
 0x188   :  { %v3880_v0 = vpop.f32.mrf.mxu1 }
 0x189   :  { %v6413_v1 = vpack.c.bf16 %v6157_v60, %v6157_v60  ;;  %9228 = vmatmul.msk.bf16.gmra.mxu2 %vm5110_vm1, %v4970_v59  ;;  %v3881_v10 = vadd.f32 %v3880_v0, %v2201_v63  ;;  %v1390_v63 = vunpack.c.l.b16 %v878_v53 }
 0x18a   :  { %8961 = vmatmul.msk.bf16.gmra.mxu0 %vm1727_vm0, %v1617_v57 }
 0x18b   :  { %v6754_v3 = vunpack.c.l.b16 %v6413_v1  ;;  %9093 = vmatmul.msk.bf16.gmra.mxu1 %vm1727_vm0, %v3297_v61  ;;  %v4475_v22 = vadd.f32 %v10138_v43, %v3881_v10  ;;  %v1389_v61 = vunpack.c.l.b16 %v877_v52 }
 0x18c   :  { %v5539_v6 = vpop.f32.mrf.mxu2 }
 0x18d   :  { %v6759_v12 = vpack.c.b16 %v6754_v3, %v6753_v2  ;;  %v5540_v16 = vadd.f32 %v9992_v47, %v5539_v6  ;;  %v4731_v30 = vmax.f32 %v4475_v22, 0.0  ;;  %v3069_v2 = vunpack.c.l.b16 %v365_v55  ;;  %v623_v22 = vld [vmem:[%s13714_s1 + $0x1b0] sm:$0xff] }
 0x18e   :  { %v3070_v3 = vunpack.c.l.b16 %v366_v56  ;;  %v1619_v9 = vpack.c.b16 %v1390_v63, %v1389_v61  ;;  %v879_v28 = vpack.c.bf16 %v623_v22, %v623_v22  ;;  %v113_v61 = vld [vmem:[%s13713_s0 + $0x1c0] sm:$0xff]  ;;  %v114_v63 = vld [vmem:[%s13713_s0 + $0x1c8] sm:$0xff] }
 0x18f   :  { %9363 = vmatmul.msk.bf16.gmra.mxu3 %vm5110_vm1, %v6759_v12  ;;  %v2203_v19 = vpop.f32.mrf.mxu0  ;;  %v6158_v26 = vmax.f32 %v5540_v16, 0.0 }
 0x190   :  { %v3882_v20 = vpop.f32.mrf.mxu1  ;;  %v3299_v14 = vpack.c.b16 %v3070_v3, %v3069_v2 }
 0x191   :  { %v3883_v23 = vadd.f32 %v3882_v20, %v2203_v19  ;;  %v6414_v34 = vpack.c.bf16 %v6158_v26, %v6158_v26  ;;  %v112_v26 = vld [vmem:[%s13713_s0 + $0x1b8] sm:$0xff] }
 0x193   :  { %v4476_v27 = vadd.f32 %v10138_v43, %v3883_v23  ;;  %v6755_v41 = vunpack.c.l.b16 %v6414_v34  ;;  %v624_v23 = vld [vmem:[%s13714_s1 + $0x1b8] sm:$0xff] }
 0x194   :  { %v5541_v29 = vpop.f32.mrf.mxu2 }
 0x195   :  { %v4732_v31 = vmax.f32 %v4476_v27, 0.0  ;;  %v5542_v32 = vadd.f32 %v9992_v47, %v5541_v29  ;;  %v880_v29 = vpack.c.bf16 %v624_v23, %v624_v23 }
 0x197   :  { %v4971_v35 = vpack.c.bf16 %v4732_v31, %v4731_v30  ;;  %v6159_v36 = vmax.f32 %v5542_v32, 0.0  ;;  %v2206_v38 = vpop.f32.mrf.mxu0  ;;  %v367_v31 = vpack.c.bf16 %v111_v25, %v111_v25  ;;  %v368_v32 = vpack.c.bf16 %v112_v26, %v112_v26 }
 0x198   :  { %v3885_v39 = vpop.f32.mrf.mxu1 }
 0x199   :  { %v6415_v40 = vpack.c.bf16 %v6159_v36, %v6159_v36  ;;  %9229 = vmatmul.msk.bf16.gmra.mxu2 %vm5110_vm1, %v4971_v35  ;;  %v3886_v50 = vadd.f32 %v3885_v39, %v2206_v38  ;;  %v1391_v38 = vunpack.c.l.b16 %v879_v28  ;;  %v1392_v39 = vunpack.c.l.b16 %v880_v29 }
 0x19a   :  { %8962 = vmatmul.msk.bf16.gmra.mxu0 %vm1727_vm0, %v1618_v33  ;;  %v3072_v44 = vunpack.c.l.b16 %v368_v32 }
 0x19b   :  { %v6756_v42 = vunpack.c.l.b16 %v6415_v40  ;;  %9094 = vmatmul.msk.bf16.gmra.mxu1 %vm1727_vm0, %v3298_v37  ;;  %v4477_v59 = vadd.f32 %v10138_v43, %v3886_v50 }
 0x19c   :  { %v5544_v46 = vpop.f32.mrf.mxu2 }
 0x19d   :  { %v6760_v51 = vpack.c.b16 %v6756_v42, %v6755_v41  ;;  %v5545_v54 = vadd.f32 %v9992_v47, %v5544_v46  ;;  %v4733_v5 = vmax.f32 %v4477_v59, 0.0  ;;  %v3071_v42 = vunpack.c.l.b16 %v367_v31  ;;  %v625_v59 = vld [vmem:[%s13714_s1 + $0x1c0] sm:$0xff] }
 0x19e   :  { %v881_v2 = vpack.c.bf16 %v625_v59, %v625_v59 }
 0x19f   :  { %9364 = vmatmul.msk.bf16.gmra.mxu3 %vm5110_vm1, %v6760_v51  ;;  %v2208_v57 = vpop.f32.mrf.mxu0  ;;  %v6160_v0 = vmax.f32 %v5545_v54, 0.0  ;;  %v3300_v53 = vpack.c.b16 %v3072_v44, %v3071_v42 }
 0x1a0   :  { %v3887_v58 = vpop.f32.mrf.mxu1 }
 0x1a1   :  { %v3888_v60 = vadd.f32 %v3887_v58, %v2208_v57  ;;  %v6416_v10 = vpack.c.bf16 %v6160_v0, %v6160_v0 }
 0x1a3   :  { %v4478_v1 = vadd.f32 %v10138_v43, %v3888_v60  ;;  %v6818_v19 = vunpack.c.l.b16 %v6416_v10  ;;  %v626_v60 = vld [vmem:[%s13714_s1 + $0x1c8] sm:$0xff] }
 0x1a4   :  { %v5546_v4 = vpop.f32.mrf.mxu2  ;;  %v882_v3 = vpack.c.bf16 %v626_v60, %v626_v60 }
 0x1a5   :  { %v4734_v6 = vmax.f32 %v4478_v1, 0.0  ;;  %v5547_v8 = vadd.f32 %v9992_v47, %v5546_v4 }
 0x1a7   :  { %v4972_v12 = vpack.c.bf16 %v4734_v6, %v4733_v5  ;;  %v6161_v13 = vmax.f32 %v5547_v8, 0.0  ;;  %v2211_v16 = vpop.f32.mrf.mxu0  ;;  %v369_v5 = vpack.c.bf16 %v113_v61, %v113_v61  ;;  %v370_v6 = vpack.c.bf16 %v114_v63, %v114_v63 }
 0x1a8   :  { %v3890_v17 = vpop.f32.mrf.mxu1 }
 0x1a9   :  { %v6417_v18 = vpack.c.bf16 %v6161_v13, %v6161_v13  ;;  %9230 = vmatmul.msk.bf16.gmra.mxu2 %vm5110_vm1, %v4972_v12  ;;  %v3891_v11 = vadd.f32 %v3890_v17, %v2211_v16  ;;  %v1394_v16 = vunpack.c.l.b16 %v882_v3 }
 0x1aa   :  { %8963 = vmatmul.msk.bf16.gmra.mxu0 %vm1727_vm0, %v1619_v9 }
 0x1ab   :  { %v6819_v20 = vunpack.c.l.b16 %v6417_v18  ;;  %9095 = vmatmul.msk.bf16.gmra.mxu1 %vm1727_vm0, %v3299_v14  ;;  %v4479_v35 = vadd.f32 %v10138_v43, %v3891_v11  ;;  %v1393_v14 = vunpack.c.l.b16 %v881_v2  ;;  %v3073_v18 = vunpack.c.l.b16 %v369_v5 }
 0x1ac   :  { %v5549_v24 = vpop.f32.mrf.mxu2 }
 0x1ad   :  { %v6826_v27 = vpack.c.b16 %v6819_v20, %v6818_v19  ;;  %v5550_v30 = vadd.f32 %v9992_v47, %v5549_v24  ;;  %v4735_v46 = vmax.f32 %v4479_v35, 0.0  ;;  %v3074_v19 = vunpack.c.l.b16 %v370_v6  ;;  %v627_v35 = vld [vmem:[%s13714_s1 + $0x1d0] sm:$0xff] }
 0x1ae   :  { %v1621_v25 = vpack.c.b16 %v1394_v16, %v1393_v14  ;;  %v883_v44 = vpack.c.bf16 %v627_v35, %v627_v35  ;;  %v629_v14 = vld [vmem:[%s13714_s1 + $0x1e0] sm:$0xff]  ;;  %v630_v16 = vld [vmem:[%s13714_s1 + $0x1e8] sm:$0xff] }
 0x1af   :  { %9365 = vmatmul.msk.bf16.vlgmr.msra.gmra.mxu3 %vm5110_vm1, %v6826_v27  ;;  %v2213_v33 = vpop.f32.mrf.mxu0  ;;  %v6162_v40 = vmax.f32 %v5550_v30, 0.0  ;;  %v3301_v28 = vpack.c.b16 %v3074_v19, %v3073_v18  ;;  %v118_v18 = vld [vmem:[%s13713_s0 + $0x1e8] sm:$0xff] }
 0x1b0   :  { %v3892_v34 = vpop.f32.mrf.mxu1  ;;  %6984 = vmatpush.bf16.msra.mxu3 %v9942_v62  ;;  %v1620_v62 = vpack.c.b16 %v1392_v39, %v1391_v38  ;;  %v115_v39 = vld [vmem:[%s13713_s0 + $0x1d0] sm:$0xff] }
 0x1b1   :  { %v3893_v36 = vadd.f32 %v3892_v34, %v2213_v33  ;;  %v6418_v50 = vpack.c.bf16 %v6162_v40, %v6162_v40  ;;  %v116_v40 = vld [vmem:[%s13713_s0 + $0x1d8] sm:$0xff] }
 0x1b2   :  { %v10202_v37 = vpop.f32.mrf.mxu3 }
 0x1b3   :  { %v4480_v41 = vadd.f32 %v10138_v43, %v3893_v36  ;;  %v6820_v58 = vunpack.c.l.b16 %v6418_v50  ;;  %v628_v36 = vld [vmem:[%s13714_s1 + $0x1d8] sm:$0xff] }
 0x1b4   :  { %v5551_v45 = vpop.f32.mrf.mxu2  ;;  %6985 = vmatpush.bf16.msra.mxu3 %v9949_v7 }
 0x1b5   :  { %v4736_v48 = vmax.f32 %v4480_v41, 0.0  ;;  %v5552_v49 = vadd.f32 %v9992_v47, %v5551_v45  ;;  %v884_v45 = vpack.c.bf16 %v628_v36, %v628_v36 }
 0x1b7   :  { %v4973_v51 = vpack.c.bf16 %v4736_v48, %v4735_v46  ;;  %v6163_v52 = vmax.f32 %v5552_v49, 0.0  ;;  %v2216_v54 = vpop.f32.mrf.mxu0  ;;  %v371_v48 = vpack.c.bf16 %v115_v39, %v115_v39  ;;  %v372_v49 = vpack.c.bf16 %v116_v40, %v116_v40 }
 0x1b8   :  { %v3895_v55 = vpop.f32.mrf.mxu1  ;;  %6986 = vmatpush.bf16.msra.mxu3 %v9956_v15 }
 0x1b9   :  { %v6419_v56 = vpack.c.bf16 %v6163_v52, %v6163_v52  ;;  %9231 = vmatmul.msk.bf16.gmra.mxu2 %vm5110_vm1, %v4973_v51  ;;  %v3896_v0 = vadd.f32 %v3895_v55, %v2216_v54  ;;  %v1395_v54 = vunpack.c.l.b16 %v883_v44  ;;  %v1396_v55 = vunpack.c.l.b16 %v884_v45 }
 0x1ba   :  { %v10209_v57 = vpop.f32.mrf.mxu3  ;;  %8964 = vmatmul.msk.bf16.gmra.mxu0 %vm1727_vm0, %v1620_v62  ;;  %v3076_v59 = vunpack.c.l.b16 %v372_v49 }
 0x1bb   :  { %v6821_v7 = vunpack.c.l.b16 %v6419_v56  ;;  %9096 = vmatmul.msk.bf16.gmra.mxu1 %vm1727_vm0, %v3300_v53  ;;  %v4481_v10 = vadd.f32 %v10138_v43, %v3896_v0  ;;  %v1622_v0 = vpack.c.b16 %v1396_v55, %v1395_v54 }
 0x1bc   :  { %v5554_v15 = vpop.f32.mrf.mxu2  ;;  %6987 = vmatpush.bf16.msra.mxu3 %v9963_v21 }
 0x1bd   :  { %v6827_v1 = vpack.c.b16 %v6821_v7, %v6820_v58  ;;  %v5555_v4 = vadd.f32 %v9992_v47, %v5554_v15  ;;  %v4737_v22 = vmax.f32 %v4481_v10, 0.0  ;;  %v3075_v7 = vunpack.c.l.b16 %v371_v48 }
 0x1bf   :  { %9366 = vmatmul.msk.bf16.gmra.mxu3 %vm5110_vm1, %v6827_v1  ;;  %v2218_v8 = vpop.f32.mrf.mxu0  ;;  %v6164_v21 = vmax.f32 %v5555_v4, 0.0  ;;  %v3302_v4 = vpack.c.b16 %v3076_v59, %v3075_v7  ;;  %v119_v7 = vld [vmem:[%s13713_s0 + $0x1f0] sm:$0xff] }
 0x1c0   :  { %v3897_v9 = vpop.f32.mrf.mxu1 }
 0x1c1   :  { %v3898_v12 = vadd.f32 %v3897_v9, %v2218_v8  ;;  %v6420_v26 = vpack.c.bf16 %v6164_v21, %v6164_v21 }
 0x1c2   :  { %v10229_v13 = vpop.f32.mrf.mxu3 }
 0x1c3   :  { %v4482_v17 = vadd.f32 %v10138_v43, %v3898_v12  ;;  %v6822_v33 = vunpack.c.l.b16 %v6420_v26  ;;  %v374_v26 = vpack.c.bf16 %v118_v18, %v118_v18 }
 0x1c4   :  { %v5556_v20 = vpop.f32.mrf.mxu2 }
 0x1c5   :  { %v4738_v23 = vmax.f32 %v4482_v17, 0.0  ;;  %v5557_v24 = vadd.f32 %v9992_v47, %v5556_v20  ;;  %v117_v17 = vld [vmem:[%s13713_s0 + $0x1e0] sm:$0xff] }
 0x1c7   :  { %v4974_v27 = vpack.c.bf16 %v4738_v23, %v4737_v22  ;;  %v6165_v11 = vmax.f32 %v5557_v24, 0.0  ;;  %v2221_v29 = vpop.f32.mrf.mxu0  ;;  %v885_v22 = vpack.c.bf16 %v629_v14, %v629_v14  ;;  %v886_v23 = vpack.c.bf16 %v630_v16, %v630_v16 }
 0x1c8   :  { %v3900_v30 = vpop.f32.mrf.mxu1 }
 0x1c9   :  { %v6421_v31 = vpack.c.bf16 %v6165_v11, %v6165_v11  ;;  %9232 = vmatmul.msk.bf16.gmra.mxu2 %vm5110_vm1, %v4974_v27  ;;  %v3901_v41 = vadd.f32 %v3900_v30, %v2221_v29 }
 0x1ca   :  { %v10234_v32 = vpop.f32.mrf.mxu3  ;;  %8965 = vmatmul.msk.bf16.gmra.mxu0 %vm1727_vm0, %v1621_v25  ;;  %v373_v25 = vpack.c.bf16 %v117_v17, %v117_v17 }
 0x1cb   :  { %v6823_v34 = vunpack.c.l.b16 %v6421_v31  ;;  %9097 = vmatmul.msk.bf16.gmra.mxu1 %vm1727_vm0, %v3301_v28  ;;  %v4483_v51 = vadd.f32 %v10138_v43, %v3901_v41  ;;  %v1397_v31 = vunpack.c.l.b16 %v885_v22  ;;  %v10283_v41 = vld [vmem:[%s13719_s6] ss:$0 sm:$0xff] }
 0x1cc   :  { %v5559_v38 = vpop.f32.mrf.mxu2  ;;  %v3077_v36 = vunpack.c.l.b16 %v373_v25 }
 0x1cd   :  { %v6828_v42 = vpack.c.b16 %v6823_v34, %v6822_v33  ;;  %v5560_v46 = vadd.f32 %v9992_v47, %v5559_v38  ;;  %v4739_v15 = vmax.f32 %v4483_v51, 0.0  ;;  %v1398_v33 = vunpack.c.l.b16 %v886_v23  ;;  %v10320_v23 = vld [vmem:[%s13720_s7 + $0x10] sm:$0xff] }
 0x1ce   :  { %v3078_v38 = vunpack.c.l.b16 %v374_v26 }
 0x1cf   :  { %9367 = vmatmul.msk.bf16.gmra.mxu3 %vm5110_vm1, %v6828_v42  ;;  %v2223_v62 = vpop.f32.mrf.mxu0  ;;  %v6166_v56 = vmax.f32 %v5560_v46, 0.0  ;;  %v1623_v44 = vpack.c.b16 %v1398_v33, %v1397_v31 }
 0x1d0   :  { %v3902_v50 = vpop.f32.mrf.mxu1  ;;  %v3303_v49 = vpack.c.b16 %v3078_v38, %v3077_v36 }
 0x1d1   :  { %v3903_v52 = vadd.f32 %v3902_v50, %v2223_v62  ;;  %v6422_v1 = vpack.c.bf16 %v6166_v56, %v6166_v56  ;;  %v631_v56 = vld [vmem:[%s13714_s1 + $0x1f0] sm:$0xff] }
 0x1d2   :  { %v10253_v53 = vpop.f32.mrf.mxu3 }
 0x1d3   :  { %v4484_v58 = vadd.f32 %v10138_v43, %v3903_v52  ;;  %v6824_v10 = vunpack.c.l.b16 %v6422_v1  ;;  %v375_v1 = vpack.c.bf16 %v119_v7, %v119_v7 }
 0x1d4   :  { %v5561_v60 = vpop.f32.mrf.mxu2 }
 0x1d5   :  { %v4740_v61 = vmax.f32 %v4484_v58, 0.0  ;;  %v5562_v63 = vadd.f32 %v9992_v47, %v5561_v60  ;;  %v632_v58 = vld [vmem:[%s13714_s1 + $0x1f8] sm:$0xff] }
 0x1d6   :  { %v120_v60 = vld [vmem:[%s13713_s0 + $0x1f8] sm:$0xff] }
 0x1d7   :  { %v4975_v2 = vpack.c.bf16 %v4740_v61, %v4739_v15  ;;  %v6167_v3 = vmax.f32 %v5562_v63, 0.0  ;;  %v2226_v5 = vpop.f32.mrf.mxu0  ;;  %v887_v63 = vpack.c.bf16 %v631_v56, %v631_v56 }
 0x1d8   :  { %v3905_v6 = vpop.f32.mrf.mxu1 }
 0x1d9   :  { %v6423_v8 = vpack.c.bf16 %v6167_v3, %v6167_v3  ;;  %9233 = vmatmul.msk.bf16.gmra.mxu2 %vm5110_vm1, %v4975_v2  ;;  %v3906_v19 = vadd.f32 %v3905_v6, %v2226_v5  ;;  %v376_v3 = vpack.c.bf16 %v120_v60, %v120_v60  ;;  %v10308_v6 = vld [vmem:[%s13720_s7 + $0x18] sm:$0xff]  ;;  %v1399_v14 = vunpack.c.l.b16 %v887_v63 }
 0x1da   :  { %v10258_v9 = vpop.f32.mrf.mxu3  ;;  %8966 = vmatmul.msk.bf16.gmra.mxu0 %vm1727_vm0, %v1622_v0  ;;  %v888_v0 = vpack.c.bf16 %v632_v58, %v632_v58 }
 0x1db   :  { %v6825_v12 = vunpack.c.l.b16 %v6423_v8  ;;  %9098 = vmatmul.msk.bf16.gmra.mxu1 %vm1727_vm0, %v3302_v4  ;;  %v4485_v28 = vadd.f32 %v10138_v43, %v3906_v19 }
 0x1dc   :  { %v5564_v21 = vpop.f32.mrf.mxu2  ;;  %v1400_v16 = vunpack.c.l.b16 %v888_v0 }
 0x1dd   :  { %v6829_v20 = vpack.c.b16 %v6825_v12, %v6824_v10  ;;  %v5565_v24 = vadd.f32 %v9992_v47, %v5564_v21  ;;  %v4741_v47 = vmax.f32 %v4485_v28, 0.0  ;;  %v3079_v21 = vunpack.c.l.b16 %v375_v1 }
 0x1df   :  { %9368 = vmatmul.msk.bf16.gmra.mxu3 %vm5110_vm1, %v6829_v20  ;;  %v2228_v27 = vpop.f32.mrf.mxu0  ;;  %v6168_v34 = vmax.f32 %v5565_v24, 0.0  ;;  %v3080_v20 = vunpack.c.l.b16 %v376_v3 }
 0x1e0   :  { %v3907_v11 = vpop.f32.mrf.mxu1 }
 0x1e1   :  { %v3908_v29 = vadd.f32 %v3907_v11, %v2228_v27  ;;  %v6424_v45 = vpack.c.bf16 %v6168_v34, %v6168_v34  ;;  %v1624_v27 = vpack.c.b16 %v1400_v16, %v1399_v14  ;;  %v3304_v31 = vpack.c.b16 %v3080_v20, %v3079_v21 }
 0x1e2   :  { %v10277_v30 = vpop.f32.mrf.mxu3 }
 0x1e3   :  { %v4486_v35 = vadd.f32 %v10138_v43, %v3908_v29  ;;  %v6887_v54 = vunpack.c.l.b16 %v6424_v45  ;;  %v121_v45 = vld [vmem:[%s13713_s0 + $0x200] sm:$0xff] }
 0x1e4   :  { %v5566_v39 = vpop.f32.mrf.mxu2 }
 0x1e5   :  { %v4742_v40 = vmax.f32 %v4486_v35, 0.0  ;;  %v5567_v42 = vadd.f32 %v10283_v41, %v5566_v39  ;;  %v10327_v35 = vld [vmem:[%s13720_s7 + $0x8] sm:$0xff] }
 0x1e7   :  { %v4976_v46 = vpack.c.bf16 %v4742_v40, %v4741_v47  ;;  %v6169_v48 = vmax.f32 %v5567_v42, 0.0  ;;  %v2231_v62 = vpop.f32.mrf.mxu0  ;;  %v633_v42 = vld [vmem:[%s13714_s1 + $0x200] sm:$0xff] }
 0x1e8   :  { %v3910_v50 = vpop.f32.mrf.mxu1 }
 0x1e9   :  { %v6425_v51 = vpack.c.bf16 %v6169_v48, %v6169_v48  ;;  %9234 = vmatmul.msk.bf16.gmra.mxu2 %vm5110_vm1, %v4976_v46  ;;  %v3911_v61 = vadd.f32 %v3910_v50, %v2231_v62  ;;  %v122_v48 = vld [vmem:[%s13713_s0 + $0x208] sm:$0xff] }
 0x1ea   :  { %v10287_v52 = vpop.f32.mrf.mxu3  ;;  %8967 = vmatmul.msk.bf16.gmra.mxu0 %vm1727_vm0, %v1623_v44  ;;  %v634_v44 = vld [vmem:[%s13714_s1 + $0x208] sm:$0xff]  ;;  %v378_v58 = vpack.c.bf16 %v122_v48, %v122_v48 }
 0x1eb   :  { %v6888_v55 = vunpack.c.l.b16 %v6425_v51  ;;  %9099 = vmatmul.msk.bf16.gmra.mxu1 %vm1727_vm0, %v3303_v49  ;;  %v4487_v8 = vadd.f32 %v10138_v43, %v3911_v61  ;;  %v10352_v49 = vld [vmem:[%s13720_s7] sm:$0xff]  ;;  %v889_v51 = vpack.c.bf16 %v633_v42, %v633_v42 }
 0x1ec   :  { %v5569_v59 = vpop.f32.mrf.mxu2 }
 0x1ed   :  { %v6895_v15 = vpack.c.b16 %v6888_v55, %v6887_v54  ;;  %v5570_v2 = vadd.f32 %v10283_v41, %v5569_v59  ;;  %v4743_v24 = vmax.f32 %v4487_v8, 0.0  ;;  %v890_v54 = vpack.c.bf16 %v634_v44, %v634_v44 }
 0x1ee   :  { %v377_v55 = vpack.c.bf16 %v121_v45, %v121_v45  ;;  %v1401_v63 = vunpack.c.l.b16 %v889_v51 }
 0x1ef   :  { %9369 = vmatmul.msk.bf16.vlgmr.msrb.gmra.mxu3 %vm5110_vm1, %v6895_v15  ;;  %v2233_v4 = vpop.f32.mrf.mxu0  ;;  %v6170_v17 = vmax.f32 %v5570_v2, 0.0  ;;  %v1402_v0 = vunpack.c.l.b16 %v890_v54 }
 0x1f0   :  { %v3912_v5 = vpop.f32.mrf.mxu1  ;;  %7053 = vmatpush.bf16.msrb.mxu3 %v10308_v6  ;;  %v3081_v1 = vunpack.c.l.b16 %v377_v55 }
 0x1f1   :  { %v3913_v10 = vadd.f32 %v3912_v5, %v2233_v4  ;;  %v6426_v11 = vpack.c.bf16 %v6170_v17, %v6170_v17  ;;  %v3082_v5 = vunpack.c.l.b16 %v378_v58  ;;  %v1625_v21 = vpack.c.b16 %v1402_v0, %v1401_v63 }
 0x1f2   :  { %v10312_v12 = vpop.f32.mrf.mxu3 }
 0x1f3   :  { %v4488_v18 = vadd.f32 %v10138_v43, %v3913_v10  ;;  %v6802_v19 = vmax.f32 %v10202_v37, %v10312_v12  ;;  %v6889_v39 = vunpack.c.l.b16 %v6426_v11 }
 0x1f4   :  { %v5571_v22 = vpop.f32.mrf.mxu2  ;;  %7054 = vmatpush.bf16.msrb.mxu3 %v10320_v23 }
 0x1f5   :  { %v4744_v25 = vmax.f32 %v4488_v18, 0.0  ;;  %v5572_v26 = vadd.f32 %v10283_v41, %v5571_v22  ;;  %v3305_v22 = vpack.c.b16 %v3082_v5, %v3081_v1 }
 0x1f7   :  { %v4977_v28 = vpack.c.bf16 %v4744_v25, %v4743_v24  ;;  %v6171_v29 = vmax.f32 %v5572_v26, 0.0  ;;  %v2236_v33 = vpop.f32.mrf.mxu0 }
 0x1f8   :  { %v3915_v34 = vpop.f32.mrf.mxu1  ;;  %7055 = vmatpush.bf16.msrb.mxu3 %v10327_v35 }
 0x1f9   :  { %v6427_v36 = vpack.c.bf16 %v6171_v29, %v6171_v29  ;;  %9235 = vmatmul.msk.bf16.gmra.mxu2 %vm5110_vm1, %v4977_v28  ;;  %v3916_v50 = vadd.f32 %v3915_v34, %v2236_v33  ;;  %v636_v33 = vld [vmem:[%s13714_s1 + $0x218] sm:$0xff]  ;;  %v123_v34 = vld [vmem:[%s13713_s0 + $0x210] sm:$0xff] }
 0x1fa   :  { %v10331_v38 = vpop.f32.mrf.mxu3  ;;  %8968 = vmatmul.msk.bf16.gmra.mxu0 %vm1727_vm0, %v1624_v27  ;;  %v892_v45 = vpack.c.bf16 %v636_v33, %v636_v33 }
 0x1fb   :  { %v6890_v47 = vunpack.c.l.b16 %v6427_v36  ;;  %v6803_v40 = vmax.f32 %v10209_v57, %v10331_v38  ;;  %9100 = vmatmul.msk.bf16.gmra.mxu1 %vm1727_vm0, %v3304_v31  ;;  %v4489_v60 = vadd.f32 %v10138_v43, %v3916_v50  ;;  %v635_v31 = vld [vmem:[%s13714_s1 + $0x210] sm:$0xff]  ;;  %v130_v57 = vld [vmem:[%s13713_s0 + $0x248] sm:$0xff] }
 0x1fc   :  { %v5574_v46 = vpop.f32.mrf.mxu2  ;;  %7056 = vmatpush.bf16.msrb.mxu3 %v10352_v49  ;;  %v891_v44 = vpack.c.bf16 %v635_v31, %v635_v31  ;;  %v125_v31 = vld [vmem:[%s13713_s0 + $0x220] sm:$0xff] }
 0x1fd   :  { %v6896_v62 = vpack.c.b16 %v6890_v47, %v6889_v39  ;;  %v5575_v56 = vadd.f32 %v10283_v41, %v5574_v46  ;;  %v4745_v10 = vmax.f32 %v4489_v60, 0.0  ;;  %v124_v39 = vld [vmem:[%s13713_s0 + $0x218] sm:$0xff]  ;;  %v379_v46 = vpack.c.bf16 %v123_v34, %v123_v34  ;;  %v126_v34 = vld [vmem:[%s13713_s0 + $0x228] sm:$0xff] }
 0x1fe   :  { %v1403_v58 = vunpack.c.l.b16 %v891_v44  ;;  %v381_v44 = vpack.c.bf16 %v125_v31, %v125_v31  ;;  %v639_v31 = vld [vmem:[%s13714_s1 + $0x230] sm:$0xff] }
 0x1ff   :  { %9370 = vmatmul.msk.bf16.gmra.mxu3 %vm5110_vm1, %v6896_v62  ;;  %v2238_v7 = vpop.f32.mrf.mxu0  ;;  %v6172_v2 = vmax.f32 %v5575_v56, 0.0  ;;  %v380_v62 = vpack.c.bf16 %v124_v39, %v124_v39 }
 0x200   :  { %v3917_v59 = vpop.f32.mrf.mxu1 }
 0x201   :  { %v3918_v15 = vadd.f32 %v3917_v59, %v2238_v7  ;;  %v6428_v17 = vpack.c.bf16 %v6172_v2, %v6172_v2  ;;  %v1404_v7 = vunpack.c.l.b16 %v892_v45  ;;  %v3083_v59 = vunpack.c.l.b16 %v379_v46 }
 0x202   :  { %v10358_v61 = vpop.f32.mrf.mxu3  ;;  %v3084_v0 = vunpack.c.l.b16 %v380_v62  ;;  %v382_v46 = vpack.c.bf16 %v126_v34, %v126_v34  ;;  %v127_v34 = vld [vmem:[%s13713_s0 + $0x230] sm:$0xff] }
 0x203   :  { %v4490_v3 = vadd.f32 %v10138_v43, %v3918_v15  ;;  %v6804_v4 = vmax.f32 %v10229_v13, %v10358_v61  ;;  %v6891_v11 = vunpack.c.l.b16 %v6428_v17 }
 0x204   :  { %v5576_v8 = vpop.f32.mrf.mxu2 }
 0x205   :  { %v4746_v14 = vmax.f32 %v4490_v3, 0.0  ;;  %v5577_v16 = vadd.f32 %v10283_v41, %v5576_v8  ;;  %v1626_v8 = vpack.c.b16 %v1404_v7, %v1403_v58  ;;  %v3085_v7 = vunpack.c.l.b16 %v381_v44 }
 0x206   :  { %v895_v44 = vpack.c.bf16 %v639_v31, %v639_v31 }
 0x207   :  { %v4978_v18 = vpack.c.bf16 %v4746_v14, %v4745_v10  ;;  %v6173_v20 = vmax.f32 %v5577_v16, 0.0  ;;  %v2241_v24 = vpop.f32.mrf.mxu0 }
 0x208   :  { %v3920_v25 = vpop.f32.mrf.mxu1 }
 0x209   :  { %v6429_v26 = vpack.c.bf16 %v6173_v20, %v6173_v20  ;;  %9236 = vmatmul.msk.bf16.gmra.mxu2 %vm5110_vm1, %v4978_v18  ;;  %v3921_v42 = vadd.f32 %v3920_v25, %v2241_v24 }
 0x20a   :  { %v10365_v27 = vpop.f32.mrf.mxu3  ;;  %8969 = vmatmul.msk.bf16.gmra.mxu0 %vm1727_vm0, %v1625_v21  ;;  %v3306_v21 = vpack.c.b16 %v3084_v0, %v3083_v59  ;;  %v3086_v0 = vunpack.c.l.b16 %v382_v46  ;;  %v383_v46 = vpack.c.bf16 %v127_v34, %v127_v34  ;;  %v641_v34 = vld [vmem:[%s13714_s1 + $0x240] sm:$0xff] }
 0x20b   :  { %v6892_v28 = vunpack.c.l.b16 %v6429_v26  ;;  %v6805_v29 = vmax.f32 %v10234_v32, %v10365_v27  ;;  %9101 = vmatmul.msk.bf16.gmra.mxu1 %vm1727_vm0, %v3305_v22  ;;  %v4491_v54 = vadd.f32 %v10138_v43, %v3921_v42  ;;  %v132_v32 = vld [vmem:[%s13713_s0 + $0x258] sm:$0xff] }
 0x20c   :  { %v5579_v36 = vpop.f32.mrf.mxu2 }
 0x20d   :  { %v6897_v47 = vpack.c.b16 %v6892_v28, %v6891_v11  ;;  %v5580_v48 = vadd.f32 %v10283_v41, %v5579_v36  ;;  %v4747_v2 = vmax.f32 %v4491_v54, 0.0  ;;  %v637_v11 = vld [vmem:[%s13714_s1 + $0x220] sm:$0xff]  ;;  %v638_v28 = vld [vmem:[%s13714_s1 + $0x228] sm:$0xff] }
 0x20e   :  { %v894_v42 = vpack.c.bf16 %v638_v28, %v638_v28 }
 0x20f   :  { %9371 = vmatmul.msk.bf16.gmra.mxu3 %vm5110_vm1, %v6897_v47  ;;  %v2243_v50 = vpop.f32.mrf.mxu0  ;;  %v6174_v60 = vmax.f32 %v5580_v48, 0.0  ;;  %v893_v47 = vpack.c.bf16 %v637_v11, %v637_v11 }
 0x210   :  { %v3922_v51 = vpop.f32.mrf.mxu1  ;;  %v1406_v58 = vunpack.c.l.b16 %v894_v42 }
 0x211   :  { %v3923_v55 = vadd.f32 %v3922_v51, %v2243_v50  ;;  %v6430_v10 = vpack.c.bf16 %v6174_v60, %v6174_v60 }
 0x212   :  { %v10386_v56 = vpop.f32.mrf.mxu3 }
 0x213   :  { %v4492_v15 = vadd.f32 %v10138_v43, %v3923_v55  ;;  %v6806_v63 = vmax.f32 %v10253_v53, %v10386_v56  ;;  %v6893_v24 = vunpack.c.l.b16 %v6430_v10  ;;  %v1405_v55 = vunpack.c.l.b16 %v893_v47 }
 0x214   :  { %v5581_v1 = vpop.f32.mrf.mxu2 }
 0x215   :  { %v4748_v3 = vmax.f32 %v4492_v15, 0.0  ;;  %v5582_v5 = vadd.f32 %v10283_v41, %v5581_v1 }
 0x217   :  { %v4979_v14 = vpack.c.bf16 %v4748_v3, %v4747_v2  ;;  %v6175_v16 = vmax.f32 %v5582_v5, 0.0  ;;  %v2246_v17 = vpop.f32.mrf.mxu0 }
 0x218   :  { %v3925_v18 = vpop.f32.mrf.mxu1 }
 0x219   :  { %v6431_v20 = vpack.c.bf16 %v6175_v16, %v6175_v16  ;;  %9237 = vmatmul.msk.bf16.gmra.mxu2 %vm5110_vm1, %v4979_v14  ;;  %v3926_v39 = vadd.f32 %v3925_v18, %v2246_v17 }
 0x21a   :  { %v10393_v22 = vpop.f32.mrf.mxu3  ;;  %8970 = vmatmul.msk.bf16.gmra.mxu0 %vm1727_vm0, %v1626_v8  ;;  %v1627_v8 = vpack.c.b16 %v1406_v58, %v1405_v55 }
 0x21b   :  { %v6894_v25 = vunpack.c.l.b16 %v6431_v20  ;;  %v6807_v26 = vmax.f32 %v10258_v9, %v10393_v22  ;;  %9102 = vmatmul.msk.bf16.gmra.mxu1 %vm1727_vm0, %v3306_v21  ;;  %v4493_v50 = vadd.f32 %v10138_v43, %v3926_v39  ;;  %v3307_v21 = vpack.c.b16 %v3086_v0, %v3085_v7  ;;  %v128_v39 = vld [vmem:[%s13713_s0 + $0x238] sm:$0xff]  ;;  %v134_v9 = vld [vmem:[%s13713_s0 + $0x268] sm:$0xff] }
 0x21c   :  { %v5584_v33 = vpop.f32.mrf.mxu2  ;;  %v3087_v0 = vunpack.c.l.b16 %v383_v46 }
 0x21d   :  { %v6898_v36 = vpack.c.b16 %v6894_v25, %v6893_v24  ;;  %v5585_v45 = vadd.f32 %v10283_v41, %v5584_v33  ;;  %v4749_v2 = vmax.f32 %v4493_v50, 0.0  ;;  %v640_v33 = vld [vmem:[%s13714_s1 + $0x238] sm:$0xff] }
 0x21f   :  { %9372 = vmatmul.msk.bf16.gmra.mxu3 %vm5110_vm1, %v6898_v36  ;;  %v2248_v48 = vpop.f32.mrf.mxu0  ;;  %v6176_v59 = vmax.f32 %v5585_v45, 0.0  ;;  %v896_v45 = vpack.c.bf16 %v640_v33, %v640_v33 }
 0x220   :  { %v3927_v62 = vpop.f32.mrf.mxu1 }
 0x221   :  { %v3928_v51 = vadd.f32 %v3927_v62, %v2248_v48  ;;  %v6432_v10 = vpack.c.bf16 %v6176_v59, %v6176_v59  ;;  %v384_v62 = vpack.c.bf16 %v128_v39, %v128_v39  ;;  %v1407_v59 = vunpack.c.l.b16 %v895_v44  ;;  %v129_v39 = vld [vmem:[%s13713_s0 + $0x240] sm:$0xff] }
 0x222   :  { %v10414_v54 = vpop.f32.mrf.mxu3 }
 0x223   :  { %v4494_v60 = vadd.f32 %v10138_v43, %v3928_v51  ;;  %v6808_v15 = vmax.f32 %v10277_v30, %v10414_v54  ;;  %v6956_v25 = vunpack.c.l.b16 %v6432_v10 }
 0x224   :  { %v5586_v1 = vpop.f32.mrf.mxu2 }
 0x225   :  { %v4750_v3 = vmax.f32 %v4494_v60, 0.0  ;;  %v5587_v5 = vadd.f32 %v10283_v41, %v5586_v1  ;;  %v1408_v60 = vunpack.c.l.b16 %v896_v45  ;;  %v385_v45 = vpack.c.bf16 %v129_v39, %v129_v39 }
 0x227   :  { %v4980_v14 = vpack.c.bf16 %v4750_v3, %v4749_v2  ;;  %v6177_v16 = vmax.f32 %v5587_v5, 0.0  ;;  %v2251_v17 = vpop.f32.mrf.mxu0  ;;  %v3088_v5 = vunpack.c.l.b16 %v384_v62 }
 0x228   :  { %v3930_v18 = vpop.f32.mrf.mxu1 }
 0x229   :  { %v6433_v20 = vpack.c.bf16 %v6177_v16, %v6177_v16  ;;  %9238 = vmatmul.msk.bf16.gmra.mxu2 %vm5110_vm1, %v4980_v14  ;;  %v3931_v42 = vadd.f32 %v3930_v18, %v2251_v17 }
 0x22a   :  { %v10421_v24 = vpop.f32.mrf.mxu3  ;;  %8971 = vmatmul.msk.bf16.gmra.mxu0 %vm1727_vm0, %v1627_v8 }
 0x22b   :  { %v6957_v11 = vunpack.c.l.b16 %v6433_v20  ;;  %v6809_v28 = vmax.f32 %v10287_v52, %v10421_v24  ;;  %9103 = vmatmul.msk.bf16.gmra.mxu1 %vm1727_vm0, %v3307_v21  ;;  %v4495_v55 = vadd.f32 %v10138_v43, %v3931_v42  ;;  %v1628_v21 = vpack.c.b16 %v1408_v60, %v1407_v59  ;;  %v136_v52 = vld [vmem:[%s13713_s0 + $0x278] sm:$0xff] }
 0x22c   :  { %v5589_v36 = vpop.f32.mrf.mxu2  ;;  %v897_v42 = vpack.c.bf16 %v641_v34, %v641_v34  ;;  %v644_v34 = vld [vmem:[%s13714_s1 + $0x258] sm:$0xff] }
 0x22d   :  { %v6964_v47 = vpack.c.b16 %v6957_v11, %v6956_v25  ;;  %v5590_v48 = vadd.f32 %v10283_v41, %v5589_v36  ;;  %v4751_v10 = vmax.f32 %v4495_v55, 0.0  ;;  %v3308_v25 = vpack.c.b16 %v3088_v5, %v3087_v0  ;;  %v642_v36 = vld [vmem:[%s13714_s1 + $0x248] sm:$0xff] }
 0x22e   :  { %v898_v44 = vpack.c.bf16 %v642_v36, %v642_v36  ;;  %v1409_v59 = vunpack.c.l.b16 %v897_v42  ;;  %v3089_v0 = vunpack.c.l.b16 %v385_v45  ;;  %v131_v36 = vld [vmem:[%s13713_s0 + $0x250] sm:$0xff]  ;;  %v388_v42 = vpack.c.bf16 %v132_v32, %v132_v32 }
 0x22f   :  { %9373 = vmatmul.msk.bf16.vlgmr.msra.gmra.mxu3 %vm5110_vm1, %v6964_v47  ;;  %v2253_v50 = vpop.f32.mrf.mxu0  ;;  %v6178_v1 = vmax.f32 %v5590_v48, 0.0  ;;  %v386_v48 = vpack.c.bf16 %v130_v57, %v130_v57  ;;  %v900_v57 = vpack.c.bf16 %v644_v34, %v644_v34 }
 0x230   :  { %v3932_v51 = vpop.f32.mrf.mxu1  ;;  %7122 = vmatpush.bf16.msra.mxu3 %v10308_v6  ;;  %v1410_v60 = vunpack.c.l.b16 %v898_v44 }
 0x231   :  { %v3933_v58 = vadd.f32 %v3932_v51, %v2253_v50  ;;  %v6434_v17 = vpack.c.bf16 %v6178_v1, %v6178_v1  ;;  %v10478_v51 = vld [vmem:[%s13717_s4] ss:$0 sm:$0xff] }
 0x232   :  { %v6851_v7 = vpop.f32.mrf.mxu3 }
 0x233   :  { %v4496_v2 = vadd.f32 %v10138_v43, %v3933_v58  ;;  %v10447_v3 = vmax.f32 %v6802_v19, %v6851_v7  ;;  %v6958_v19 = vunpack.c.l.b16 %v6434_v17  ;;  %v1629_v17 = vpack.c.b16 %v1410_v60, %v1409_v59 }
 0x234   :  { %v5591_v8 = vpop.f32.mrf.mxu2  ;;  %7123 = vmatpush.bf16.msra.mxu3 %v10320_v23 }
 0x235   :  { %v4752_v14 = vmax.f32 %v4496_v2, 0.0  ;;  %v5592_v16 = vadd.f32 %v10283_v41, %v5591_v8  ;;  %v3090_v8 = vunpack.c.l.b16 %v386_v48 }
 0x237   :  { %v4981_v18 = vpack.c.bf16 %v4752_v14, %v4751_v10  ;;  %v6179_v20 = vmax.f32 %v5592_v16, 0.0  ;;  %v2256_v11 = vpop.f32.mrf.mxu0 }
 0x238   :  { %v3935_v43 = vpop.f32.mrf.mxu1  ;;  %7124 = vmatpush.bf16.msra.mxu3 %v10327_v35 }
 0x239   :  { %v6435_v37 = vpack.c.bf16 %v6179_v20, %v6179_v20  ;;  %9239 = vmatmul.msk.bf16.gmra.mxu2 %vm5110_vm1, %v4981_v18 }
 0x23a   :  { %v6853_v12 = vpop.f32.mrf.mxu3  ;;  %8972 = vmatmul.msk.bf16.gmra.mxu0 %vm1727_vm0, %v1628_v21 }
 0x23b   :  { %v6959_v31 = vunpack.c.l.b16 %v6435_v37  ;;  %v10456_v33 = vmax.f32 %v6803_v40, %v6853_v12  ;;  %9104 = vmatmul.msk.bf16.gmra.mxu1 %vm1727_vm0, %v3308_v25  ;;  %v3936_v40 = vadd.f32 %v3935_v43, %v2256_v11  ;;  %v3309_v11 = vpack.c.b16 %v3090_v8, %v3089_v0 }
 0x23c   :  { %v5594_v47 = vpop.f32.mrf.mxu2  ;;  %7125 = vmatpush.bf16.msra.mxu3 %v10352_v49  ;;  %v3092_v0 = vunpack.c.l.b16 %v388_v42 }
 0x23d   :  { %v6965_v38 = vpack.c.b16 %v6959_v31, %v6958_v19  ;;  %v5595_v46 = vadd.f32 %v10283_v41, %v5594_v47  ;;  %v4497_v55 = vadd.f32 %v10478_v51, %v3936_v40  ;;  %v643_v31 = vld [vmem:[%s13714_s1 + $0x250] sm:$0xff] }
 0x23e   :  { %v899_v47 = vpack.c.bf16 %v643_v31, %v643_v31 }
 0x23f   :  { %9374 = vmatmul.msk.bf16.gmra.mxu3 %vm5110_vm1, %v6965_v38  ;;  %v2258_v62 = vpop.f32.mrf.mxu0  ;;  %v6180_v1 = vmax.f32 %v5595_v46, 0.0  ;;  %v4753_v14 = vmax.f32 %v4497_v55, 0.0  ;;  %v387_v38 = vpack.c.bf16 %v131_v36, %v131_v36  ;;  %v1412_v55 = vunpack.c.l.b16 %v900_v57 }
 0x240   :  { %v3937_v50 = vpop.f32.mrf.mxu1 }
 0x241   :  { %v3938_v58 = vadd.f32 %v3937_v50, %v2258_v62  ;;  %v6436_v18 = vpack.c.bf16 %v6180_v1, %v6180_v1  ;;  %v1411_v50 = vunpack.c.l.b16 %v899_v47 }
 0x242   :  { %v6856_v7 = vpop.f32.mrf.mxu3 }
 0x243   :  { %v4498_v2 = vadd.f32 %v10478_v51, %v3938_v58  ;;  %v10485_v5 = vmax.f32 %v6804_v4, %v6856_v7  ;;  %v6960_v13 = vunpack.c.l.b16 %v6436_v18  ;;  %v3091_v58 = vunpack.c.l.b16 %v387_v38 }
 0x244   :  { %v5596_v10 = vpop.f32.mrf.mxu2 }
 0x245   :  { %v4754_v16 = vmax.f32 %v4498_v2, 0.0  ;;  %v5597_v21 = vadd.f32 %v10283_v41, %v5596_v10  ;;  %v3310_v18 = vpack.c.b16 %v3092_v0, %v3091_v58 }
 0x247   :  { %v4982_v20 = vpack.c.bf16 %v4754_v16, %v4753_v14  ;;  %v6181_v25 = vmax.f32 %v5597_v21, 0.0  ;;  %v2261_v43 = vpop.f32.mrf.mxu0  ;;  %v1630_v14 = vpack.c.b16 %v1412_v55, %v1411_v50 }
 0x248   :  { %v3940_v37 = vpop.f32.mrf.mxu1 }
 0x249   :  { %v6437_v12 = vpack.c.bf16 %v6181_v25, %v6181_v25  ;;  %9240 = vmatmul.msk.bf16.gmra.mxu2 %vm5110_vm1, %v4982_v20 }
 0x24a   :  { %v6858_v19 = vpop.f32.mrf.mxu3  ;;  %8973 = vmatmul.msk.bf16.gmra.mxu0 %vm1727_vm0, %v1629_v17 }
 0x24b   :  { %v6961_v61 = vunpack.c.l.b16 %v6437_v12  ;;  %v10492_v4 = vmax.f32 %v6805_v29, %v6858_v19  ;;  %9105 = vmatmul.msk.bf16.gmra.mxu1 %vm1727_vm0, %v3309_v11  ;;  %v3941_v29 = vadd.f32 %v3940_v37, %v2261_v43  ;;  %v645_v37 = vld [vmem:[%s13714_s1 + $0x260] sm:$0xff]  ;;  %v646_v12 = vld [vmem:[%s13714_s1 + $0x268] sm:$0xff] }
 0x24c   :  { %v5599_v39 = vpop.f32.mrf.mxu2  ;;  %v133_v19 = vld [vmem:[%s13713_s0 + $0x260] sm:$0xff]  ;;  %v902_v31 = vpack.c.bf16 %v646_v12, %v646_v12 }
 0x24d   :  { %v6966_v27 = vpack.c.b16 %v6961_v61, %v6960_v13  ;;  %v5600_v40 = vadd.f32 %v10283_v41, %v5599_v39  ;;  %v4499_v46 = vadd.f32 %v10478_v51, %v3941_v29  ;;  %v901_v61 = vpack.c.bf16 %v645_v37, %v645_v37 }
 0x24e   :  { %v389_v34 = vpack.c.bf16 %v133_v19, %v133_v19  ;;  %v390_v39 = vpack.c.bf16 %v134_v9, %v134_v9 }
 0x24f   :  { %9375 = vmatmul.msk.bf16.gmra.mxu3 %vm5110_vm1, %v6966_v27  ;;  %v2263_v44 = vpop.f32.mrf.mxu0  ;;  %v6182_v7 = vmax.f32 %v5600_v40, 0.0  ;;  %v4755_v2 = vmax.f32 %v4499_v46, 0.0  ;;  %v1413_v38 = vunpack.c.l.b16 %v901_v61  ;;  %v1414_v40 = vunpack.c.l.b16 %v902_v31 }
 0x250   :  { %v3942_v45 = vpop.f32.mrf.mxu1  ;;  %v3093_v42 = vunpack.c.l.b16 %v389_v34 }
 0x251   :  { %v3943_v48 = vadd.f32 %v3942_v45, %v2263_v44  ;;  %v6438_v16 = vpack.c.bf16 %v6182_v7, %v6182_v7  ;;  %v1631_v7 = vpack.c.b16 %v1414_v40, %v1413_v38 }
 0x252   :  { %v6861_v62 = vpop.f32.mrf.mxu3 }
 0x253   :  { %v4500_v59 = vadd.f32 %v10478_v51, %v3943_v48  ;;  %v10515_v60 = vmax.f32 %v6806_v63, %v6861_v62  ;;  %v6962_v53 = vunpack.c.l.b16 %v6438_v16  ;;  %v3094_v48 = vunpack.c.l.b16 %v390_v39 }
 0x254   :  { %v5601_v1 = vpop.f32.mrf.mxu2 }
 0x255   :  { %v4756_v8 = vmax.f32 %v4500_v59, 0.0  ;;  %v5602_v10 = vadd.f32 %v10283_v41, %v5601_v1 }
 0x257   :  { %v4983_v21 = vpack.c.bf16 %v4756_v8, %v4755_v2  ;;  %v6183_v17 = vmax.f32 %v5602_v10, 0.0  ;;  %v2266_v20 = vpop.f32.mrf.mxu0  ;;  %v3311_v2 = vpack.c.b16 %v3094_v48, %v3093_v42 }
 0x258   :  { %v3945_v25 = vpop.f32.mrf.mxu1 }
 0x259   :  { %v6439_v11 = vpack.c.bf16 %v6183_v17, %v6183_v17  ;;  %9241 = vmatmul.msk.bf16.gmra.mxu2 %vm5110_vm1, %v4983_v21  ;;  %v647_v21 = vld [vmem:[%s13714_s1 + $0x270] sm:$0xff]  ;;  %v648_v17 = vld [vmem:[%s13714_s1 + $0x278] sm:$0xff] }
 0x25a   :  { %v6863_v43 = vpop.f32.mrf.mxu3  ;;  %8974 = vmatmul.msk.bf16.gmra.mxu0 %vm1727_vm0, %v1630_v14 }
 0x25b   :  { %v6963_v56 = vunpack.c.l.b16 %v6439_v11  ;;  %v10522_v63 = vmax.f32 %v6807_v26, %v6863_v43  ;;  %9106 = vmatmul.msk.bf16.gmra.mxu1 %vm1727_vm0, %v3310_v18  ;;  %v3946_v26 = vadd.f32 %v3945_v25, %v2266_v20  ;;  %v135_v18 = vld [vmem:[%s13713_s0 + $0x270] sm:$0xff]  ;;  %v903_v25 = vpack.c.bf16 %v647_v21, %v647_v21 }
 0x25c   :  { %v5604_v13 = vpop.f32.mrf.mxu2  ;;  %v904_v11 = vpack.c.bf16 %v648_v17, %v648_v17  ;;  %v391_v43 = vpack.c.bf16 %v135_v18, %v135_v18 }
 0x25d   :  { %v6967_v22 = vpack.c.b16 %v6963_v56, %v6962_v53  ;;  %v5605_v36 = vadd.f32 %v10283_v41, %v5604_v13  ;;  %v4501_v29 = vadd.f32 %v10478_v51, %v3946_v26  ;;  %v392_v56 = vpack.c.bf16 %v136_v52, %v136_v52 }
 0x25e   :  { %v1416_v26 = vunpack.c.l.b16 %v904_v11  ;;  %v3095_v61 = vunpack.c.l.b16 %v391_v43 }
 0x25f   :  { %9376 = vmatmul.msk.bf16.gmra.mxu3 %vm5110_vm1, %v6967_v22  ;;  %v2268_v32 = vpop.f32.mrf.mxu0  ;;  %v6184_v44 = vmax.f32 %v5605_v36, 0.0  ;;  %v4757_v50 = vmax.f32 %v4501_v29, 0.0  ;;  %v1415_v22 = vunpack.c.l.b16 %v903_v25  ;;  %v3096_v39 = vunpack.c.l.b16 %v392_v56 }
 0x260   :  { %v3947_v27 = vpop.f32.mrf.mxu1 }
 0x261   :  { %v3948_v47 = vadd.f32 %v3947_v27, %v2268_v32  ;;  %v6440_v59 = vpack.c.bf16 %v6184_v44, %v6184_v44  ;;  %v3312_v42 = vpack.c.b16 %v3096_v39, %v3095_v61 }
 0x262   :  { %v6866_v57 = vpop.f32.mrf.mxu3 }
 0x263   :  { %v4502_v45 = vadd.f32 %v10478_v51, %v3948_v47  ;;  %v10545_v46 = vmax.f32 %v6808_v15, %v6866_v57  ;;  %v7025_v30 = vunpack.c.l.b16 %v6440_v59  ;;  %v1632_v47 = vpack.c.b16 %v1416_v26, %v1415_v22 }
 0x264   :  { %v5606_v62 = vpop.f32.mrf.mxu2 }
 0x265   :  { %v4758_v55 = vmax.f32 %v4502_v45, 0.0  ;;  %v5607_v58 = vadd.f32 %v10283_v41, %v5606_v62 }
 0x267   :  { %v4984_v0 = vpack.c.bf16 %v4758_v55, %v4757_v50  ;;  %v6185_v1 = vmax.f32 %v5607_v58, 0.0  ;;  %v2271_v8 = vpop.f32.mrf.mxu0  ;;  %v649_v58 = vld [vmem:[%s13714_s1 + $0x280] sm:$0xff] }
 0x268   :  { %v3950_v10 = vpop.f32.mrf.mxu1 }
 0x269   :  { %v6441_v14 = vpack.c.bf16 %v6185_v1, %v6185_v1  ;;  %9242 = vmatmul.msk.bf16.gmra.mxu2 %vm5110_vm1, %v4984_v0  ;;  %v138_v0 = vld [vmem:[%s13713_s0 + $0x288] sm:$0xff] }
 0x26a   :  { %v6868_v16 = vpop.f32.mrf.mxu3  ;;  %8975 = vmatmul.msk.bf16.gmra.mxu0 %vm1727_vm0, %v1631_v7  ;;  %v137_v7 = vld [vmem:[%s13713_s0 + $0x280] sm:$0xff] }
 0x26b   :  { %v7026_v54 = vunpack.c.l.b16 %v6441_v14  ;;  %v10552_v15 = vmax.f32 %v6809_v28, %v6868_v16  ;;  %9107 = vmatmul.msk.bf16.gmra.mxu1 %vm1727_vm0, %v3311_v2  ;;  %v3951_v28 = vadd.f32 %v3950_v10, %v2271_v8  ;;  %v905_v8 = vpack.c.bf16 %v649_v58, %v649_v58 }
 0x26c   :  { %v5609_v20 = vpop.f32.mrf.mxu2  ;;  %v393_v14 = vpack.c.bf16 %v137_v7, %v137_v7 }
 0x26d   :  { %v7033_v24 = vpack.c.b16 %v7026_v54, %v7025_v30  ;;  %v5610_v53 = vadd.f32 %v10283_v41, %v5609_v20  ;;  %v4503_v19 = vadd.f32 %v10478_v51, %v3951_v28  ;;  %v394_v30 = vpack.c.bf16 %v138_v0, %v138_v0 }
 0x26e   :  { %v1417_v52 = vunpack.c.l.b16 %v905_v8 }
 0x26f   :  { %9377 = vmatmul.msk.bf16.vlgmr.msrb.gmra.mxu3 %vm5110_vm1, %v7033_v24  ;;  %v2273_v37 = vpop.f32.mrf.mxu0  ;;  %v6186_v31 = vmax.f32 %v5610_v53, 0.0  ;;  %v4759_v27 = vmax.f32 %v4503_v19, 0.0  ;;  %v3098_v43 = vunpack.c.l.b16 %v394_v30 }
 0x270   :  { %v3952_v12 = vpop.f32.mrf.mxu1  ;;  %7191 = vmatpush.bf16.msrb.mxu3 %v10308_v6 }
 0x271   :  { %v3953_v13 = vadd.f32 %v3952_v12, %v2273_v37  ;;  %v6442_v57 = vpack.c.bf16 %v6186_v31, %v6186_v31 }
 0x272   :  { %v10572_v9 = vpop.f32.mrf.mxu3 }
 0x273   :  { %v4504_v34 = vadd.f32 %v10478_v51, %v3953_v13  ;;  %v6940_v36 = vmax.f32 %v10447_v3, %v10572_v9  ;;  %v7027_v50 = vunpack.c.l.b16 %v6442_v57  ;;  %v652_v57 = vld [vmem:[%s13714_s1 + $0x298] sm:$0xff] }
 0x274   :  { %v5611_v32 = vpop.f32.mrf.mxu2  ;;  %7192 = vmatpush.bf16.msrb.mxu3 %v10320_v23 }
 0x275   :  { %v4760_v6 = vmax.f32 %v4504_v34, 0.0  ;;  %v5612_v29 = vadd.f32 %v10283_v41, %v5611_v32 }
 0x277   :  { %v4985_v38 = vpack.c.bf16 %v4760_v6, %v4759_v27  ;;  %v6187_v40 = vmax.f32 %v5612_v29, 0.0  ;;  %v2276_v44 = vpop.f32.mrf.mxu0 }
 0x278   :  { %v3955_v45 = vpop.f32.mrf.mxu1  ;;  %7193 = vmatpush.bf16.msrb.mxu3 %v10327_v35  ;;  %v650_v35 = vld [vmem:[%s13714_s1 + $0x288] sm:$0xff] }
 0x279   :  { %v6443_v48 = vpack.c.bf16 %v6187_v40, %v6187_v40  ;;  %9243 = vmatmul.msk.bf16.gmra.mxu2 %vm5110_vm1, %v4985_v38  ;;  %v3956_v2 = vadd.f32 %v3955_v45, %v2276_v44  ;;  %v906_v10 = vpack.c.bf16 %v650_v35, %v650_v35  ;;  %v139_v38 = vld [vmem:[%s13713_s0 + $0x290] sm:$0xff] }
 0x27a   :  { %v10581_v62 = vpop.f32.mrf.mxu3  ;;  %8976 = vmatmul.msk.bf16.gmra.mxu0 %vm1727_vm0, %v1632_v47  ;;  %v651_v47 = vld [vmem:[%s13714_s1 + $0x290] sm:$0xff] }
 0x27b   :  { %v7028_v23 = vunpack.c.l.b16 %v6443_v48  ;;  %v6941_v55 = vmax.f32 %v10456_v33, %v10581_v62  ;;  %9108 = vmatmul.msk.bf16.gmra.mxu1 %vm1727_vm0, %v3312_v42  ;;  %v4505_v17 = vadd.f32 %v10478_v51, %v3956_v2  ;;  %v1418_v24 = vunpack.c.l.b16 %v906_v10  ;;  %v140_v42 = vld [vmem:[%s13713_s0 + $0x298] sm:$0xff]  ;;  %v146_v33 = vld [vmem:[%s13713_s0 + $0x2c8] sm:$0xff]  ;;  %v10740_v62 = vld [vmem:[%s13720_s7] sm:$0xff] }
 0x27c   :  { %v5614_v59 = vpop.f32.mrf.mxu2  ;;  %7194 = vmatpush.bf16.msrb.mxu3 %v10352_v49  ;;  %v3097_v49 = vunpack.c.l.b16 %v393_v14  ;;  %v907_v48 = vpack.c.bf16 %v651_v47, %v651_v47  ;;  %v396_v35 = vpack.c.bf16 %v140_v42, %v140_v42 }
 0x27d   :  { %v7034_v1 = vpack.c.b16 %v7028_v23, %v7027_v50  ;;  %v5615_v16 = vadd.f32 %v10283_v41, %v5614_v59  ;;  %v4761_v56 = vmax.f32 %v4505_v17, 0.0  ;;  %v1633_v19 = vpack.c.b16 %v1418_v24, %v1417_v52 }
 0x27e   :  { %v3313_v61 = vpack.c.b16 %v3098_v43, %v3097_v49  ;;  %v908_v50 = vpack.c.bf16 %v652_v57, %v652_v57  ;;  %v395_v23 = vpack.c.bf16 %v139_v38, %v139_v38  ;;  %v1419_v8 = vunpack.c.l.b16 %v907_v48 }
 0x27f   :  { %9378 = vmatmul.msk.bf16.gmra.mxu3 %vm5110_vm1, %v7034_v1  ;;  %v2278_v54 = vpop.f32.mrf.mxu0  ;;  %v6188_v28 = vmax.f32 %v5615_v16, 0.0 }
 0x280   :  { %v3957_v21 = vpop.f32.mrf.mxu1  ;;  %v1420_v10 = vunpack.c.l.b16 %v908_v50  ;;  %v3099_v14 = vunpack.c.l.b16 %v395_v23 }
 0x281   :  { %v3958_v18 = vadd.f32 %v3957_v21, %v2278_v54  ;;  %v6444_v13 = vpack.c.bf16 %v6188_v28, %v6188_v28  ;;  %v3100_v21 = vunpack.c.l.b16 %v396_v35 }
 0x282   :  { %v10603_v20 = vpop.f32.mrf.mxu3  ;;  %v1634_v49 = vpack.c.b16 %v1420_v10, %v1419_v8 }
 0x283   :  { %v4506_v25 = vadd.f32 %v10478_v51, %v3958_v18  ;;  %v6942_v11 = vmax.f32 %v10485_v5, %v10603_v20  ;;  %v7029_v27 = vunpack.c.l.b16 %v6444_v13 }
 0x284   :  { %v5616_v53 = vpop.f32.mrf.mxu2 }
 0x285   :  { %v4762_v37 = vmax.f32 %v4506_v25, 0.0  ;;  %v5617_v12 = vadd.f32 %v10283_v41, %v5616_v53  ;;  %v3314_v53 = vpack.c.b16 %v3100_v21, %v3099_v14 }
 0x287   :  { %v4986_v22 = vpack.c.bf16 %v4762_v37, %v4761_v56  ;;  %v6189_v26 = vmax.f32 %v5617_v12, 0.0  ;;  %v2281_v31 = vpop.f32.mrf.mxu0 }
 0x288   :  { %v3960_v34 = vpop.f32.mrf.mxu1 }
 0x289   :  { %v6445_v39 = vpack.c.bf16 %v6189_v26, %v6189_v26  ;;  %9244 = vmatmul.msk.bf16.gmra.mxu2 %vm5110_vm1, %v4986_v22  ;;  %v3961_v45 = vadd.f32 %v3960_v34, %v2281_v31  ;;  %v141_v31 = vld [vmem:[%s13713_s0 + $0x2a0] sm:$0xff] }
 0x28a   :  { %v10610_v32 = vpop.f32.mrf.mxu3  ;;  %8977 = vmatmul.msk.bf16.gmra.mxu0 %vm1727_vm0, %v1633_v19  ;;  %v397_v38 = vpack.c.bf16 %v141_v31, %v141_v31  ;;  %v144_v31 = vld [vmem:[%s13713_s0 + $0x2b8] sm:$0xff] }
 0x28b   :  { %v7030_v6 = vunpack.c.l.b16 %v6445_v39  ;;  %v6943_v29 = vmax.f32 %v10492_v4, %v10610_v32  ;;  %9109 = vmatmul.msk.bf16.gmra.mxu1 %vm1727_vm0, %v3313_v61  ;;  %v4507_v0 = vadd.f32 %v10478_v51, %v3961_v45  ;;  %v654_v61 = vld [vmem:[%s13714_s1 + $0x2a8] sm:$0xff]  ;;  %v148_v4 = vld [vmem:[%s13713_s0 + $0x2d8] sm:$0xff] }
 0x28c   :  { %v5619_v40 = vpop.f32.mrf.mxu2  ;;  %v142_v39 = vld [vmem:[%s13713_s0 + $0x2a8] sm:$0xff]  ;;  %v910_v57 = vpack.c.bf16 %v654_v61, %v654_v61 }
 0x28d   :  { %v7035_v44 = vpack.c.b16 %v7030_v6, %v7029_v27  ;;  %v5620_v58 = vadd.f32 %v10283_v41, %v5619_v40  ;;  %v4763_v18 = vmax.f32 %v4507_v0, 0.0  ;;  %v10659_v40 = vld [vmem:[%s13719_s6] ss:$0 sm:$0xff] }
 0x28f   :  { %9379 = vmatmul.msk.bf16.gmra.mxu3 %vm5110_vm1, %v7035_v44  ;;  %v2283_v7 = vpop.f32.mrf.mxu0  ;;  %v6190_v16 = vmax.f32 %v5620_v58, 0.0  ;;  %v398_v44 = vpack.c.bf16 %v142_v39, %v142_v39 }
 0x290   :  { %v3962_v59 = vpop.f32.mrf.mxu1 }
 0x291   :  { %v3963_v1 = vadd.f32 %v3962_v59, %v2283_v7  ;;  %v6446_v28 = vpack.c.bf16 %v6190_v16, %v6190_v16  ;;  %v1422_v7 = vunpack.c.l.b16 %v910_v57  ;;  %v3101_v59 = vunpack.c.l.b16 %v397_v38 }
 0x292   :  { %v10631_v2 = vpop.f32.mrf.mxu3  ;;  %v3102_v10 = vunpack.c.l.b16 %v398_v44  ;;  %v400_v38 = vpack.c.bf16 %v144_v31, %v144_v31  ;;  %v145_v31 = vld [vmem:[%s13713_s0 + $0x2c0] sm:$0xff] }
 0x293   :  { %v4508_v30 = vadd.f32 %v10478_v51, %v3963_v1  ;;  %v6944_v54 = vmax.f32 %v10515_v60, %v10631_v2  ;;  %v7031_v13 = vunpack.c.l.b16 %v6446_v28 }
 0x294   :  { %v5621_v17 = vpop.f32.mrf.mxu2 }
 0x295   :  { %v4764_v52 = vmax.f32 %v4508_v30, 0.0  ;;  %v5622_v24 = vadd.f32 %v10283_v41, %v5621_v17  ;;  %v653_v41 = vld [vmem:[%s13714_s1 + $0x2a0] sm:$0xff] }
 0x296   :  { %v909_v47 = vpack.c.bf16 %v653_v41, %v653_v41  ;;  %v143_v41 = vld [vmem:[%s13713_s0 + $0x2b0] sm:$0xff] }
 0x297   :  { %v4987_v25 = vpack.c.bf16 %v4764_v52, %v4763_v18  ;;  %v6191_v43 = vmax.f32 %v5622_v24, 0.0  ;;  %v2286_v56 = vpop.f32.mrf.mxu0 }
 0x298   :  { %v3965_v37 = vpop.f32.mrf.mxu1  ;;  %v1421_v35 = vunpack.c.l.b16 %v909_v47  ;;  %v399_v47 = vpack.c.bf16 %v143_v41, %v143_v41  ;;  %v657_v41 = vld [vmem:[%s13714_s1 + $0x2c0] sm:$0xff] }
 0x299   :  { %v6447_v12 = vpack.c.bf16 %v6191_v43, %v6191_v43  ;;  %9245 = vmatmul.msk.bf16.gmra.mxu2 %vm5110_vm1, %v4987_v25  ;;  %v3966_v6 = vadd.f32 %v3965_v37, %v2286_v56 }
 0x29a   :  { %v10638_v19 = vpop.f32.mrf.mxu3  ;;  %8978 = vmatmul.msk.bf16.gmra.mxu0 %vm1727_vm0, %v1634_v49  ;;  %v1635_v17 = vpack.c.b16 %v1422_v7, %v1421_v35  ;;  %v3315_v49 = vpack.c.b16 %v3102_v10, %v3101_v59  ;;  %v3103_v59 = vunpack.c.l.b16 %v399_v47  ;;  %v401_v47 = vpack.c.bf16 %v145_v31, %v145_v31 }
 0x29b   :  { %v7032_v22 = vunpack.c.l.b16 %v6447_v12  ;;  %v6945_v26 = vmax.f32 %v10522_v63, %v10638_v19  ;;  %9110 = vmatmul.msk.bf16.gmra.mxu1 %vm1727_vm0, %v3314_v53  ;;  %v4509_v50 = vadd.f32 %v10478_v51, %v3966_v6  ;;  %v150_v63 = vld [vmem:[%s13713_s0 + $0x2e8] sm:$0xff] }
 0x29c   :  { %v5624_v34 = vpop.f32.mrf.mxu2 }
 0x29d   :  { %v7036_v27 = vpack.c.b16 %v7032_v22, %v7031_v13  ;;  %v5625_v42 = vadd.f32 %v10659_v40, %v5624_v34  ;;  %v4765_v16 = vmax.f32 %v4509_v50, 0.0  ;;  %v655_v13 = vld [vmem:[%s13714_s1 + $0x2b0] sm:$0xff]  ;;  %v656_v22 = vld [vmem:[%s13714_s1 + $0x2b8] sm:$0xff] }
 0x29e   :  { %v912_v6 = vpack.c.bf16 %v656_v22, %v656_v22 }
 0x29f   :  { %9380 = vmatmul.msk.bf16.gmra.mxu3 %vm5110_vm1, %v7036_v27  ;;  %v2288_v45 = vpop.f32.mrf.mxu0  ;;  %v6192_v0 = vmax.f32 %v5625_v42, 0.0  ;;  %v911_v27 = vpack.c.bf16 %v655_v13, %v655_v13 }
 0x2a0   :  { %v3967_v48 = vpop.f32.mrf.mxu1  ;;  %v1424_v7 = vunpack.c.l.b16 %v912_v6 }
 0x2a1   :  { %v3968_v23 = vadd.f32 %v3967_v48, %v2288_v45  ;;  %v6448_v18 = vpack.c.bf16 %v6192_v0, %v6192_v0  ;;  %v10694_v45 = vld [vmem:[%s13720_s7 + $0x18] sm:$0xff]  ;;  %v1423_v35 = vunpack.c.l.b16 %v911_v27  ;;  %v913_v27 = vpack.c.bf16 %v657_v41, %v657_v41 }
 0x2a2   :  { %v10664_v58 = vpop.f32.mrf.mxu3  ;;  %v660_v41 = vld [vmem:[%s13714_s1 + $0x2d8] sm:$0xff] }
 0x2a3   :  { %v4510_v1 = vadd.f32 %v10478_v51, %v3968_v23  ;;  %v6946_v8 = vmax.f32 %v10545_v46, %v10664_v58  ;;  %v7094_v56 = vunpack.c.l.b16 %v6448_v18 }
 0x2a4   :  { %v5626_v14 = vpop.f32.mrf.mxu2 }
 0x2a5   :  { %v4766_v30 = vmax.f32 %v4510_v1, 0.0  ;;  %v5627_v21 = vadd.f32 %v10659_v40, %v5626_v14  ;;  %v3104_v14 = vunpack.c.l.b16 %v400_v38  ;;  %v402_v38 = vpack.c.bf16 %v146_v33, %v146_v33 }
 0x2a6   :  { %v916_v33 = vpack.c.bf16 %v660_v41, %v660_v41 }
 0x2a7   :  { %v4988_v52 = vpack.c.bf16 %v4766_v30, %v4765_v16  ;;  %v6193_v24 = vmax.f32 %v5627_v21, 0.0  ;;  %v2291_v28 = vpop.f32.mrf.mxu0  ;;  %v10707_v30 = vld [vmem:[%s13720_s7 + $0x10] sm:$0xff]  ;;  %v3316_v3 = vpack.c.b16 %v3104_v14, %v3103_v59  ;;  %v3105_v59 = vunpack.c.l.b16 %v401_v47 }
 0x2a8   :  { %v3970_v25 = vpop.f32.mrf.mxu1 }
 0x2a9   :  { %v6449_v43 = vpack.c.bf16 %v6193_v24, %v6193_v24  ;;  %9246 = vmatmul.msk.bf16.gmra.mxu2 %vm5110_vm1, %v4988_v52  ;;  %v3971_v39 = vadd.f32 %v3970_v25, %v2291_v28  ;;  %v1636_v52 = vpack.c.b16 %v1424_v7, %v1423_v35  ;;  %v10714_v25 = vld [vmem:[%s13720_s7 + $0x8] sm:$0xff]  ;;  %v1425_v35 = vunpack.c.l.b16 %v913_v27 }
 0x2aa   :  { %v10671_v53 = vpop.f32.mrf.mxu3  ;;  %8979 = vmatmul.msk.bf16.gmra.mxu0 %vm1727_vm0, %v1635_v17  ;;  %v404_v27 = vpack.c.bf16 %v148_v4, %v148_v4 }
 0x2ab   :  { %v7095_v37 = vunpack.c.l.b16 %v6449_v43  ;;  %v6947_v12 = vmax.f32 %v10552_v15, %v10671_v53  ;;  %9111 = vmatmul.msk.bf16.gmra.mxu1 %vm1727_vm0, %v3315_v49  ;;  %v4511_v48 = vadd.f32 %v10478_v51, %v3971_v39  ;;  %v152_v15 = vld [vmem:[%s13713_s0 + $0x2f8] sm:$0xff] }
 0x2ac   :  { %v5629_v61 = vpop.f32.mrf.mxu2 }
 0x2ad   :  { %v7102_v34 = vpack.c.b16 %v7095_v37, %v7094_v56  ;;  %v5630_v57 = vadd.f32 %v10659_v40, %v5629_v61  ;;  %v4767_v21 = vmax.f32 %v4511_v48, 0.0  ;;  %v658_v61 = vld [vmem:[%s13714_s1 + $0x2c8] sm:$0xff] }
 0x2ae   :  { %v914_v6 = vpack.c.bf16 %v658_v61, %v658_v61  ;;  %v147_v61 = vld [vmem:[%s13713_s0 + $0x2d0] sm:$0xff] }
 0x2af   :  { %9381 = vmatmul.msk.bf16.vlgmr.msra.gmra.mxu3 %vm5110_vm1, %v7102_v34  ;;  %v2293_v42 = vpop.f32.mrf.mxu0  ;;  %v6194_v0 = vmax.f32 %v5630_v57, 0.0 }
 0x2b0   :  { %v3972_v44 = vpop.f32.mrf.mxu1  ;;  %7260 = vmatpush.bf16.msra.mxu3 %v10694_v45  ;;  %v1426_v7 = vunpack.c.l.b16 %v914_v6 }
 0x2b1   :  { %v3973_v50 = vadd.f32 %v3972_v44, %v2293_v42  ;;  %v6450_v24 = vpack.c.bf16 %v6194_v0, %v6194_v0 }
 0x2b2   :  { %v6989_v23 = vpop.f32.mrf.mxu3 }
 0x2b3   :  { %v4512_v1 = vadd.f32 %v10478_v51, %v3973_v50  ;;  %v10702_v10 = vmax.f32 %v6940_v36, %v6989_v23  ;;  %v7096_v37 = vunpack.c.l.b16 %v6450_v24  ;;  %v1637_v24 = vpack.c.b16 %v1426_v7, %v1425_v35 }
 0x2b4   :  { %v5631_v16 = vpop.f32.mrf.mxu2  ;;  %7261 = vmatpush.bf16.msra.mxu3 %v10707_v30 }
 0x2b5   :  { %v4768_v17 = vmax.f32 %v4512_v1, 0.0  ;;  %v5632_v18 = vadd.f32 %v10659_v40, %v5631_v16  ;;  %v3106_v16 = vunpack.c.l.b16 %v402_v38 }
 0x2b7   :  { %v4989_v49 = vpack.c.bf16 %v4768_v17, %v4767_v21  ;;  %v6195_v28 = vmax.f32 %v5632_v18, 0.0  ;;  %v2296_v9 = vpop.f32.mrf.mxu0 }
 0x2b8   :  { %v3975_v36 = vpop.f32.mrf.mxu1  ;;  %7262 = vmatpush.bf16.msra.mxu3 %v10714_v25 }
 0x2b9   :  { %v6451_v43 = vpack.c.bf16 %v6195_v28, %v6195_v28  ;;  %9247 = vmatmul.msk.bf16.gmra.mxu2 %vm5110_vm1, %v4989_v49  ;;  %v3976_v39 = vadd.f32 %v3975_v36, %v2296_v9  ;;  %v3317_v9 = vpack.c.b16 %v3106_v16, %v3105_v59  ;;  %v3108_v59 = vunpack.c.l.b16 %v404_v27 }
 0x2ba   :  { %v6991_v56 = vpop.f32.mrf.mxu3  ;;  %8980 = vmatmul.msk.bf16.gmra.mxu0 %vm1727_vm0, %v1636_v52 }
 0x2bb   :  { %v7097_v13 = vunpack.c.l.b16 %v6451_v43  ;;  %v10721_v22 = vmax.f32 %v6941_v55, %v6991_v56  ;;  %9112 = vmatmul.msk.bf16.gmra.mxu1 %vm1727_vm0, %v3316_v3  ;;  %v4513_v48 = vadd.f32 %v10478_v51, %v3976_v39 }
 0x2bc   :  { %v5634_v34 = vpop.f32.mrf.mxu2  ;;  %7263 = vmatpush.bf16.msra.mxu3 %v10740_v62 }
 0x2bd   :  { %v7103_v55 = vpack.c.b16 %v7097_v13, %v7096_v37  ;;  %v5635_v57 = vadd.f32 %v10659_v40, %v5634_v34  ;;  %v4769_v17 = vmax.f32 %v4513_v48, 0.0  ;;  %v659_v13 = vld [vmem:[%s13714_s1 + $0x2d0] sm:$0xff]  ;;  %v1428_v48 = vunpack.c.l.b16 %v916_v33 }
 0x2be   :  { %v915_v34 = vpack.c.bf16 %v659_v13, %v659_v13 }
 0x2bf   :  { %9382 = vmatmul.msk.bf16.gmra.mxu3 %vm5110_vm1, %v7103_v55  ;;  %v2298_v42 = vpop.f32.mrf.mxu0  ;;  %v6196_v0 = vmax.f32 %v5635_v57, 0.0  ;;  %v403_v55 = vpack.c.bf16 %v147_v61, %v147_v61 }
 0x2c0   :  { %v3977_v44 = vpop.f32.mrf.mxu1 }
 0x2c1   :  { %v3978_v50 = vadd.f32 %v3977_v44, %v2298_v42  ;;  %v6452_v49 = vpack.c.bf16 %v6196_v0, %v6196_v0  ;;  %v1427_v44 = vunpack.c.l.b16 %v915_v34 }
 0x2c2   :  { %v6994_v23 = vpop.f32.mrf.mxu3 }
 0x2c3   :  { %v4514_v1 = vadd.f32 %v10478_v51, %v3978_v50  ;;  %v10750_v14 = vmax.f32 %v6942_v11, %v6994_v23  ;;  %v7098_v5 = vunpack.c.l.b16 %v6452_v49  ;;  %v3107_v50 = vunpack.c.l.b16 %v403_v55 }
 0x2c4   :  { %v5636_v21 = vpop.f32.mrf.mxu2 }
 0x2c5   :  { %v4770_v18 = vmax.f32 %v4514_v1, 0.0  ;;  %v5637_v52 = vadd.f32 %v10659_v40, %v5636_v21  ;;  %v3318_v49 = vpack.c.b16 %v3108_v59, %v3107_v50 }
 0x2c7   :  { %v4990_v28 = vpack.c.bf16 %v4770_v18, %v4769_v17  ;;  %v6197_v3 = vmax.f32 %v5637_v52, 0.0  ;;  %v2301_v36 = vpop.f32.mrf.mxu0  ;;  %v1638_v17 = vpack.c.b16 %v1428_v48, %v1427_v44 }
 0x2c8   :  { %v3980_v43 = vpop.f32.mrf.mxu1 }
 0x2c9   :  { %v6453_v56 = vpack.c.bf16 %v6197_v3, %v6197_v3  ;;  %9248 = vmatmul.msk.bf16.gmra.mxu2 %vm5110_vm1, %v4990_v28 }
 0x2ca   :  { %v6996_v37 = vpop.f32.mrf.mxu3  ;;  %8981 = vmatmul.msk.bf16.gmra.mxu0 %vm1727_vm0, %v1637_v24 }
 0x2cb   :  { %v7099_v20 = vunpack.c.l.b16 %v6453_v56  ;;  %v10757_v11 = vmax.f32 %v6943_v29, %v6996_v37  ;;  %9113 = vmatmul.msk.bf16.gmra.mxu1 %vm1727_vm0, %v3317_v9  ;;  %v3981_v29 = vadd.f32 %v3980_v43, %v2301_v36  ;;  %v661_v43 = vld [vmem:[%s13714_s1 + $0x2e0] sm:$0xff]  ;;  %v662_v56 = vld [vmem:[%s13714_s1 + $0x2e8] sm:$0xff] }
 0x2cc   :  { %v5639_v31 = vpop.f32.mrf.mxu2  ;;  %v149_v37 = vld [vmem:[%s13713_s0 + $0x2e0] sm:$0xff]  ;;  %v918_v13 = vpack.c.bf16 %v662_v56, %v662_v56 }
 0x2cd   :  { %v7104_v32 = vpack.c.b16 %v7099_v20, %v7098_v5  ;;  %v5640_v39 = vadd.f32 %v10659_v40, %v5639_v31  ;;  %v4515_v57 = vadd.f32 %v10478_v51, %v3981_v29  ;;  %v917_v20 = vpack.c.bf16 %v661_v43, %v661_v43 }
 0x2ce   :  { %v405_v41 = vpack.c.bf16 %v149_v37, %v149_v37  ;;  %v406_v31 = vpack.c.bf16 %v150_v63, %v150_v63 }
 0x2cf   :  { %9383 = vmatmul.msk.bf16.gmra.mxu3 %vm5110_vm1, %v7104_v32  ;;  %v2303_v6 = vpop.f32.mrf.mxu0  ;;  %v6198_v23 = vmax.f32 %v5640_v39, 0.0  ;;  %v4771_v1 = vmax.f32 %v4515_v57, 0.0  ;;  %v1429_v55 = vunpack.c.l.b16 %v917_v20  ;;  %v1430_v39 = vunpack.c.l.b16 %v918_v13 }
 0x2d0   :  { %v3982_v47 = vpop.f32.mrf.mxu1  ;;  %v3109_v27 = vunpack.c.l.b16 %v405_v41 }
 0x2d1   :  { %v3983_v38 = vadd.f32 %v3982_v47, %v2303_v6  ;;  %v6454_v18 = vpack.c.bf16 %v6198_v23, %v6198_v23  ;;  %v1639_v23 = vpack.c.b16 %v1430_v39, %v1429_v55 }
 0x2d2   :  { %v6999_v42 = vpop.f32.mrf.mxu3 }
 0x2d3   :  { %v4516_v35 = vadd.f32 %v10478_v51, %v3983_v38  ;;  %v10780_v7 = vmax.f32 %v6944_v54, %v6999_v42  ;;  %v7100_v60 = vunpack.c.l.b16 %v6454_v18  ;;  %v3110_v38 = vunpack.c.l.b16 %v406_v31 }
 0x2d4   :  { %v5641_v0 = vpop.f32.mrf.mxu2 }
 0x2d5   :  { %v4772_v16 = vmax.f32 %v4516_v35, 0.0  ;;  %v5642_v21 = vadd.f32 %v10659_v40, %v5641_v0 }
 0x2d7   :  { %v4991_v52 = vpack.c.bf16 %v4772_v16, %v4771_v1  ;;  %v6199_v24 = vmax.f32 %v5642_v21, 0.0  ;;  %v2306_v28 = vpop.f32.mrf.mxu0  ;;  %v3319_v1 = vpack.c.b16 %v3110_v38, %v3109_v27 }
 0x2d8   :  { %v3985_v3 = vpop.f32.mrf.mxu1 }
 0x2d9   :  { %v6455_v9 = vpack.c.bf16 %v6199_v24, %v6199_v24  ;;  %9249 = vmatmul.msk.bf16.gmra.mxu2 %vm5110_vm1, %v4991_v52  ;;  %v663_v52 = vld [vmem:[%s13714_s1 + $0x2f0] sm:$0xff]  ;;  %v664_v24 = vld [vmem:[%s13714_s1 + $0x2f8] sm:$0xff] }
 0x2da   :  { %v7001_v36 = vpop.f32.mrf.mxu3  ;;  %8982 = vmatmul.msk.bf16.gmra.mxu0 %vm1727_vm0, %v1638_v17 }
 0x2db   :  { %v7101_v2 = vunpack.c.l.b16 %v6455_v9  ;;  %v10787_v54 = vmax.f32 %v6945_v26, %v7001_v36  ;;  %9114 = vmatmul.msk.bf16.gmra.mxu1 %vm1727_vm0, %v3318_v49  ;;  %v3986_v26 = vadd.f32 %v3985_v3, %v2306_v28  ;;  %v151_v49 = vld [vmem:[%s13713_s0 + $0x2f0] sm:$0xff]  ;;  %v919_v3 = vpack.c.bf16 %v663_v52, %v663_v52 }
 0x2dc   :  { %v5644_v5 = vpop.f32.mrf.mxu2  ;;  %v920_v9 = vpack.c.bf16 %v664_v24, %v664_v24  ;;  %v407_v36 = vpack.c.bf16 %v151_v49, %v151_v49 }
 0x2dd   :  { %v7105_v19 = vpack.c.b16 %v7101_v2, %v7100_v60  ;;  %v5645_v61 = vadd.f32 %v10659_v40, %v5644_v5  ;;  %v4517_v29 = vadd.f32 %v10478_v51, %v3986_v26  ;;  %v408_v2 = vpack.c.bf16 %v152_v15, %v152_v15 }
 0x2de   :  { %v1432_v26 = vunpack.c.l.b16 %v920_v9  ;;  %v3111_v20 = vunpack.c.l.b16 %v407_v36 }
 0x2df   :  { %9384 = vmatmul.msk.bf16.gmra.mxu3 %vm5110_vm1, %v7105_v19  ;;  %v2308_v4 = vpop.f32.mrf.mxu0  ;;  %v6200_v6 = vmax.f32 %v5645_v61, 0.0  ;;  %v4773_v44 = vmax.f32 %v4517_v29, 0.0  ;;  %v1431_v19 = vunpack.c.l.b16 %v919_v3  ;;  %v3112_v31 = vunpack.c.l.b16 %v408_v2 }
 0x2e0   :  { %v3987_v32 = vpop.f32.mrf.mxu1 }
 0x2e1   :  { %v3988_v34 = vadd.f32 %v3987_v32, %v2308_v4  ;;  %v6456_v35 = vpack.c.bf16 %v6200_v6, %v6200_v6  ;;  %v3320_v6 = vpack.c.b16 %v3112_v31, %v3111_v20 }
 0x2e2   :  { %v7004_v33 = vpop.f32.mrf.mxu3 }
 0x2e3   :  { %v4518_v47 = vadd.f32 %v10478_v51, %v3988_v34  ;;  %v10810_v57 = vmax.f32 %v6946_v8, %v7004_v33  ;;  %v7163_v46 = vunpack.c.l.b16 %v6456_v35  ;;  %v1640_v33 = vpack.c.b16 %v1432_v26, %v1431_v19  ;;  %v666_v35 = vld [vmem:[%s13714_s1 + $0x308] sm:$0xff] }
 0x2e4   :  { %v5646_v42 = vpop.f32.mrf.mxu2 }
 0x2e5   :  { %v4774_v48 = vmax.f32 %v4518_v47, 0.0  ;;  %v5647_v50 = vadd.f32 %v10659_v40, %v5646_v42 }
 0x2e7   :  { %v4992_v59 = vpack.c.bf16 %v4774_v48, %v4773_v44  ;;  %v6201_v0 = vmax.f32 %v5647_v50, 0.0  ;;  %v2311_v16 = vpop.f32.mrf.mxu0 }
 0x2e8   :  { %v3990_v21 = vpop.f32.mrf.mxu1 }
 0x2e9   :  { %v6457_v17 = vpack.c.bf16 %v6201_v0, %v6201_v0  ;;  %9250 = vmatmul.msk.bf16.gmra.mxu2 %vm5110_vm1, %v4992_v59  ;;  %v153_v59 = vld [vmem:[%s13713_s0 + $0x300] sm:$0xff] }
 0x2ea   :  { %v7006_v18 = vpop.f32.mrf.mxu3  ;;  %8983 = vmatmul.msk.bf16.gmra.mxu0 %vm1727_vm0, %v1639_v23  ;;  %v665_v23 = vld [vmem:[%s13714_s1 + $0x300] sm:$0xff] }
 0x2eb   :  { %v7164_v58 = vunpack.c.l.b16 %v6457_v17  ;;  %v10817_v8 = vmax.f32 %v6947_v12, %v7006_v18  ;;  %9115 = vmatmul.msk.bf16.gmra.mxu1 %vm1727_vm0, %v3319_v1  ;;  %v3991_v12 = vadd.f32 %v3990_v21, %v2311_v16  ;;  %v154_v1 = vld [vmem:[%s13713_s0 + $0x308] sm:$0xff]  ;;  %v921_v17 = vpack.c.bf16 %v665_v23, %v665_v23 }
 0x2ec   :  { %v5649_v28 = vpop.f32.mrf.mxu2  ;;  %v922_v18 = vpack.c.bf16 %v666_v35, %v666_v35  ;;  %v410_v52 = vpack.c.bf16 %v154_v1, %v154_v1 }
 0x2ed   :  { %v7171_v53 = vpack.c.b16 %v7164_v58, %v7163_v46  ;;  %v5650_v60 = vadd.f32 %v10659_v40, %v5649_v28  ;;  %v4519_v37 = vadd.f32 %v10478_v51, %v3991_v12  ;;  %v409_v46 = vpack.c.bf16 %v153_v59, %v153_v59  ;;  %v10870_v28 = vld [vmem:[%s13717_s4] ss:$0 sm:$0xff] }
 0x2ee   :  { %v1433_v3 = vunpack.c.l.b16 %v921_v17  ;;  %v1434_v9 = vunpack.c.l.b16 %v922_v18 }
 0x2ef   :  { %9385 = vmatmul.msk.bf16.vlgmr.msrb.gmra.mxu3 %vm5110_vm1, %v7171_v53  ;;  %v2313_v43 = vpop.f32.mrf.mxu0  ;;  %v6202_v13 = vmax.f32 %v5650_v60, 0.0  ;;  %v4775_v32 = vmax.f32 %v4519_v37, 0.0  ;;  %v3113_v36 = vunpack.c.l.b16 %v409_v46 }
 0x2f0   :  { %v3992_v56 = vpop.f32.mrf.mxu1  ;;  %7329 = vmatpush.bf16.msrb.mxu3 %v10694_v45  ;;  %v1641_v20 = vpack.c.b16 %v1434_v9, %v1433_v3 }
 0x2f1   :  { %v3993_v5 = vadd.f32 %v3992_v56, %v2313_v43  ;;  %v6458_v55 = vpack.c.bf16 %v6202_v13, %v6202_v13  ;;  %v3114_v56 = vunpack.c.l.b16 %v410_v52 }
 0x2f2   :  { %v10837_v63 = vpop.f32.mrf.mxu3 }
 0x2f3   :  { %v4520_v41 = vadd.f32 %v10478_v51, %v3993_v5  ;;  %v7078_v61 = vmax.f32 %v10702_v10, %v10837_v63  ;;  %v7165_v44 = vunpack.c.l.b16 %v6458_v55 }
 0x2f4   :  { %v5651_v4 = vpop.f32.mrf.mxu2  ;;  %7330 = vmatpush.bf16.msrb.mxu3 %v10707_v30 }
 0x2f5   :  { %v4776_v29 = vmax.f32 %v4520_v41, 0.0  ;;  %v5652_v34 = vadd.f32 %v10659_v40, %v5651_v4  ;;  %v3321_v4 = vpack.c.b16 %v3114_v56, %v3113_v36 }
 0x2f7   :  { %v4993_v39 = vpack.c.bf16 %v4776_v29, %v4775_v32  ;;  %v6203_v27 = vmax.f32 %v5652_v34, 0.0  ;;  %v2316_v47 = vpop.f32.mrf.mxu0 }
 0x2f8   :  { %v3995_v38 = vpop.f32.mrf.mxu1  ;;  %7331 = vmatpush.bf16.msrb.mxu3 %v10714_v25 }
 0x2f9   :  { %v6459_v51 = vpack.c.bf16 %v6203_v27, %v6203_v27  ;;  %9251 = vmatmul.msk.bf16.gmra.mxu2 %vm5110_vm1, %v4993_v39  ;;  %v3996_v21 = vadd.f32 %v3995_v38, %v2316_v47  ;;  %v668_v47 = vld [vmem:[%s13714_s1 + $0x318] sm:$0xff]  ;;  %v155_v38 = vld [vmem:[%s13713_s0 + $0x310] sm:$0xff] }
 0x2fa   :  { %v10846_v42 = vpop.f32.mrf.mxu3  ;;  %8984 = vmatmul.msk.bf16.gmra.mxu0 %vm1727_vm0, %v1640_v33  ;;  %v924_v59 = vpack.c.bf16 %v668_v47, %v668_v47 }
 0x2fb   :  { %v7166_v48 = vunpack.c.l.b16 %v6459_v51  ;;  %v7079_v50 = vmax.f32 %v10721_v22, %v10846_v42  ;;  %9116 = vmatmul.msk.bf16.gmra.mxu1 %vm1727_vm0, %v3320_v6  ;;  %v4521_v15 = vadd.f32 %v10870_v28, %v3996_v21  ;;  %v667_v6 = vld [vmem:[%s13714_s1 + $0x310] sm:$0xff]  ;;  %v162_v22 = vld [vmem:[%s13713_s0 + $0x348] sm:$0xff] }
 0x2fc   :  { %v5654_v0 = vpop.f32.mrf.mxu2  ;;  %7332 = vmatpush.bf16.msrb.mxu3 %v10740_v62  ;;  %v923_v35 = vpack.c.bf16 %v667_v6, %v667_v6  ;;  %v157_v6 = vld [vmem:[%s13713_s0 + $0x320] sm:$0xff] }
 0x2fd   :  { %v7172_v16 = vpack.c.b16 %v7166_v48, %v7165_v44  ;;  %v5655_v58 = vadd.f32 %v10659_v40, %v5654_v0  ;;  %v4777_v5 = vmax.f32 %v4521_v15, 0.0  ;;  %v156_v44 = vld [vmem:[%s13713_s0 + $0x318] sm:$0xff]  ;;  %v411_v0 = vpack.c.bf16 %v155_v38, %v155_v38  ;;  %v158_v38 = vld [vmem:[%s13713_s0 + $0x328] sm:$0xff] }
 0x2fe   :  { %v1435_v52 = vunpack.c.l.b16 %v923_v35  ;;  %v413_v35 = vpack.c.bf16 %v157_v6, %v157_v6  ;;  %v671_v6 = vld [vmem:[%s13714_s1 + $0x330] sm:$0xff] }
 0x2ff   :  { %9386 = vmatmul.msk.bf16.gmra.mxu3 %vm5110_vm1, %v7172_v16  ;;  %v2318_v24 = vpop.f32.mrf.mxu0  ;;  %v6204_v60 = vmax.f32 %v5655_v58, 0.0  ;;  %v412_v16 = vpack.c.bf16 %v156_v44, %v156_v44 }
 0x300   :  { %v3997_v49 = vpop.f32.mrf.mxu1 }
 0x301   :  { %v3998_v53 = vadd.f32 %v3997_v49, %v2318_v24  ;;  %v6460_v13 = vpack.c.bf16 %v6204_v60, %v6204_v60  ;;  %v1436_v24 = vunpack.c.l.b16 %v924_v59  ;;  %v3115_v49 = vunpack.c.l.b16 %v411_v0 }
 0x302   :  { %v10873_v12 = vpop.f32.mrf.mxu3  ;;  %v3116_v9 = vunpack.c.l.b16 %v412_v16  ;;  %v414_v0 = vpack.c.bf16 %v158_v38, %v158_v38  ;;  %v159_v38 = vld [vmem:[%s13713_s0 + $0x330] sm:$0xff] }
 0x303   :  { %v4522_v2 = vadd.f32 %v10870_v28, %v3998_v53  ;;  %v7080_v43 = vmax.f32 %v10750_v14, %v10873_v12  ;;  %v7167_v55 = vunpack.c.l.b16 %v6460_v13 }
 0x304   :  { %v5656_v37 = vpop.f32.mrf.mxu2 }
 0x305   :  { %v4778_v19 = vmax.f32 %v4522_v2, 0.0  ;;  %v5657_v26 = vadd.f32 %v10659_v40, %v5656_v37  ;;  %v1642_v37 = vpack.c.b16 %v1436_v24, %v1435_v52  ;;  %v3117_v24 = vunpack.c.l.b16 %v413_v35 }
 0x306   :  { %v927_v35 = vpack.c.bf16 %v671_v6, %v671_v6 }
 0x307   :  { %v4994_v41 = vpack.c.bf16 %v4778_v19, %v4777_v5  ;;  %v6205_v31 = vmax.f32 %v5657_v26, 0.0  ;;  %v2321_v32 = vpop.f32.mrf.mxu0 }
 0x308   :  { %v4000_v29 = vpop.f32.mrf.mxu1 }
 0x309   :  { %v6461_v34 = vpack.c.bf16 %v6205_v31, %v6205_v31  ;;  %9252 = vmatmul.msk.bf16.gmra.mxu2 %vm5110_vm1, %v4994_v41  ;;  %v4001_v23 = vadd.f32 %v4000_v29, %v2321_v32 }
 0x30a   :  { %v10880_v33 = vpop.f32.mrf.mxu3  ;;  %8985 = vmatmul.msk.bf16.gmra.mxu0 %vm1727_vm0, %v1641_v20  ;;  %v3322_v20 = vpack.c.b16 %v3116_v9, %v3115_v49  ;;  %v3118_v9 = vunpack.c.l.b16 %v414_v0  ;;  %v415_v0 = vpack.c.bf16 %v159_v38, %v159_v38  ;;  %v161_v38 = vld [vmem:[%s13713_s0 + $0x340] sm:$0xff] }
 0x30b   :  { %v7168_v39 = vunpack.c.l.b16 %v6461_v34  ;;  %v7081_v27 = vmax.f32 %v10757_v11, %v10880_v33  ;;  %9117 = vmatmul.msk.bf16.gmra.mxu1 %vm1727_vm0, %v3321_v4  ;;  %v4523_v18 = vadd.f32 %v10870_v28, %v4001_v23  ;;  %v164_v11 = vld [vmem:[%s13713_s0 + $0x358] sm:$0xff] }
 0x30c   :  { %v5659_v51 = vpop.f32.mrf.mxu2 }
 0x30d   :  { %v7173_v48 = vpack.c.b16 %v7168_v39, %v7167_v55  ;;  %v5660_v1 = vadd.f32 %v10659_v40, %v5659_v51  ;;  %v4779_v60 = vmax.f32 %v4523_v18, 0.0  ;;  %v669_v55 = vld [vmem:[%s13714_s1 + $0x320] sm:$0xff]  ;;  %v670_v39 = vld [vmem:[%s13714_s1 + $0x328] sm:$0xff] }
 0x30e   :  { %v926_v23 = vpack.c.bf16 %v670_v39, %v670_v39 }
 0x30f   :  { %9387 = vmatmul.msk.bf16.gmra.mxu3 %vm5110_vm1, %v7173_v48  ;;  %v2323_v21 = vpop.f32.mrf.mxu0  ;;  %v6206_v15 = vmax.f32 %v5660_v1, 0.0  ;;  %v925_v48 = vpack.c.bf16 %v669_v55, %v669_v55 }
 0x310   :  { %v4002_v17 = vpop.f32.mrf.mxu1  ;;  %v1438_v52 = vunpack.c.l.b16 %v926_v23 }
 0x311   :  { %v4003_v46 = vadd.f32 %v4002_v17, %v2323_v21  ;;  %v6462_v5 = vpack.c.bf16 %v6206_v15, %v6206_v15 }
 0x312   :  { %v10901_v58 = vpop.f32.mrf.mxu3 }
 0x313   :  { %v4524_v53 = vadd.f32 %v10870_v28, %v4003_v46  ;;  %v7082_v3 = vmax.f32 %v10780_v7, %v10901_v58  ;;  %v7169_v32 = vunpack.c.l.b16 %v6462_v5  ;;  %v1437_v46 = vunpack.c.l.b16 %v925_v48 }
 0x314   :  { %v5661_v36 = vpop.f32.mrf.mxu2 }
 0x315   :  { %v4780_v2 = vmax.f32 %v4524_v53, 0.0  ;;  %v5662_v56 = vadd.f32 %v10659_v40, %v5661_v36 }
 0x317   :  { %v4995_v19 = vpack.c.bf16 %v4780_v2, %v4779_v60  ;;  %v6207_v26 = vmax.f32 %v5662_v56, 0.0  ;;  %v2326_v13 = vpop.f32.mrf.mxu0 }
 0x318   :  { %v4005_v41 = vpop.f32.mrf.mxu1 }
 0x319   :  { %v6463_v31 = vpack.c.bf16 %v6207_v26, %v6207_v26  ;;  %9253 = vmatmul.msk.bf16.gmra.mxu2 %vm5110_vm1, %v4995_v19  ;;  %v4006_v44 = vadd.f32 %v4005_v41, %v2326_v13 }
 0x31a   :  { %v10908_v4 = vpop.f32.mrf.mxu3  ;;  %8986 = vmatmul.msk.bf16.gmra.mxu0 %vm1727_vm0, %v1642_v37  ;;  %v1643_v37 = vpack.c.b16 %v1438_v52, %v1437_v46 }
 0x31b   :  { %v7170_v29 = vunpack.c.l.b16 %v6463_v31  ;;  %v7083_v34 = vmax.f32 %v10787_v54, %v10908_v4  ;;  %9118 = vmatmul.msk.bf16.gmra.mxu1 %vm1727_vm0, %v3322_v20  ;;  %v4525_v21 = vadd.f32 %v10870_v28, %v4006_v44  ;;  %v3323_v20 = vpack.c.b16 %v3118_v9, %v3117_v24  ;;  %v160_v44 = vld [vmem:[%s13713_s0 + $0x338] sm:$0xff]  ;;  %v166_v54 = vld [vmem:[%s13713_s0 + $0x368] sm:$0xff] }
 0x31c   :  { %v5664_v47 = vpop.f32.mrf.mxu2  ;;  %v3119_v9 = vunpack.c.l.b16 %v415_v0 }
 0x31d   :  { %v7174_v51 = vpack.c.b16 %v7170_v29, %v7169_v32  ;;  %v5665_v59 = vadd.f32 %v10659_v40, %v5664_v47  ;;  %v4781_v60 = vmax.f32 %v4525_v21, 0.0  ;;  %v672_v47 = vld [vmem:[%s13714_s1 + $0x338] sm:$0xff] }
 0x31f   :  { %9388 = vmatmul.msk.bf16.gmra.mxu3 %vm5110_vm1, %v7174_v51  ;;  %v2328_v1 = vpop.f32.mrf.mxu0  ;;  %v6208_v49 = vmax.f32 %v5665_v59, 0.0  ;;  %v928_v59 = vpack.c.bf16 %v672_v47, %v672_v47  ;;  %v673_v47 = vld [vmem:[%s13714_s1 + $0x340] sm:$0xff] }
 0x320   :  { %v4007_v16 = vpop.f32.mrf.mxu1 }
 0x321   :  { %v4008_v17 = vadd.f32 %v4007_v16, %v2328_v1  ;;  %v6464_v5 = vpack.c.bf16 %v6208_v49, %v6208_v49  ;;  %v416_v16 = vpack.c.bf16 %v160_v44, %v160_v44  ;;  %v1439_v49 = vunpack.c.l.b16 %v927_v35 }
 0x322   :  { %v10929_v18 = vpop.f32.mrf.mxu3  ;;  %v929_v44 = vpack.c.bf16 %v673_v47, %v673_v47 }
 0x323   :  { %v4526_v15 = vadd.f32 %v10870_v28, %v4008_v17  ;;  %v7084_v53 = vmax.f32 %v10810_v57, %v10929_v18  ;;  %v7232_v29 = vunpack.c.l.b16 %v6464_v5 }
 0x324   :  { %v5666_v36 = vpop.f32.mrf.mxu2 }
 0x325   :  { %v4782_v2 = vmax.f32 %v4526_v15, 0.0  ;;  %v5667_v56 = vadd.f32 %v10659_v40, %v5666_v36  ;;  %v1440_v15 = vunpack.c.l.b16 %v928_v59  ;;  %v418_v59 = vpack.c.bf16 %v162_v22, %v162_v22 }
 0x327   :  { %v4996_v19 = vpack.c.bf16 %v4782_v2, %v4781_v60  ;;  %v6209_v26 = vmax.f32 %v5667_v56, 0.0  ;;  %v2331_v13 = vpop.f32.mrf.mxu0  ;;  %v3120_v56 = vunpack.c.l.b16 %v416_v16 }
 0x328   :  { %v4010_v41 = vpop.f32.mrf.mxu1 }
 0x329   :  { %v6465_v31 = vpack.c.bf16 %v6209_v26, %v6209_v26  ;;  %9254 = vmatmul.msk.bf16.gmra.mxu2 %vm5110_vm1, %v4996_v19  ;;  %v4011_v23 = vadd.f32 %v4010_v41, %v2331_v13  ;;  %v1644_v26 = vpack.c.b16 %v1440_v15, %v1439_v49 }
 0x32a   :  { %v10936_v32 = vpop.f32.mrf.mxu3  ;;  %8987 = vmatmul.msk.bf16.gmra.mxu0 %vm1727_vm0, %v1643_v37 }
 0x32b   :  { %v7233_v55 = vunpack.c.l.b16 %v6465_v31  ;;  %v7085_v39 = vmax.f32 %v10817_v8, %v10936_v32  ;;  %9119 = vmatmul.msk.bf16.gmra.mxu1 %vm1727_vm0, %v3323_v20  ;;  %v4527_v46 = vadd.f32 %v10870_v28, %v4011_v23  ;;  %v3324_v31 = vpack.c.b16 %v3120_v56, %v3119_v9  ;;  %v168_v8 = vld [vmem:[%s13713_s0 + $0x378] sm:$0xff] }
 0x32c   :  { %v5669_v51 = vpop.f32.mrf.mxu2  ;;  %v417_v23 = vpack.c.bf16 %v161_v38, %v161_v38  ;;  %v3122_v9 = vunpack.c.l.b16 %v418_v59 }
 0x32d   :  { %v7240_v48 = vpack.c.b16 %v7233_v55, %v7232_v29  ;;  %v5670_v1 = vadd.f32 %v10659_v40, %v5669_v51 }
 0x32f   :  { %9389 = vmatmul.msk.bf16.vlgmr.msra.gmra.mxu3 %vm5110_vm1, %v7240_v48  ;;  %v2333_v21 = vpop.f32.mrf.mxu0  ;;  %v6210_v36 = vmax.f32 %v5670_v1, 0.0 }
 0x330   :  { %v4012_v17 = vpop.f32.mrf.mxu1  ;;  %7398 = vmatpush.bf16.msra.mxu3 %v10694_v45  ;;  %v4783_v45 = vmax.f32 %v4527_v46, 0.0  ;;  %v1441_v46 = vunpack.c.l.b16 %v929_v44 }
 0x331   :  { %v4013_v52 = vadd.f32 %v4012_v17, %v2333_v21  ;;  %v6466_v20 = vpack.c.bf16 %v6210_v36, %v6210_v36 }
 0x332   :  { %v7127_v24 = vpop.f32.mrf.mxu3 }
 0x333   :  { %v4528_v60 = vadd.f32 %v10870_v28, %v4013_v52  ;;  %v10962_v2 = vmax.f32 %v7078_v61, %v7127_v24  ;;  %v7234_v61 = vunpack.c.l.b16 %v6466_v20  ;;  %v3121_v24 = vunpack.c.l.b16 %v417_v23 }
 0x334   :  { %v5671_v37 = vpop.f32.mrf.mxu2  ;;  %7399 = vmatpush.bf16.msra.mxu3 %v10707_v30 }
 0x335   :  { %v4784_v5 = vmax.f32 %v4528_v60, 0.0  ;;  %v5672_v19 = vadd.f32 %v10659_v40, %v5671_v37  ;;  %v3325_v20 = vpack.c.b16 %v3122_v9, %v3121_v24 }
 0x337   :  { %v4997_v13 = vpack.c.bf16 %v4784_v5, %v4783_v45  ;;  %v6211_v41 = vmax.f32 %v5672_v19, 0.0  ;;  %v2336_v29 = vpop.f32.mrf.mxu0 }
 0x338   :  { %v4015_v55 = vpop.f32.mrf.mxu1  ;;  %7400 = vmatpush.bf16.msra.mxu3 %v10714_v25  ;;  %v674_v25 = vld [vmem:[%s13714_s1 + $0x348] sm:$0xff] }
 0x339   :  { %v6467_v10 = vpack.c.bf16 %v6211_v41, %v6211_v41  ;;  %9255 = vmatmul.msk.bf16.gmra.mxu2 %vm5110_vm1, %v4997_v13  ;;  %v930_v48 = vpack.c.bf16 %v674_v25, %v674_v25 }
 0x33a   :  { %v7129_v63 = vpop.f32.mrf.mxu3  ;;  %8988 = vmatmul.msk.bf16.gmra.mxu0 %vm1727_vm0, %v1644_v26 }
 0x33b   :  { %v7235_v6 = vunpack.c.l.b16 %v6467_v10  ;;  %v10971_v30 = vmax.f32 %v7079_v50, %v7129_v63  ;;  %9120 = vmatmul.msk.bf16.gmra.mxu1 %vm1727_vm0, %v3324_v31  ;;  %v4016_v50 = vadd.f32 %v4015_v55, %v2336_v29  ;;  %v1442_v52 = vunpack.c.l.b16 %v930_v48  ;;  %v675_v55 = vld [vmem:[%s13714_s1 + $0x350] sm:$0xff]  ;;  %v676_v10 = vld [vmem:[%s13714_s1 + $0x358] sm:$0xff] }
 0x33c   :  { %v5674_v51 = vpop.f32.mrf.mxu2  ;;  %7401 = vmatpush.bf16.msra.mxu3 %v10740_v62  ;;  %v163_v63 = vld [vmem:[%s13713_s0 + $0x350] sm:$0xff]  ;;  %v932_v47 = vpack.c.bf16 %v676_v10, %v676_v10 }
 0x33d   :  { %v7241_v42 = vpack.c.b16 %v7235_v6, %v7234_v61  ;;  %v5675_v35 = vadd.f32 %v10659_v40, %v5674_v51  ;;  %v4529_v16 = vadd.f32 %v10870_v28, %v4016_v50  ;;  %v1645_v45 = vpack.c.b16 %v1442_v52, %v1441_v46  ;;  %v11030_v52 = vld [vmem:[%s13719_s6] ss:$0 sm:$0xff] }
 0x33e   :  { %v931_v6 = vpack.c.bf16 %v675_v55, %v675_v55  ;;  %v419_v25 = vpack.c.bf16 %v163_v63, %v163_v63  ;;  %v420_v51 = vpack.c.bf16 %v164_v11, %v164_v11 }
 0x33f   :  { %9390 = vmatmul.msk.bf16.gmra.mxu3 %vm5110_vm1, %v7241_v42  ;;  %v2338_v0 = vpop.f32.mrf.mxu0  ;;  %v6212_v62 = vmax.f32 %v5675_v35, 0.0  ;;  %v4785_v60 = vmax.f32 %v4529_v16, 0.0  ;;  %v1444_v35 = vunpack.c.l.b16 %v932_v47 }
 0x340   :  { %v4017_v1 = vpop.f32.mrf.mxu1  ;;  %v1443_v23 = vunpack.c.l.b16 %v931_v6  ;;  %v3123_v59 = vunpack.c.l.b16 %v419_v25 }
 0x341   :  { %v4018_v21 = vadd.f32 %v4017_v1, %v2338_v0  ;;  %v6468_v5 = vpack.c.bf16 %v6212_v62, %v6212_v62 }
 0x342   :  { %v7132_v17 = vpop.f32.mrf.mxu3  ;;  %v1646_v62 = vpack.c.b16 %v1444_v35, %v1443_v23 }
 0x343   :  { %v4530_v49 = vadd.f32 %v10870_v28, %v4018_v21  ;;  %v10995_v15 = vmax.f32 %v7080_v43, %v7132_v17  ;;  %v7236_v14 = vunpack.c.l.b16 %v6468_v5 }
 0x344   :  { %v5676_v36 = vpop.f32.mrf.mxu2 }
 0x345   :  { %v4786_v56 = vmax.f32 %v4530_v49, 0.0  ;;  %v5677_v37 = vadd.f32 %v10659_v40, %v5676_v36 }
 0x347   :  { %v4998_v19 = vpack.c.bf16 %v4786_v56, %v4785_v60  ;;  %v6213_v26 = vmax.f32 %v5677_v37, 0.0  ;;  %v2341_v13 = vpop.f32.mrf.mxu0 }
 0x348   :  { %v4020_v41 = vpop.f32.mrf.mxu1 }
 0x349   :  { %v6469_v31 = vpack.c.bf16 %v6213_v26, %v6213_v26  ;;  %9256 = vmatmul.msk.bf16.gmra.mxu2 %vm5110_vm1, %v4998_v19  ;;  %v677_v19 = vld [vmem:[%s13714_s1 + $0x360] sm:$0xff]  ;;  %v678_v26 = vld [vmem:[%s13714_s1 + $0x368] sm:$0xff] }
 0x34a   :  { %v7134_v29 = vpop.f32.mrf.mxu3  ;;  %8989 = vmatmul.msk.bf16.gmra.mxu0 %vm1727_vm0, %v1645_v45 }
 0x34b   :  { %v7237_v12 = vunpack.c.l.b16 %v6469_v31  ;;  %v11002_v43 = vmax.f32 %v7081_v27, %v7134_v29  ;;  %9121 = vmatmul.msk.bf16.gmra.mxu1 %vm1727_vm0, %v3325_v20  ;;  %v4021_v27 = vadd.f32 %v4020_v41, %v2341_v13  ;;  %v165_v20 = vld [vmem:[%s13713_s0 + $0x360] sm:$0xff]  ;;  %v933_v41 = vpack.c.bf16 %v677_v19, %v677_v19 }
 0x34c   :  { %v5679_v61 = vpop.f32.mrf.mxu2  ;;  %v934_v31 = vpack.c.bf16 %v678_v26, %v678_v26  ;;  %v421_v29 = vpack.c.bf16 %v165_v20, %v165_v20 }
 0x34d   :  { %v7242_v33 = vpack.c.b16 %v7237_v12, %v7236_v14  ;;  %v5680_v38 = vadd.f32 %v10659_v40, %v5679_v61  ;;  %v4531_v50 = vadd.f32 %v10870_v28, %v4021_v27  ;;  %v3124_v40 = vunpack.c.l.b16 %v420_v51 }
 0x34e   :  { %v422_v12 = vpack.c.bf16 %v166_v54, %v166_v54  ;;  %v1446_v27 = vunpack.c.l.b16 %v934_v31  ;;  %v3125_v6 = vunpack.c.l.b16 %v421_v29 }
 0x34f   :  { %9391 = vmatmul.msk.bf16.gmra.mxu3 %vm5110_vm1, %v7242_v33  ;;  %v2343_v22 = vpop.f32.mrf.mxu0  ;;  %v6214_v0 = vmax.f32 %v5680_v38, 0.0  ;;  %v4787_v17 = vmax.f32 %v4531_v50, 0.0  ;;  %v3326_v60 = vpack.c.b16 %v3124_v40, %v3123_v59  ;;  %v1445_v33 = vunpack.c.l.b16 %v933_v41 }
 0x350   :  { %v4022_v42 = vpop.f32.mrf.mxu1  ;;  %v3126_v51 = vunpack.c.l.b16 %v422_v12 }
 0x351   :  { %v4023_v44 = vadd.f32 %v4022_v42, %v2343_v22  ;;  %v6470_v49 = vpack.c.bf16 %v6214_v0, %v6214_v0 }
 0x352   :  { %v7137_v48 = vpop.f32.mrf.mxu3  ;;  %v3327_v0 = vpack.c.b16 %v3126_v51, %v3125_v6 }
 0x353   :  { %v4532_v1 = vadd.f32 %v10870_v28, %v4023_v44  ;;  %v11025_v16 = vmax.f32 %v7082_v3, %v7137_v48  ;;  %v7238_v37 = vunpack.c.l.b16 %v6470_v49  ;;  %v1647_v48 = vpack.c.b16 %v1446_v27, %v1445_v33 }
 0x354   :  { %v5681_v21 = vpop.f32.mrf.mxu2 }
 0x355   :  { %v4788_v46 = vmax.f32 %v4532_v1, 0.0  ;;  %v5682_v24 = vadd.f32 %v11030_v52, %v5681_v21 }
 0x357   :  { %v4999_v9 = vpack.c.bf16 %v4788_v46, %v4787_v17  ;;  %v6215_v36 = vmax.f32 %v5682_v24, 0.0  ;;  %v2346_v56 = vpop.f32.mrf.mxu0  ;;  %v679_v46 = vld [vmem:[%s13714_s1 + $0x370] sm:$0xff]  ;;  %v680_v24 = vld [vmem:[%s13714_s1 + $0x378] sm:$0xff] }
 0x358   :  { %v4025_v7 = vpop.f32.mrf.mxu1 }
 0x359   :  { %v6471_v58 = vpack.c.bf16 %v6215_v36, %v6215_v36  ;;  %9257 = vmatmul.msk.bf16.gmra.mxu2 %vm5110_vm1, %v4999_v9  ;;  %v935_v9 = vpack.c.bf16 %v679_v46, %v679_v46  ;;  %v936_v36 = vpack.c.bf16 %v680_v24, %v680_v24 }
 0x35a   :  { %v7139_v3 = vpop.f32.mrf.mxu3  ;;  %8990 = vmatmul.msk.bf16.gmra.mxu0 %vm1727_vm0, %v1646_v62  ;;  %v167_v62 = vld [vmem:[%s13713_s0 + $0x370] sm:$0xff] }
 0x35b   :  { %v7239_v45 = vunpack.c.l.b16 %v6471_v58  ;;  %v11037_v5 = vmax.f32 %v7083_v34, %v7139_v3  ;;  %9122 = vmatmul.msk.bf16.gmra.mxu1 %vm1727_vm0, %v3326_v60  ;;  %v4026_v34 = vadd.f32 %v4025_v7, %v2346_v56  ;;  %v423_v60 = vpack.c.bf16 %v167_v62, %v167_v62 }
 0x35c   :  { %v5684_v13 = vpop.f32.mrf.mxu2  ;;  %v424_v7 = vpack.c.bf16 %v168_v8, %v168_v8  ;;  %v1447_v20 = vunpack.c.l.b16 %v935_v9 }
 0x35d   :  { %v7243_v4 = vpack.c.b16 %v7239_v45, %v7238_v37  ;;  %v5685_v14 = vadd.f32 %v11030_v52, %v5684_v13  ;;  %v4533_v63 = vadd.f32 %v10870_v28, %v4026_v34  ;;  %v11088_v37 = vld [vmem:[%s13720_s7 + $0x18] sm:$0xff]  ;;  %v1448_v13 = vunpack.c.l.b16 %v936_v36 }
 0x35e   :  { %v3127_v54 = vunpack.c.l.b16 %v423_v60  ;;  %v3128_v31 = vunpack.c.l.b16 %v424_v7 }
 0x35f   :  { %9392 = vmatmul.msk.bf16.gmra.mxu3 %vm5110_vm1, %v7243_v4  ;;  %v2348_v55 = vpop.f32.mrf.mxu0  ;;  %v6216_v47 = vmax.f32 %v5685_v14, 0.0  ;;  %v4789_v42 = vmax.f32 %v4533_v63, 0.0  ;;  %v11100_v14 = vld [vmem:[%s13720_s7 + $0x10] sm:$0xff]  ;;  %v1648_v63 = vpack.c.b16 %v1448_v13, %v1447_v20 }
 0x360   :  { %v4027_v10 = vpop.f32.mrf.mxu1  ;;  %v3328_v27 = vpack.c.b16 %v3128_v31, %v3127_v54 }
 0x361   :  { %v4028_v61 = vadd.f32 %v4027_v10, %v2348_v55  ;;  %v6472_v23 = vpack.c.bf16 %v6216_v47, %v6216_v47 }
 0x362   :  { %v7142_v11 = vpop.f32.mrf.mxu3 }
 0x363   :  { %v4534_v25 = vadd.f32 %v10870_v28, %v4028_v61  ;;  %v11060_v38 = vmax.f32 %v7084_v53, %v7142_v11  ;;  %v7301_v57 = vunpack.c.l.b16 %v6472_v23  ;;  %v682_v23 = vld [vmem:[%s13714_s1 + $0x388] sm:$0xff] }
 0x364   :  { %v5686_v22 = vpop.f32.mrf.mxu2 }
 0x365   :  { %v4790_v50 = vmax.f32 %v4534_v25, 0.0  ;;  %v5687_v44 = vadd.f32 %v11030_v52, %v5686_v22  ;;  %v11107_v25 = vld [vmem:[%s13720_s7 + $0x8] sm:$0xff] }
 0x367   :  { %v5000_v35 = vpack.c.bf16 %v4790_v50, %v4789_v42  ;;  %v6217_v59 = vmax.f32 %v5687_v44, 0.0  ;;  %v2351_v1 = vpop.f32.mrf.mxu0 }
 0x368   :  { %v4030_v40 = vpop.f32.mrf.mxu1 }
 0x369   :  { %v6473_v21 = vpack.c.bf16 %v6217_v59, %v6217_v59  ;;  %9258 = vmatmul.msk.bf16.gmra.mxu2 %vm5110_vm1, %v5000_v35  ;;  %v169_v35 = vld [vmem:[%s13713_s0 + $0x380] sm:$0xff] }
 0x36a   :  { %v7144_v17 = vpop.f32.mrf.mxu3  ;;  %8991 = vmatmul.msk.bf16.gmra.mxu0 %vm1727_vm0, %v1647_v48  ;;  %v681_v48 = vld [vmem:[%s13714_s1 + $0x380] sm:$0xff] }
 0x36b   :  { %v7302_v18 = vunpack.c.l.b16 %v6473_v21  ;;  %v11067_v53 = vmax.f32 %v7085_v39, %v7144_v17  ;;  %9123 = vmatmul.msk.bf16.gmra.mxu1 %vm1727_vm0, %v3327_v0  ;;  %v4031_v39 = vadd.f32 %v4030_v40, %v2351_v1  ;;  %v170_v0 = vld [vmem:[%s13713_s0 + $0x388] sm:$0xff]  ;;  %v11132_v1 = vld [vmem:[%s13720_s7] sm:$0xff]  ;;  %v937_v17 = vpack.c.bf16 %v681_v48, %v681_v48 }
 0x36c   :  { %v5689_v49 = vpop.f32.mrf.mxu2  ;;  %v426_v24 = vpack.c.bf16 %v170_v0, %v170_v0 }
 0x36d   :  { %v7309_v32 = vpack.c.b16 %v7302_v18, %v7301_v57  ;;  %v5690_v56 = vadd.f32 %v11030_v52, %v5689_v49  ;;  %v4535_v45 = vadd.f32 %v10870_v28, %v4031_v39  ;;  %v938_v57 = vpack.c.bf16 %v682_v23, %v682_v23 }
 0x36e   :  { %v425_v18 = vpack.c.bf16 %v169_v35, %v169_v35  ;;  %v1449_v9 = vunpack.c.l.b16 %v937_v17 }
 0x36f   :  { %9393 = vmatmul.msk.bf16.vlgmr.msrb.gmra.mxu3 %vm5110_vm1, %v7309_v32  ;;  %v2353_v58 = vpop.f32.mrf.mxu0  ;;  %v6218_v4 = vmax.f32 %v5690_v56, 0.0  ;;  %v4791_v12 = vmax.f32 %v4535_v45, 0.0  ;;  %v1450_v36 = vunpack.c.l.b16 %v938_v57 }
 0x370   :  { %v4032_v3 = vpop.f32.mrf.mxu1  ;;  %7467 = vmatpush.bf16.msrb.mxu3 %v11088_v37  ;;  %v3129_v60 = vunpack.c.l.b16 %v425_v18 }
 0x371   :  { %v4033_v19 = vadd.f32 %v4032_v3, %v2353_v58  ;;  %v6474_v61 = vpack.c.bf16 %v6218_v4, %v6218_v4  ;;  %v3130_v3 = vunpack.c.l.b16 %v426_v24  ;;  %v1649_v54 = vpack.c.b16 %v1450_v36, %v1449_v9 }
 0x372   :  { %v11092_v26 = vpop.f32.mrf.mxu3 }
 0x373   :  { %v4536_v34 = vadd.f32 %v10870_v28, %v4033_v19  ;;  %v7216_v41 = vmax.f32 %v10962_v2, %v11092_v26  ;;  %v7303_v42 = vunpack.c.l.b16 %v6474_v61 }
 0x374   :  { %v5691_v29 = vpop.f32.mrf.mxu2  ;;  %7468 = vmatpush.bf16.msrb.mxu3 %v11100_v14 }
 0x375   :  { %v4792_v55 = vmax.f32 %v4536_v34, 0.0  ;;  %v5692_v10 = vadd.f32 %v11030_v52, %v5691_v29  ;;  %v3329_v29 = vpack.c.b16 %v3130_v3, %v3129_v60 }
 0x377   :  { %v5001_v11 = vpack.c.bf16 %v4792_v55, %v4791_v12  ;;  %v6219_v33 = vmax.f32 %v5692_v10, 0.0  ;;  %v2356_v6 = vpop.f32.mrf.mxu0 }
 0x378   :  { %v4035_v47 = vpop.f32.mrf.mxu1  ;;  %7469 = vmatpush.bf16.msrb.mxu3 %v11107_v25 }
 0x379   :  { %v6475_v51 = vpack.c.bf16 %v6219_v33, %v6219_v33  ;;  %9259 = vmatmul.msk.bf16.gmra.mxu2 %vm5110_vm1, %v5001_v11  ;;  %v4036_v21 = vadd.f32 %v4035_v47, %v2356_v6  ;;  %v684_v6 = vld [vmem:[%s13714_s1 + $0x398] sm:$0xff]  ;;  %v171_v47 = vld [vmem:[%s13713_s0 + $0x390] sm:$0xff] }
 0x37a   :  { %v11111_v22 = vpop.f32.mrf.mxu3  ;;  %8992 = vmatmul.msk.bf16.gmra.mxu0 %vm1727_vm0, %v1648_v63  ;;  %v940_v35 = vpack.c.bf16 %v684_v6, %v684_v6 }
 0x37b   :  { %v7304_v50 = vunpack.c.l.b16 %v6475_v51  ;;  %v7217_v44 = vmax.f32 %v10971_v30, %v11111_v22  ;;  %9124 = vmatmul.msk.bf16.gmra.mxu1 %vm1727_vm0, %v3328_v27  ;;  %v4537_v8 = vadd.f32 %v10870_v28, %v4036_v21  ;;  %v683_v27 = vld [vmem:[%s13714_s1 + $0x390] sm:$0xff]  ;;  %v178_v30 = vld [vmem:[%s13713_s0 + $0x3c8] sm:$0xff] }
 0x37c   :  { %v5694_v59 = vpop.f32.mrf.mxu2  ;;  %7470 = vmatpush.bf16.msrb.mxu3 %v11132_v1  ;;  %v939_v23 = vpack.c.bf16 %v683_v27, %v683_v27  ;;  %v173_v27 = vld [vmem:[%s13713_s0 + $0x3a0] sm:$0xff] }
 0x37d   :  { %v7310_v40 = vpack.c.b16 %v7304_v50, %v7303_v42  ;;  %v5695_v46 = vadd.f32 %v11030_v52, %v5694_v59  ;;  %v4793_v19 = vmax.f32 %v4537_v8, 0.0  ;;  %v172_v42 = vld [vmem:[%s13713_s0 + $0x398] sm:$0xff]  ;;  %v427_v59 = vpack.c.bf16 %v171_v47, %v171_v47  ;;  %v174_v47 = vld [vmem:[%s13713_s0 + $0x3a8] sm:$0xff] }
 0x37e   :  { %v1451_v24 = vunpack.c.l.b16 %v939_v23  ;;  %v429_v23 = vpack.c.bf16 %v173_v27, %v173_v27  ;;  %v687_v27 = vld [vmem:[%s13714_s1 + $0x3b0] sm:$0xff] }
 0x37f   :  { %9394 = vmatmul.msk.bf16.gmra.mxu3 %vm5110_vm1, %v7310_v40  ;;  %v2358_v62 = vpop.f32.mrf.mxu0  ;;  %v6220_v56 = vmax.f32 %v5695_v46, 0.0  ;;  %v428_v40 = vpack.c.bf16 %v172_v42, %v172_v42 }
 0x380   :  { %v4037_v49 = vpop.f32.mrf.mxu1 }
 0x381   :  { %v4038_v32 = vadd.f32 %v4037_v49, %v2358_v62  ;;  %v6476_v4 = vpack.c.bf16 %v6220_v56, %v6220_v56  ;;  %v1452_v62 = vunpack.c.l.b16 %v940_v35  ;;  %v3131_v49 = vunpack.c.l.b16 %v427_v59 }
 0x382   :  { %v11138_v39 = vpop.f32.mrf.mxu3  ;;  %v3132_v36 = vunpack.c.l.b16 %v428_v40  ;;  %v430_v59 = vpack.c.bf16 %v174_v47, %v174_v47  ;;  %v175_v47 = vld [vmem:[%s13713_s0 + $0x3b0] sm:$0xff] }
 0x383   :  { %v4538_v7 = vadd.f32 %v10870_v28, %v4038_v32  ;;  %v7218_v58 = vmax.f32 %v10995_v15, %v11138_v39  ;;  %v7305_v61 = vunpack.c.l.b16 %v6476_v4 }
 0x384   :  { %v5696_v45 = vpop.f32.mrf.mxu2 }
 0x385   :  { %v4794_v20 = vmax.f32 %v4538_v7, 0.0  ;;  %v5697_v13 = vadd.f32 %v11030_v52, %v5696_v45  ;;  %v1650_v45 = vpack.c.b16 %v1452_v62, %v1451_v24  ;;  %v3133_v62 = vunpack.c.l.b16 %v429_v23 }
 0x386   :  { %v943_v23 = vpack.c.bf16 %v687_v27, %v687_v27 }
 0x387   :  { %v5002_v34 = vpack.c.bf16 %v4794_v20, %v4793_v19  ;;  %v6221_v31 = vmax.f32 %v5697_v13, 0.0  ;;  %v2361_v12 = vpop.f32.mrf.mxu0 }
 0x388   :  { %v4040_v55 = vpop.f32.mrf.mxu1 }
 0x389   :  { %v6477_v10 = vpack.c.bf16 %v6221_v31, %v6221_v31  ;;  %9260 = vmatmul.msk.bf16.gmra.mxu2 %vm5110_vm1, %v5002_v34  ;;  %v4041_v48 = vadd.f32 %v4040_v55, %v2361_v12 }
 0x38a   :  { %v11145_v63 = vpop.f32.mrf.mxu3  ;;  %8993 = vmatmul.msk.bf16.gmra.mxu0 %vm1727_vm0, %v1649_v54  ;;  %v3330_v54 = vpack.c.b16 %v3132_v36, %v3131_v49  ;;  %v3134_v36 = vunpack.c.l.b16 %v430_v59  ;;  %v431_v59 = vpack.c.bf16 %v175_v47, %v175_v47  ;;  %v689_v47 = vld [vmem:[%s13714_s1 + $0x3c0] sm:$0xff] }
 0x38b   :  { %v7306_v11 = vunpack.c.l.b16 %v6477_v10  ;;  %v7219_v33 = vmax.f32 %v11002_v43, %v11145_v63  ;;  %9125 = vmatmul.msk.bf16.gmra.mxu1 %vm1727_vm0, %v3329_v29  ;;  %v4539_v57 = vadd.f32 %v10870_v28, %v4041_v48  ;;  %v180_v43 = vld [vmem:[%s13713_s0 + $0x3d8] sm:$0xff] }
 0x38c   :  { %v5699_v51 = vpop.f32.mrf.mxu2 }
 0x38d   :  { %v7311_v50 = vpack.c.b16 %v7306_v11, %v7305_v61  ;;  %v5700_v0 = vadd.f32 %v11030_v52, %v5699_v51  ;;  %v4795_v56 = vmax.f32 %v4539_v57, 0.0  ;;  %v685_v61 = vld [vmem:[%s13714_s1 + $0x3a0] sm:$0xff]  ;;  %v686_v11 = vld [vmem:[%s13714_s1 + $0x3a8] sm:$0xff] }
 0x38e   :  { %v942_v48 = vpack.c.bf16 %v686_v11, %v686_v11 }
 0x38f   :  { %9395 = vmatmul.msk.bf16.gmra.mxu3 %vm5110_vm1, %v7311_v50  ;;  %v2363_v21 = vpop.f32.mrf.mxu0  ;;  %v6222_v8 = vmax.f32 %v5700_v0, 0.0  ;;  %v941_v50 = vpack.c.bf16 %v685_v61, %v685_v61 }
 0x390   :  { %v4042_v17 = vpop.f32.mrf.mxu1  ;;  %v1454_v24 = vunpack.c.l.b16 %v942_v48 }
 0x391   :  { %v4043_v18 = vadd.f32 %v4042_v17, %v2363_v21  ;;  %v6478_v19 = vpack.c.bf16 %v6222_v8, %v6222_v8 }
 0x392   :  { %v11166_v46 = vpop.f32.mrf.mxu3 }
 0x393   :  { %v4540_v32 = vadd.f32 %v10870_v28, %v4043_v18  ;;  %v7220_v9 = vmax.f32 %v11025_v16, %v11166_v46  ;;  %v7307_v12 = vunpack.c.l.b16 %v6478_v19  ;;  %v1453_v18 = vunpack.c.l.b16 %v941_v50 }
 0x394   :  { %v5701_v60 = vpop.f32.mrf.mxu2 }
 0x395   :  { %v4796_v7 = vmax.f32 %v4540_v32, 0.0  ;;  %v5702_v3 = vadd.f32 %v11030_v52, %v5701_v60 }
 0x397   :  { %v5003_v20 = vpack.c.bf16 %v4796_v7, %v4795_v56  ;;  %v6223_v13 = vmax.f32 %v5702_v3, 0.0  ;;  %v2366_v4 = vpop.f32.mrf.mxu0 }
 0x398   :  { %v4045_v34 = vpop.f32.mrf.mxu1 }
 0x399   :  { %v6479_v31 = vpack.c.bf16 %v6223_v13, %v6223_v13  ;;  %9261 = vmatmul.msk.bf16.gmra.mxu2 %vm5110_vm1, %v5003_v20  ;;  %v4046_v42 = vadd.f32 %v4045_v34, %v2366_v4 }
 0x39a   :  { %v11173_v29 = vpop.f32.mrf.mxu3  ;;  %8994 = vmatmul.msk.bf16.gmra.mxu0 %vm1727_vm0, %v1650_v45  ;;  %v1651_v45 = vpack.c.b16 %v1454_v24, %v1453_v18 }
 0x39b   :  { %v7308_v55 = vunpack.c.l.b16 %v6479_v31  ;;  %v7221_v10 = vmax.f32 %v11037_v5, %v11173_v29  ;;  %9126 = vmatmul.msk.bf16.gmra.mxu1 %vm1727_vm0, %v3330_v54  ;;  %v4541_v21 = vadd.f32 %v10870_v28, %v4046_v42  ;;  %v3331_v54 = vpack.c.b16 %v3134_v36, %v3133_v62  ;;  %v176_v42 = vld [vmem:[%s13713_s0 + $0x3b8] sm:$0xff]  ;;  %v182_v5 = vld [vmem:[%s13713_s0 + $0x3e8] sm:$0xff] }
 0x39c   :  { %v5704_v6 = vpop.f32.mrf.mxu2  ;;  %v3135_v36 = vunpack.c.l.b16 %v431_v59 }
 0x39d   :  { %v7312_v51 = vpack.c.b16 %v7308_v55, %v7307_v12  ;;  %v5705_v35 = vadd.f32 %v11030_v52, %v5704_v6  ;;  %v4797_v56 = vmax.f32 %v4541_v21, 0.0  ;;  %v688_v6 = vld [vmem:[%s13714_s1 + $0x3b8] sm:$0xff] }
 0x39f   :  { %9396 = vmatmul.msk.bf16.gmra.mxu3 %vm5110_vm1, %v7312_v51  ;;  %v2368_v0 = vpop.f32.mrf.mxu0  ;;  %v6224_v49 = vmax.f32 %v5705_v35, 0.0  ;;  %v944_v35 = vpack.c.bf16 %v688_v6, %v688_v6 }
 0x3a0   :  { %v4047_v40 = vpop.f32.mrf.mxu1 }
 0x3a1   :  { %v4048_v17 = vadd.f32 %v4047_v40, %v2368_v0  ;;  %v6480_v19 = vpack.c.bf16 %v6224_v49, %v6224_v49  ;;  %v432_v40 = vpack.c.bf16 %v176_v42, %v176_v42  ;;  %v1455_v49 = vunpack.c.l.b16 %v943_v23  ;;  %v177_v42 = vld [vmem:[%s13713_s0 + $0x3c0] sm:$0xff] }
 0x3a2   :  { %v11194_v57 = vpop.f32.mrf.mxu3 }
 0x3a3   :  { %v4542_v8 = vadd.f32 %v10870_v28, %v4048_v17  ;;  %v7222_v32 = vmax.f32 %v11060_v38, %v11194_v57  ;;  %v7370_v55 = vunpack.c.l.b16 %v6480_v19 }
 0x3a4   :  { %v5706_v60 = vpop.f32.mrf.mxu2 }
 0x3a5   :  { %v4798_v7 = vmax.f32 %v4542_v8, 0.0  ;;  %v5707_v3 = vadd.f32 %v11030_v52, %v5706_v60  ;;  %v1456_v8 = vunpack.c.l.b16 %v944_v35  ;;  %v433_v35 = vpack.c.bf16 %v177_v42, %v177_v42 }
 0x3a7   :  { %v5004_v20 = vpack.c.bf16 %v4798_v7, %v4797_v56  ;;  %v6225_v13 = vmax.f32 %v5707_v3, 0.0  ;;  %v2371_v4 = vpop.f32.mrf.mxu0  ;;  %v3136_v3 = vunpack.c.l.b16 %v432_v40 }
 0x3a8   :  { %v4050_v34 = vpop.f32.mrf.mxu1 }
 0x3a9   :  { %v6481_v31 = vpack.c.bf16 %v6225_v13, %v6225_v13  ;;  %9262 = vmatmul.msk.bf16.gmra.mxu2 %vm5110_vm1, %v5004_v20  ;;  %v4051_v48 = vadd.f32 %v4050_v34, %v2371_v4 }
 0x3aa   :  { %v11201_v12 = vpop.f32.mrf.mxu3  ;;  %8995 = vmatmul.msk.bf16.gmra.mxu0 %vm1727_vm0, %v1651_v45 }
 0x3ab   :  { %v7371_v61 = vunpack.c.l.b16 %v6481_v31  ;;  %v7223_v11 = vmax.f32 %v11067_v53, %v11201_v12  ;;  %9127 = vmatmul.msk.bf16.gmra.mxu1 %vm1727_vm0, %v3331_v54  ;;  %v4543_v18 = vadd.f32 %v10870_v28, %v4051_v48  ;;  %v1652_v54 = vpack.c.b16 %v1456_v8, %v1455_v49  ;;  %v184_v53 = vld [vmem:[%s13713_s0 + $0x3f8] sm:$0xff] }
 0x3ac   :  { %v5709_v51 = vpop.f32.mrf.mxu2  ;;  %v945_v48 = vpack.c.bf16 %v689_v47, %v689_v47  ;;  %v692_v47 = vld [vmem:[%s13714_s1 + $0x3d8] sm:$0xff] }
 0x3ad   :  { %v7378_v50 = vpack.c.b16 %v7371_v61, %v7370_v55  ;;  %v5710_v0 = vadd.f32 %v11030_v52, %v5709_v51  ;;  %v4799_v19 = vmax.f32 %v4543_v18, 0.0  ;;  %v3332_v55 = vpack.c.b16 %v3136_v3, %v3135_v36  ;;  %v690_v51 = vld [vmem:[%s13714_s1 + $0x3c8] sm:$0xff] }
 0x3ae   :  { %v946_v23 = vpack.c.bf16 %v690_v51, %v690_v51  ;;  %v1457_v49 = vunpack.c.l.b16 %v945_v48  ;;  %v3137_v36 = vunpack.c.l.b16 %v433_v35  ;;  %v179_v51 = vld [vmem:[%s13713_s0 + $0x3d0] sm:$0xff]  ;;  %v436_v48 = vpack.c.bf16 %v180_v43, %v180_v43 }
 0x3af   :  { %9397 = vmatmul.msk.bf16.vlgmr.msra.gmra.mxu3 %vm5110_vm1, %v7378_v50  ;;  %v2373_v21 = vpop.f32.mrf.mxu0  ;;  %v6226_v60 = vmax.f32 %v5710_v0, 0.0  ;;  %v434_v0 = vpack.c.bf16 %v178_v30, %v178_v30  ;;  %v948_v30 = vpack.c.bf16 %v692_v47, %v692_v47 }
 0x3b0   :  { %v4052_v17 = vpop.f32.mrf.mxu1  ;;  %7536 = vmatpush.bf16.msra.mxu3 %v11088_v37  ;;  %v1458_v8 = vunpack.c.l.b16 %v946_v23 }
 0x3b1   :  { %v4053_v24 = vadd.f32 %v4052_v17, %v2373_v21  ;;  %v6482_v4 = vpack.c.bf16 %v6226_v60, %v6226_v60  ;;  %v11258_v17 = vld [vmem:[%s13717_s4] ss:$0 sm:$0xff] }
 0x3b2   :  { %v7265_v62 = vpop.f32.mrf.mxu3 }
 0x3b3   :  { %v4544_v56 = vadd.f32 %v10870_v28, %v4053_v24  ;;  %v11227_v7 = vmax.f32 %v7216_v41, %v7265_v62  ;;  %v7372_v41 = vunpack.c.l.b16 %v6482_v4  ;;  %v1653_v4 = vpack.c.b16 %v1458_v8, %v1457_v49 }
 0x3b4   :  { %v5711_v45 = vpop.f32.mrf.mxu2  ;;  %7537 = vmatpush.bf16.msra.mxu3 %v11100_v14 }
 0x3b5   :  { %v4800_v20 = vmax.f32 %v4544_v56, 0.0  ;;  %v5712_v13 = vadd.f32 %v11030_v52, %v5711_v45  ;;  %v3138_v45 = vunpack.c.l.b16 %v434_v0 }
 0x3b7   :  { %v5005_v34 = vpack.c.bf16 %v4800_v20, %v4799_v19  ;;  %v6227_v31 = vmax.f32 %v5712_v13, 0.0  ;;  %v2376_v61 = vpop.f32.mrf.mxu0 }
 0x3b8   :  { %v4055_v28 = vpop.f32.mrf.mxu1  ;;  %7538 = vmatpush.bf16.msra.mxu3 %v11107_v25 }
 0x3b9   :  { %v6483_v2 = vpack.c.bf16 %v6227_v31, %v6227_v31  ;;  %9263 = vmatmul.msk.bf16.gmra.mxu2 %vm5110_vm1, %v5005_v34 }
 0x3ba   :  { %v7267_v26 = vpop.f32.mrf.mxu3  ;;  %8996 = vmatmul.msk.bf16.gmra.mxu0 %vm1727_vm0, %v1652_v54 }
 0x3bb   :  { %v7373_v27 = vunpack.c.l.b16 %v6483_v2  ;;  %v11236_v6 = vmax.f32 %v7217_v44, %v7267_v26  ;;  %9128 = vmatmul.msk.bf16.gmra.mxu1 %vm1727_vm0, %v3332_v55  ;;  %v4056_v44 = vadd.f32 %v4055_v28, %v2376_v61  ;;  %v3333_v61 = vpack.c.b16 %v3138_v45, %v3137_v36 }
 0x3bc   :  { %v5714_v50 = vpop.f32.mrf.mxu2  ;;  %7539 = vmatpush.bf16.msra.mxu3 %v11132_v1  ;;  %v3140_v36 = vunpack.c.l.b16 %v436_v48 }
 0x3bd   :  { %v7379_v22 = vpack.c.b16 %v7373_v27, %v7372_v41  ;;  %v5715_v59 = vadd.f32 %v11030_v52, %v5714_v50  ;;  %v4545_v18 = vadd.f32 %v11258_v17, %v4056_v44  ;;  %v691_v27 = vld [vmem:[%s13714_s1 + $0x3d0] sm:$0xff] }
 0x3be   :  { %v947_v50 = vpack.c.bf16 %v691_v27, %v691_v27 }
 0x3bf   :  { %9398 = vmatmul.msk.bf16.gmra.mxu3 %vm5110_vm1, %v7379_v22  ;;  %v2378_v40 = vpop.f32.mrf.mxu0  ;;  %v6228_v60 = vmax.f32 %v5715_v59, 0.0  ;;  %v4801_v20 = vmax.f32 %v4545_v18, 0.0  ;;  %v435_v22 = vpack.c.bf16 %v179_v51, %v179_v51  ;;  %v1460_v18 = vunpack.c.l.b16 %v948_v30 }
 0x3c0   :  { %v4057_v21 = vpop.f32.mrf.mxu1 }
 0x3c1   :  { %v4058_v24 = vadd.f32 %v4057_v21, %v2378_v40  ;;  %v6484_v34 = vpack.c.bf16 %v6228_v60, %v6228_v60  ;;  %v1459_v21 = vunpack.c.l.b16 %v947_v50 }
 0x3c2   :  { %v7270_v62 = vpop.f32.mrf.mxu3 }
 0x3c3   :  { %v4546_v56 = vadd.f32 %v11258_v17, %v4058_v24  ;;  %v11265_v3 = vmax.f32 %v7218_v58, %v7270_v62  ;;  %v7374_v15 = vunpack.c.l.b16 %v6484_v34  ;;  %v3139_v24 = vunpack.c.l.b16 %v435_v22 }
 0x3c4   :  { %v5716_v19 = vpop.f32.mrf.mxu2 }
 0x3c5   :  { %v4802_v13 = vmax.f32 %v4546_v56, 0.0  ;;  %v5717_v54 = vadd.f32 %v11030_v52, %v5716_v19  ;;  %v3334_v34 = vpack.c.b16 %v3140_v36, %v3139_v24 }
 0x3c7   :  { %v5006_v31 = vpack.c.bf16 %v4802_v13, %v4801_v20  ;;  %v6229_v55 = vmax.f32 %v5717_v54, 0.0  ;;  %v2381_v28 = vpop.f32.mrf.mxu0  ;;  %v1654_v20 = vpack.c.b16 %v1460_v18, %v1459_v21 }
 0x3c8   :  { %v4060_v2 = vpop.f32.mrf.mxu1 }
 0x3c9   :  { %v6485_v26 = vpack.c.bf16 %v6229_v55, %v6229_v55  ;;  %9264 = vmatmul.msk.bf16.gmra.mxu2 %vm5110_vm1, %v5006_v31 }
 0x3ca   :  { %v7272_v41 = vpop.f32.mrf.mxu3  ;;  %8997 = vmatmul.msk.bf16.gmra.mxu0 %vm1727_vm0, %v1653_v4 }
 0x3cb   :  { %v7375_v39 = vunpack.c.l.b16 %v6485_v26  ;;  %v11272_v58 = vmax.f32 %v7219_v33, %v7272_v41  ;;  %9129 = vmatmul.msk.bf16.gmra.mxu1 %vm1727_vm0, %v3333_v61  ;;  %v4061_v33 = vadd.f32 %v4060_v2, %v2381_v28  ;;  %v693_v2 = vld [vmem:[%s13714_s1 + $0x3e0] sm:$0xff]  ;;  %v694_v26 = vld [vmem:[%s13714_s1 + $0x3e8] sm:$0xff] }
 0x3cc   :  { %v5719_v42 = vpop.f32.mrf.mxu2  ;;  %v181_v41 = vld [vmem:[%s13713_s0 + $0x3e0] sm:$0xff]  ;;  %v950_v27 = vpack.c.bf16 %v694_v26, %v694_v26 }
 0x3cd   :  { %v7380_v63 = vpack.c.b16 %v7375_v39, %v7374_v15  ;;  %v5720_v44 = vadd.f32 %v11030_v52, %v5719_v42  ;;  %v4547_v59 = vadd.f32 %v11258_v17, %v4061_v33  ;;  %v949_v39 = vpack.c.bf16 %v693_v2, %v693_v2 }
 0x3ce   :  { %v437_v47 = vpack.c.bf16 %v181_v41, %v181_v41  ;;  %v438_v42 = vpack.c.bf16 %v182_v5, %v182_v5 }
 0x3cf   :  { %9399 = vmatmul.msk.bf16.gmra.mxu3 %vm5110_vm1, %v7380_v63  ;;  %v2383_v23 = vpop.f32.mrf.mxu0  ;;  %v6230_v62 = vmax.f32 %v5720_v44, 0.0  ;;  %v4803_v56 = vmax.f32 %v4547_v59, 0.0  ;;  %v1461_v22 = vunpack.c.l.b16 %v949_v39  ;;  %v1462_v44 = vunpack.c.l.b16 %v950_v27 }
 0x3d0   :  { %v4062_v35 = vpop.f32.mrf.mxu1  ;;  %v3141_v48 = vunpack.c.l.b16 %v437_v47 }
 0x3d1   :  { %v4063_v0 = vadd.f32 %v4062_v35, %v2383_v23  ;;  %v6486_v13 = vpack.c.bf16 %v6230_v62, %v6230_v62  ;;  %v1655_v62 = vpack.c.b16 %v1462_v44, %v1461_v22 }
 0x3d2   :  { %v7275_v40 = vpop.f32.mrf.mxu3 }
 0x3d3   :  { %v4548_v49 = vadd.f32 %v11258_v17, %v4063_v0  ;;  %v11295_v8 = vmax.f32 %v7220_v9, %v7275_v40  ;;  %v7376_v16 = vunpack.c.l.b16 %v6486_v13  ;;  %v3142_v0 = vunpack.c.l.b16 %v438_v42 }
 0x3d4   :  { %v5721_v60 = vpop.f32.mrf.mxu2 }
 0x3d5   :  { %v4804_v45 = vmax.f32 %v4548_v49, 0.0  ;;  %v5722_v19 = vadd.f32 %v11030_v52, %v5721_v60 }
 0x3d7   :  { %v5007_v54 = vpack.c.bf16 %v4804_v45, %v4803_v56  ;;  %v6231_v4 = vmax.f32 %v5722_v19, 0.0  ;;  %v2386_v31 = vpop.f32.mrf.mxu0  ;;  %v3335_v56 = vpack.c.b16 %v3142_v0, %v3141_v48 }
 0x3d8   :  { %v4065_v55 = vpop.f32.mrf.mxu1 }
 0x3d9   :  { %v6487_v61 = vpack.c.bf16 %v6231_v4, %v6231_v4  ;;  %9265 = vmatmul.msk.bf16.gmra.mxu2 %vm5110_vm1, %v5007_v54  ;;  %v695_v54 = vld [vmem:[%s13714_s1 + $0x3f0] sm:$0xff]  ;;  %v696_v4 = vld [vmem:[%s13714_s1 + $0x3f8] sm:$0xff] }
 0x3da   :  { %v7277_v28 = vpop.f32.mrf.mxu3  ;;  %8998 = vmatmul.msk.bf16.gmra.mxu0 %vm1727_vm0, %v1654_v20 }
 0x3db   :  { %v7377_v46 = vunpack.c.l.b16 %v6487_v61  ;;  %v11302_v9 = vmax.f32 %v7221_v10, %v7277_v28  ;;  %9130 = vmatmul.msk.bf16.gmra.mxu1 %vm1727_vm0, %v3334_v34  ;;  %v4066_v10 = vadd.f32 %v4065_v55, %v2386_v31  ;;  %v183_v34 = vld [vmem:[%s13713_s0 + $0x3f0] sm:$0xff]  ;;  %v951_v55 = vpack.c.bf16 %v695_v54, %v695_v54 }
 0x3dc   :  { %v5724_v15 = vpop.f32.mrf.mxu2  ;;  %v952_v61 = vpack.c.bf16 %v696_v4, %v696_v4  ;;  %v439_v28 = vpack.c.bf16 %v183_v34, %v183_v34 }
 0x3dd   :  { %v7381_v29 = vpack.c.b16 %v7377_v46, %v7376_v16  ;;  %v5725_v51 = vadd.f32 %v11030_v52, %v5724_v15  ;;  %v4549_v33 = vadd.f32 %v11258_v17, %v4066_v10  ;;  %v440_v46 = vpack.c.bf16 %v184_v53, %v184_v53 }
 0x3de   :  { %v1464_v10 = vunpack.c.l.b16 %v952_v61  ;;  %v3143_v39 = vunpack.c.l.b16 %v439_v28 }
 0x3df   :  { %9400 = vmatmul.msk.bf16.gmra.mxu3 %vm5110_vm1, %v7381_v29  ;;  %v2388_v43 = vpop.f32.mrf.mxu0  ;;  %v6232_v23 = vmax.f32 %v5725_v51, 0.0  ;;  %v4805_v21 = vmax.f32 %v4549_v33, 0.0  ;;  %v1463_v29 = vunpack.c.l.b16 %v951_v55  ;;  %v3144_v42 = vunpack.c.l.b16 %v440_v46 }
 0x3e0   :  { %v4067_v63 = vpop.f32.mrf.mxu1 }
 0x3e1   :  { %v4068_v50 = vadd.f32 %v4067_v63, %v2388_v43  ;;  %v6488_v49 = vpack.c.bf16 %v6232_v23, %v6232_v23  ;;  %v3336_v48 = vpack.c.b16 %v3144_v42, %v3143_v39 }
 0x3e2   :  { %v7280_v30 = vpop.f32.mrf.mxu3 }
 0x3e3   :  { %v4550_v35 = vadd.f32 %v11258_v17, %v4068_v50  ;;  %v11325_v59 = vmax.f32 %v7222_v32, %v7280_v30  ;;  %v7439_v38 = vunpack.c.l.b16 %v6488_v49  ;;  %v1656_v50 = vpack.c.b16 %v1464_v10, %v1463_v29 }
 0x3e4   :  { %v5726_v40 = vpop.f32.mrf.mxu2 }
 0x3e5   :  { %v4806_v18 = vmax.f32 %v4550_v35, 0.0  ;;  %v5727_v24 = vadd.f32 %v11030_v52, %v5726_v40 }
 0x3e7   :  { %v5008_v36 = vpack.c.bf16 %v4806_v18, %v4805_v21  ;;  %v6233_v60 = vmax.f32 %v5727_v24, 0.0  ;;  %v2391_v45 = vpop.f32.mrf.mxu0  ;;  %v697_v24 = vld [vmem:[%s13714_s1 + $0x400] sm:$0xff] }
 0x3e8   :  { %v4070_v19 = vpop.f32.mrf.mxu1 }
 0x3e9   :  { %v6489_v20 = vpack.c.bf16 %v6233_v60, %v6233_v60  ;;  %9266 = vmatmul.msk.bf16.gmra.mxu2 %vm5110_vm1, %v5008_v36  ;;  %v186_v36 = vld [vmem:[%s13713_s0 + $0x408] sm:$0xff] }
 0x3ea   :  { %v7282_v13 = vpop.f32.mrf.mxu3  ;;  %8999 = vmatmul.msk.bf16.gmra.mxu0 %vm1727_vm0, %v1655_v62  ;;  %v185_v62 = vld [vmem:[%s13713_s0 + $0x400] sm:$0xff] }
 0x3eb   :  { %v7440_v57 = vunpack.c.l.b16 %v6489_v20  ;;  %v11332_v32 = vmax.f32 %v7223_v11, %v7282_v13  ;;  %9131 = vmatmul.msk.bf16.gmra.mxu1 %vm1727_vm0, %v3335_v56  ;;  %v4071_v11 = vadd.f32 %v4070_v19, %v2391_v45  ;;  %v953_v45 = vpack.c.bf16 %v697_v24, %v697_v24 }
 0x3ec   :  { %v5729_v31 = vpop.f32.mrf.mxu2  ;;  %v441_v20 = vpack.c.bf16 %v185_v62, %v185_v62 }
 0x3ed   :  { %v7447_v12 = vpack.c.b16 %v7440_v57, %v7439_v38  ;;  %v5730_v16 = vadd.f32 %v11030_v52, %v5729_v31  ;;  %v4551_v41 = vadd.f32 %v11258_v17, %v4071_v11  ;;  %v442_v38 = vpack.c.bf16 %v186_v36, %v186_v36 }
 0x3ee   :  { %v1465_v53 = vunpack.c.l.b16 %v953_v45 }
 0x3ef   :  { %9401 = vmatmul.msk.bf16.vlgmr.msrb.gmra.mxu3 %vm5110_vm1, %v7447_v12  ;;  %v2393_v2 = vpop.f32.mrf.mxu0  ;;  %v6234_v27 = vmax.f32 %v5730_v16, 0.0  ;;  %v4807_v63 = vmax.f32 %v4551_v41, 0.0  ;;  %v3146_v28 = vunpack.c.l.b16 %v442_v38 }
 0x3f0   :  { %v4072_v26 = vpop.f32.mrf.mxu1  ;;  %7605 = vmatpush.bf16.msrb.mxu3 %v11088_v37 }
 0x3f1   :  { %v4073_v15 = vadd.f32 %v4072_v26, %v2393_v2  ;;  %v6490_v30 = vpack.c.bf16 %v6234_v27, %v6234_v27 }
 0x3f2   :  { %v11352_v5 = vpop.f32.mrf.mxu3 }
 0x3f3   :  { %v4552_v47 = vadd.f32 %v11258_v17, %v4073_v15  ;;  %v7354_v51 = vmax.f32 %v11227_v7, %v11352_v5  ;;  %v7441_v21 = vunpack.c.l.b16 %v6490_v30  ;;  %v187_v30 = vld [vmem:[%s13713_s0 + $0x410] sm:$0xff] }
 0x3f4   :  { %v5731_v43 = vpop.f32.mrf.mxu2  ;;  %7606 = vmatpush.bf16.msrb.mxu3 %v11100_v14 }
 0x3f5   :  { %v4808_v37 = vmax.f32 %v4552_v47, 0.0  ;;  %v5732_v33 = vadd.f32 %v11030_v52, %v5731_v43 }
 0x3f7   :  { %v5009_v22 = vpack.c.bf16 %v4808_v37, %v4807_v63  ;;  %v6235_v44 = vmax.f32 %v5732_v33, 0.0  ;;  %v2396_v23 = vpop.f32.mrf.mxu0 }
 0x3f8   :  { %v4075_v35 = vpop.f32.mrf.mxu1  ;;  %7607 = vmatpush.bf16.msrb.mxu3 %v11107_v25  ;;  %v698_v25 = vld [vmem:[%s13714_s1 + $0x408] sm:$0xff] }
 0x3f9   :  { %v6491_v0 = vpack.c.bf16 %v6235_v44, %v6235_v44  ;;  %9267 = vmatmul.msk.bf16.gmra.mxu2 %vm5110_vm1, %v5009_v22  ;;  %v4076_v56 = vadd.f32 %v4075_v35, %v2396_v23  ;;  %v954_v19 = vpack.c.bf16 %v698_v25, %v698_v25  ;;  %v188_v44 = vld [vmem:[%s13713_s0 + $0x418] sm:$0xff] }
 0x3fa   :  { %v11361_v40 = vpop.f32.mrf.mxu3  ;;  %9000 = vmatmul.msk.bf16.gmra.mxu0 %vm1727_vm0, %v1656_v50  ;;  %v700_v50 = vld [vmem:[%s13714_s1 + $0x418] sm:$0xff]  ;;  %v444_v25 = vpack.c.bf16 %v188_v44, %v188_v44 }
 0x3fb   :  { %v7442_v14 = vunpack.c.l.b16 %v6491_v0  ;;  %v7355_v18 = vmax.f32 %v11236_v6, %v11361_v40  ;;  %9132 = vmatmul.msk.bf16.gmra.mxu1 %vm1727_vm0, %v3336_v48  ;;  %v4553_v4 = vadd.f32 %v11258_v17, %v4076_v56  ;;  %v1466_v12 = vunpack.c.l.b16 %v954_v19  ;;  %v194_v6 = vld [vmem:[%s13713_s0 + $0x448] sm:$0xff]  ;;  %v11520_v40 = vld [vmem:[%s13720_s7] sm:$0xff] }
 0x3fc   :  { %v5734_v49 = vpop.f32.mrf.mxu2  ;;  %7608 = vmatpush.bf16.msrb.mxu3 %v11132_v1  ;;  %v3145_v1 = vunpack.c.l.b16 %v441_v20  ;;  %v956_v0 = vpack.c.bf16 %v700_v50, %v700_v50 }
 0x3fd   :  { %v7448_v60 = vpack.c.b16 %v7442_v14, %v7441_v21  ;;  %v5735_v13 = vadd.f32 %v11030_v52, %v5734_v49  ;;  %v4809_v46 = vmax.f32 %v4553_v4, 0.0  ;;  %v1657_v41 = vpack.c.b16 %v1466_v12, %v1465_v53  ;;  %v11411_v14 = vld [vmem:[%s13719_s6] ss:$0 sm:$0xff] }
 0x3fe   :  { %v3337_v39 = vpack.c.b16 %v3146_v28, %v3145_v1  ;;  %v443_v21 = vpack.c.bf16 %v187_v30, %v187_v30  ;;  %v1468_v19 = vunpack.c.l.b16 %v956_v0 }
 0x3ff   :  { %9402 = vmatmul.msk.bf16.gmra.mxu3 %vm5110_vm1, %v7448_v60  ;;  %v2398_v57 = vpop.f32.mrf.mxu0  ;;  %v6236_v11 = vmax.f32 %v5735_v13, 0.0 }
 0x400   :  { %v4077_v54 = vpop.f32.mrf.mxu1  ;;  %v3147_v20 = vunpack.c.l.b16 %v443_v21 }
 0x401   :  { %v4078_v34 = vadd.f32 %v4077_v54, %v2398_v57  ;;  %v6492_v15 = vpack.c.bf16 %v6236_v11, %v6236_v11  ;;  %v3148_v54 = vunpack.c.l.b16 %v444_v25 }
 0x402   :  { %v11383_v31 = vpop.f32.mrf.mxu3 }
 0x403   :  { %v4554_v55 = vadd.f32 %v11258_v17, %v4078_v34  ;;  %v7356_v61 = vmax.f32 %v11265_v3, %v11383_v31  ;;  %v7443_v63 = vunpack.c.l.b16 %v6492_v15 }
 0x404   :  { %v5736_v16 = vpop.f32.mrf.mxu2 }
 0x405   :  { %v4810_v2 = vmax.f32 %v4554_v55, 0.0  ;;  %v5737_v26 = vadd.f32 %v11030_v52, %v5736_v16  ;;  %v699_v52 = vld [vmem:[%s13714_s1 + $0x410] sm:$0xff]  ;;  %v3338_v16 = vpack.c.b16 %v3148_v54, %v3147_v20 }
 0x406   :  { %v955_v35 = vpack.c.bf16 %v699_v52, %v699_v52 }
 0x407   :  { %v5010_v29 = vpack.c.bf16 %v4810_v2, %v4809_v46  ;;  %v6237_v10 = vmax.f32 %v5737_v26, 0.0  ;;  %v2401_v27 = vpop.f32.mrf.mxu0 }
 0x408   :  { %v4080_v47 = vpop.f32.mrf.mxu1  ;;  %v1467_v45 = vunpack.c.l.b16 %v955_v35 }
 0x409   :  { %v6493_v42 = vpack.c.bf16 %v6237_v10, %v6237_v10  ;;  %9268 = vmatmul.msk.bf16.gmra.mxu2 %vm5110_vm1, %v5010_v29  ;;  %v4081_v23 = vadd.f32 %v4080_v47, %v2401_v27  ;;  %v702_v27 = vld [vmem:[%s13714_s1 + $0x428] sm:$0xff]  ;;  %v189_v47 = vld [vmem:[%s13713_s0 + $0x420] sm:$0xff] }
 0x40a   :  { %v11390_v43 = vpop.f32.mrf.mxu3  ;;  %9001 = vmatmul.msk.bf16.gmra.mxu0 %vm1727_vm0, %v1657_v41  ;;  %v1658_v1 = vpack.c.b16 %v1468_v19, %v1467_v45  ;;  %v958_v30 = vpack.c.bf16 %v702_v27, %v702_v27 }
 0x40b   :  { %v7444_v37 = vunpack.c.l.b16 %v6493_v42  ;;  %v7357_v33 = vmax.f32 %v11272_v58, %v11390_v43  ;;  %9133 = vmatmul.msk.bf16.gmra.mxu1 %vm1727_vm0, %v3337_v39  ;;  %v4555_v36 = vadd.f32 %v11258_v17, %v4081_v23  ;;  %v701_v39 = vld [vmem:[%s13714_s1 + $0x420] sm:$0xff]  ;;  %v196_v58 = vld [vmem:[%s13713_s0 + $0x458] sm:$0xff] }
 0x40c   :  { %v5739_v22 = vpop.f32.mrf.mxu2  ;;  %v957_v50 = vpack.c.bf16 %v701_v39, %v701_v39  ;;  %v191_v39 = vld [vmem:[%s13713_s0 + $0x430] sm:$0xff] }
 0x40d   :  { %v7449_v48 = vpack.c.b16 %v7444_v37, %v7443_v63  ;;  %v5740_v24 = vadd.f32 %v11411_v14, %v5739_v22  ;;  %v4811_v34 = vmax.f32 %v4555_v36, 0.0  ;;  %v190_v63 = vld [vmem:[%s13713_s0 + $0x428] sm:$0xff]  ;;  %v445_v22 = vpack.c.bf16 %v189_v47, %v189_v47  ;;  %v192_v47 = vld [vmem:[%s13713_s0 + $0x438] sm:$0xff] }
 0x40e   :  { %v1469_v25 = vunpack.c.l.b16 %v957_v50  ;;  %v447_v50 = vpack.c.bf16 %v191_v39, %v191_v39  ;;  %v705_v39 = vld [vmem:[%s13714_s1 + $0x440] sm:$0xff] }
 0x40f   :  { %9403 = vmatmul.msk.bf16.gmra.mxu3 %vm5110_vm1, %v7449_v48  ;;  %v2403_v62 = vpop.f32.mrf.mxu0  ;;  %v6238_v13 = vmax.f32 %v5740_v24, 0.0  ;;  %v446_v48 = vpack.c.bf16 %v190_v63, %v190_v63 }
 0x410   :  { %v4082_v49 = vpop.f32.mrf.mxu1 }
 0x411   :  { %v4083_v60 = vadd.f32 %v4082_v49, %v2403_v62  ;;  %v6494_v11 = vpack.c.bf16 %v6238_v13, %v6238_v13  ;;  %v1470_v62 = vunpack.c.l.b16 %v958_v30  ;;  %v3149_v49 = vunpack.c.l.b16 %v445_v22 }
 0x412   :  { %v11416_v56 = vpop.f32.mrf.mxu3  ;;  %v3150_v19 = vunpack.c.l.b16 %v446_v48  ;;  %v448_v22 = vpack.c.bf16 %v192_v47, %v192_v47  ;;  %v193_v47 = vld [vmem:[%s13713_s0 + $0x440] sm:$0xff] }
 0x413   :  { %v4556_v38 = vadd.f32 %v11258_v17, %v4083_v60  ;;  %v7358_v57 = vmax.f32 %v11295_v8, %v11416_v56  ;;  %v7445_v15 = vunpack.c.l.b16 %v6494_v11 }
 0x414   :  { %v5741_v4 = vpop.f32.mrf.mxu2 }
 0x415   :  { %v4812_v53 = vmax.f32 %v4556_v38, 0.0  ;;  %v5742_v12 = vadd.f32 %v11411_v14, %v5741_v4  ;;  %v1659_v4 = vpack.c.b16 %v1470_v62, %v1469_v25 }
 0x417   :  { %v5011_v55 = vpack.c.bf16 %v4812_v53, %v4811_v34  ;;  %v6239_v28 = vmax.f32 %v5742_v12, 0.0  ;;  %v2406_v46 = vpop.f32.mrf.mxu0 }
 0x418   :  { %v4085_v2 = vpop.f32.mrf.mxu1 }
 0x419   :  { %v6495_v26 = vpack.c.bf16 %v6239_v28, %v6239_v28  ;;  %9269 = vmatmul.msk.bf16.gmra.mxu2 %vm5110_vm1, %v5011_v55  ;;  %v4086_v52 = vadd.f32 %v4085_v2, %v2406_v46 }
 0x41a   :  { %v11423_v41 = vpop.f32.mrf.mxu3  ;;  %9002 = vmatmul.msk.bf16.gmra.mxu0 %vm1727_vm0, %v1658_v1  ;;  %v3339_v1 = vpack.c.b16 %v3150_v19, %v3149_v49  ;;  %v3151_v49 = vunpack.c.l.b16 %v447_v50  ;;  %v449_v50 = vpack.c.bf16 %v193_v47, %v193_v47 }
 0x41b   :  { %v7446_v29 = vunpack.c.l.b16 %v6495_v26  ;;  %v7359_v10 = vmax.f32 %v11302_v9, %v11423_v41  ;;  %9134 = vmatmul.msk.bf16.gmra.mxu1 %vm1727_vm0, %v3338_v16  ;;  %v4557_v0 = vadd.f32 %v11258_v17, %v4086_v52  ;;  %v198_v9 = vld [vmem:[%s13713_s0 + $0x468] sm:$0xff] }
 0x41c   :  { %v5744_v42 = vpop.f32.mrf.mxu2 }
 0x41d   :  { %v7450_v37 = vpack.c.b16 %v7446_v29, %v7445_v15  ;;  %v5745_v44 = vadd.f32 %v11411_v14, %v5744_v42  ;;  %v4813_v13 = vmax.f32 %v4557_v0, 0.0  ;;  %v703_v15 = vld [vmem:[%s13714_s1 + $0x430] sm:$0xff]  ;;  %v704_v29 = vld [vmem:[%s13714_s1 + $0x438] sm:$0xff] }
 0x41e   :  { %v960_v52 = vpack.c.bf16 %v704_v29, %v704_v29 }
 0x41f   :  { %9404 = vmatmul.msk.bf16.gmra.mxu3 %vm5110_vm1, %v7450_v37  ;;  %v2408_v23 = vpop.f32.mrf.mxu0  ;;  %v6240_v36 = vmax.f32 %v5745_v44, 0.0  ;;  %v959_v37 = vpack.c.bf16 %v703_v15, %v703_v15 }
 0x420   :  { %v4087_v35 = vpop.f32.mrf.mxu1  ;;  %v1472_v62 = vunpack.c.l.b16 %v960_v52 }
 0x421   :  { %v4088_v21 = vadd.f32 %v4087_v35, %v2408_v23  ;;  %v6496_v34 = vpack.c.bf16 %v6240_v36, %v6240_v36  ;;  %v11474_v23 = vld [vmem:[%s13720_s7 + $0x18] sm:$0xff]  ;;  %v1471_v25 = vunpack.c.l.b16 %v959_v37  ;;  %v961_v37 = vpack.c.bf16 %v705_v39, %v705_v39 }
 0x422   :  { %v11444_v24 = vpop.f32.mrf.mxu3  ;;  %v708_v39 = vld [vmem:[%s13714_s1 + $0x458] sm:$0xff] }
 0x423   :  { %v4558_v60 = vadd.f32 %v11258_v17, %v4088_v21  ;;  %v7360_v45 = vmax.f32 %v11325_v59, %v11444_v24  ;;  %v7508_v46 = vunpack.c.l.b16 %v6496_v34 }
 0x424   :  { %v5746_v20 = vpop.f32.mrf.mxu2 }
 0x425   :  { %v4814_v38 = vmax.f32 %v4558_v60, 0.0  ;;  %v5747_v54 = vadd.f32 %v11411_v14, %v5746_v20  ;;  %v3152_v20 = vunpack.c.l.b16 %v448_v22  ;;  %v450_v22 = vpack.c.bf16 %v194_v6, %v194_v6 }
 0x426   :  { %v964_v6 = vpack.c.bf16 %v708_v39, %v708_v39 }
 0x427   :  { %v5012_v53 = vpack.c.bf16 %v4814_v38, %v4813_v13  ;;  %v6241_v12 = vmax.f32 %v5747_v54, 0.0  ;;  %v2411_v11 = vpop.f32.mrf.mxu0  ;;  %v11487_v38 = vld [vmem:[%s13720_s7 + $0x10] sm:$0xff]  ;;  %v3340_v7 = vpack.c.b16 %v3152_v20, %v3151_v49  ;;  %v3153_v49 = vunpack.c.l.b16 %v449_v50 }
 0x428   :  { %v4090_v55 = vpop.f32.mrf.mxu1 }
 0x429   :  { %v6497_v28 = vpack.c.bf16 %v6241_v12, %v6241_v12  ;;  %9270 = vmatmul.msk.bf16.gmra.mxu2 %vm5110_vm1, %v5012_v53  ;;  %v4091_v63 = vadd.f32 %v4090_v55, %v2411_v11  ;;  %v1660_v53 = vpack.c.b16 %v1472_v62, %v1471_v25  ;;  %v11494_v55 = vld [vmem:[%s13720_s7 + $0x8] sm:$0xff]  ;;  %v1473_v25 = vunpack.c.l.b16 %v961_v37 }
 0x42a   :  { %v11451_v16 = vpop.f32.mrf.mxu3  ;;  %9003 = vmatmul.msk.bf16.gmra.mxu0 %vm1727_vm0, %v1659_v4  ;;  %v452_v37 = vpack.c.bf16 %v196_v58, %v196_v58 }
 0x42b   :  { %v7509_v2 = vunpack.c.l.b16 %v6497_v28  ;;  %v7361_v26 = vmax.f32 %v11332_v32, %v11451_v16  ;;  %9135 = vmatmul.msk.bf16.gmra.mxu1 %vm1727_vm0, %v3339_v1  ;;  %v4559_v35 = vadd.f32 %v11258_v17, %v4091_v63  ;;  %v200_v32 = vld [vmem:[%s13713_s0 + $0x478] sm:$0xff] }
 0x42c   :  { %v5749_v27 = vpop.f32.mrf.mxu2 }
 0x42d   :  { %v7516_v42 = vpack.c.b16 %v7509_v2, %v7508_v46  ;;  %v5750_v30 = vadd.f32 %v11411_v14, %v5749_v27  ;;  %v4815_v54 = vmax.f32 %v4559_v35, 0.0  ;;  %v706_v27 = vld [vmem:[%s13714_s1 + $0x448] sm:$0xff] }
 0x42e   :  { %v962_v52 = vpack.c.bf16 %v706_v27, %v706_v27  ;;  %v195_v27 = vld [vmem:[%s13713_s0 + $0x450] sm:$0xff] }
 0x42f   :  { %9405 = vmatmul.msk.bf16.vlgmr.msra.gmra.mxu3 %vm5110_vm1, %v7516_v42  ;;  %v2413_v44 = vpop.f32.mrf.mxu0  ;;  %v6242_v36 = vmax.f32 %v5750_v30, 0.0 }
 0x430   :  { %v4092_v48 = vpop.f32.mrf.mxu1  ;;  %7674 = vmatpush.bf16.msra.mxu3 %v11474_v23  ;;  %v1474_v62 = vunpack.c.l.b16 %v962_v52 }
 0x431   :  { %v4093_v0 = vadd.f32 %v4092_v48, %v2413_v44  ;;  %v6498_v12 = vpack.c.bf16 %v6242_v36, %v6242_v36 }
 0x432   :  { %v7403_v21 = vpop.f32.mrf.mxu3 }
 0x433   :  { %v4560_v60 = vadd.f32 %v11258_v17, %v4093_v0  ;;  %v11482_v19 = vmax.f32 %v7354_v51, %v7403_v21  ;;  %v7510_v2 = vunpack.c.l.b16 %v6498_v12  ;;  %v1661_v12 = vpack.c.b16 %v1474_v62, %v1473_v25 }
 0x434   :  { %v5751_v13 = vpop.f32.mrf.mxu2  ;;  %7675 = vmatpush.bf16.msra.mxu3 %v11487_v38 }
 0x435   :  { %v4816_v4 = vmax.f32 %v4560_v60, 0.0  ;;  %v5752_v34 = vadd.f32 %v11411_v14, %v5751_v13  ;;  %v3154_v13 = vunpack.c.l.b16 %v450_v22 }
 0x437   :  { %v5013_v1 = vpack.c.bf16 %v4816_v4, %v4815_v54  ;;  %v6243_v11 = vmax.f32 %v5752_v34, 0.0  ;;  %v2416_v5 = vpop.f32.mrf.mxu0 }
 0x438   :  { %v4095_v51 = vpop.f32.mrf.mxu1  ;;  %7676 = vmatpush.bf16.msra.mxu3 %v11494_v55 }
 0x439   :  { %v6499_v28 = vpack.c.bf16 %v6243_v11, %v6243_v11  ;;  %9271 = vmatmul.msk.bf16.gmra.mxu2 %vm5110_vm1, %v5013_v1  ;;  %v4096_v63 = vadd.f32 %v4095_v51, %v2416_v5  ;;  %v3341_v5 = vpack.c.b16 %v3154_v13, %v3153_v49  ;;  %v3156_v49 = vunpack.c.l.b16 %v452_v37 }
 0x43a   :  { %v7405_v46 = vpop.f32.mrf.mxu3  ;;  %9004 = vmatmul.msk.bf16.gmra.mxu0 %vm1727_vm0, %v1660_v53 }
 0x43b   :  { %v7511_v15 = vunpack.c.l.b16 %v6499_v28  ;;  %v11501_v29 = vmax.f32 %v7355_v18, %v7405_v46  ;;  %9136 = vmatmul.msk.bf16.gmra.mxu1 %vm1727_vm0, %v3340_v7  ;;  %v4561_v35 = vadd.f32 %v11258_v17, %v4096_v63 }
 0x43c   :  { %v5754_v42 = vpop.f32.mrf.mxu2  ;;  %7677 = vmatpush.bf16.msra.mxu3 %v11520_v40 }
 0x43d   :  { %v7517_v18 = vpack.c.b16 %v7511_v15, %v7510_v2  ;;  %v5755_v30 = vadd.f32 %v11411_v14, %v5754_v42  ;;  %v4817_v4 = vmax.f32 %v4561_v35, 0.0  ;;  %v707_v15 = vld [vmem:[%s13714_s1 + $0x450] sm:$0xff]  ;;  %v1476_v35 = vunpack.c.l.b16 %v964_v6 }
 0x43e   :  { %v963_v42 = vpack.c.bf16 %v707_v15, %v707_v15 }
 0x43f   :  { %9406 = vmatmul.msk.bf16.gmra.mxu3 %vm5110_vm1, %v7517_v18  ;;  %v2418_v44 = vpop.f32.mrf.mxu0  ;;  %v6244_v36 = vmax.f32 %v5755_v30, 0.0  ;;  %v451_v18 = vpack.c.bf16 %v195_v27, %v195_v27 }
 0x440   :  { %v4097_v48 = vpop.f32.mrf.mxu1 }
 0x441   :  { %v4098_v0 = vadd.f32 %v4097_v48, %v2418_v44  ;;  %v6500_v1 = vpack.c.bf16 %v6244_v36, %v6244_v36  ;;  %v1475_v48 = vunpack.c.l.b16 %v963_v42 }
 0x442   :  { %v7408_v21 = vpop.f32.mrf.mxu3 }
 0x443   :  { %v4562_v60 = vadd.f32 %v11258_v17, %v4098_v0  ;;  %v11530_v20 = vmax.f32 %v7356_v61, %v7408_v21  ;;  %v7512_v3 = vunpack.c.l.b16 %v6500_v1  ;;  %v3155_v0 = vunpack.c.l.b16 %v451_v18 }
 0x444   :  { %v5756_v54 = vpop.f32.mrf.mxu2 }
 0x445   :  { %v4818_v34 = vmax.f32 %v4562_v60, 0.0  ;;  %v5757_v53 = vadd.f32 %v11411_v14, %v5756_v54  ;;  %v3342_v1 = vpack.c.b16 %v3156_v49, %v3155_v0 }
 0x447   :  { %v5014_v11 = vpack.c.bf16 %v4818_v34, %v4817_v4  ;;  %v6245_v7 = vmax.f32 %v5757_v53, 0.0  ;;  %v2421_v51 = vpop.f32.mrf.mxu0  ;;  %v1662_v4 = vpack.c.b16 %v1476_v35, %v1475_v48 }
 0x448   :  { %v4100_v28 = vpop.f32.mrf.mxu1 }
 0x449   :  { %v6501_v46 = vpack.c.bf16 %v6245_v7, %v6245_v7  ;;  %9272 = vmatmul.msk.bf16.gmra.mxu2 %vm5110_vm1, %v5014_v11 }
 0x44a   :  { %v7410_v2 = vpop.f32.mrf.mxu3  ;;  %9005 = vmatmul.msk.bf16.gmra.mxu0 %vm1727_vm0, %v1661_v12 }
 0x44b   :  { %v7513_v31 = vunpack.c.l.b16 %v6501_v46  ;;  %v11537_v61 = vmax.f32 %v7357_v33, %v7410_v2  ;;  %9137 = vmatmul.msk.bf16.gmra.mxu1 %vm1727_vm0, %v3341_v5  ;;  %v4101_v33 = vadd.f32 %v4100_v28, %v2421_v51  ;;  %v709_v28 = vld [vmem:[%s13714_s1 + $0x460] sm:$0xff]  ;;  %v710_v46 = vld [vmem:[%s13714_s1 + $0x468] sm:$0xff] }
 0x44c   :  { %v5759_v47 = vpop.f32.mrf.mxu2  ;;  %v197_v2 = vld [vmem:[%s13713_s0 + $0x460] sm:$0xff]  ;;  %v966_v15 = vpack.c.bf16 %v710_v46, %v710_v46 }
 0x44d   :  { %v7518_v43 = vpack.c.b16 %v7513_v31, %v7512_v3  ;;  %v5760_v63 = vadd.f32 %v11411_v14, %v5759_v47  ;;  %v4563_v30 = vadd.f32 %v11258_v17, %v4101_v33  ;;  %v965_v31 = vpack.c.bf16 %v709_v28, %v709_v28 }
 0x44e   :  { %v453_v39 = vpack.c.bf16 %v197_v2, %v197_v2  ;;  %v454_v47 = vpack.c.bf16 %v198_v9, %v198_v9 }
 0x44f   :  { %9407 = vmatmul.msk.bf16.gmra.mxu3 %vm5110_vm1, %v7518_v43  ;;  %v2423_v52 = vpop.f32.mrf.mxu0  ;;  %v6246_v21 = vmax.f32 %v5760_v63, 0.0  ;;  %v4819_v60 = vmax.f32 %v4563_v30, 0.0  ;;  %v1477_v18 = vunpack.c.l.b16 %v965_v31  ;;  %v1478_v63 = vunpack.c.l.b16 %v966_v15 }
 0x450   :  { %v4102_v50 = vpop.f32.mrf.mxu1  ;;  %v3157_v37 = vunpack.c.l.b16 %v453_v39 }
 0x451   :  { %v4103_v22 = vadd.f32 %v4102_v50, %v2423_v52  ;;  %v6502_v34 = vpack.c.bf16 %v6246_v21, %v6246_v21  ;;  %v1663_v21 = vpack.c.b16 %v1478_v63, %v1477_v18 }
 0x452   :  { %v7413_v44 = vpop.f32.mrf.mxu3 }
 0x453   :  { %v4564_v25 = vadd.f32 %v11258_v17, %v4103_v22  ;;  %v11560_v62 = vmax.f32 %v7358_v57, %v7413_v44  ;;  %v7514_v8 = vunpack.c.l.b16 %v6502_v34  ;;  %v3158_v22 = vunpack.c.l.b16 %v454_v47 }
 0x454   :  { %v5761_v36 = vpop.f32.mrf.mxu2 }
 0x455   :  { %v4820_v13 = vmax.f32 %v4564_v25, 0.0  ;;  %v5762_v54 = vadd.f32 %v11411_v14, %v5761_v36 }
 0x457   :  { %v5015_v53 = vpack.c.bf16 %v4820_v13, %v4819_v60  ;;  %v6247_v12 = vmax.f32 %v5762_v54, 0.0  ;;  %v2426_v11 = vpop.f32.mrf.mxu0  ;;  %v3343_v60 = vpack.c.b16 %v3158_v22, %v3157_v37 }
 0x458   :  { %v4105_v7 = vpop.f32.mrf.mxu1 }
 0x459   :  { %v6503_v5 = vpack.c.bf16 %v6247_v12, %v6247_v12  ;;  %9273 = vmatmul.msk.bf16.gmra.mxu2 %vm5110_vm1, %v5015_v53  ;;  %v711_v53 = vld [vmem:[%s13714_s1 + $0x470] sm:$0xff]  ;;  %v712_v12 = vld [vmem:[%s13714_s1 + $0x478] sm:$0xff] }
 0x45a   :  { %v7415_v51 = vpop.f32.mrf.mxu3  ;;  %9006 = vmatmul.msk.bf16.gmra.mxu0 %vm1727_vm0, %v1662_v4 }
 0x45b   :  { %v7515_v56 = vunpack.c.l.b16 %v6503_v5  ;;  %v11567_v57 = vmax.f32 %v7359_v10, %v7415_v51  ;;  %9138 = vmatmul.msk.bf16.gmra.mxu1 %vm1727_vm0, %v3342_v1  ;;  %v4106_v10 = vadd.f32 %v4105_v7, %v2426_v11  ;;  %v199_v1 = vld [vmem:[%s13713_s0 + $0x470] sm:$0xff]  ;;  %v967_v7 = vpack.c.bf16 %v711_v53, %v711_v53 }
 0x45c   :  { %v5764_v3 = vpop.f32.mrf.mxu2  ;;  %v968_v5 = vpack.c.bf16 %v712_v12, %v712_v12  ;;  %v455_v51 = vpack.c.bf16 %v199_v1, %v199_v1 }
 0x45d   :  { %v7519_v41 = vpack.c.b16 %v7515_v56, %v7514_v8  ;;  %v5765_v27 = vadd.f32 %v11411_v14, %v5764_v3  ;;  %v4565_v33 = vadd.f32 %v11258_v17, %v4106_v10  ;;  %v456_v56 = vpack.c.bf16 %v200_v32, %v200_v32 }
 0x45e   :  { %v1480_v10 = vunpack.c.l.b16 %v968_v5  ;;  %v3159_v31 = vunpack.c.l.b16 %v455_v51 }
 0x45f   :  { %9408 = vmatmul.msk.bf16.gmra.mxu3 %vm5110_vm1, %v7519_v41  ;;  %v2428_v58 = vpop.f32.mrf.mxu0  ;;  %v6248_v52 = vmax.f32 %v5765_v27, 0.0  ;;  %v4821_v48 = vmax.f32 %v4565_v33, 0.0  ;;  %v1479_v41 = vunpack.c.l.b16 %v967_v7  ;;  %v3160_v47 = vunpack.c.l.b16 %v456_v56 }
 0x460   :  { %v4107_v43 = vpop.f32.mrf.mxu1 }
 0x461   :  { %v4108_v42 = vadd.f32 %v4107_v43, %v2428_v58  ;;  %v6504_v25 = vpack.c.bf16 %v6248_v52, %v6248_v52  ;;  %v3344_v52 = vpack.c.b16 %v3160_v47, %v3159_v31 }
 0x462   :  { %v7418_v6 = vpop.f32.mrf.mxu3 }
 0x463   :  { %v4566_v50 = vadd.f32 %v11258_v17, %v4108_v42  ;;  %v11590_v30 = vmax.f32 %v7360_v45, %v7418_v6  ;;  %v7577_v59 = vunpack.c.l.b16 %v6504_v25  ;;  %v1664_v6 = vpack.c.b16 %v1480_v10, %v1479_v41  ;;  %v714_v25 = vld [vmem:[%s13714_s1 + $0x488] sm:$0xff] }
 0x464   :  { %v5766_v44 = vpop.f32.mrf.mxu2 }
 0x465   :  { %v4822_v35 = vmax.f32 %v4566_v50, 0.0  ;;  %v5767_v0 = vadd.f32 %v11411_v14, %v5766_v44 }
 0x467   :  { %v5016_v49 = vpack.c.bf16 %v4822_v35, %v4821_v48  ;;  %v6249_v36 = vmax.f32 %v5767_v0, 0.0  ;;  %v2431_v13 = vpop.f32.mrf.mxu0 }
 0x468   :  { %v4110_v54 = vpop.f32.mrf.mxu1 }
 0x469   :  { %v6505_v4 = vpack.c.bf16 %v6249_v36, %v6249_v36  ;;  %9274 = vmatmul.msk.bf16.gmra.mxu2 %vm5110_vm1, %v5016_v49  ;;  %v201_v49 = vld [vmem:[%s13713_s0 + $0x480] sm:$0xff] }
 0x46a   :  { %v7420_v34 = vpop.f32.mrf.mxu3  ;;  %9007 = vmatmul.msk.bf16.gmra.mxu0 %vm1727_vm0, %v1663_v21  ;;  %v713_v21 = vld [vmem:[%s13714_s1 + $0x480] sm:$0xff] }
 0x46b   :  { %v7578_v24 = vunpack.c.l.b16 %v6505_v4  ;;  %v11597_v45 = vmax.f32 %v7361_v26, %v7420_v34  ;;  %9139 = vmatmul.msk.bf16.gmra.mxu1 %vm1727_vm0, %v3343_v60  ;;  %v4111_v26 = vadd.f32 %v4110_v54, %v2431_v13  ;;  %v202_v60 = vld [vmem:[%s13713_s0 + $0x488] sm:$0xff]  ;;  %v969_v4 = vpack.c.bf16 %v713_v21, %v713_v21 }
 0x46c   :  { %v5769_v11 = vpop.f32.mrf.mxu2  ;;  %v970_v34 = vpack.c.bf16 %v714_v25, %v714_v25  ;;  %v458_v53 = vpack.c.bf16 %v202_v60, %v202_v60 }
 0x46d   :  { %v7585_v16 = vpack.c.b16 %v7578_v24, %v7577_v59  ;;  %v5770_v8 = vadd.f32 %v11411_v14, %v5769_v11  ;;  %v4567_v2 = vadd.f32 %v11258_v17, %v4111_v26  ;;  %v457_v59 = vpack.c.bf16 %v201_v49, %v201_v49  ;;  %v11650_v11 = vld [vmem:[%s13717_s4] ss:$0 sm:$0xff] }
 0x46e   :  { %v1481_v7 = vunpack.c.l.b16 %v969_v4  ;;  %v1482_v5 = vunpack.c.l.b16 %v970_v34 }
 0x46f   :  { %9409 = vmatmul.msk.bf16.vlgmr.msrb.gmra.mxu3 %vm5110_vm1, %v7585_v16  ;;  %v2433_v28 = vpop.f32.mrf.mxu0  ;;  %v6250_v15 = vmax.f32 %v5770_v8, 0.0  ;;  %v4823_v43 = vmax.f32 %v4567_v2, 0.0  ;;  %v3161_v51 = vunpack.c.l.b16 %v457_v59 }
 0x470   :  { %v4112_v46 = vpop.f32.mrf.mxu1  ;;  %7743 = vmatpush.bf16.msrb.mxu3 %v11474_v23  ;;  %v1665_v31 = vpack.c.b16 %v1482_v5, %v1481_v7 }
 0x471   :  { %v4113_v3 = vadd.f32 %v4112_v46, %v2433_v28  ;;  %v6506_v18 = vpack.c.bf16 %v6250_v15, %v6250_v15  ;;  %v3162_v46 = vunpack.c.l.b16 %v458_v53 }
 0x472   :  { %v11617_v9 = vpop.f32.mrf.mxu3 }
 0x473   :  { %v4568_v39 = vadd.f32 %v11258_v17, %v4113_v3  ;;  %v7492_v27 = vmax.f32 %v11482_v19, %v11617_v9  ;;  %v7579_v48 = vunpack.c.l.b16 %v6506_v18 }
 0x474   :  { %v5771_v58 = vpop.f32.mrf.mxu2  ;;  %7744 = vmatpush.bf16.msrb.mxu3 %v11487_v38 }
 0x475   :  { %v4824_v33 = vmax.f32 %v4568_v39, 0.0  ;;  %v5772_v42 = vadd.f32 %v11411_v14, %v5771_v58  ;;  %v3345_v58 = vpack.c.b16 %v3162_v46, %v3161_v51 }
 0x477   :  { %v5017_v63 = vpack.c.bf16 %v4824_v33, %v4823_v43  ;;  %v6251_v37 = vmax.f32 %v5772_v42, 0.0  ;;  %v2436_v50 = vpop.f32.mrf.mxu0 }
 0x478   :  { %v4115_v22 = vpop.f32.mrf.mxu1  ;;  %7745 = vmatpush.bf16.msrb.mxu3 %v11494_v55 }
 0x479   :  { %v6507_v17 = vpack.c.bf16 %v6251_v37, %v6251_v37  ;;  %9275 = vmatmul.msk.bf16.gmra.mxu2 %vm5110_vm1, %v5017_v63  ;;  %v4116_v54 = vadd.f32 %v4115_v22, %v2436_v50  ;;  %v716_v50 = vld [vmem:[%s13714_s1 + $0x498] sm:$0xff]  ;;  %v203_v22 = vld [vmem:[%s13713_s0 + $0x490] sm:$0xff] }
 0x47a   :  { %v11626_v44 = vpop.f32.mrf.mxu3  ;;  %9008 = vmatmul.msk.bf16.gmra.mxu0 %vm1727_vm0, %v1664_v6  ;;  %v972_v49 = vpack.c.bf16 %v716_v50, %v716_v50 }
 0x47b   :  { %v7580_v35 = vunpack.c.l.b16 %v6507_v17  ;;  %v7493_v0 = vmax.f32 %v11501_v29, %v11626_v44  ;;  %9140 = vmatmul.msk.bf16.gmra.mxu1 %vm1727_vm0, %v3344_v52  ;;  %v4569_v32 = vadd.f32 %v11650_v11, %v4116_v54  ;;  %v715_v52 = vld [vmem:[%s13714_s1 + $0x490] sm:$0xff]  ;;  %v210_v29 = vld [vmem:[%s13713_s0 + $0x4c8] sm:$0xff] }
 0x47c   :  { %v5774_v36 = vpop.f32.mrf.mxu2  ;;  %7746 = vmatpush.bf16.msrb.mxu3 %v11520_v40  ;;  %v971_v25 = vpack.c.bf16 %v715_v52, %v715_v52  ;;  %v205_v52 = vld [vmem:[%s13713_s0 + $0x4a0] sm:$0xff] }
 0x47d   :  { %v7586_v13 = vpack.c.b16 %v7580_v35, %v7579_v48  ;;  %v5775_v24 = vadd.f32 %v11411_v14, %v5774_v36  ;;  %v4825_v3 = vmax.f32 %v4569_v32, 0.0  ;;  %v204_v48 = vld [vmem:[%s13713_s0 + $0x498] sm:$0xff]  ;;  %v459_v36 = vpack.c.bf16 %v203_v22, %v203_v22  ;;  %v206_v22 = vld [vmem:[%s13713_s0 + $0x4a8] sm:$0xff] }
 0x47e   :  { %v1483_v53 = vunpack.c.l.b16 %v971_v25  ;;  %v461_v25 = vpack.c.bf16 %v205_v52, %v205_v52  ;;  %v719_v52 = vld [vmem:[%s13714_s1 + $0x4b0] sm:$0xff] }
 0x47f   :  { %9410 = vmatmul.msk.bf16.gmra.mxu3 %vm5110_vm1, %v7586_v13  ;;  %v2438_v12 = vpop.f32.mrf.mxu0  ;;  %v6252_v8 = vmax.f32 %v5775_v24, 0.0  ;;  %v460_v13 = vpack.c.bf16 %v204_v48, %v204_v48 }
 0x480   :  { %v4117_v1 = vpop.f32.mrf.mxu1 }
 0x481   :  { %v4118_v16 = vadd.f32 %v4117_v1, %v2438_v12  ;;  %v6508_v15 = vpack.c.bf16 %v6252_v8, %v6252_v8  ;;  %v1484_v12 = vunpack.c.l.b16 %v972_v49  ;;  %v3163_v1 = vunpack.c.l.b16 %v459_v36 }
 0x482   :  { %v11653_v26 = vpop.f32.mrf.mxu3  ;;  %v3164_v5 = vunpack.c.l.b16 %v460_v13  ;;  %v462_v36 = vpack.c.bf16 %v206_v22, %v206_v22  ;;  %v207_v22 = vld [vmem:[%s13713_s0 + $0x4b0] sm:$0xff] }
 0x483   :  { %v4570_v56 = vadd.f32 %v11650_v11, %v4118_v16  ;;  %v7494_v28 = vmax.f32 %v11530_v20, %v11653_v26  ;;  %v7581_v18 = vunpack.c.l.b16 %v6508_v15 }
 0x484   :  { %v5776_v2 = vpop.f32.mrf.mxu2 }
 0x485   :  { %v4826_v41 = vmax.f32 %v4570_v56, 0.0  ;;  %v5777_v10 = vadd.f32 %v11411_v14, %v5776_v2  ;;  %v1666_v2 = vpack.c.b16 %v1484_v12, %v1483_v53  ;;  %v3165_v12 = vunpack.c.l.b16 %v461_v25 }
 0x486   :  { %v975_v25 = vpack.c.bf16 %v719_v52, %v719_v52 }
 0x487   :  { %v5018_v39 = vpack.c.bf16 %v4826_v41, %v4825_v3  ;;  %v6253_v47 = vmax.f32 %v5777_v10, 0.0  ;;  %v2441_v43 = vpop.f32.mrf.mxu0 }
 0x488   :  { %v4120_v33 = vpop.f32.mrf.mxu1 }
 0x489   :  { %v6509_v42 = vpack.c.bf16 %v6253_v47, %v6253_v47  ;;  %9276 = vmatmul.msk.bf16.gmra.mxu2 %vm5110_vm1, %v5018_v39  ;;  %v4121_v21 = vadd.f32 %v4120_v33, %v2441_v43 }
 0x48a   :  { %v11660_v6 = vpop.f32.mrf.mxu3  ;;  %9009 = vmatmul.msk.bf16.gmra.mxu0 %vm1727_vm0, %v1665_v31  ;;  %v3346_v31 = vpack.c.b16 %v3164_v5, %v3163_v1  ;;  %v3166_v5 = vunpack.c.l.b16 %v462_v36  ;;  %v463_v36 = vpack.c.bf16 %v207_v22, %v207_v22  ;;  %v209_v22 = vld [vmem:[%s13713_s0 + $0x4c0] sm:$0xff] }
 0x48b   :  { %v7582_v63 = vunpack.c.l.b16 %v6509_v42  ;;  %v7495_v37 = vmax.f32 %v11537_v61, %v11660_v6  ;;  %9141 = vmatmul.msk.bf16.gmra.mxu1 %vm1727_vm0, %v3345_v58  ;;  %v4571_v34 = vadd.f32 %v11650_v11, %v4121_v21  ;;  %v212_v61 = vld [vmem:[%s13713_s0 + $0x4d8] sm:$0xff] }
 0x48c   :  { %v5779_v17 = vpop.f32.mrf.mxu2 }
 0x48d   :  { %v7587_v35 = vpack.c.b16 %v7582_v63, %v7581_v18  ;;  %v5780_v60 = vadd.f32 %v11411_v14, %v5779_v17  ;;  %v4827_v8 = vmax.f32 %v4571_v34, 0.0  ;;  %v717_v18 = vld [vmem:[%s13714_s1 + $0x4a0] sm:$0xff]  ;;  %v718_v63 = vld [vmem:[%s13714_s1 + $0x4a8] sm:$0xff] }
 0x48e   :  { %v974_v21 = vpack.c.bf16 %v718_v63, %v718_v63 }
 0x48f   :  { %9411 = vmatmul.msk.bf16.gmra.mxu3 %vm5110_vm1, %v7587_v35  ;;  %v2443_v54 = vpop.f32.mrf.mxu0  ;;  %v6254_v32 = vmax.f32 %v5780_v60, 0.0  ;;  %v973_v35 = vpack.c.bf16 %v717_v18, %v717_v18 }
 0x490   :  { %v4122_v4 = vpop.f32.mrf.mxu1  ;;  %v1486_v53 = vunpack.c.l.b16 %v974_v21 }
 0x491   :  { %v4123_v59 = vadd.f32 %v4122_v4, %v2443_v54  ;;  %v6510_v3 = vpack.c.bf16 %v6254_v32, %v6254_v32 }
 0x492   :  { %v11681_v24 = vpop.f32.mrf.mxu3 }
 0x493   :  { %v4572_v16 = vadd.f32 %v11650_v11, %v4123_v59  ;;  %v7496_v7 = vmax.f32 %v11560_v62, %v11681_v24  ;;  %v7583_v43 = vunpack.c.l.b16 %v6510_v3  ;;  %v1485_v59 = vunpack.c.l.b16 %v973_v35 }
 0x494   :  { %v5781_v51 = vpop.f32.mrf.mxu2 }
 0x495   :  { %v4828_v56 = vmax.f32 %v4572_v16, 0.0  ;;  %v5782_v46 = vadd.f32 %v11411_v14, %v5781_v51 }
 0x497   :  { %v5019_v41 = vpack.c.bf16 %v4828_v56, %v4827_v8  ;;  %v6255_v10 = vmax.f32 %v5782_v46, 0.0  ;;  %v2446_v15 = vpop.f32.mrf.mxu0 }
 0x498   :  { %v4125_v39 = vpop.f32.mrf.mxu1 }
 0x499   :  { %v6511_v47 = vpack.c.bf16 %v6255_v10, %v6255_v10  ;;  %9277 = vmatmul.msk.bf16.gmra.mxu2 %vm5110_vm1, %v5019_v41  ;;  %v4126_v48 = vadd.f32 %v4125_v39, %v2446_v15 }
 0x49a   :  { %v11688_v58 = vpop.f32.mrf.mxu3  ;;  %9010 = vmatmul.msk.bf16.gmra.mxu0 %vm1727_vm0, %v1666_v2  ;;  %v1667_v2 = vpack.c.b16 %v1486_v53, %v1485_v59 }
 0x49b   :  { %v7584_v33 = vunpack.c.l.b16 %v6511_v47  ;;  %v7497_v42 = vmax.f32 %v11567_v57, %v11688_v58  ;;  %9142 = vmatmul.msk.bf16.gmra.mxu1 %vm1727_vm0, %v3346_v31  ;;  %v4573_v54 = vadd.f32 %v11650_v11, %v4126_v48  ;;  %v3347_v31 = vpack.c.b16 %v3166_v5, %v3165_v12  ;;  %v208_v48 = vld [vmem:[%s13713_s0 + $0x4b8] sm:$0xff]  ;;  %v214_v57 = vld [vmem:[%s13713_s0 + $0x4e8] sm:$0xff] }
 0x49c   :  { %v5784_v50 = vpop.f32.mrf.mxu2  ;;  %v3167_v5 = vunpack.c.l.b16 %v463_v36 }
 0x49d   :  { %v7588_v17 = vpack.c.b16 %v7584_v33, %v7583_v43  ;;  %v5785_v49 = vadd.f32 %v11411_v14, %v5784_v50  ;;  %v4829_v8 = vmax.f32 %v4573_v54, 0.0  ;;  %v720_v50 = vld [vmem:[%s13714_s1 + $0x4b8] sm:$0xff] }
 0x49f   :  { %9412 = vmatmul.msk.bf16.gmra.mxu3 %vm5110_vm1, %v7588_v17  ;;  %v2448_v60 = vpop.f32.mrf.mxu0  ;;  %v6256_v1 = vmax.f32 %v5785_v49, 0.0  ;;  %v976_v49 = vpack.c.bf16 %v720_v50, %v720_v50  ;;  %v721_v50 = vld [vmem:[%s13714_s1 + $0x4c0] sm:$0xff] }
 0x4a0   :  { %v4127_v13 = vpop.f32.mrf.mxu1 }
 0x4a1   :  { %v4128_v4 = vadd.f32 %v4127_v13, %v2448_v60  ;;  %v6512_v3 = vpack.c.bf16 %v6256_v1, %v6256_v1  ;;  %v464_v13 = vpack.c.bf16 %v208_v48, %v208_v48  ;;  %v1487_v1 = vunpack.c.l.b16 %v975_v25 }
 0x4a2   :  { %v11709_v34 = vpop.f32.mrf.mxu3  ;;  %v977_v48 = vpack.c.bf16 %v721_v50, %v721_v50 }
 0x4a3   :  { %v4574_v32 = vadd.f32 %v11650_v11, %v4128_v4  ;;  %v7498_v16 = vmax.f32 %v11590_v30, %v11709_v34  ;;  %v7646_v33 = vunpack.c.l.b16 %v6512_v3 }
 0x4a4   :  { %v5786_v51 = vpop.f32.mrf.mxu2 }
 0x4a5   :  { %v4830_v56 = vmax.f32 %v4574_v32, 0.0  ;;  %v5787_v46 = vadd.f32 %v11411_v14, %v5786_v51  ;;  %v1488_v32 = vunpack.c.l.b16 %v976_v49  ;;  %v466_v49 = vpack.c.bf16 %v210_v29, %v210_v29 }
 0x4a7   :  { %v5020_v41 = vpack.c.bf16 %v4830_v56, %v4829_v8  ;;  %v6257_v10 = vmax.f32 %v5787_v46, 0.0  ;;  %v2451_v15 = vpop.f32.mrf.mxu0  ;;  %v3168_v46 = vunpack.c.l.b16 %v464_v13 }
 0x4a8   :  { %v4130_v39 = vpop.f32.mrf.mxu1 }
 0x4a9   :  { %v6513_v47 = vpack.c.bf16 %v6257_v10, %v6257_v10  ;;  %9278 = vmatmul.msk.bf16.gmra.mxu2 %vm5110_vm1, %v5020_v41  ;;  %v4131_v21 = vadd.f32 %v4130_v39, %v2451_v15  ;;  %v1668_v10 = vpack.c.b16 %v1488_v32, %v1487_v1 }
 0x4aa   :  { %v11716_v43 = vpop.f32.mrf.mxu3  ;;  %9011 = vmatmul.msk.bf16.gmra.mxu0 %vm1727_vm0, %v1667_v2 }
 0x4ab   :  { %v7647_v18 = vunpack.c.l.b16 %v6513_v47  ;;  %v7499_v63 = vmax.f32 %v11597_v45, %v11716_v43  ;;  %9143 = vmatmul.msk.bf16.gmra.mxu1 %vm1727_vm0, %v3347_v31  ;;  %v4575_v59 = vadd.f32 %v11650_v11, %v4131_v21  ;;  %v3348_v47 = vpack.c.b16 %v3168_v46, %v3167_v5  ;;  %v11780_v46 = vld [vmem:[%s13719_s6] ss:$0 sm:$0xff]  ;;  %v216_v45 = vld [vmem:[%s13713_s0 + $0x4f8] sm:$0xff] }
 0x4ac   :  { %v5789_v17 = vpop.f32.mrf.mxu2  ;;  %v465_v21 = vpack.c.bf16 %v209_v22, %v209_v22 }
 0x4ad   :  { %v7654_v35 = vpack.c.b16 %v7647_v18, %v7646_v33  ;;  %v5790_v60 = vadd.f32 %v11411_v14, %v5789_v17 }
 0x4af   :  { %9413 = vmatmul.msk.bf16.vlgmr.msra.gmra.mxu3 %vm5110_vm1, %v7654_v35  ;;  %v2453_v54 = vpop.f32.mrf.mxu0  ;;  %v6258_v51 = vmax.f32 %v5790_v60, 0.0 }
 0x4b0   :  { %v4132_v4 = vpop.f32.mrf.mxu1  ;;  %7812 = vmatpush.bf16.msra.mxu3 %v11474_v23  ;;  %v4831_v23 = vmax.f32 %v4575_v59, 0.0  ;;  %v1489_v59 = vunpack.c.l.b16 %v977_v48 }
 0x4b1   :  { %v4133_v53 = vadd.f32 %v4132_v4, %v2453_v54  ;;  %v6514_v31 = vpack.c.bf16 %v6258_v51, %v6258_v51 }
 0x4b2   :  { %v7541_v12 = vpop.f32.mrf.mxu3 }
 0x4b3   :  { %v4576_v8 = vadd.f32 %v11650_v11, %v4133_v53  ;;  %v11742_v56 = vmax.f32 %v7492_v27, %v7541_v12  ;;  %v7648_v27 = vunpack.c.l.b16 %v6514_v31  ;;  %v3169_v12 = vunpack.c.l.b16 %v465_v21 }
 0x4b4   :  { %v5791_v2 = vpop.f32.mrf.mxu2  ;;  %7813 = vmatpush.bf16.msra.mxu3 %v11487_v38 }
 0x4b5   :  { %v4832_v3 = vmax.f32 %v4576_v8, 0.0  ;;  %v5792_v41 = vadd.f32 %v11411_v14, %v5791_v2 }
 0x4b7   :  { %v5021_v15 = vpack.c.bf16 %v4832_v3, %v4831_v23  ;;  %v6259_v39 = vmax.f32 %v5792_v41, 0.0  ;;  %v2456_v33 = vpop.f32.mrf.mxu0 }
 0x4b8   :  { %v4135_v18 = vpop.f32.mrf.mxu1  ;;  %7814 = vmatpush.bf16.msra.mxu3 %v11494_v55  ;;  %v722_v55 = vld [vmem:[%s13714_s1 + $0x4c8] sm:$0xff] }
 0x4b9   :  { %v6515_v19 = vpack.c.bf16 %v6259_v39, %v6259_v39  ;;  %9279 = vmatmul.msk.bf16.gmra.mxu2 %vm5110_vm1, %v5021_v15  ;;  %v978_v35 = vpack.c.bf16 %v722_v55, %v722_v55 }
 0x4ba   :  { %v7543_v9 = vpop.f32.mrf.mxu3  ;;  %9012 = vmatmul.msk.bf16.gmra.mxu0 %vm1727_vm0, %v1668_v10 }
 0x4bb   :  { %v7649_v52 = vunpack.c.l.b16 %v6515_v19  ;;  %v11751_v38 = vmax.f32 %v7493_v0, %v7543_v9  ;;  %9144 = vmatmul.msk.bf16.gmra.mxu1 %vm1727_vm0, %v3348_v47  ;;  %v4136_v0 = vadd.f32 %v4135_v18, %v2456_v33  ;;  %v1490_v53 = vunpack.c.l.b16 %v978_v35  ;;  %v723_v18 = vld [vmem:[%s13714_s1 + $0x4d0] sm:$0xff]  ;;  %v724_v19 = vld [vmem:[%s13714_s1 + $0x4d8] sm:$0xff] }
 0x4bc   :  { %v5794_v17 = vpop.f32.mrf.mxu2  ;;  %7815 = vmatpush.bf16.msra.mxu3 %v11520_v40  ;;  %v211_v9 = vld [vmem:[%s13713_s0 + $0x4d0] sm:$0xff]  ;;  %v980_v50 = vpack.c.bf16 %v724_v19, %v724_v19 }
 0x4bd   :  { %v7655_v44 = vpack.c.b16 %v7649_v52, %v7648_v27  ;;  %v5795_v25 = vadd.f32 %v11411_v14, %v5794_v17  ;;  %v4577_v13 = vadd.f32 %v11650_v11, %v4136_v0  ;;  %v3170_v14 = vunpack.c.l.b16 %v466_v49 }
 0x4be   :  { %v1669_v23 = vpack.c.b16 %v1490_v53, %v1489_v59  ;;  %v979_v52 = vpack.c.bf16 %v723_v18, %v723_v18  ;;  %v467_v55 = vpack.c.bf16 %v211_v9, %v211_v9  ;;  %v468_v17 = vpack.c.bf16 %v212_v61, %v212_v61 }
 0x4bf   :  { %9414 = vmatmul.msk.bf16.gmra.mxu3 %vm5110_vm1, %v7655_v44  ;;  %v2458_v36 = vpop.f32.mrf.mxu0  ;;  %v6260_v40 = vmax.f32 %v5795_v25, 0.0  ;;  %v4833_v51 = vmax.f32 %v4577_v13, 0.0  ;;  %v3349_v31 = vpack.c.b16 %v3170_v14, %v3169_v12  ;;  %v1492_v25 = vunpack.c.l.b16 %v980_v50 }
 0x4c0   :  { %v4137_v60 = vpop.f32.mrf.mxu1  ;;  %v1491_v21 = vunpack.c.l.b16 %v979_v52  ;;  %v3171_v49 = vunpack.c.l.b16 %v467_v55 }
 0x4c1   :  { %v4138_v54 = vadd.f32 %v4137_v60, %v2458_v36  ;;  %v6516_v3 = vpack.c.bf16 %v6260_v40, %v6260_v40 }
 0x4c2   :  { %v7546_v4 = vpop.f32.mrf.mxu3  ;;  %v1670_v40 = vpack.c.b16 %v1492_v25, %v1491_v21 }
 0x4c3   :  { %v4578_v1 = vadd.f32 %v11650_v11, %v4138_v54  ;;  %v11775_v32 = vmax.f32 %v7494_v28, %v7546_v4  ;;  %v7650_v39 = vunpack.c.l.b16 %v6516_v3  ;;  %v3172_v54 = vunpack.c.l.b16 %v468_v17 }
 0x4c4   :  { %v5796_v5 = vpop.f32.mrf.mxu2 }
 0x4c5   :  { %v4834_v8 = vmax.f32 %v4578_v1, 0.0  ;;  %v5797_v2 = vadd.f32 %v11780_v46, %v5796_v5 }
 0x4c7   :  { %v5022_v41 = vpack.c.bf16 %v4834_v8, %v4833_v51  ;;  %v6261_v10 = vmax.f32 %v5797_v2, 0.0  ;;  %v2461_v15 = vpop.f32.mrf.mxu0  ;;  %v3350_v51 = vpack.c.b16 %v3172_v54, %v3171_v49 }
 0x4c8   :  { %v4140_v20 = vpop.f32.mrf.mxu1 }
 0x4c9   :  { %v6517_v26 = vpack.c.bf16 %v6261_v10, %v6261_v10  ;;  %9280 = vmatmul.msk.bf16.gmra.mxu2 %vm5110_vm1, %v5022_v41  ;;  %v725_v41 = vld [vmem:[%s13714_s1 + $0x4e0] sm:$0xff]  ;;  %v726_v10 = vld [vmem:[%s13714_s1 + $0x4e8] sm:$0xff] }
 0x4ca   :  { %v7548_v28 = vpop.f32.mrf.mxu3  ;;  %9013 = vmatmul.msk.bf16.gmra.mxu0 %vm1727_vm0, %v1669_v23 }
 0x4cb   :  { %v7651_v47 = vunpack.c.l.b16 %v6517_v26  ;;  %v11787_v33 = vmax.f32 %v7495_v37, %v7548_v28  ;;  %9145 = vmatmul.msk.bf16.gmra.mxu1 %vm1727_vm0, %v3349_v31  ;;  %v4141_v37 = vadd.f32 %v4140_v20, %v2461_v15  ;;  %v213_v31 = vld [vmem:[%s13713_s0 + $0x4e0] sm:$0xff]  ;;  %v981_v20 = vpack.c.bf16 %v725_v41, %v725_v41 }
 0x4cc   :  { %v5799_v27 = vpop.f32.mrf.mxu2  ;;  %v982_v26 = vpack.c.bf16 %v726_v10, %v726_v10  ;;  %v469_v28 = vpack.c.bf16 %v213_v31, %v213_v31 }
 0x4cd   :  { %v7656_v6 = vpack.c.b16 %v7651_v47, %v7650_v39  ;;  %v5800_v22 = vadd.f32 %v11780_v46, %v5799_v27  ;;  %v4579_v0 = vadd.f32 %v11650_v11, %v4141_v37  ;;  %v470_v47 = vpack.c.bf16 %v214_v57, %v214_v57 }
 0x4ce   :  { %v1494_v37 = vunpack.c.l.b16 %v982_v26  ;;  %v3173_v52 = vunpack.c.l.b16 %v469_v28 }
 0x4cf   :  { %9415 = vmatmul.msk.bf16.gmra.mxu3 %vm5110_vm1, %v7656_v6  ;;  %v2463_v29 = vpop.f32.mrf.mxu0  ;;  %v6262_v36 = vmax.f32 %v5800_v22, 0.0  ;;  %v4835_v59 = vmax.f32 %v4579_v0, 0.0  ;;  %v1493_v6 = vunpack.c.l.b16 %v981_v20  ;;  %v3174_v17 = vunpack.c.l.b16 %v470_v47 }
 0x4d0   :  { %v4142_v44 = vpop.f32.mrf.mxu1 }
 0x4d1   :  { %v4143_v48 = vadd.f32 %v4142_v44, %v2463_v29  ;;  %v6518_v1 = vpack.c.bf16 %v6262_v36, %v6262_v36  ;;  %v3351_v36 = vpack.c.b16 %v3174_v17, %v3173_v52 }
 0x4d2   :  { %v7551_v35 = vpop.f32.mrf.mxu3 }
 0x4d3   :  { %v4580_v60 = vadd.f32 %v11650_v11, %v4143_v48  ;;  %v11810_v13 = vmax.f32 %v7496_v7, %v7551_v35  ;;  %v7652_v62 = vunpack.c.l.b16 %v6518_v1  ;;  %v1671_v35 = vpack.c.b16 %v1494_v37, %v1493_v6 }
 0x4d4   :  { %v5801_v4 = vpop.f32.mrf.mxu2 }
 0x4d5   :  { %v4836_v53 = vmax.f32 %v4580_v60, 0.0  ;;  %v5802_v12 = vadd.f32 %v11780_v46, %v5801_v4 }
 0x4d7   :  { %v5023_v14 = vpack.c.bf16 %v4836_v53, %v4835_v59  ;;  %v6263_v5 = vmax.f32 %v5802_v12, 0.0  ;;  %v2466_v8 = vpop.f32.mrf.mxu0  ;;  %v727_v53 = vld [vmem:[%s13714_s1 + $0x4f0] sm:$0xff]  ;;  %v728_v12 = vld [vmem:[%s13714_s1 + $0x4f8] sm:$0xff] }
 0x4d8   :  { %v4145_v2 = vpop.f32.mrf.mxu1 }
 0x4d9   :  { %v6519_v23 = vpack.c.bf16 %v6263_v5, %v6263_v5  ;;  %9281 = vmatmul.msk.bf16.gmra.mxu2 %vm5110_vm1, %v5023_v14  ;;  %v983_v14 = vpack.c.bf16 %v727_v53, %v727_v53  ;;  %v984_v5 = vpack.c.bf16 %v728_v12, %v728_v12 }
 0x4da   :  { %v7553_v3 = vpop.f32.mrf.mxu3  ;;  %9014 = vmatmul.msk.bf16.gmra.mxu0 %vm1727_vm0, %v1670_v40  ;;  %v215_v40 = vld [vmem:[%s13713_s0 + $0x4f0] sm:$0xff] }
 0x4db   :  { %v7653_v24 = vunpack.c.l.b16 %v6519_v23  ;;  %v11817_v7 = vmax.f32 %v7497_v42, %v7553_v3  ;;  %9146 = vmatmul.msk.bf16.gmra.mxu1 %vm1727_vm0, %v3350_v51  ;;  %v4146_v42 = vadd.f32 %v4145_v2, %v2466_v8  ;;  %v471_v51 = vpack.c.bf16 %v215_v40, %v215_v40 }
 0x4dc   :  { %v5804_v15 = vpop.f32.mrf.mxu2  ;;  %v472_v2 = vpack.c.bf16 %v216_v45, %v216_v45  ;;  %v1495_v31 = vunpack.c.l.b16 %v983_v14 }
 0x4dd   :  { %v7657_v58 = vpack.c.b16 %v7653_v24, %v7652_v62  ;;  %v5805_v39 = vadd.f32 %v11780_v46, %v5804_v15  ;;  %v4581_v9 = vadd.f32 %v11650_v11, %v4146_v42  ;;  %v11868_v62 = vld [vmem:[%s13720_s7 + $0x18] sm:$0xff]  ;;  %v1496_v15 = vunpack.c.l.b16 %v984_v5 }
 0x4de   :  { %v3175_v57 = vunpack.c.l.b16 %v471_v51  ;;  %v3176_v26 = vunpack.c.l.b16 %v472_v2 }
 0x4df   :  { %9416 = vmatmul.msk.bf16.gmra.mxu3 %vm5110_vm1, %v7657_v58  ;;  %v2468_v18 = vpop.f32.mrf.mxu0  ;;  %v6264_v50 = vmax.f32 %v5805_v39, 0.0  ;;  %v4837_v44 = vmax.f32 %v4581_v9, 0.0  ;;  %v11880_v39 = vld [vmem:[%s13720_s7 + $0x10] sm:$0xff]  ;;  %v1672_v9 = vpack.c.b16 %v1496_v15, %v1495_v31 }
 0x4e0   :  { %v4147_v19 = vpop.f32.mrf.mxu1  ;;  %v3352_v37 = vpack.c.b16 %v3176_v26, %v3175_v57 }
 0x4e1   :  { %v4148_v27 = vadd.f32 %v4147_v19, %v2468_v18  ;;  %v6520_v21 = vpack.c.bf16 %v6264_v50, %v6264_v50 }
 0x4e2   :  { %v7556_v61 = vpop.f32.mrf.mxu3 }
 0x4e3   :  { %v4582_v55 = vadd.f32 %v11650_v11, %v4148_v27  ;;  %v11840_v22 = vmax.f32 %v7498_v16, %v7556_v61  ;;  %v7715_v30 = vunpack.c.l.b16 %v6520_v21  ;;  %v730_v21 = vld [vmem:[%s13714_s1 + $0x508] sm:$0xff] }
 0x4e4   :  { %v5806_v29 = vpop.f32.mrf.mxu2 }
 0x4e5   :  { %v4838_v0 = vmax.f32 %v4582_v55, 0.0  ;;  %v5807_v48 = vadd.f32 %v11780_v46, %v5806_v29  ;;  %v11887_v55 = vld [vmem:[%s13720_s7 + $0x8] sm:$0xff] }
 0x4e7   :  { %v5024_v25 = vpack.c.bf16 %v4838_v0, %v4837_v44  ;;  %v6265_v49 = vmax.f32 %v5807_v48, 0.0  ;;  %v2471_v60 = vpop.f32.mrf.mxu0 }
 0x4e8   :  { %v4150_v54 = vpop.f32.mrf.mxu1 }
 0x4e9   :  { %v6521_v4 = vpack.c.bf16 %v6265_v49, %v6265_v49  ;;  %9282 = vmatmul.msk.bf16.gmra.mxu2 %vm5110_vm1, %v5024_v25  ;;  %v217_v25 = vld [vmem:[%s13713_s0 + $0x500] sm:$0xff] }
 0x4ea   :  { %v7558_v59 = vpop.f32.mrf.mxu3  ;;  %9015 = vmatmul.msk.bf16.gmra.mxu0 %vm1727_vm0, %v1671_v35  ;;  %v729_v35 = vld [vmem:[%s13714_s1 + $0x500] sm:$0xff] }
 0x4eb   :  { %v7716_v34 = vunpack.c.l.b16 %v6521_v4  ;;  %v11847_v16 = vmax.f32 %v7499_v63, %v7558_v59  ;;  %9147 = vmatmul.msk.bf16.gmra.mxu1 %vm1727_vm0, %v3351_v36  ;;  %v4151_v63 = vadd.f32 %v4150_v54, %v2471_v60  ;;  %v218_v36 = vld [vmem:[%s13713_s0 + $0x508] sm:$0xff]  ;;  %v11912_v60 = vld [vmem:[%s13720_s7] sm:$0xff]  ;;  %v985_v59 = vpack.c.bf16 %v729_v35, %v729_v35 }
 0x4ec   :  { %v5809_v1 = vpop.f32.mrf.mxu2  ;;  %v474_v12 = vpack.c.bf16 %v218_v36, %v218_v36 }
 0x4ed   :  { %v7723_v43 = vpack.c.b16 %v7716_v34, %v7715_v30  ;;  %v5810_v8 = vadd.f32 %v11780_v46, %v5809_v1  ;;  %v4583_v24 = vadd.f32 %v11650_v11, %v4151_v63  ;;  %v986_v30 = vpack.c.bf16 %v730_v21, %v730_v21 }
 0x4ee   :  { %v473_v34 = vpack.c.bf16 %v217_v25, %v217_v25  ;;  %v1497_v14 = vunpack.c.l.b16 %v985_v59 }
 0x4ef   :  { %9417 = vmatmul.msk.bf16.vlgmr.msrb.gmra.mxu3 %vm5110_vm1, %v7723_v43  ;;  %v2473_v23 = vpop.f32.mrf.mxu0  ;;  %v6266_v58 = vmax.f32 %v5810_v8, 0.0  ;;  %v4839_v47 = vmax.f32 %v4583_v24, 0.0  ;;  %v1498_v5 = vunpack.c.l.b16 %v986_v30 }
 0x4f0   :  { %v4152_v3 = vpop.f32.mrf.mxu1  ;;  %7881 = vmatpush.bf16.msrb.mxu3 %v11868_v62  ;;  %v3177_v51 = vunpack.c.l.b16 %v473_v34 }
 0x4f1   :  { %v4153_v41 = vadd.f32 %v4152_v3, %v2473_v23  ;;  %v6522_v27 = vpack.c.bf16 %v6266_v58, %v6266_v58  ;;  %v3178_v3 = vunpack.c.l.b16 %v474_v12  ;;  %v1673_v57 = vpack.c.b16 %v1498_v5, %v1497_v14 }
 0x4f2   :  { %v11872_v10 = vpop.f32.mrf.mxu3 }
 0x4f3   :  { %v4584_v42 = vadd.f32 %v11650_v11, %v4153_v41  ;;  %v7630_v20 = vmax.f32 %v11742_v56, %v11872_v10  ;;  %v7717_v44 = vunpack.c.l.b16 %v6522_v27 }
 0x4f4   :  { %v5811_v28 = vpop.f32.mrf.mxu2  ;;  %7882 = vmatpush.bf16.msrb.mxu3 %v11880_v39 }
 0x4f5   :  { %v4840_v18 = vmax.f32 %v4584_v42, 0.0  ;;  %v5812_v19 = vadd.f32 %v11780_v46, %v5811_v28  ;;  %v3353_v28 = vpack.c.b16 %v3178_v3, %v3177_v51 }
 0x4f7   :  { %v5025_v61 = vpack.c.bf16 %v4840_v18, %v4839_v47  ;;  %v6267_v6 = vmax.f32 %v5812_v19, 0.0  ;;  %v2476_v52 = vpop.f32.mrf.mxu0 }
 0x4f8   :  { %v4155_v50 = vpop.f32.mrf.mxu1  ;;  %7883 = vmatpush.bf16.msrb.mxu3 %v11887_v55 }
 0x4f9   :  { %v6523_v17 = vpack.c.bf16 %v6267_v6, %v6267_v6  ;;  %9283 = vmatmul.msk.bf16.gmra.mxu2 %vm5110_vm1, %v5025_v61  ;;  %v4156_v4 = vadd.f32 %v4155_v50, %v2476_v52  ;;  %v732_v52 = vld [vmem:[%s13714_s1 + $0x518] sm:$0xff]  ;;  %v219_v50 = vld [vmem:[%s13713_s0 + $0x510] sm:$0xff] }
 0x4fa   :  { %v11891_v29 = vpop.f32.mrf.mxu3  ;;  %9016 = vmatmul.msk.bf16.gmra.mxu0 %vm1727_vm0, %v1672_v9  ;;  %v988_v25 = vpack.c.bf16 %v732_v52, %v732_v52 }
 0x4fb   :  { %v7718_v0 = vunpack.c.l.b16 %v6523_v17  ;;  %v7631_v48 = vmax.f32 %v11751_v38, %v11891_v29  ;;  %9148 = vmatmul.msk.bf16.gmra.mxu1 %vm1727_vm0, %v3352_v37  ;;  %v4585_v45 = vadd.f32 %v11650_v11, %v4156_v4  ;;  %v731_v37 = vld [vmem:[%s13714_s1 + $0x510] sm:$0xff]  ;;  %v226_v38 = vld [vmem:[%s13713_s0 + $0x548] sm:$0xff] }
 0x4fc   :  { %v5814_v49 = vpop.f32.mrf.mxu2  ;;  %7884 = vmatpush.bf16.msrb.mxu3 %v11912_v60  ;;  %v987_v21 = vpack.c.bf16 %v731_v37, %v731_v37  ;;  %v221_v37 = vld [vmem:[%s13713_s0 + $0x520] sm:$0xff] }
 0x4fd   :  { %v7724_v54 = vpack.c.b16 %v7718_v0, %v7717_v44  ;;  %v5815_v53 = vadd.f32 %v11780_v46, %v5814_v49  ;;  %v4841_v41 = vmax.f32 %v4585_v45, 0.0  ;;  %v220_v44 = vld [vmem:[%s13713_s0 + $0x518] sm:$0xff]  ;;  %v475_v49 = vpack.c.bf16 %v219_v50, %v219_v50  ;;  %v222_v50 = vld [vmem:[%s13713_s0 + $0x528] sm:$0xff] }
 0x4fe   :  { %v1499_v12 = vunpack.c.l.b16 %v987_v21  ;;  %v477_v21 = vpack.c.bf16 %v221_v37, %v221_v37  ;;  %v735_v37 = vld [vmem:[%s13714_s1 + $0x530] sm:$0xff] }
 0x4ff   :  { %9418 = vmatmul.msk.bf16.gmra.mxu3 %vm5110_vm1, %v7724_v54  ;;  %v2478_v40 = vpop.f32.mrf.mxu0  ;;  %v6268_v8 = vmax.f32 %v5815_v53, 0.0  ;;  %v476_v54 = vpack.c.bf16 %v220_v44, %v220_v44 }
 0x500   :  { %v4157_v1 = vpop.f32.mrf.mxu1 }
 0x501   :  { %v4158_v43 = vadd.f32 %v4157_v1, %v2478_v40  ;;  %v6524_v58 = vpack.c.bf16 %v6268_v8, %v6268_v8  ;;  %v1500_v40 = vunpack.c.l.b16 %v988_v25  ;;  %v3179_v1 = vunpack.c.l.b16 %v475_v49 }
 0x502   :  { %v11918_v63 = vpop.f32.mrf.mxu3  ;;  %v3180_v5 = vunpack.c.l.b16 %v476_v54  ;;  %v478_v49 = vpack.c.bf16 %v222_v50, %v222_v50  ;;  %v223_v50 = vld [vmem:[%s13713_s0 + $0x530] sm:$0xff] }
 0x503   :  { %v4586_v2 = vadd.f32 %v11650_v11, %v4158_v43  ;;  %v7632_v23 = vmax.f32 %v11775_v32, %v11918_v63  ;;  %v7719_v27 = vunpack.c.l.b16 %v6524_v58 }
 0x504   :  { %v5816_v24 = vpop.f32.mrf.mxu2 }
 0x505   :  { %v4842_v31 = vmax.f32 %v4586_v2, 0.0  ;;  %v5817_v15 = vadd.f32 %v11780_v46, %v5816_v24  ;;  %v1674_v24 = vpack.c.b16 %v1500_v40, %v1499_v12  ;;  %v3181_v40 = vunpack.c.l.b16 %v477_v21 }
 0x506   :  { %v991_v21 = vpack.c.bf16 %v735_v37, %v735_v37 }
 0x507   :  { %v5026_v42 = vpack.c.bf16 %v4842_v31, %v4841_v41  ;;  %v6269_v26 = vmax.f32 %v5817_v15, 0.0  ;;  %v2481_v47 = vpop.f32.mrf.mxu0 }
 0x508   :  { %v4160_v18 = vpop.f32.mrf.mxu1 }
 0x509   :  { %v6525_v19 = vpack.c.bf16 %v6269_v26, %v6269_v26  ;;  %9284 = vmatmul.msk.bf16.gmra.mxu2 %vm5110_vm1, %v5026_v42  ;;  %v4161_v35 = vadd.f32 %v4160_v18, %v2481_v47 }
 0x50a   :  { %v11925_v9 = vpop.f32.mrf.mxu3  ;;  %9017 = vmatmul.msk.bf16.gmra.mxu0 %vm1727_vm0, %v1673_v57  ;;  %v3354_v57 = vpack.c.b16 %v3180_v5, %v3179_v1  ;;  %v3182_v5 = vunpack.c.l.b16 %v478_v49  ;;  %v479_v49 = vpack.c.bf16 %v223_v50, %v223_v50  ;;  %v737_v50 = vld [vmem:[%s13714_s1 + $0x540] sm:$0xff] }
 0x50b   :  { %v7720_v61 = vunpack.c.l.b16 %v6525_v19  ;;  %v7633_v6 = vmax.f32 %v11787_v33, %v11925_v9  ;;  %9149 = vmatmul.msk.bf16.gmra.mxu1 %vm1727_vm0, %v3353_v28  ;;  %v4587_v30 = vadd.f32 %v11650_v11, %v4161_v35  ;;  %v228_v33 = vld [vmem:[%s13713_s0 + $0x558] sm:$0xff] }
 0x50c   :  { %v5819_v17 = vpop.f32.mrf.mxu2 }
 0x50d   :  { %v7725_v0 = vpack.c.b16 %v7720_v61, %v7719_v27  ;;  %v5820_v36 = vadd.f32 %v11780_v46, %v5819_v17  ;;  %v4843_v8 = vmax.f32 %v4587_v30, 0.0  ;;  %v733_v27 = vld [vmem:[%s13714_s1 + $0x520] sm:$0xff]  ;;  %v734_v61 = vld [vmem:[%s13714_s1 + $0x528] sm:$0xff] }
 0x50e   :  { %v990_v35 = vpack.c.bf16 %v734_v61, %v734_v61 }
 0x50f   :  { %9419 = vmatmul.msk.bf16.gmra.mxu3 %vm5110_vm1, %v7725_v0  ;;  %v2483_v4 = vpop.f32.mrf.mxu0  ;;  %v6270_v45 = vmax.f32 %v5820_v36, 0.0  ;;  %v989_v0 = vpack.c.bf16 %v733_v27, %v733_v27 }
 0x510   :  { %v4162_v59 = vpop.f32.mrf.mxu1  ;;  %v1502_v12 = vunpack.c.l.b16 %v990_v35 }
 0x511   :  { %v4163_v34 = vadd.f32 %v4162_v59, %v2483_v4  ;;  %v6526_v41 = vpack.c.bf16 %v6270_v45, %v6270_v45 }
 0x512   :  { %v11946_v53 = vpop.f32.mrf.mxu3 }
 0x513   :  { %v4588_v43 = vadd.f32 %v11650_v11, %v4163_v34  ;;  %v7634_v14 = vmax.f32 %v11810_v13, %v11946_v53  ;;  %v7721_v47 = vunpack.c.l.b16 %v6526_v41  ;;  %v1501_v34 = vunpack.c.l.b16 %v989_v0 }
 0x514   :  { %v5821_v51 = vpop.f32.mrf.mxu2 }
 0x515   :  { %v4844_v2 = vmax.f32 %v4588_v43, 0.0  ;;  %v5822_v3 = vadd.f32 %v11780_v46, %v5821_v51 }
 0x517   :  { %v5027_v31 = vpack.c.bf16 %v4844_v2, %v4843_v8  ;;  %v6271_v15 = vmax.f32 %v5822_v3, 0.0  ;;  %v2486_v58 = vpop.f32.mrf.mxu0 }
 0x518   :  { %v4165_v42 = vpop.f32.mrf.mxu1 }
 0x519   :  { %v6527_v26 = vpack.c.bf16 %v6271_v15, %v6271_v15  ;;  %9285 = vmatmul.msk.bf16.gmra.mxu2 %vm5110_vm1, %v5027_v31  ;;  %v4166_v44 = vadd.f32 %v4165_v42, %v2486_v58 }
 0x51a   :  { %v11953_v28 = vpop.f32.mrf.mxu3  ;;  %9018 = vmatmul.msk.bf16.gmra.mxu0 %vm1727_vm0, %v1674_v24  ;;  %v1675_v24 = vpack.c.b16 %v1502_v12, %v1501_v34 }
 0x51b   :  { %v7722_v18 = vunpack.c.l.b16 %v6527_v26  ;;  %v7635_v19 = vmax.f32 %v11817_v7, %v11953_v28  ;;  %9150 = vmatmul.msk.bf16.gmra.mxu1 %vm1727_vm0, %v3354_v57  ;;  %v4589_v4 = vadd.f32 %v11650_v11, %v4166_v44  ;;  %v3355_v57 = vpack.c.b16 %v3182_v5, %v3181_v40  ;;  %v224_v44 = vld [vmem:[%s13713_s0 + $0x538] sm:$0xff]  ;;  %v230_v7 = vld [vmem:[%s13713_s0 + $0x568] sm:$0xff] }
 0x51c   :  { %v5824_v52 = vpop.f32.mrf.mxu2  ;;  %v3183_v5 = vunpack.c.l.b16 %v479_v49 }
 0x51d   :  { %v7726_v17 = vpack.c.b16 %v7722_v18, %v7721_v47  ;;  %v5825_v25 = vadd.f32 %v11780_v46, %v5824_v52  ;;  %v4845_v8 = vmax.f32 %v4589_v4, 0.0  ;;  %v736_v52 = vld [vmem:[%s13714_s1 + $0x538] sm:$0xff] }
 0x51f   :  { %9420 = vmatmul.msk.bf16.gmra.mxu3 %vm5110_vm1, %v7726_v17  ;;  %v2488_v36 = vpop.f32.mrf.mxu0  ;;  %v6272_v1 = vmax.f32 %v5825_v25, 0.0  ;;  %v992_v25 = vpack.c.bf16 %v736_v52, %v736_v52 }
 0x520   :  { %v4167_v54 = vpop.f32.mrf.mxu1 }
 0x521   :  { %v4168_v59 = vadd.f32 %v4167_v54, %v2488_v36  ;;  %v6528_v41 = vpack.c.bf16 %v6272_v1, %v6272_v1  ;;  %v480_v54 = vpack.c.bf16 %v224_v44, %v224_v44  ;;  %v1503_v1 = vunpack.c.l.b16 %v991_v21  ;;  %v225_v44 = vld [vmem:[%s13713_s0 + $0x540] sm:$0xff] }
 0x522   :  { %v11974_v30 = vpop.f32.mrf.mxu3 }
 0x523   :  { %v4590_v45 = vadd.f32 %v11650_v11, %v4168_v59  ;;  %v7636_v43 = vmax.f32 %v11840_v22, %v11974_v30  ;;  %v7784_v18 = vunpack.c.l.b16 %v6528_v41 }
 0x524   :  { %v5826_v51 = vpop.f32.mrf.mxu2 }
 0x525   :  { %v4846_v2 = vmax.f32 %v4590_v45, 0.0  ;;  %v5827_v3 = vadd.f32 %v11780_v46, %v5826_v51  ;;  %v1504_v45 = vunpack.c.l.b16 %v992_v25  ;;  %v481_v25 = vpack.c.bf16 %v225_v44, %v225_v44 }
 0x527   :  { %v5028_v31 = vpack.c.bf16 %v4846_v2, %v4845_v8  ;;  %v6273_v15 = vmax.f32 %v5827_v3, 0.0  ;;  %v2491_v58 = vpop.f32.mrf.mxu0  ;;  %v3184_v3 = vunpack.c.l.b16 %v480_v54 }
 0x528   :  { %v4170_v42 = vpop.f32.mrf.mxu1 }
 0x529   :  { %v6529_v26 = vpack.c.bf16 %v6273_v15, %v6273_v15  ;;  %9286 = vmatmul.msk.bf16.gmra.mxu2 %vm5110_vm1, %v5028_v31  ;;  %v4171_v35 = vadd.f32 %v4170_v42, %v2491_v58 }
 0x52a   :  { %v11981_v47 = vpop.f32.mrf.mxu3  ;;  %9019 = vmatmul.msk.bf16.gmra.mxu0 %vm1727_vm0, %v1675_v24 }
 0x52b   :  { %v7785_v27 = vunpack.c.l.b16 %v6529_v26  ;;  %v7637_v61 = vmax.f32 %v11847_v16, %v11981_v47  ;;  %9151 = vmatmul.msk.bf16.gmra.mxu1 %vm1727_vm0, %v3355_v57  ;;  %v4591_v34 = vadd.f32 %v11650_v11, %v4171_v35  ;;  %v1676_v57 = vpack.c.b16 %v1504_v45, %v1503_v1  ;;  %v232_v16 = vld [vmem:[%s13713_s0 + $0x578] sm:$0xff] }
 0x52c   :  { %v5829_v17 = vpop.f32.mrf.mxu2  ;;  %v993_v35 = vpack.c.bf16 %v737_v50, %v737_v50  ;;  %v740_v50 = vld [vmem:[%s13714_s1 + $0x558] sm:$0xff] }
 0x52d   :  { %v7792_v0 = vpack.c.b16 %v7785_v27, %v7784_v18  ;;  %v5830_v36 = vadd.f32 %v11780_v46, %v5829_v17  ;;  %v4847_v41 = vmax.f32 %v4591_v34, 0.0  ;;  %v3356_v18 = vpack.c.b16 %v3184_v3, %v3183_v5  ;;  %v738_v17 = vld [vmem:[%s13714_s1 + $0x548] sm:$0xff] }
 0x52e   :  { %v994_v21 = vpack.c.bf16 %v738_v17, %v738_v17  ;;  %v1505_v1 = vunpack.c.l.b16 %v993_v35  ;;  %v3185_v5 = vunpack.c.l.b16 %v481_v25  ;;  %v227_v17 = vld [vmem:[%s13713_s0 + $0x550] sm:$0xff]  ;;  %v484_v35 = vpack.c.bf16 %v228_v33, %v228_v33 }
 0x52f   :  { %9421 = vmatmul.msk.bf16.vlgmr.msra.gmra.mxu3 %vm5110_vm1, %v7792_v0  ;;  %v2493_v4 = vpop.f32.mrf.mxu0  ;;  %v6274_v51 = vmax.f32 %v5830_v36, 0.0  ;;  %v482_v36 = vpack.c.bf16 %v226_v38, %v226_v38  ;;  %v996_v38 = vpack.c.bf16 %v740_v50, %v740_v50 }
 0x530   :  { %v4172_v59 = vpop.f32.mrf.mxu1  ;;  %7950 = vmatpush.bf16.msra.mxu3 %v11868_v62  ;;  %v1506_v45 = vunpack.c.l.b16 %v994_v21 }
 0x531   :  { %v4173_v12 = vadd.f32 %v4172_v59, %v2493_v4  ;;  %v6530_v58 = vpack.c.bf16 %v6274_v51, %v6274_v51  ;;  %v12038_v59 = vld [vmem:[%s13717_s4] ss:$0 sm:$0xff] }
 0x532   :  { %v7679_v40 = vpop.f32.mrf.mxu3 }
 0x533   :  { %v4592_v8 = vadd.f32 %v11650_v11, %v4173_v12  ;;  %v12007_v2 = vmax.f32 %v7630_v20, %v7679_v40  ;;  %v7786_v20 = vunpack.c.l.b16 %v6530_v58  ;;  %v1677_v58 = vpack.c.b16 %v1506_v45, %v1505_v1 }
 0x534   :  { %v5831_v24 = vpop.f32.mrf.mxu2  ;;  %7951 = vmatpush.bf16.msra.mxu3 %v11880_v39 }
 0x535   :  { %v4848_v31 = vmax.f32 %v4592_v8, 0.0  ;;  %v5832_v15 = vadd.f32 %v11780_v46, %v5831_v24  ;;  %v3186_v24 = vunpack.c.l.b16 %v482_v36 }
 0x537   :  { %v5029_v42 = vpack.c.bf16 %v4848_v31, %v4847_v41  ;;  %v6275_v26 = vmax.f32 %v5832_v15, 0.0  ;;  %v2496_v27 = vpop.f32.mrf.mxu0 }
 0x538   :  { %v4175_v11 = vpop.f32.mrf.mxu1  ;;  %7952 = vmatpush.bf16.msra.mxu3 %v11887_v55 }
 0x539   :  { %v6531_v56 = vpack.c.bf16 %v6275_v26, %v6275_v26  ;;  %9287 = vmatmul.msk.bf16.gmra.mxu2 %vm5110_vm1, %v5029_v42 }
 0x53a   :  { %v7681_v10 = vpop.f32.mrf.mxu3  ;;  %9020 = vmatmul.msk.bf16.gmra.mxu0 %vm1727_vm0, %v1676_v57 }
 0x53b   :  { %v7787_v37 = vunpack.c.l.b16 %v6531_v56  ;;  %v12016_v52 = vmax.f32 %v7631_v48, %v7681_v10  ;;  %9152 = vmatmul.msk.bf16.gmra.mxu1 %vm1727_vm0, %v3356_v18  ;;  %v4176_v48 = vadd.f32 %v4175_v11, %v2496_v27  ;;  %v3357_v27 = vpack.c.b16 %v3186_v24, %v3185_v5 }
 0x53c   :  { %v5834_v0 = vpop.f32.mrf.mxu2  ;;  %7953 = vmatpush.bf16.msra.mxu3 %v11912_v60  ;;  %v3188_v5 = vunpack.c.l.b16 %v484_v35 }
 0x53d   :  { %v7793_v29 = vpack.c.b16 %v7787_v37, %v7786_v20  ;;  %v5835_v49 = vadd.f32 %v11780_v46, %v5834_v0  ;;  %v4593_v34 = vadd.f32 %v12038_v59, %v4176_v48  ;;  %v739_v37 = vld [vmem:[%s13714_s1 + $0x550] sm:$0xff] }
 0x53e   :  { %v995_v0 = vpack.c.bf16 %v739_v37, %v739_v37 }
 0x53f   :  { %9422 = vmatmul.msk.bf16.gmra.mxu3 %vm5110_vm1, %v7793_v29  ;;  %v2498_v54 = vpop.f32.mrf.mxu0  ;;  %v6276_v51 = vmax.f32 %v5835_v49, 0.0  ;;  %v4849_v31 = vmax.f32 %v4593_v34, 0.0  ;;  %v483_v29 = vpack.c.bf16 %v227_v17, %v227_v17  ;;  %v1508_v34 = vunpack.c.l.b16 %v996_v38 }
 0x540   :  { %v4177_v4 = vpop.f32.mrf.mxu1 }
 0x541   :  { %v4178_v12 = vadd.f32 %v4177_v4, %v2498_v54  ;;  %v6532_v42 = vpack.c.bf16 %v6276_v51, %v6276_v51  ;;  %v1507_v4 = vunpack.c.l.b16 %v995_v0 }
 0x542   :  { %v7684_v40 = vpop.f32.mrf.mxu3 }
 0x543   :  { %v4594_v8 = vadd.f32 %v12038_v59, %v4178_v12  ;;  %v12045_v3 = vmax.f32 %v7632_v23, %v7684_v40  ;;  %v7788_v32 = vunpack.c.l.b16 %v6532_v42  ;;  %v3187_v12 = vunpack.c.l.b16 %v483_v29 }
 0x544   :  { %v5836_v41 = vpop.f32.mrf.mxu2 }
 0x545   :  { %v4850_v15 = vmax.f32 %v4594_v8, 0.0  ;;  %v5837_v57 = vadd.f32 %v11780_v46, %v5836_v41  ;;  %v3358_v42 = vpack.c.b16 %v3188_v5, %v3187_v12 }
 0x547   :  { %v5030_v26 = vpack.c.bf16 %v4850_v15, %v4849_v31  ;;  %v6277_v18 = vmax.f32 %v5837_v57, 0.0  ;;  %v2501_v11 = vpop.f32.mrf.mxu0  ;;  %v1678_v31 = vpack.c.b16 %v1508_v34, %v1507_v4 }
 0x548   :  { %v4180_v56 = vpop.f32.mrf.mxu1 }
 0x549   :  { %v6533_v10 = vpack.c.bf16 %v6277_v18, %v6277_v18  ;;  %9288 = vmatmul.msk.bf16.gmra.mxu2 %vm5110_vm1, %v5030_v26 }
 0x54a   :  { %v7686_v20 = vpop.f32.mrf.mxu3  ;;  %9021 = vmatmul.msk.bf16.gmra.mxu0 %vm1727_vm0, %v1677_v58 }
 0x54b   :  { %v7789_v63 = vunpack.c.l.b16 %v6533_v10  ;;  %v12052_v23 = vmax.f32 %v7633_v6, %v7686_v20  ;;  %9153 = vmatmul.msk.bf16.gmra.mxu1 %vm1727_vm0, %v3357_v27  ;;  %v4181_v6 = vadd.f32 %v4180_v56, %v2501_v11  ;;  %v741_v56 = vld [vmem:[%s13714_s1 + $0x560] sm:$0xff]  ;;  %v742_v10 = vld [vmem:[%s13714_s1 + $0x568] sm:$0xff] }
 0x54c   :  { %v5839_v44 = vpop.f32.mrf.mxu2  ;;  %v229_v20 = vld [vmem:[%s13713_s0 + $0x560] sm:$0xff]  ;;  %v998_v37 = vpack.c.bf16 %v742_v10, %v742_v10 }
 0x54d   :  { %v7794_v9 = vpack.c.b16 %v7789_v63, %v7788_v32  ;;  %v5840_v48 = vadd.f32 %v11780_v46, %v5839_v44  ;;  %v4595_v49 = vadd.f32 %v12038_v59, %v4181_v6  ;;  %v997_v63 = vpack.c.bf16 %v741_v56, %v741_v56 }
 0x54e   :  { %v485_v50 = vpack.c.bf16 %v229_v20, %v229_v20  ;;  %v486_v44 = vpack.c.bf16 %v230_v7, %v230_v7 }
 0x54f   :  { %9423 = vmatmul.msk.bf16.gmra.mxu3 %vm5110_vm1, %v7794_v9  ;;  %v2503_v21 = vpop.f32.mrf.mxu0  ;;  %v6278_v40 = vmax.f32 %v5840_v48, 0.0  ;;  %v4851_v8 = vmax.f32 %v4595_v49, 0.0  ;;  %v1509_v29 = vunpack.c.l.b16 %v997_v63  ;;  %v1510_v48 = vunpack.c.l.b16 %v998_v37 }
 0x550   :  { %v4182_v25 = vpop.f32.mrf.mxu1  ;;  %v3189_v35 = vunpack.c.l.b16 %v485_v50 }
 0x551   :  { %v4183_v36 = vadd.f32 %v4182_v25, %v2503_v21  ;;  %v6534_v15 = vpack.c.bf16 %v6278_v40, %v6278_v40  ;;  %v1679_v40 = vpack.c.b16 %v1510_v48, %v1509_v29 }
 0x552   :  { %v7689_v54 = vpop.f32.mrf.mxu3 }
 0x553   :  { %v4596_v1 = vadd.f32 %v12038_v59, %v4183_v36  ;;  %v12075_v45 = vmax.f32 %v7634_v14, %v7689_v54  ;;  %v7790_v13 = vunpack.c.l.b16 %v6534_v15  ;;  %v3190_v36 = vunpack.c.l.b16 %v486_v44 }
 0x554   :  { %v5841_v51 = vpop.f32.mrf.mxu2 }
 0x555   :  { %v4852_v24 = vmax.f32 %v4596_v1, 0.0  ;;  %v5842_v41 = vadd.f32 %v11780_v46, %v5841_v51 }
 0x557   :  { %v5031_v57 = vpack.c.bf16 %v4852_v24, %v4851_v8  ;;  %v6279_v58 = vmax.f32 %v5842_v41, 0.0  ;;  %v2506_v26 = vpop.f32.mrf.mxu0  ;;  %v3359_v8 = vpack.c.b16 %v3190_v36, %v3189_v35 }
 0x558   :  { %v4185_v18 = vpop.f32.mrf.mxu1 }
 0x559   :  { %v6535_v27 = vpack.c.bf16 %v6279_v58, %v6279_v58  ;;  %9289 = vmatmul.msk.bf16.gmra.mxu2 %vm5110_vm1, %v5031_v57  ;;  %v743_v57 = vld [vmem:[%s13714_s1 + $0x570] sm:$0xff]  ;;  %v744_v58 = vld [vmem:[%s13714_s1 + $0x578] sm:$0xff] }
 0x55a   :  { %v7691_v11 = vpop.f32.mrf.mxu3  ;;  %9022 = vmatmul.msk.bf16.gmra.mxu0 %vm1727_vm0, %v1678_v31 }
 0x55b   :  { %v7791_v53 = vunpack.c.l.b16 %v6535_v27  ;;  %v12082_v14 = vmax.f32 %v7635_v19, %v7691_v11  ;;  %9154 = vmatmul.msk.bf16.gmra.mxu1 %vm1727_vm0, %v3358_v42  ;;  %v4186_v19 = vadd.f32 %v4185_v18, %v2506_v26  ;;  %v231_v42 = vld [vmem:[%s13713_s0 + $0x570] sm:$0xff]  ;;  %v999_v18 = vpack.c.bf16 %v743_v57, %v743_v57 }
 0x55c   :  { %v5844_v32 = vpop.f32.mrf.mxu2  ;;  %v1000_v27 = vpack.c.bf16 %v744_v58, %v744_v58  ;;  %v487_v11 = vpack.c.bf16 %v231_v42, %v231_v42 }
 0x55d   :  { %v7795_v28 = vpack.c.b16 %v7791_v53, %v7790_v13  ;;  %v5845_v17 = vadd.f32 %v11780_v46, %v5844_v32  ;;  %v4597_v6 = vadd.f32 %v12038_v59, %v4186_v19  ;;  %v488_v53 = vpack.c.bf16 %v232_v16, %v232_v16 }
 0x55e   :  { %v1512_v19 = vunpack.c.l.b16 %v1000_v27  ;;  %v3191_v63 = vunpack.c.l.b16 %v487_v11 }
 0x55f   :  { %9424 = vmatmul.msk.bf16.gmra.mxu3 %vm5110_vm1, %v7795_v28  ;;  %v2508_v33 = vpop.f32.mrf.mxu0  ;;  %v6280_v21 = vmax.f32 %v5845_v17, 0.0  ;;  %v4853_v4 = vmax.f32 %v4597_v6, 0.0  ;;  %v1511_v28 = vunpack.c.l.b16 %v999_v18  ;;  %v3192_v44 = vunpack.c.l.b16 %v488_v53 }
 0x560   :  { %v4187_v9 = vpop.f32.mrf.mxu1 }
 0x561   :  { %v4188_v0 = vadd.f32 %v4187_v9, %v2508_v33  ;;  %v6536_v1 = vpack.c.bf16 %v6280_v21, %v6280_v21  ;;  %v3360_v35 = vpack.c.b16 %v3192_v44, %v3191_v63 }
 0x562   :  { %v7694_v38 = vpop.f32.mrf.mxu3 }
 0x563   :  { %v4598_v25 = vadd.f32 %v12038_v59, %v4188_v0  ;;  %v12105_v49 = vmax.f32 %v7636_v43, %v7694_v38  ;;  %v7853_v22 = vunpack.c.l.b16 %v6536_v1  ;;  %v1680_v0 = vpack.c.b16 %v1512_v19, %v1511_v28  ;;  %v234_v1 = vld [vmem:[%s13713_s0 + $0x588] sm:$0xff] }
 0x564   :  { %v5846_v54 = vpop.f32.mrf.mxu2 }
 0x565   :  { %v4854_v34 = vmax.f32 %v4598_v25, 0.0  ;;  %v5847_v12 = vadd.f32 %v11780_v46, %v5846_v54 }
 0x567   :  { %v5032_v5 = vpack.c.bf16 %v4854_v34, %v4853_v4  ;;  %v6281_v51 = vmax.f32 %v5847_v12, 0.0  ;;  %v2511_v24 = vpop.f32.mrf.mxu0  ;;  %v233_v12 = vld [vmem:[%s13713_s0 + $0x580] sm:$0xff] }
 0x568   :  { %v4190_v41 = vpop.f32.mrf.mxu1 }
 0x569   :  { %v6537_v31 = vpack.c.bf16 %v6281_v51, %v6281_v51  ;;  %9290 = vmatmul.msk.bf16.gmra.mxu2 %vm5110_vm1, %v5032_v5 }
 0x56a   :  { %v7696_v15 = vpop.f32.mrf.mxu3  ;;  %9023 = vmatmul.msk.bf16.gmra.mxu0 %vm1727_vm0, %v1679_v40 }
 0x56b   :  { %v7854_v30 = vunpack.c.l.b16 %v6537_v31  ;;  %v12112_v43 = vmax.f32 %v7637_v61, %v7696_v15  ;;  %9155 = vmatmul.msk.bf16.gmra.mxu1 %vm1727_vm0, %v3359_v8  ;;  %v4191_v61 = vadd.f32 %v4190_v41, %v2511_v24  ;;  %v489_v41 = vpack.c.bf16 %v233_v12, %v233_v12  ;;  %v12163_v31 = vld [vmem:[%s13719_s6] ss:$0 sm:$0xff] }
 0x56c   :  { %v5849_v26 = vpop.f32.mrf.mxu2 }
 0x56d   :  { %v7861_v47 = vpack.c.b16 %v7854_v30, %v7853_v22  ;;  %v5850_v13 = vadd.f32 %v11780_v46, %v5849_v26  ;;  %v4599_v20 = vadd.f32 %v12038_v59, %v4191_v61  ;;  %v490_v22 = vpack.c.bf16 %v234_v1, %v234_v1 }
 0x56f   :  { %9425 = vmatmul.msk.bf16.vlgmr.msrb.gmra.mxu3 %vm5110_vm1, %v7861_v47  ;;  %v2513_v56 = vpop.f32.mrf.mxu0  ;;  %v6282_v37 = vmax.f32 %v5850_v13, 0.0  ;;  %v4855_v9 = vmax.f32 %v4599_v20, 0.0  ;;  %v3193_v47 = vunpack.c.l.b16 %v489_v41  ;;  %v3194_v11 = vunpack.c.l.b16 %v490_v22 }
 0x570   :  { %v4192_v10 = vpop.f32.mrf.mxu1  ;;  %8019 = vmatpush.bf16.msrb.mxu3 %v11868_v62 }
 0x571   :  { %v4193_v32 = vadd.f32 %v4192_v10, %v2513_v56  ;;  %v6538_v38 = vpack.c.bf16 %v6282_v37, %v6282_v37  ;;  %v3361_v63 = vpack.c.b16 %v3194_v11, %v3193_v47 }
 0x572   :  { %v12132_v7 = vpop.f32.mrf.mxu3 }
 0x573   :  { %v4600_v50 = vadd.f32 %v12038_v59, %v4193_v32  ;;  %v7768_v17 = vmax.f32 %v12007_v2, %v12132_v7  ;;  %v7855_v4 = vunpack.c.l.b16 %v6538_v38  ;;  %v748_v38 = vld [vmem:[%s13714_s1 + $0x598] sm:$0xff] }
 0x574   :  { %v5851_v33 = vpop.f32.mrf.mxu2  ;;  %8020 = vmatpush.bf16.msrb.mxu3 %v11880_v39 }
 0x575   :  { %v4856_v62 = vmax.f32 %v4600_v50, 0.0  ;;  %v5852_v6 = vadd.f32 %v11780_v46, %v5851_v33  ;;  %v745_v46 = vld [vmem:[%s13714_s1 + $0x580] sm:$0xff] }
 0x576   :  { %v1001_v8 = vpack.c.bf16 %v745_v46, %v745_v46 }
 0x577   :  { %v5033_v29 = vpack.c.bf16 %v4856_v62, %v4855_v9  ;;  %v6283_v48 = vmax.f32 %v5852_v6, 0.0  ;;  %v2516_v21 = vpop.f32.mrf.mxu0 }
 0x578   :  { %v4195_v25 = vpop.f32.mrf.mxu1  ;;  %8021 = vmatpush.bf16.msrb.mxu3 %v11887_v55  ;;  %v746_v55 = vld [vmem:[%s13714_s1 + $0x588] sm:$0xff]  ;;  %v1513_v26 = vunpack.c.l.b16 %v1001_v8 }
 0x579   :  { %v6539_v36 = vpack.c.bf16 %v6283_v48, %v6283_v48  ;;  %9291 = vmatmul.msk.bf16.gmra.mxu2 %vm5110_vm1, %v5033_v29  ;;  %v4196_v51 = vadd.f32 %v4195_v25, %v2516_v21  ;;  %v1002_v24 = vpack.c.bf16 %v746_v55, %v746_v55  ;;  %v235_v29 = vld [vmem:[%s13713_s0 + $0x590] sm:$0xff] }
 0x57a   :  { %v12141_v54 = vpop.f32.mrf.mxu3  ;;  %9024 = vmatmul.msk.bf16.gmra.mxu0 %vm1727_vm0, %v1680_v0  ;;  %v747_v0 = vld [vmem:[%s13714_s1 + $0x590] sm:$0xff] }
 0x57b   :  { %v7856_v39 = vunpack.c.l.b16 %v6539_v36  ;;  %v7769_v34 = vmax.f32 %v12016_v52, %v12141_v54  ;;  %9156 = vmatmul.msk.bf16.gmra.mxu1 %vm1727_vm0, %v3360_v35  ;;  %v4601_v58 = vadd.f32 %v12038_v59, %v4196_v51  ;;  %v1514_v16 = vunpack.c.l.b16 %v1002_v24  ;;  %v236_v35 = vld [vmem:[%s13713_s0 + $0x598] sm:$0xff]  ;;  %v242_v52 = vld [vmem:[%s13713_s0 + $0x5c8] sm:$0xff]  ;;  %v12300_v54 = vld [vmem:[%s13720_s7] sm:$0xff] }
 0x57c   :  { %v5854_v40 = vpop.f32.mrf.mxu2  ;;  %8022 = vmatpush.bf16.msrb.mxu3 %v11912_v60  ;;  %v1003_v36 = vpack.c.bf16 %v747_v0, %v747_v0  ;;  %v492_v55 = vpack.c.bf16 %v236_v35, %v236_v35 }
 0x57d   :  { %v7862_v5 = vpack.c.b16 %v7856_v39, %v7855_v4  ;;  %v5855_v15 = vadd.f32 %v12163_v31, %v5854_v40  ;;  %v4857_v53 = vmax.f32 %v4601_v58, 0.0  ;;  %v1681_v20 = vpack.c.b16 %v1514_v16, %v1513_v26 }
 0x57e   :  { %v1004_v4 = vpack.c.bf16 %v748_v38, %v748_v38  ;;  %v491_v39 = vpack.c.bf16 %v235_v29, %v235_v29  ;;  %v1515_v8 = vunpack.c.l.b16 %v1003_v36 }
 0x57f   :  { %9426 = vmatmul.msk.bf16.gmra.mxu3 %vm5110_vm1, %v7862_v5  ;;  %v2518_v30 = vpop.f32.mrf.mxu0  ;;  %v6284_v61 = vmax.f32 %v5855_v15, 0.0 }
 0x580   :  { %v4197_v57 = vpop.f32.mrf.mxu1  ;;  %v1516_v24 = vunpack.c.l.b16 %v1004_v4  ;;  %v3195_v41 = vunpack.c.l.b16 %v491_v39 }
 0x581   :  { %v4198_v60 = vadd.f32 %v4197_v57, %v2518_v30  ;;  %v6540_v32 = vpack.c.bf16 %v6284_v61, %v6284_v61  ;;  %v3196_v57 = vunpack.c.l.b16 %v492_v55 }
 0x582   :  { %v12168_v42 = vpop.f32.mrf.mxu3  ;;  %v1682_v47 = vpack.c.b16 %v1516_v24, %v1515_v8 }
 0x583   :  { %v4602_v18 = vadd.f32 %v12038_v59, %v4198_v60  ;;  %v7770_v27 = vmax.f32 %v12045_v3, %v12168_v42  ;;  %v7857_v9 = vunpack.c.l.b16 %v6540_v32 }
 0x584   :  { %v5856_v13 = vpop.f32.mrf.mxu2 }
 0x585   :  { %v4858_v56 = vmax.f32 %v4602_v18, 0.0  ;;  %v5857_v10 = vadd.f32 %v12163_v31, %v5856_v13  ;;  %v3362_v13 = vpack.c.b16 %v3196_v57, %v3195_v41 }
 0x587   :  { %v5034_v28 = vpack.c.bf16 %v4858_v56, %v4857_v53  ;;  %v6285_v19 = vmax.f32 %v5857_v10, 0.0  ;;  %v2521_v37 = vpop.f32.mrf.mxu0 }
 0x588   :  { %v4200_v50 = vpop.f32.mrf.mxu1 }
 0x589   :  { %v6541_v44 = vpack.c.bf16 %v6285_v19, %v6285_v19  ;;  %9292 = vmatmul.msk.bf16.gmra.mxu2 %vm5110_vm1, %v5034_v28  ;;  %v4201_v25 = vadd.f32 %v4200_v50, %v2521_v37  ;;  %v750_v37 = vld [vmem:[%s13714_s1 + $0x5a8] sm:$0xff]  ;;  %v237_v50 = vld [vmem:[%s13713_s0 + $0x5a0] sm:$0xff] }
 0x58a   :  { %v12175_v33 = vpop.f32.mrf.mxu3  ;;  %9025 = vmatmul.msk.bf16.gmra.mxu0 %vm1727_vm0, %v1681_v20  ;;  %v1006_v29 = vpack.c.bf16 %v750_v37, %v750_v37 }
 0x58b   :  { %v7858_v62 = vunpack.c.l.b16 %v6541_v44  ;;  %v7771_v6 = vmax.f32 %v12052_v23, %v12175_v33  ;;  %9157 = vmatmul.msk.bf16.gmra.mxu1 %vm1727_vm0, %v3361_v63  ;;  %v4603_v1 = vadd.f32 %v12038_v59, %v4201_v25  ;;  %v749_v63 = vld [vmem:[%s13714_s1 + $0x5a0] sm:$0xff]  ;;  %v244_v23 = vld [vmem:[%s13713_s0 + $0x5d8] sm:$0xff] }
 0x58c   :  { %v5859_v48 = vpop.f32.mrf.mxu2  ;;  %v1005_v38 = vpack.c.bf16 %v749_v63, %v749_v63  ;;  %v239_v63 = vld [vmem:[%s13713_s0 + $0x5b0] sm:$0xff] }
 0x58d   :  { %v7863_v21 = vpack.c.b16 %v7858_v62, %v7857_v9  ;;  %v5860_v46 = vadd.f32 %v12163_v31, %v5859_v48  ;;  %v4859_v60 = vmax.f32 %v4603_v1, 0.0  ;;  %v238_v9 = vld [vmem:[%s13713_s0 + $0x5a8] sm:$0xff]  ;;  %v493_v48 = vpack.c.bf16 %v237_v50, %v237_v50  ;;  %v240_v50 = vld [vmem:[%s13713_s0 + $0x5b8] sm:$0xff] }
 0x58e   :  { %v1517_v55 = vunpack.c.l.b16 %v1005_v38  ;;  %v495_v38 = vpack.c.bf16 %v239_v63, %v239_v63  ;;  %v753_v63 = vld [vmem:[%s13714_s1 + $0x5c0] sm:$0xff] }
 0x58f   :  { %9427 = vmatmul.msk.bf16.gmra.mxu3 %vm5110_vm1, %v7863_v21  ;;  %v2523_v12 = vpop.f32.mrf.mxu0  ;;  %v6286_v15 = vmax.f32 %v5860_v46, 0.0  ;;  %v494_v21 = vpack.c.bf16 %v238_v9, %v238_v9 }
 0x590   :  { %v4202_v40 = vpop.f32.mrf.mxu1 }
 0x591   :  { %v4203_v5 = vadd.f32 %v4202_v40, %v2523_v12  ;;  %v6542_v61 = vpack.c.bf16 %v6286_v15, %v6286_v15  ;;  %v1518_v12 = vunpack.c.l.b16 %v1006_v29  ;;  %v3197_v40 = vunpack.c.l.b16 %v493_v48 }
 0x592   :  { %v12196_v51 = vpop.f32.mrf.mxu3  ;;  %v3198_v24 = vunpack.c.l.b16 %v494_v21  ;;  %v496_v48 = vpack.c.bf16 %v240_v50, %v240_v50  ;;  %v241_v50 = vld [vmem:[%s13713_s0 + $0x5c0] sm:$0xff] }
 0x593   :  { %v4604_v22 = vadd.f32 %v12038_v59, %v4203_v5  ;;  %v7772_v30 = vmax.f32 %v12075_v45, %v12196_v51  ;;  %v7859_v32 = vunpack.c.l.b16 %v6542_v61 }
 0x594   :  { %v5861_v58 = vpop.f32.mrf.mxu2 }
 0x595   :  { %v4860_v26 = vmax.f32 %v4604_v22, 0.0  ;;  %v5862_v16 = vadd.f32 %v12163_v31, %v5861_v58  ;;  %v1683_v58 = vpack.c.b16 %v1518_v12, %v1517_v55 }
 0x597   :  { %v5035_v18 = vpack.c.bf16 %v4860_v26, %v4859_v60  ;;  %v6287_v11 = vmax.f32 %v5862_v16, 0.0  ;;  %v2526_v53 = vpop.f32.mrf.mxu0 }
 0x598   :  { %v4205_v56 = vpop.f32.mrf.mxu1 }
 0x599   :  { %v6543_v10 = vpack.c.bf16 %v6287_v11, %v6287_v11  ;;  %9293 = vmatmul.msk.bf16.gmra.mxu2 %vm5110_vm1, %v5035_v18  ;;  %v4206_v0 = vadd.f32 %v4205_v56, %v2526_v53 }
 0x59a   :  { %v12203_v20 = vpop.f32.mrf.mxu3  ;;  %9026 = vmatmul.msk.bf16.gmra.mxu0 %vm1727_vm0, %v1682_v47  ;;  %v3363_v47 = vpack.c.b16 %v3198_v24, %v3197_v40  ;;  %v3199_v40 = vunpack.c.l.b16 %v495_v38  ;;  %v497_v38 = vpack.c.bf16 %v241_v50, %v241_v50 }
 0x59b   :  { %v7860_v28 = vunpack.c.l.b16 %v6543_v10  ;;  %v7773_v19 = vmax.f32 %v12082_v14, %v12203_v20  ;;  %9158 = vmatmul.msk.bf16.gmra.mxu1 %vm1727_vm0, %v3362_v13  ;;  %v4605_v4 = vadd.f32 %v12038_v59, %v4206_v0  ;;  %v246_v14 = vld [vmem:[%s13713_s0 + $0x5e8] sm:$0xff] }
 0x59c   :  { %v5864_v44 = vpop.f32.mrf.mxu2 }
 0x59d   :  { %v7864_v62 = vpack.c.b16 %v7860_v28, %v7859_v32  ;;  %v5865_v35 = vadd.f32 %v12163_v31, %v5864_v44  ;;  %v4861_v15 = vmax.f32 %v4605_v4, 0.0  ;;  %v751_v32 = vld [vmem:[%s13714_s1 + $0x5b0] sm:$0xff]  ;;  %v752_v28 = vld [vmem:[%s13714_s1 + $0x5b8] sm:$0xff] }
 0x59e   :  { %v1008_v0 = vpack.c.bf16 %v752_v28, %v752_v28 }
 0x59f   :  { %9428 = vmatmul.msk.bf16.gmra.mxu3 %vm5110_vm1, %v7864_v62  ;;  %v2528_v25 = vpop.f32.mrf.mxu0  ;;  %v6288_v1 = vmax.f32 %v5865_v35, 0.0  ;;  %v1007_v62 = vpack.c.bf16 %v751_v32, %v751_v32 }
 0x5a0   :  { %v4207_v36 = vpop.f32.mrf.mxu1  ;;  %v1520_v12 = vunpack.c.l.b16 %v1008_v0 }
 0x5a1   :  { %v4208_v39 = vadd.f32 %v4207_v36, %v2528_v25  ;;  %v6544_v60 = vpack.c.bf16 %v6288_v1, %v6288_v1  ;;  %v12254_v25 = vld [vmem:[%s13720_s7 + $0x18] sm:$0xff]  ;;  %v1519_v55 = vunpack.c.l.b16 %v1007_v62  ;;  %v1009_v62 = vpack.c.bf16 %v753_v63, %v753_v63 }
 0x5a2   :  { %v12224_v46 = vpop.f32.mrf.mxu3  ;;  %v756_v63 = vld [vmem:[%s13714_s1 + $0x5d8] sm:$0xff] }
 0x5a3   :  { %v4606_v5 = vadd.f32 %v12038_v59, %v4208_v39  ;;  %v7774_v8 = vmax.f32 %v12105_v49, %v12224_v46  ;;  %v7922_v53 = vunpack.c.l.b16 %v6544_v60 }
 0x5a4   :  { %v5866_v41 = vpop.f32.mrf.mxu2 }
 0x5a5   :  { %v4862_v22 = vmax.f32 %v4606_v5, 0.0  ;;  %v5867_v57 = vadd.f32 %v12163_v31, %v5866_v41  ;;  %v3200_v41 = vunpack.c.l.b16 %v496_v48  ;;  %v498_v48 = vpack.c.bf16 %v242_v52, %v242_v52 }
 0x5a6   :  { %v1012_v52 = vpack.c.bf16 %v756_v63, %v756_v63 }
 0x5a7   :  { %v5036_v26 = vpack.c.bf16 %v4862_v22, %v4861_v15  ;;  %v6289_v16 = vmax.f32 %v5867_v57, 0.0  ;;  %v2531_v61 = vpop.f32.mrf.mxu0  ;;  %v12267_v22 = vld [vmem:[%s13720_s7 + $0x10] sm:$0xff]  ;;  %v3364_v2 = vpack.c.b16 %v3200_v41, %v3199_v40  ;;  %v3201_v40 = vunpack.c.l.b16 %v497_v38 }
 0x5a8   :  { %v4210_v18 = vpop.f32.mrf.mxu1 }
 0x5a9   :  { %v6545_v11 = vpack.c.bf16 %v6289_v16, %v6289_v16  ;;  %9294 = vmatmul.msk.bf16.gmra.mxu2 %vm5110_vm1, %v5036_v26  ;;  %v4211_v9 = vadd.f32 %v4210_v18, %v2531_v61  ;;  %v1684_v26 = vpack.c.b16 %v1520_v12, %v1519_v55  ;;  %v12274_v18 = vld [vmem:[%s13720_s7 + $0x8] sm:$0xff]  ;;  %v1521_v55 = vunpack.c.l.b16 %v1009_v62 }
 0x5aa   :  { %v12231_v13 = vpop.f32.mrf.mxu3  ;;  %9027 = vmatmul.msk.bf16.gmra.mxu0 %vm1727_vm0, %v1683_v58  ;;  %v500_v62 = vpack.c.bf16 %v244_v23, %v244_v23 }
 0x5ab   :  { %v7923_v56 = vunpack.c.l.b16 %v6545_v11  ;;  %v7775_v10 = vmax.f32 %v12112_v43, %v12231_v13  ;;  %9159 = vmatmul.msk.bf16.gmra.mxu1 %vm1727_vm0, %v3363_v47  ;;  %v4607_v36 = vadd.f32 %v12038_v59, %v4211_v9  ;;  %v248_v43 = vld [vmem:[%s13713_s0 + $0x5f8] sm:$0xff] }
 0x5ac   :  { %v5869_v37 = vpop.f32.mrf.mxu2 }
 0x5ad   :  { %v7930_v44 = vpack.c.b16 %v7923_v56, %v7922_v53  ;;  %v5870_v29 = vadd.f32 %v12163_v31, %v5869_v37  ;;  %v4863_v57 = vmax.f32 %v4607_v36, 0.0  ;;  %v754_v37 = vld [vmem:[%s13714_s1 + $0x5c8] sm:$0xff] }
 0x5ae   :  { %v1010_v0 = vpack.c.bf16 %v754_v37, %v754_v37  ;;  %v243_v37 = vld [vmem:[%s13713_s0 + $0x5d0] sm:$0xff] }
 0x5af   :  { %9429 = vmatmul.msk.bf16.vlgmr.msra.gmra.mxu3 %vm5110_vm1, %v7930_v44  ;;  %v2533_v35 = vpop.f32.mrf.mxu0  ;;  %v6290_v1 = vmax.f32 %v5870_v29, 0.0 }
 0x5b0   :  { %v4212_v21 = vpop.f32.mrf.mxu1  ;;  %8088 = vmatpush.bf16.msra.mxu3 %v12254_v25  ;;  %v1522_v12 = vunpack.c.l.b16 %v1010_v0 }
 0x5b1   :  { %v4213_v4 = vadd.f32 %v4212_v21, %v2533_v35  ;;  %v6546_v16 = vpack.c.bf16 %v6290_v1, %v6290_v1 }
 0x5b2   :  { %v7817_v39 = vpop.f32.mrf.mxu3 }
 0x5b3   :  { %v4608_v5 = vadd.f32 %v12038_v59, %v4213_v4  ;;  %v12262_v24 = vmax.f32 %v7768_v17, %v7817_v39  ;;  %v7924_v56 = vunpack.c.l.b16 %v6546_v16  ;;  %v1685_v16 = vpack.c.b16 %v1522_v12, %v1521_v55 }
 0x5b4   :  { %v5871_v15 = vpop.f32.mrf.mxu2  ;;  %8089 = vmatpush.bf16.msra.mxu3 %v12267_v22 }
 0x5b5   :  { %v4864_v58 = vmax.f32 %v4608_v5, 0.0  ;;  %v5872_v60 = vadd.f32 %v12163_v31, %v5871_v15  ;;  %v3202_v15 = vunpack.c.l.b16 %v498_v48 }
 0x5b7   :  { %v5037_v47 = vpack.c.bf16 %v4864_v58, %v4863_v57  ;;  %v6291_v61 = vmax.f32 %v5872_v60, 0.0  ;;  %v2536_v7 = vpop.f32.mrf.mxu0 }
 0x5b8   :  { %v4215_v17 = vpop.f32.mrf.mxu1  ;;  %8090 = vmatpush.bf16.msra.mxu3 %v12274_v18 }
 0x5b9   :  { %v6547_v11 = vpack.c.bf16 %v6291_v61, %v6291_v61  ;;  %9295 = vmatmul.msk.bf16.gmra.mxu2 %vm5110_vm1, %v5037_v47  ;;  %v4216_v9 = vadd.f32 %v4215_v17, %v2536_v7  ;;  %v3365_v7 = vpack.c.b16 %v3202_v15, %v3201_v40  ;;  %v3204_v40 = vunpack.c.l.b16 %v500_v62 }
 0x5ba   :  { %v7819_v53 = vpop.f32.mrf.mxu3  ;;  %9028 = vmatmul.msk.bf16.gmra.mxu0 %vm1727_vm0, %v1684_v26 }
 0x5bb   :  { %v7925_v32 = vunpack.c.l.b16 %v6547_v11  ;;  %v12281_v28 = vmax.f32 %v7769_v34, %v7819_v53  ;;  %9160 = vmatmul.msk.bf16.gmra.mxu1 %vm1727_vm0, %v3364_v2  ;;  %v4609_v36 = vadd.f32 %v12038_v59, %v4216_v9 }
 0x5bc   :  { %v5874_v44 = vpop.f32.mrf.mxu2  ;;  %8091 = vmatpush.bf16.msra.mxu3 %v12300_v54 }
 0x5bd   :  { %v7931_v34 = vpack.c.b16 %v7925_v32, %v7924_v56  ;;  %v5875_v29 = vadd.f32 %v12163_v31, %v5874_v44  ;;  %v4865_v58 = vmax.f32 %v4609_v36, 0.0  ;;  %v755_v32 = vld [vmem:[%s13714_s1 + $0x5d0] sm:$0xff]  ;;  %v1524_v36 = vunpack.c.l.b16 %v1012_v52 }
 0x5be   :  { %v1011_v44 = vpack.c.bf16 %v755_v32, %v755_v32 }
 0x5bf   :  { %9430 = vmatmul.msk.bf16.gmra.mxu3 %vm5110_vm1, %v7931_v34  ;;  %v2538_v35 = vpop.f32.mrf.mxu0  ;;  %v6292_v1 = vmax.f32 %v5875_v29, 0.0  ;;  %v499_v34 = vpack.c.bf16 %v243_v37, %v243_v37 }
 0x5c0   :  { %v4217_v21 = vpop.f32.mrf.mxu1 }
 0x5c1   :  { %v4218_v4 = vadd.f32 %v4217_v21, %v2538_v35  ;;  %v6548_v47 = vpack.c.bf16 %v6292_v1, %v6292_v1  ;;  %v1523_v21 = vunpack.c.l.b16 %v1011_v44 }
 0x5c2   :  { %v7822_v39 = vpop.f32.mrf.mxu3 }
 0x5c3   :  { %v4610_v5 = vadd.f32 %v12038_v59, %v4218_v4  ;;  %v12310_v41 = vmax.f32 %v7770_v27, %v7822_v39  ;;  %v7926_v3 = vunpack.c.l.b16 %v6548_v47  ;;  %v3203_v4 = vunpack.c.l.b16 %v499_v34 }
 0x5c4   :  { %v5876_v57 = vpop.f32.mrf.mxu2 }
 0x5c5   :  { %v4866_v60 = vmax.f32 %v4610_v5, 0.0  ;;  %v5877_v26 = vadd.f32 %v12163_v31, %v5876_v57  ;;  %v3366_v47 = vpack.c.b16 %v3204_v40, %v3203_v4 }
 0x5c7   :  { %v5038_v61 = vpack.c.bf16 %v4866_v60, %v4865_v58  ;;  %v6293_v2 = vmax.f32 %v5877_v26, 0.0  ;;  %v2541_v17 = vpop.f32.mrf.mxu0  ;;  %v1686_v58 = vpack.c.b16 %v1524_v36, %v1523_v21 }
 0x5c8   :  { %v4220_v11 = vpop.f32.mrf.mxu1 }
 0x5c9   :  { %v6549_v53 = vpack.c.bf16 %v6293_v2, %v6293_v2  ;;  %9296 = vmatmul.msk.bf16.gmra.mxu2 %vm5110_vm1, %v5038_v61 }
 0x5ca   :  { %v7824_v56 = vpop.f32.mrf.mxu3  ;;  %9029 = vmatmul.msk.bf16.gmra.mxu0 %vm1727_vm0, %v1685_v16 }
 0x5cb   :  { %v7927_v42 = vunpack.c.l.b16 %v6549_v53  ;;  %v12317_v27 = vmax.f32 %v7771_v6, %v7824_v56  ;;  %9161 = vmatmul.msk.bf16.gmra.mxu1 %vm1727_vm0, %v3365_v7  ;;  %v4221_v6 = vadd.f32 %v4220_v11, %v2541_v17  ;;  %v757_v11 = vld [vmem:[%s13714_s1 + $0x5e0] sm:$0xff]  ;;  %v758_v53 = vld [vmem:[%s13714_s1 + $0x5e8] sm:$0xff] }
 0x5cc   :  { %v5879_v50 = vpop.f32.mrf.mxu2  ;;  %v245_v56 = vld [vmem:[%s13713_s0 + $0x5e0] sm:$0xff]  ;;  %v1014_v32 = vpack.c.bf16 %v758_v53, %v758_v53 }
 0x5cd   :  { %v7932_v33 = vpack.c.b16 %v7927_v42, %v7926_v3  ;;  %v5880_v9 = vadd.f32 %v12163_v31, %v5879_v50  ;;  %v4611_v29 = vadd.f32 %v12038_v59, %v4221_v6  ;;  %v1013_v42 = vpack.c.bf16 %v757_v11, %v757_v11 }
 0x5ce   :  { %v501_v63 = vpack.c.bf16 %v245_v56, %v245_v56  ;;  %v502_v50 = vpack.c.bf16 %v246_v14, %v246_v14 }
 0x5cf   :  { %9431 = vmatmul.msk.bf16.gmra.mxu3 %vm5110_vm1, %v7932_v33  ;;  %v2543_v0 = vpop.f32.mrf.mxu0  ;;  %v6294_v39 = vmax.f32 %v5880_v9, 0.0  ;;  %v4867_v5 = vmax.f32 %v4611_v29, 0.0  ;;  %v1525_v34 = vunpack.c.l.b16 %v1013_v42  ;;  %v1526_v9 = vunpack.c.l.b16 %v1014_v32 }
 0x5d0   :  { %v4222_v38 = vpop.f32.mrf.mxu1  ;;  %v3205_v62 = vunpack.c.l.b16 %v501_v63 }
 0x5d1   :  { %v4223_v48 = vadd.f32 %v4222_v38, %v2543_v0  ;;  %v6550_v60 = vpack.c.bf16 %v6294_v39, %v6294_v39  ;;  %v1687_v39 = vpack.c.b16 %v1526_v9, %v1525_v34 }
 0x5d2   :  { %v7827_v35 = vpop.f32.mrf.mxu3 }
 0x5d3   :  { %v4612_v55 = vadd.f32 %v12038_v59, %v4223_v48  ;;  %v12340_v12 = vmax.f32 %v7772_v30, %v7827_v35  ;;  %v7928_v45 = vunpack.c.l.b16 %v6550_v60  ;;  %v3206_v48 = vunpack.c.l.b16 %v502_v50 }
 0x5d4   :  { %v5881_v1 = vpop.f32.mrf.mxu2 }
 0x5d5   :  { %v4868_v15 = vmax.f32 %v4612_v55, 0.0  ;;  %v5882_v57 = vadd.f32 %v12163_v31, %v5881_v1 }
 0x5d7   :  { %v5039_v26 = vpack.c.bf16 %v4868_v15, %v4867_v5  ;;  %v6295_v16 = vmax.f32 %v5882_v57, 0.0  ;;  %v2546_v61 = vpop.f32.mrf.mxu0  ;;  %v3367_v5 = vpack.c.b16 %v3206_v48, %v3205_v62 }
 0x5d8   :  { %v4225_v2 = vpop.f32.mrf.mxu1 }
 0x5d9   :  { %v6551_v7 = vpack.c.bf16 %v6295_v16, %v6295_v16  ;;  %9297 = vmatmul.msk.bf16.gmra.mxu2 %vm5110_vm1, %v5039_v26  ;;  %v759_v26 = vld [vmem:[%s13714_s1 + $0x5f0] sm:$0xff]  ;;  %v760_v16 = vld [vmem:[%s13714_s1 + $0x5f8] sm:$0xff] }
 0x5da   :  { %v7829_v17 = vpop.f32.mrf.mxu3  ;;  %9030 = vmatmul.msk.bf16.gmra.mxu0 %vm1727_vm0, %v1686_v58 }
 0x5db   :  { %v7929_v51 = vunpack.c.l.b16 %v6551_v7  ;;  %v12347_v30 = vmax.f32 %v7773_v19, %v7829_v17  ;;  %9162 = vmatmul.msk.bf16.gmra.mxu1 %vm1727_vm0, %v3366_v47  ;;  %v4226_v19 = vadd.f32 %v4225_v2, %v2546_v61  ;;  %v247_v47 = vld [vmem:[%s13713_s0 + $0x5f0] sm:$0xff]  ;;  %v1015_v2 = vpack.c.bf16 %v759_v26, %v759_v26 }
 0x5dc   :  { %v5884_v3 = vpop.f32.mrf.mxu2  ;;  %v1016_v7 = vpack.c.bf16 %v760_v16, %v760_v16  ;;  %v503_v17 = vpack.c.bf16 %v247_v47, %v247_v47 }
 0x5dd   :  { %v7933_v20 = vpack.c.b16 %v7929_v51, %v7928_v45  ;;  %v5885_v37 = vadd.f32 %v12163_v31, %v5884_v3  ;;  %v4613_v6 = vadd.f32 %v12038_v59, %v4226_v19  ;;  %v504_v51 = vpack.c.bf16 %v248_v43, %v248_v43 }
 0x5de   :  { %v1528_v19 = vunpack.c.l.b16 %v1016_v7  ;;  %v3207_v42 = vunpack.c.l.b16 %v503_v17 }
 0x5df   :  { %9432 = vmatmul.msk.bf16.gmra.mxu3 %vm5110_vm1, %v7933_v20  ;;  %v2548_v23 = vpop.f32.mrf.mxu0  ;;  %v6296_v0 = vmax.f32 %v5885_v37, 0.0  ;;  %v4869_v21 = vmax.f32 %v4613_v6, 0.0  ;;  %v1527_v20 = vunpack.c.l.b16 %v1015_v2  ;;  %v3208_v50 = vunpack.c.l.b16 %v504_v51 }
 0x5e0   :  { %v4227_v33 = vpop.f32.mrf.mxu1 }
 0x5e1   :  { %v4228_v44 = vadd.f32 %v4227_v33, %v2548_v23  ;;  %v6552_v55 = vpack.c.bf16 %v6296_v0, %v6296_v0  ;;  %v3368_v0 = vpack.c.b16 %v3208_v50, %v3207_v42 }
 0x5e2   :  { %v7832_v52 = vpop.f32.mrf.mxu3 }
 0x5e3   :  { %v4614_v38 = vadd.f32 %v12038_v59, %v4228_v44  ;;  %v12370_v29 = vmax.f32 %v7774_v8, %v7832_v52  ;;  %v7991_v49 = vunpack.c.l.b16 %v6552_v55  ;;  %v1688_v52 = vpack.c.b16 %v1528_v19, %v1527_v20  ;;  %v762_v55 = vld [vmem:[%s13714_s1 + $0x608] sm:$0xff] }
 0x5e4   :  { %v5886_v35 = vpop.f32.mrf.mxu2 }
 0x5e5   :  { %v4870_v36 = vmax.f32 %v4614_v38, 0.0  ;;  %v5887_v4 = vadd.f32 %v12163_v31, %v5886_v35 }
 0x5e7   :  { %v5040_v40 = vpack.c.bf16 %v4870_v36, %v4869_v21  ;;  %v6297_v1 = vmax.f32 %v5887_v4, 0.0  ;;  %v2551_v15 = vpop.f32.mrf.mxu0 }
 0x5e8   :  { %v4230_v57 = vpop.f32.mrf.mxu1 }
 0x5e9   :  { %v6553_v58 = vpack.c.bf16 %v6297_v1, %v6297_v1  ;;  %9298 = vmatmul.msk.bf16.gmra.mxu2 %vm5110_vm1, %v5040_v40  ;;  %v249_v40 = vld [vmem:[%s13713_s0 + $0x600] sm:$0xff] }
 0x5ea   :  { %v7834_v60 = vpop.f32.mrf.mxu3  ;;  %9031 = vmatmul.msk.bf16.gmra.mxu0 %vm1727_vm0, %v1687_v39  ;;  %v761_v39 = vld [vmem:[%s13714_s1 + $0x600] sm:$0xff] }
 0x5eb   :  { %v7992_v46 = vunpack.c.l.b16 %v6553_v58  ;;  %v12377_v8 = vmax.f32 %v7775_v10, %v7834_v60  ;;  %9163 = vmatmul.msk.bf16.gmra.mxu1 %vm1727_vm0, %v3367_v5  ;;  %v4231_v10 = vadd.f32 %v4230_v57, %v2551_v15  ;;  %v250_v5 = vld [vmem:[%s13713_s0 + $0x608] sm:$0xff]  ;;  %v1017_v58 = vpack.c.bf16 %v761_v39, %v761_v39 }
 0x5ec   :  { %v5889_v61 = vpop.f32.mrf.mxu2  ;;  %v1018_v60 = vpack.c.bf16 %v762_v55, %v762_v55  ;;  %v506_v26 = vpack.c.bf16 %v250_v5, %v250_v5 }
 0x5ed   :  { %v7999_v13 = vpack.c.b16 %v7992_v46, %v7991_v49  ;;  %v5890_v45 = vadd.f32 %v12163_v31, %v5889_v61  ;;  %v4615_v56 = vadd.f32 %v12038_v59, %v4231_v10  ;;  %v505_v49 = vpack.c.bf16 %v249_v40, %v249_v40  ;;  %v12430_v61 = vld [vmem:[%s13717_s4] ss:$0 sm:$0xff] }
 0x5ee   :  { %v1529_v2 = vunpack.c.l.b16 %v1017_v58  ;;  %v1530_v7 = vunpack.c.l.b16 %v1018_v60 }
 0x5ef   :  { %9433 = vmatmul.msk.bf16.vlgmr.msrb.gmra.mxu3 %vm5110_vm1, %v7999_v13  ;;  %v2553_v11 = vpop.f32.mrf.mxu0  ;;  %v6298_v32 = vmax.f32 %v5890_v45, 0.0  ;;  %v4871_v33 = vmax.f32 %v4615_v56, 0.0  ;;  %v3209_v17 = vunpack.c.l.b16 %v505_v49 }
 0x5f0   :  { %v4232_v53 = vpop.f32.mrf.mxu1  ;;  %8157 = vmatpush.bf16.msrb.mxu3 %v12254_v25  ;;  %v1689_v42 = vpack.c.b16 %v1530_v7, %v1529_v2 }
 0x5f1   :  { %v4233_v3 = vadd.f32 %v4232_v53, %v2553_v11  ;;  %v6554_v34 = vpack.c.bf16 %v6298_v32, %v6298_v32  ;;  %v3210_v53 = vunpack.c.l.b16 %v506_v26 }
 0x5f2   :  { %v12397_v14 = vpop.f32.mrf.mxu3 }
 0x5f3   :  { %v4616_v63 = vadd.f32 %v12038_v59, %v4233_v3  ;;  %v7906_v37 = vmax.f32 %v12262_v24, %v12397_v14  ;;  %v7993_v21 = vunpack.c.l.b16 %v6554_v34 }
 0x5f4   :  { %v5891_v23 = vpop.f32.mrf.mxu2  ;;  %8158 = vmatpush.bf16.msrb.mxu3 %v12267_v22 }
 0x5f5   :  { %v4872_v6 = vmax.f32 %v4616_v63, 0.0  ;;  %v5892_v44 = vadd.f32 %v12163_v31, %v5891_v23  ;;  %v3369_v23 = vpack.c.b16 %v3210_v53, %v3209_v17 }
 0x5f7   :  { %v5041_v9 = vpack.c.bf16 %v4872_v6, %v4871_v33  ;;  %v6299_v62 = vmax.f32 %v5892_v44, 0.0  ;;  %v2556_v38 = vpop.f32.mrf.mxu0 }
 0x5f8   :  { %v4235_v48 = vpop.f32.mrf.mxu1  ;;  %8159 = vmatpush.bf16.msrb.mxu3 %v12274_v18 }
 0x5f9   :  { %v6555_v59 = vpack.c.bf16 %v6299_v62, %v6299_v62  ;;  %9299 = vmatmul.msk.bf16.gmra.mxu2 %vm5110_vm1, %v5041_v9  ;;  %v4236_v57 = vadd.f32 %v4235_v48, %v2556_v38  ;;  %v764_v38 = vld [vmem:[%s13714_s1 + $0x618] sm:$0xff]  ;;  %v251_v48 = vld [vmem:[%s13713_s0 + $0x610] sm:$0xff] }
 0x5fa   :  { %v12406_v35 = vpop.f32.mrf.mxu3  ;;  %9032 = vmatmul.msk.bf16.gmra.mxu0 %vm1727_vm0, %v1688_v52  ;;  %v1020_v40 = vpack.c.bf16 %v764_v38, %v764_v38 }
 0x5fb   :  { %v7994_v36 = vunpack.c.l.b16 %v6555_v59  ;;  %v7907_v4 = vmax.f32 %v12281_v28, %v12406_v35  ;;  %9164 = vmatmul.msk.bf16.gmra.mxu1 %vm1727_vm0, %v3368_v0  ;;  %v4617_v43 = vadd.f32 %v12430_v61, %v4236_v57  ;;  %v763_v0 = vld [vmem:[%s13714_s1 + $0x610] sm:$0xff]  ;;  %v258_v28 = vld [vmem:[%s13713_s0 + $0x648] sm:$0xff] }
 0x5fc   :  { %v5894_v1 = vpop.f32.mrf.mxu2  ;;  %8160 = vmatpush.bf16.msrb.mxu3 %v12300_v54  ;;  %v1019_v55 = vpack.c.bf16 %v763_v0, %v763_v0  ;;  %v253_v0 = vld [vmem:[%s13713_s0 + $0x620] sm:$0xff] }
 0x5fd   :  { %v8000_v15 = vpack.c.b16 %v7994_v36, %v7993_v21  ;;  %v5895_v46 = vadd.f32 %v12163_v31, %v5894_v1  ;;  %v4873_v3 = vmax.f32 %v4617_v43, 0.0  ;;  %v252_v21 = vld [vmem:[%s13713_s0 + $0x618] sm:$0xff]  ;;  %v507_v1 = vpack.c.bf16 %v251_v48, %v251_v48  ;;  %v254_v48 = vld [vmem:[%s13713_s0 + $0x628] sm:$0xff] }
 0x5fe   :  { %v1531_v26 = vunpack.c.l.b16 %v1019_v55  ;;  %v509_v55 = vpack.c.bf16 %v253_v0, %v253_v0  ;;  %v767_v0 = vld [vmem:[%s13714_s1 + $0x630] sm:$0xff] }
 0x5ff   :  { %9434 = vmatmul.msk.bf16.gmra.mxu3 %vm5110_vm1, %v8000_v15  ;;  %v2558_v16 = vpop.f32.mrf.mxu0  ;;  %v6300_v45 = vmax.f32 %v5895_v46, 0.0  ;;  %v508_v15 = vpack.c.bf16 %v252_v21, %v252_v21 }
 0x600   :  { %v4237_v47 = vpop.f32.mrf.mxu1 }
 0x601   :  { %v4238_v13 = vadd.f32 %v4237_v47, %v2558_v16  ;;  %v6556_v32 = vpack.c.bf16 %v6300_v45, %v6300_v45  ;;  %v1532_v16 = vunpack.c.l.b16 %v1020_v40  ;;  %v3211_v47 = vunpack.c.l.b16 %v507_v1 }
 0x602   :  { %v12433_v10 = vpop.f32.mrf.mxu3  ;;  %v3212_v7 = vunpack.c.l.b16 %v508_v15  ;;  %v510_v1 = vpack.c.bf16 %v254_v48, %v254_v48  ;;  %v255_v48 = vld [vmem:[%s13713_s0 + $0x630] sm:$0xff] }
 0x603   :  { %v4618_v51 = vadd.f32 %v12430_v61, %v4238_v13  ;;  %v7908_v11 = vmax.f32 %v12310_v41, %v12433_v10  ;;  %v7995_v34 = vunpack.c.l.b16 %v6556_v32 }
 0x604   :  { %v5896_v56 = vpop.f32.mrf.mxu2 }
 0x605   :  { %v4874_v20 = vmax.f32 %v4618_v51, 0.0  ;;  %v5897_v19 = vadd.f32 %v12163_v31, %v5896_v56  ;;  %v1690_v56 = vpack.c.b16 %v1532_v16, %v1531_v26  ;;  %v3213_v16 = vunpack.c.l.b16 %v509_v55 }
 0x606   :  { %v1023_v55 = vpack.c.bf16 %v767_v0, %v767_v0 }
 0x607   :  { %v5042_v63 = vpack.c.bf16 %v4874_v20, %v4873_v3  ;;  %v6301_v50 = vmax.f32 %v5897_v19, 0.0  ;;  %v2561_v33 = vpop.f32.mrf.mxu0 }
 0x608   :  { %v4240_v6 = vpop.f32.mrf.mxu1 }
 0x609   :  { %v6557_v44 = vpack.c.bf16 %v6301_v50, %v6301_v50  ;;  %9300 = vmatmul.msk.bf16.gmra.mxu2 %vm5110_vm1, %v5042_v63  ;;  %v4241_v39 = vadd.f32 %v4240_v6, %v2561_v33 }
 0x60a   :  { %v12440_v52 = vpop.f32.mrf.mxu3  ;;  %9033 = vmatmul.msk.bf16.gmra.mxu0 %vm1727_vm0, %v1689_v42  ;;  %v3370_v42 = vpack.c.b16 %v3212_v7, %v3211_v47  ;;  %v3214_v7 = vunpack.c.l.b16 %v510_v1  ;;  %v511_v1 = vpack.c.bf16 %v255_v48, %v255_v48  ;;  %v257_v48 = vld [vmem:[%s13713_s0 + $0x640] sm:$0xff] }
 0x60b   :  { %v7996_v9 = vunpack.c.l.b16 %v6557_v44  ;;  %v7909_v62 = vmax.f32 %v12317_v27, %v12440_v52  ;;  %9165 = vmatmul.msk.bf16.gmra.mxu1 %vm1727_vm0, %v3369_v23  ;;  %v4619_v60 = vadd.f32 %v12430_v61, %v4241_v39  ;;  %v260_v27 = vld [vmem:[%s13713_s0 + $0x658] sm:$0xff] }
 0x60c   :  { %v5899_v59 = vpop.f32.mrf.mxu2 }
 0x60d   :  { %v8001_v36 = vpack.c.b16 %v7996_v9, %v7995_v34  ;;  %v5900_v5 = vadd.f32 %v12163_v31, %v5899_v59  ;;  %v4875_v45 = vmax.f32 %v4619_v60, 0.0  ;;  %v765_v34 = vld [vmem:[%s13714_s1 + $0x620] sm:$0xff]  ;;  %v766_v9 = vld [vmem:[%s13714_s1 + $0x628] sm:$0xff] }
 0x60e   :  { %v1022_v39 = vpack.c.bf16 %v766_v9, %v766_v9 }
 0x60f   :  { %9435 = vmatmul.msk.bf16.gmra.mxu3 %vm5110_vm1, %v8001_v36  ;;  %v2563_v57 = vpop.f32.mrf.mxu0  ;;  %v6302_v43 = vmax.f32 %v5900_v5, 0.0  ;;  %v1021_v36 = vpack.c.bf16 %v765_v34, %v765_v34 }
 0x610   :  { %v4242_v58 = vpop.f32.mrf.mxu1  ;;  %v1534_v26 = vunpack.c.l.b16 %v1022_v39 }
 0x611   :  { %v4243_v49 = vadd.f32 %v4242_v58, %v2563_v57  ;;  %v6558_v3 = vpack.c.bf16 %v6302_v43, %v6302_v43 }
 0x612   :  { %v12461_v46 = vpop.f32.mrf.mxu3 }
 0x613   :  { %v4620_v13 = vadd.f32 %v12430_v61, %v4243_v49  ;;  %v7910_v2 = vmax.f32 %v12340_v12, %v12461_v46  ;;  %v7997_v33 = vunpack.c.l.b16 %v6558_v3  ;;  %v1533_v49 = vunpack.c.l.b16 %v1021_v36 }
 0x614   :  { %v5901_v17 = vpop.f32.mrf.mxu2 }
 0x615   :  { %v4876_v51 = vmax.f32 %v4620_v13, 0.0  ;;  %v5902_v53 = vadd.f32 %v12163_v31, %v5901_v17 }
 0x617   :  { %v5043_v20 = vpack.c.bf16 %v4876_v51, %v4875_v45  ;;  %v6303_v19 = vmax.f32 %v5902_v53, 0.0  ;;  %v2566_v32 = vpop.f32.mrf.mxu0 }
 0x618   :  { %v4245_v63 = vpop.f32.mrf.mxu1 }
 0x619   :  { %v6559_v50 = vpack.c.bf16 %v6303_v19, %v6303_v19  ;;  %9301 = vmatmul.msk.bf16.gmra.mxu2 %vm5110_vm1, %v5043_v20  ;;  %v4246_v21 = vadd.f32 %v4245_v63, %v2566_v32 }
 0x61a   :  { %v12468_v23 = vpop.f32.mrf.mxu3  ;;  %9034 = vmatmul.msk.bf16.gmra.mxu0 %vm1727_vm0, %v1690_v56  ;;  %v1691_v56 = vpack.c.b16 %v1534_v26, %v1533_v49 }
 0x61b   :  { %v7998_v6 = vunpack.c.l.b16 %v6559_v50  ;;  %v7911_v44 = vmax.f32 %v12347_v30, %v12468_v23  ;;  %9166 = vmatmul.msk.bf16.gmra.mxu1 %vm1727_vm0, %v3370_v42  ;;  %v4621_v57 = vadd.f32 %v12430_v61, %v4246_v21  ;;  %v3371_v42 = vpack.c.b16 %v3214_v7, %v3213_v16  ;;  %v256_v21 = vld [vmem:[%s13713_s0 + $0x638] sm:$0xff]  ;;  %v262_v30 = vld [vmem:[%s13713_s0 + $0x668] sm:$0xff] }
 0x61c   :  { %v5904_v38 = vpop.f32.mrf.mxu2  ;;  %v3215_v7 = vunpack.c.l.b16 %v511_v1 }
 0x61d   :  { %v8002_v59 = vpack.c.b16 %v7998_v6, %v7997_v33  ;;  %v5905_v40 = vadd.f32 %v12163_v31, %v5904_v38  ;;  %v4877_v45 = vmax.f32 %v4621_v57, 0.0  ;;  %v768_v38 = vld [vmem:[%s13714_s1 + $0x638] sm:$0xff] }
 0x61f   :  { %9436 = vmatmul.msk.bf16.gmra.mxu3 %vm5110_vm1, %v8002_v59  ;;  %v2568_v5 = vpop.f32.mrf.mxu0  ;;  %v6304_v47 = vmax.f32 %v5905_v40, 0.0  ;;  %v1024_v40 = vpack.c.bf16 %v768_v38, %v768_v38  ;;  %v769_v38 = vld [vmem:[%s13714_s1 + $0x640] sm:$0xff] }
 0x620   :  { %v4247_v15 = vpop.f32.mrf.mxu1 }
 0x621   :  { %v4248_v58 = vadd.f32 %v4247_v15, %v2568_v5  ;;  %v6560_v3 = vpack.c.bf16 %v6304_v47, %v6304_v47  ;;  %v512_v15 = vpack.c.bf16 %v256_v21, %v256_v21  ;;  %v1535_v47 = vunpack.c.l.b16 %v1023_v55 }
 0x622   :  { %v12489_v60 = vpop.f32.mrf.mxu3  ;;  %v1025_v21 = vpack.c.bf16 %v769_v38, %v769_v38 }
 0x623   :  { %v4622_v43 = vadd.f32 %v12430_v61, %v4248_v58  ;;  %v7912_v13 = vmax.f32 %v12370_v29, %v12489_v60  ;;  %v8060_v6 = vunpack.c.l.b16 %v6560_v3  ;;  %v12528_v3 = vld [vmem:[%s13719_s6] ss:$0 sm:$0xff] }
 0x624   :  { %v5906_v17 = vpop.f32.mrf.mxu2 }
 0x625   :  { %v4878_v51 = vmax.f32 %v4622_v43, 0.0  ;;  %v5907_v53 = vadd.f32 %v12163_v31, %v5906_v17  ;;  %v1536_v43 = vunpack.c.l.b16 %v1024_v40  ;;  %v514_v40 = vpack.c.bf16 %v258_v28, %v258_v28 }
 0x627   :  { %v5044_v20 = vpack.c.bf16 %v4878_v51, %v4877_v45  ;;  %v6305_v19 = vmax.f32 %v5907_v53, 0.0  ;;  %v2571_v32 = vpop.f32.mrf.mxu0  ;;  %v3216_v51 = vunpack.c.l.b16 %v512_v15 }
 0x628   :  { %v4250_v63 = vpop.f32.mrf.mxu1 }
 0x629   :  { %v6561_v50 = vpack.c.bf16 %v6305_v19, %v6305_v19  ;;  %9302 = vmatmul.msk.bf16.gmra.mxu2 %vm5110_vm1, %v5044_v20  ;;  %v4251_v39 = vadd.f32 %v4250_v63, %v2571_v32  ;;  %v1692_v19 = vpack.c.b16 %v1536_v43, %v1535_v47  ;;  %v3372_v24 = vpack.c.b16 %v3216_v51, %v3215_v7 }
 0x62a   :  { %v12496_v33 = vpop.f32.mrf.mxu3  ;;  %9035 = vmatmul.msk.bf16.gmra.mxu0 %vm1727_vm0, %v1691_v56  ;;  %v3218_v7 = vunpack.c.l.b16 %v514_v40 }
 0x62b   :  { %v8061_v34 = vunpack.c.l.b16 %v6561_v50  ;;  %v7913_v9 = vmax.f32 %v12377_v8, %v12496_v33  ;;  %9167 = vmatmul.msk.bf16.gmra.mxu1 %vm1727_vm0, %v3371_v42  ;;  %v4623_v49 = vadd.f32 %v12430_v61, %v4251_v39  ;;  %v513_v39 = vpack.c.bf16 %v257_v48, %v257_v48  ;;  %v264_v8 = vld [vmem:[%s13713_s0 + $0x678] sm:$0xff] }
 0x62c   :  { %v5909_v59 = vpop.f32.mrf.mxu2 }
 0x62d   :  { %v8068_v36 = vpack.c.b16 %v8061_v34, %v8060_v6  ;;  %v5910_v5 = vadd.f32 %v12163_v31, %v5909_v59 }
 0x62f   :  { %9437 = vmatmul.msk.bf16.vlgmr.msra.gmra.mxu3 %vm5110_vm1, %v8068_v36  ;;  %v2573_v57 = vpop.f32.mrf.mxu0  ;;  %v6306_v17 = vmax.f32 %v5910_v5, 0.0 }
 0x630   :  { %v4252_v58 = vpop.f32.mrf.mxu1  ;;  %8226 = vmatpush.bf16.msra.mxu3 %v12254_v25  ;;  %v4879_v25 = vmax.f32 %v4623_v49, 0.0  ;;  %v1537_v49 = vunpack.c.l.b16 %v1025_v21 }
 0x631   :  { %v4253_v26 = vadd.f32 %v4252_v58, %v2573_v57  ;;  %v6562_v42 = vpack.c.bf16 %v6306_v17, %v6306_v17 }
 0x632   :  { %v7955_v16 = vpop.f32.mrf.mxu3 }
 0x633   :  { %v4624_v45 = vadd.f32 %v12430_v61, %v4253_v26  ;;  %v12522_v31 = vmax.f32 %v7906_v37, %v7955_v16  ;;  %v8062_v6 = vunpack.c.l.b16 %v6562_v42  ;;  %v3217_v16 = vunpack.c.l.b16 %v513_v39 }
 0x634   :  { %v5911_v53 = vpop.f32.mrf.mxu2  ;;  %8227 = vmatpush.bf16.msra.mxu3 %v12267_v22 }
 0x635   :  { %v4880_v56 = vmax.f32 %v4624_v45, 0.0  ;;  %v5912_v20 = vadd.f32 %v12528_v3, %v5911_v53  ;;  %v3373_v42 = vpack.c.b16 %v3218_v7, %v3217_v16 }
 0x637   :  { %v5045_v32 = vpack.c.bf16 %v4880_v56, %v4879_v25  ;;  %v6307_v63 = vmax.f32 %v5912_v20, 0.0  ;;  %v2576_v14 = vpop.f32.mrf.mxu0 }
 0x638   :  { %v4255_v37 = vpop.f32.mrf.mxu1  ;;  %8228 = vmatpush.bf16.msra.mxu3 %v12274_v18  ;;  %v770_v18 = vld [vmem:[%s13714_s1 + $0x648] sm:$0xff] }
 0x639   :  { %v6563_v50 = vpack.c.bf16 %v6307_v63, %v6307_v63  ;;  %9303 = vmatmul.msk.bf16.gmra.mxu2 %vm5110_vm1, %v5045_v32  ;;  %v1026_v36 = vpack.c.bf16 %v770_v18, %v770_v18 }
 0x63a   :  { %v7957_v22 = vpop.f32.mrf.mxu3  ;;  %9036 = vmatmul.msk.bf16.gmra.mxu0 %vm1727_vm0, %v1692_v19 }
 0x63b   :  { %v8063_v34 = vunpack.c.l.b16 %v6563_v50  ;;  %v12536_v0 = vmax.f32 %v7907_v4, %v7957_v22  ;;  %9168 = vmatmul.msk.bf16.gmra.mxu1 %vm1727_vm0, %v3372_v24  ;;  %v4256_v4 = vadd.f32 %v4255_v37, %v2576_v14  ;;  %v1538_v26 = vunpack.c.l.b16 %v1026_v36  ;;  %v771_v37 = vld [vmem:[%s13714_s1 + $0x650] sm:$0xff]  ;;  %v772_v50 = vld [vmem:[%s13714_s1 + $0x658] sm:$0xff] }
 0x63c   :  { %v5914_v59 = vpop.f32.mrf.mxu2  ;;  %8229 = vmatpush.bf16.msra.mxu3 %v12300_v54  ;;  %v259_v22 = vld [vmem:[%s13713_s0 + $0x650] sm:$0xff]  ;;  %v1028_v38 = vpack.c.bf16 %v772_v50, %v772_v50 }
 0x63d   :  { %v8069_v35 = vpack.c.b16 %v8063_v34, %v8062_v6  ;;  %v5915_v55 = vadd.f32 %v12528_v3, %v5914_v59  ;;  %v4625_v15 = vadd.f32 %v12430_v61, %v4256_v4  ;;  %v1693_v25 = vpack.c.b16 %v1538_v26, %v1537_v49 }
 0x63e   :  { %v1027_v34 = vpack.c.bf16 %v771_v37, %v771_v37  ;;  %v515_v18 = vpack.c.bf16 %v259_v22, %v259_v22  ;;  %v516_v59 = vpack.c.bf16 %v260_v27, %v260_v27 }
 0x63f   :  { %9438 = vmatmul.msk.bf16.gmra.mxu3 %vm5110_vm1, %v8069_v35  ;;  %v2578_v1 = vpop.f32.mrf.mxu0  ;;  %v6308_v54 = vmax.f32 %v5915_v55, 0.0  ;;  %v4881_v45 = vmax.f32 %v4625_v15, 0.0  ;;  %v1540_v55 = vunpack.c.l.b16 %v1028_v38 }
 0x640   :  { %v4257_v5 = vpop.f32.mrf.mxu1  ;;  %v1539_v39 = vunpack.c.l.b16 %v1027_v34  ;;  %v3219_v40 = vunpack.c.l.b16 %v515_v18 }
 0x641   :  { %v4258_v57 = vadd.f32 %v4257_v5, %v2578_v1  ;;  %v6564_v56 = vpack.c.bf16 %v6308_v54, %v6308_v54 }
 0x642   :  { %v7960_v58 = vpop.f32.mrf.mxu3  ;;  %v1694_v54 = vpack.c.b16 %v1540_v55, %v1539_v39 }
 0x643   :  { %v4626_v47 = vadd.f32 %v12430_v61, %v4258_v57  ;;  %v12560_v43 = vmax.f32 %v7908_v11, %v7960_v58  ;;  %v8064_v41 = vunpack.c.l.b16 %v6564_v56  ;;  %v3220_v57 = vunpack.c.l.b16 %v516_v59 }
 0x644   :  { %v5916_v17 = vpop.f32.mrf.mxu2 }
 0x645   :  { %v4882_v51 = vmax.f32 %v4626_v47, 0.0  ;;  %v5917_v53 = vadd.f32 %v12528_v3, %v5916_v17 }
 0x647   :  { %v5046_v20 = vpack.c.bf16 %v4882_v51, %v4881_v45  ;;  %v6309_v19 = vmax.f32 %v5917_v53, 0.0  ;;  %v2581_v32 = vpop.f32.mrf.mxu0  ;;  %v3374_v45 = vpack.c.b16 %v3220_v57, %v3219_v40 }
 0x648   :  { %v4260_v63 = vpop.f32.mrf.mxu1 }
 0x649   :  { %v6565_v24 = vpack.c.bf16 %v6309_v19, %v6309_v19  ;;  %9304 = vmatmul.msk.bf16.gmra.mxu2 %vm5110_vm1, %v5046_v20  ;;  %v773_v20 = vld [vmem:[%s13714_s1 + $0x660] sm:$0xff]  ;;  %v774_v19 = vld [vmem:[%s13714_s1 + $0x668] sm:$0xff] }
 0x64a   :  { %v7962_v14 = vpop.f32.mrf.mxu3  ;;  %9037 = vmatmul.msk.bf16.gmra.mxu0 %vm1727_vm0, %v1693_v25 }
 0x64b   :  { %v8065_v10 = vunpack.c.l.b16 %v6565_v24  ;;  %v12567_v11 = vmax.f32 %v7909_v62, %v7962_v14  ;;  %9169 = vmatmul.msk.bf16.gmra.mxu1 %vm1727_vm0, %v3373_v42  ;;  %v4261_v62 = vadd.f32 %v4260_v63, %v2581_v32  ;;  %v261_v42 = vld [vmem:[%s13713_s0 + $0x660] sm:$0xff]  ;;  %v1029_v63 = vpack.c.bf16 %v773_v20, %v773_v20 }
 0x64c   :  { %v5919_v6 = vpop.f32.mrf.mxu2  ;;  %v1030_v24 = vpack.c.bf16 %v774_v19, %v774_v19  ;;  %v517_v14 = vpack.c.bf16 %v261_v42, %v261_v42 }
 0x64d   :  { %v8070_v52 = vpack.c.b16 %v8065_v10, %v8064_v41  ;;  %v5920_v48 = vadd.f32 %v12528_v3, %v5919_v6  ;;  %v4627_v4 = vadd.f32 %v12430_v61, %v4261_v62  ;;  %v518_v10 = vpack.c.bf16 %v262_v30, %v262_v30 }
 0x64e   :  { %v1542_v62 = vunpack.c.l.b16 %v1030_v24  ;;  %v3221_v34 = vunpack.c.l.b16 %v517_v14 }
 0x64f   :  { %9439 = vmatmul.msk.bf16.gmra.mxu3 %vm5110_vm1, %v8070_v52  ;;  %v2583_v28 = vpop.f32.mrf.mxu0  ;;  %v6310_v1 = vmax.f32 %v5920_v48, 0.0  ;;  %v4883_v49 = vmax.f32 %v4627_v4, 0.0  ;;  %v1541_v52 = vunpack.c.l.b16 %v1029_v63  ;;  %v3222_v59 = vunpack.c.l.b16 %v518_v10 }
 0x650   :  { %v4262_v35 = vpop.f32.mrf.mxu1 }
 0x651   :  { %v4263_v21 = vadd.f32 %v4262_v35, %v2583_v28  ;;  %v6566_v47 = vpack.c.bf16 %v6310_v1, %v6310_v1  ;;  %v3375_v1 = vpack.c.b16 %v3222_v59, %v3221_v34 }
 0x652   :  { %v7965_v36 = vpop.f32.mrf.mxu3 }
 0x653   :  { %v4628_v5 = vadd.f32 %v12430_v61, %v4263_v21  ;;  %v12590_v15 = vmax.f32 %v7910_v2, %v7965_v36  ;;  %v8066_v12 = vunpack.c.l.b16 %v6566_v47  ;;  %v1695_v36 = vpack.c.b16 %v1542_v62, %v1541_v52 }
 0x654   :  { %v5921_v58 = vpop.f32.mrf.mxu2 }
 0x655   :  { %v4884_v26 = vmax.f32 %v4628_v5, 0.0  ;;  %v5922_v16 = vadd.f32 %v12528_v3, %v5921_v58 }
 0x657   :  { %v5047_v7 = vpack.c.bf16 %v4884_v26, %v4883_v49  ;;  %v6311_v17 = vmax.f32 %v5922_v16, 0.0  ;;  %v2586_v51 = vpop.f32.mrf.mxu0  ;;  %v775_v26 = vld [vmem:[%s13714_s1 + $0x670] sm:$0xff]  ;;  %v776_v16 = vld [vmem:[%s13714_s1 + $0x678] sm:$0xff] }
 0x658   :  { %v4265_v53 = vpop.f32.mrf.mxu1 }
 0x659   :  { %v6567_v25 = vpack.c.bf16 %v6311_v17, %v6311_v17  ;;  %9305 = vmatmul.msk.bf16.gmra.mxu2 %vm5110_vm1, %v5047_v7  ;;  %v1031_v7 = vpack.c.bf16 %v775_v26, %v775_v26  ;;  %v1032_v17 = vpack.c.bf16 %v776_v16, %v776_v16 }
 0x65a   :  { %v7967_v56 = vpop.f32.mrf.mxu3  ;;  %9038 = vmatmul.msk.bf16.gmra.mxu0 %vm1727_vm0, %v1694_v54  ;;  %v263_v54 = vld [vmem:[%s13713_s0 + $0x670] sm:$0xff] }
 0x65b   :  { %v8067_v46 = vunpack.c.l.b16 %v6567_v25  ;;  %v12597_v2 = vmax.f32 %v7911_v44, %v7967_v56  ;;  %9170 = vmatmul.msk.bf16.gmra.mxu1 %vm1727_vm0, %v3374_v45  ;;  %v4266_v44 = vadd.f32 %v4265_v53, %v2586_v51  ;;  %v519_v45 = vpack.c.bf16 %v263_v54, %v263_v54 }
 0x65c   :  { %v5924_v32 = vpop.f32.mrf.mxu2  ;;  %v520_v53 = vpack.c.bf16 %v264_v8, %v264_v8  ;;  %v1543_v42 = vunpack.c.l.b16 %v1031_v7 }
 0x65d   :  { %v8071_v23 = vpack.c.b16 %v8067_v46, %v8066_v12  ;;  %v5925_v41 = vadd.f32 %v12528_v3, %v5924_v32  ;;  %v4629_v22 = vadd.f32 %v12430_v61, %v4266_v44  ;;  %v12648_v12 = vld [vmem:[%s13720_s7 + $0x18] sm:$0xff]  ;;  %v1544_v32 = vunpack.c.l.b16 %v1032_v17 }
 0x65e   :  { %v3223_v30 = vunpack.c.l.b16 %v519_v45  ;;  %v3224_v24 = vunpack.c.l.b16 %v520_v53 }
 0x65f   :  { %9440 = vmatmul.msk.bf16.gmra.mxu3 %vm5110_vm1, %v8071_v23  ;;  %v2588_v37 = vpop.f32.mrf.mxu0  ;;  %v6312_v38 = vmax.f32 %v5925_v41, 0.0  ;;  %v4885_v35 = vmax.f32 %v4629_v22, 0.0  ;;  %v12660_v41 = vld [vmem:[%s13720_s7 + $0x10] sm:$0xff]  ;;  %v1696_v22 = vpack.c.b16 %v1544_v32, %v1543_v42 }
 0x660   :  { %v4267_v50 = vpop.f32.mrf.mxu1  ;;  %v3376_v62 = vpack.c.b16 %v3224_v24, %v3223_v30 }
 0x661   :  { %v4268_v6 = vadd.f32 %v4267_v50, %v2588_v37  ;;  %v6568_v39 = vpack.c.bf16 %v6312_v38, %v6312_v38 }
 0x662   :  { %v7970_v27 = vpop.f32.mrf.mxu3 }
 0x663   :  { %v4630_v18 = vadd.f32 %v12430_v61, %v4268_v6  ;;  %v12620_v48 = vmax.f32 %v7912_v13, %v7970_v27  ;;  %v8129_v29 = vunpack.c.l.b16 %v6568_v39  ;;  %v778_v39 = vld [vmem:[%s13714_s1 + $0x688] sm:$0xff] }
 0x664   :  { %v5926_v28 = vpop.f32.mrf.mxu2 }
 0x665   :  { %v4886_v4 = vmax.f32 %v4630_v18, 0.0  ;;  %v5927_v21 = vadd.f32 %v12528_v3, %v5926_v28  ;;  %v12667_v18 = vld [vmem:[%s13720_s7 + $0x8] sm:$0xff] }
 0x667   :  { %v5048_v55 = vpack.c.bf16 %v4886_v4, %v4885_v35  ;;  %v6313_v40 = vmax.f32 %v5927_v21, 0.0  ;;  %v2591_v5 = vpop.f32.mrf.mxu0 }
 0x668   :  { %v4270_v57 = vpop.f32.mrf.mxu1 }
 0x669   :  { %v6569_v58 = vpack.c.bf16 %v6313_v40, %v6313_v40  ;;  %9306 = vmatmul.msk.bf16.gmra.mxu2 %vm5110_vm1, %v5048_v55  ;;  %v265_v55 = vld [vmem:[%s13713_s0 + $0x680] sm:$0xff] }
 0x66a   :  { %v7972_v49 = vpop.f32.mrf.mxu3  ;;  %9039 = vmatmul.msk.bf16.gmra.mxu0 %vm1727_vm0, %v1695_v36  ;;  %v777_v36 = vld [vmem:[%s13714_s1 + $0x680] sm:$0xff] }
 0x66b   :  { %v8130_v60 = vunpack.c.l.b16 %v6569_v58  ;;  %v12627_v13 = vmax.f32 %v7913_v9, %v7972_v49  ;;  %9171 = vmatmul.msk.bf16.gmra.mxu1 %vm1727_vm0, %v3375_v1  ;;  %v4271_v9 = vadd.f32 %v4270_v57, %v2591_v5  ;;  %v266_v1 = vld [vmem:[%s13713_s0 + $0x688] sm:$0xff]  ;;  %v12692_v5 = vld [vmem:[%s13720_s7] sm:$0xff]  ;;  %v1033_v49 = vpack.c.bf16 %v777_v36, %v777_v36 }
 0x66c   :  { %v5929_v47 = vpop.f32.mrf.mxu2  ;;  %v522_v16 = vpack.c.bf16 %v266_v1, %v266_v1 }
 0x66d   :  { %v8137_v33 = vpack.c.b16 %v8130_v60, %v8129_v29  ;;  %v5930_v51 = vadd.f32 %v12528_v3, %v5929_v47  ;;  %v4631_v46 = vadd.f32 %v12430_v61, %v4271_v9  ;;  %v1034_v29 = vpack.c.bf16 %v778_v39, %v778_v39 }
 0x66e   :  { %v521_v60 = vpack.c.bf16 %v265_v55, %v265_v55  ;;  %v1545_v7 = vunpack.c.l.b16 %v1033_v49 }
 0x66f   :  { %9441 = vmatmul.msk.bf16.vlgmr.msrb.gmra.mxu3 %vm5110_vm1, %v8137_v33  ;;  %v2593_v25 = vpop.f32.mrf.mxu0  ;;  %v6314_v23 = vmax.f32 %v5930_v51, 0.0  ;;  %v4887_v10 = vmax.f32 %v4631_v46, 0.0  ;;  %v1546_v17 = vunpack.c.l.b16 %v1034_v29 }
 0x670   :  { %v4272_v56 = vpop.f32.mrf.mxu1  ;;  %8295 = vmatpush.bf16.msrb.mxu3 %v12648_v12  ;;  %v3225_v45 = vunpack.c.l.b16 %v521_v60 }
 0x671   :  { %v4273_v20 = vadd.f32 %v4272_v56, %v2593_v25  ;;  %v6570_v6 = vpack.c.bf16 %v6314_v23, %v6314_v23  ;;  %v3226_v56 = vunpack.c.l.b16 %v522_v16  ;;  %v1697_v30 = vpack.c.b16 %v1546_v17, %v1545_v7 }
 0x672   :  { %v12652_v19 = vpop.f32.mrf.mxu3 }
 0x673   :  { %v4632_v44 = vadd.f32 %v12430_v61, %v4273_v20  ;;  %v8044_v63 = vmax.f32 %v12522_v31, %v12652_v19  ;;  %v8131_v35 = vunpack.c.l.b16 %v6570_v6 }
 0x674   :  { %v5931_v14 = vpop.f32.mrf.mxu2  ;;  %8296 = vmatpush.bf16.msrb.mxu3 %v12660_v41 }
 0x675   :  { %v4888_v37 = vmax.f32 %v4632_v44, 0.0  ;;  %v5932_v50 = vadd.f32 %v12528_v3, %v5931_v14  ;;  %v3377_v14 = vpack.c.b16 %v3226_v56, %v3225_v45 }
 0x677   :  { %v5049_v27 = vpack.c.bf16 %v4888_v37, %v4887_v10  ;;  %v6315_v52 = vmax.f32 %v5932_v50, 0.0  ;;  %v2596_v34 = vpop.f32.mrf.mxu0 }
 0x678   :  { %v4275_v38 = vpop.f32.mrf.mxu1  ;;  %8297 = vmatpush.bf16.msrb.mxu3 %v12667_v18 }
 0x679   :  { %v6571_v59 = vpack.c.bf16 %v6315_v52, %v6315_v52  ;;  %9307 = vmatmul.msk.bf16.gmra.mxu2 %vm5110_vm1, %v5049_v27  ;;  %v4276_v58 = vadd.f32 %v4275_v38, %v2596_v34  ;;  %v780_v34 = vld [vmem:[%s13714_s1 + $0x698] sm:$0xff]  ;;  %v267_v38 = vld [vmem:[%s13713_s0 + $0x690] sm:$0xff] }
 0x67a   :  { %v12671_v28 = vpop.f32.mrf.mxu3  ;;  %9040 = vmatmul.msk.bf16.gmra.mxu0 %vm1727_vm0, %v1696_v22  ;;  %v1036_v55 = vpack.c.bf16 %v780_v34, %v780_v34 }
 0x67b   :  { %v8132_v4 = vunpack.c.l.b16 %v6571_v59  ;;  %v8045_v21 = vmax.f32 %v12536_v0, %v12671_v28  ;;  %9172 = vmatmul.msk.bf16.gmra.mxu1 %vm1727_vm0, %v3376_v62  ;;  %v4633_v8 = vadd.f32 %v12430_v61, %v4276_v58  ;;  %v779_v62 = vld [vmem:[%s13714_s1 + $0x690] sm:$0xff]  ;;  %v274_v0 = vld [vmem:[%s13713_s0 + $0x6c8] sm:$0xff] }
 0x67c   :  { %v5934_v40 = vpop.f32.mrf.mxu2  ;;  %8298 = vmatpush.bf16.msrb.mxu3 %v12692_v5  ;;  %v1035_v39 = vpack.c.bf16 %v779_v62, %v779_v62  ;;  %v269_v62 = vld [vmem:[%s13713_s0 + $0x6a0] sm:$0xff] }
 0x67d   :  { %v8138_v57 = vpack.c.b16 %v8132_v4, %v8131_v35  ;;  %v5935_v26 = vadd.f32 %v12528_v3, %v5934_v40  ;;  %v4889_v20 = vmax.f32 %v4633_v8, 0.0  ;;  %v268_v35 = vld [vmem:[%s13713_s0 + $0x698] sm:$0xff]  ;;  %v523_v40 = vpack.c.bf16 %v267_v38, %v267_v38  ;;  %v270_v38 = vld [vmem:[%s13713_s0 + $0x6a8] sm:$0xff] }
 0x67e   :  { %v1547_v16 = vunpack.c.l.b16 %v1035_v39  ;;  %v525_v39 = vpack.c.bf16 %v269_v62, %v269_v62  ;;  %v783_v62 = vld [vmem:[%s13714_s1 + $0x6b0] sm:$0xff] }
 0x67f   :  { %9442 = vmatmul.msk.bf16.gmra.mxu3 %vm5110_vm1, %v8138_v57  ;;  %v2598_v54 = vpop.f32.mrf.mxu0  ;;  %v6316_v51 = vmax.f32 %v5935_v26, 0.0  ;;  %v524_v57 = vpack.c.bf16 %v268_v35, %v268_v35 }
 0x680   :  { %v4277_v47 = vpop.f32.mrf.mxu1 }
 0x681   :  { %v4278_v33 = vadd.f32 %v4277_v47, %v2598_v54  ;;  %v6572_v23 = vpack.c.bf16 %v6316_v51, %v6316_v51  ;;  %v1548_v54 = vunpack.c.l.b16 %v1036_v55  ;;  %v3227_v47 = vunpack.c.l.b16 %v523_v40 }
 0x682   :  { %v12698_v9 = vpop.f32.mrf.mxu3  ;;  %v3228_v17 = vunpack.c.l.b16 %v524_v57  ;;  %v526_v40 = vpack.c.bf16 %v270_v38, %v270_v38  ;;  %v271_v38 = vld [vmem:[%s13713_s0 + $0x6b0] sm:$0xff] }
 0x683   :  { %v4634_v53 = vadd.f32 %v12430_v61, %v4278_v33  ;;  %v8046_v25 = vmax.f32 %v12560_v43, %v12698_v9  ;;  %v8133_v6 = vunpack.c.l.b16 %v6572_v23 }
 0x684   :  { %v5936_v46 = vpop.f32.mrf.mxu2 }
 0x685   :  { %v4890_v42 = vmax.f32 %v4634_v53, 0.0  ;;  %v5937_v32 = vadd.f32 %v12528_v3, %v5936_v46  ;;  %v1698_v46 = vpack.c.b16 %v1548_v54, %v1547_v16  ;;  %v3229_v54 = vunpack.c.l.b16 %v525_v39 }
 0x686   :  { %v1039_v39 = vpack.c.bf16 %v783_v62, %v783_v62 }
 0x687   :  { %v5050_v44 = vpack.c.bf16 %v4890_v42, %v4889_v20  ;;  %v6317_v24 = vmax.f32 %v5937_v32, 0.0  ;;  %v2601_v10 = vpop.f32.mrf.mxu0 }
 0x688   :  { %v4280_v37 = vpop.f32.mrf.mxu1 }
 0x689   :  { %v6573_v50 = vpack.c.bf16 %v6317_v24, %v6317_v24  ;;  %9308 = vmatmul.msk.bf16.gmra.mxu2 %vm5110_vm1, %v5050_v44  ;;  %v4281_v36 = vadd.f32 %v4280_v37, %v2601_v10 }
 0x68a   :  { %v12705_v22 = vpop.f32.mrf.mxu3  ;;  %9041 = vmatmul.msk.bf16.gmra.mxu0 %vm1727_vm0, %v1697_v30  ;;  %v3378_v30 = vpack.c.b16 %v3228_v17, %v3227_v47  ;;  %v3230_v17 = vunpack.c.l.b16 %v526_v40  ;;  %v527_v40 = vpack.c.bf16 %v271_v38, %v271_v38  ;;  %v785_v38 = vld [vmem:[%s13714_s1 + $0x6c0] sm:$0xff] }
 0x68b   :  { %v8134_v27 = vunpack.c.l.b16 %v6573_v50  ;;  %v8047_v52 = vmax.f32 %v12567_v11, %v12705_v22  ;;  %9173 = vmatmul.msk.bf16.gmra.mxu1 %vm1727_vm0, %v3377_v14  ;;  %v4635_v29 = vadd.f32 %v12430_v61, %v4281_v36  ;;  %v276_v11 = vld [vmem:[%s13713_s0 + $0x6d8] sm:$0xff] }
 0x68c   :  { %v5939_v59 = vpop.f32.mrf.mxu2 }
 0x68d   :  { %v8139_v4 = vpack.c.b16 %v8134_v27, %v8133_v6  ;;  %v5940_v1 = vadd.f32 %v12528_v3, %v5939_v59  ;;  %v4891_v51 = vmax.f32 %v4635_v29, 0.0  ;;  %v781_v6 = vld [vmem:[%s13714_s1 + $0x6a0] sm:$0xff]  ;;  %v782_v27 = vld [vmem:[%s13714_s1 + $0x6a8] sm:$0xff] }
 0x68e   :  { %v1038_v36 = vpack.c.bf16 %v782_v27, %v782_v27 }
 0x68f   :  { %9443 = vmatmul.msk.bf16.gmra.mxu3 %vm5110_vm1, %v8139_v4  ;;  %v2603_v58 = vpop.f32.mrf.mxu0  ;;  %v6318_v8 = vmax.f32 %v5940_v1, 0.0  ;;  %v1037_v4 = vpack.c.bf16 %v781_v6, %v781_v6 }
 0x690   :  { %v4282_v49 = vpop.f32.mrf.mxu1  ;;  %v1550_v16 = vunpack.c.l.b16 %v1038_v36 }
 0x691   :  { %v4283_v60 = vadd.f32 %v4282_v49, %v2603_v58  ;;  %v6574_v20 = vpack.c.bf16 %v6318_v8, %v6318_v8 }
 0x692   :  { %v12726_v26 = vpop.f32.mrf.mxu3 }
 0x693   :  { %v4636_v33 = vadd.f32 %v12430_v61, %v4283_v60  ;;  %v8048_v7 = vmax.f32 %v12590_v15, %v12726_v26  ;;  %v8135_v10 = vunpack.c.l.b16 %v6574_v20  ;;  %v1549_v60 = vunpack.c.l.b16 %v1037_v4 }
 0x694   :  { %v5941_v45 = vpop.f32.mrf.mxu2 }
 0x695   :  { %v4892_v53 = vmax.f32 %v4636_v33, 0.0  ;;  %v5942_v56 = vadd.f32 %v12528_v3, %v5941_v45 }
 0x697   :  { %v5051_v42 = vpack.c.bf16 %v4892_v53, %v4891_v51  ;;  %v6319_v32 = vmax.f32 %v5942_v56, 0.0  ;;  %v2606_v23 = vpop.f32.mrf.mxu0 }
 0x698   :  { %v4285_v44 = vpop.f32.mrf.mxu1 }
 0x699   :  { %v6575_v24 = vpack.c.bf16 %v6319_v32, %v6319_v32  ;;  %9309 = vmatmul.msk.bf16.gmra.mxu2 %vm5110_vm1, %v5051_v42  ;;  %v4286_v35 = vadd.f32 %v4285_v44, %v2606_v23 }
 0x69a   :  { %v12733_v14 = vpop.f32.mrf.mxu3  ;;  %9042 = vmatmul.msk.bf16.gmra.mxu0 %vm1727_vm0, %v1698_v46  ;;  %v1699_v46 = vpack.c.b16 %v1550_v16, %v1549_v60 }
 0x69b   :  { %v8136_v37 = vunpack.c.l.b16 %v6575_v24  ;;  %v8049_v50 = vmax.f32 %v12597_v2, %v12733_v14  ;;  %9174 = vmatmul.msk.bf16.gmra.mxu1 %vm1727_vm0, %v3378_v30  ;;  %v4637_v58 = vadd.f32 %v12430_v61, %v4286_v35  ;;  %v3379_v30 = vpack.c.b16 %v3230_v17, %v3229_v54  ;;  %v272_v35 = vld [vmem:[%s13713_s0 + $0x6b8] sm:$0xff]  ;;  %v278_v2 = vld [vmem:[%s13713_s0 + $0x6e8] sm:$0xff] }
 0x69c   :  { %v5944_v34 = vpop.f32.mrf.mxu2  ;;  %v3231_v17 = vunpack.c.l.b16 %v527_v40 }
 0x69d   :  { %v8140_v59 = vpack.c.b16 %v8136_v37, %v8135_v10  ;;  %v5945_v55 = vadd.f32 %v12528_v3, %v5944_v34  ;;  %v4893_v51 = vmax.f32 %v4637_v58, 0.0  ;;  %v784_v34 = vld [vmem:[%s13714_s1 + $0x6b8] sm:$0xff] }
 0x69f   :  { %9444 = vmatmul.msk.bf16.gmra.mxu3 %vm5110_vm1, %v8140_v59  ;;  %v2608_v1 = vpop.f32.mrf.mxu0  ;;  %v6320_v47 = vmax.f32 %v5945_v55, 0.0  ;;  %v1040_v55 = vpack.c.bf16 %v784_v34, %v784_v34 }
 0x6a0   :  { %v4287_v57 = vpop.f32.mrf.mxu1 }
 0x6a1   :  { %v4288_v49 = vadd.f32 %v4287_v57, %v2608_v1  ;;  %v6576_v20 = vpack.c.bf16 %v6320_v47, %v6320_v47  ;;  %v528_v57 = vpack.c.bf16 %v272_v35, %v272_v35  ;;  %v1551_v47 = vunpack.c.l.b16 %v1039_v39  ;;  %v273_v35 = vld [vmem:[%s13713_s0 + $0x6c0] sm:$0xff] }
 0x6a2   :  { %v12754_v29 = vpop.f32.mrf.mxu3 }
 0x6a3   :  { %v4638_v8 = vadd.f32 %v12430_v61, %v4288_v49  ;;  %v8050_v33 = vmax.f32 %v12620_v48, %v12754_v29  ;;  %v8198_v37 = vunpack.c.l.b16 %v6576_v20 }
 0x6a4   :  { %v5946_v45 = vpop.f32.mrf.mxu2 }
 0x6a5   :  { %v4894_v53 = vmax.f32 %v4638_v8, 0.0  ;;  %v5947_v56 = vadd.f32 %v12528_v3, %v5946_v45  ;;  %v1552_v8 = vunpack.c.l.b16 %v1040_v55  ;;  %v529_v55 = vpack.c.bf16 %v273_v35, %v273_v35 }
 0x6a7   :  { %v5052_v42 = vpack.c.bf16 %v4894_v53, %v4893_v51  ;;  %v6321_v32 = vmax.f32 %v5947_v56, 0.0  ;;  %v2611_v23 = vpop.f32.mrf.mxu0  ;;  %v3232_v56 = vunpack.c.l.b16 %v528_v57 }
 0x6a8   :  { %v4290_v44 = vpop.f32.mrf.mxu1 }
 0x6a9   :  { %v6577_v24 = vpack.c.bf16 %v6321_v32, %v6321_v32  ;;  %9310 = vmatmul.msk.bf16.gmra.mxu2 %vm5110_vm1, %v5052_v42  ;;  %v4291_v36 = vadd.f32 %v4290_v44, %v2611_v23 }
 0x6aa   :  { %v12761_v10 = vpop.f32.mrf.mxu3  ;;  %9043 = vmatmul.msk.bf16.gmra.mxu0 %vm1727_vm0, %v1699_v46 }
 0x6ab   :  { %v8199_v6 = vunpack.c.l.b16 %v6577_v24  ;;  %v8051_v27 = vmax.f32 %v12627_v13, %v12761_v10  ;;  %9175 = vmatmul.msk.bf16.gmra.mxu1 %vm1727_vm0, %v3379_v30  ;;  %v4639_v60 = vadd.f32 %v12430_v61, %v4291_v36  ;;  %v1700_v30 = vpack.c.b16 %v1552_v8, %v1551_v47  ;;  %v280_v13 = vld [vmem:[%s13713_s0 + $0x6f8] sm:$0xff] }
 0x6ac   :  { %v5949_v59 = vpop.f32.mrf.mxu2  ;;  %v1041_v36 = vpack.c.bf16 %v785_v38, %v785_v38  ;;  %v788_v38 = vld [vmem:[%s13714_s1 + $0x6d8] sm:$0xff] }
 0x6ad   :  { %v8206_v4 = vpack.c.b16 %v8199_v6, %v8198_v37  ;;  %v5950_v1 = vadd.f32 %v12528_v3, %v5949_v59  ;;  %v4895_v20 = vmax.f32 %v4639_v60, 0.0  ;;  %v3380_v37 = vpack.c.b16 %v3232_v56, %v3231_v17  ;;  %v786_v59 = vld [vmem:[%s13714_s1 + $0x6c8] sm:$0xff] }
 0x6ae   :  { %v1042_v39 = vpack.c.bf16 %v786_v59, %v786_v59  ;;  %v1553_v47 = vunpack.c.l.b16 %v1041_v36  ;;  %v3233_v17 = vunpack.c.l.b16 %v529_v55  ;;  %v275_v59 = vld [vmem:[%s13713_s0 + $0x6d0] sm:$0xff]  ;;  %v532_v36 = vpack.c.bf16 %v276_v11, %v276_v11 }
 0x6af   :  { %9445 = vmatmul.msk.bf16.vlgmr.msra.gmra.mxu3 %vm5110_vm1, %v8206_v4  ;;  %v2613_v58 = vpop.f32.mrf.mxu0  ;;  %v6322_v45 = vmax.f32 %v5950_v1, 0.0  ;;  %v530_v1 = vpack.c.bf16 %v274_v0, %v274_v0  ;;  %v1044_v0 = vpack.c.bf16 %v788_v38, %v788_v38 }
 0x6b0   :  { %v4292_v49 = vpop.f32.mrf.mxu1  ;;  %8364 = vmatpush.bf16.msra.mxu3 %v12648_v12  ;;  %v1554_v8 = vunpack.c.l.b16 %v1042_v39 }
 0x6b1   :  { %v4293_v16 = vadd.f32 %v4292_v49, %v2613_v58  ;;  %v6578_v23 = vpack.c.bf16 %v6322_v45, %v6322_v45  ;;  %v12818_v49 = vld [vmem:[%s13717_s4] ss:$0 sm:$0xff] }
 0x6b2   :  { %v8093_v54 = vpop.f32.mrf.mxu3 }
 0x6b3   :  { %v4640_v51 = vadd.f32 %v12430_v61, %v4293_v16  ;;  %v12787_v53 = vmax.f32 %v8044_v63, %v8093_v54  ;;  %v8200_v63 = vunpack.c.l.b16 %v6578_v23  ;;  %v1701_v23 = vpack.c.b16 %v1554_v8, %v1553_v47 }
 0x6b4   :  { %v5951_v46 = vpop.f32.mrf.mxu2  ;;  %8365 = vmatpush.bf16.msra.mxu3 %v12660_v41 }
 0x6b5   :  { %v4896_v42 = vmax.f32 %v4640_v51, 0.0  ;;  %v5952_v32 = vadd.f32 %v12528_v3, %v5951_v46  ;;  %v3234_v46 = vunpack.c.l.b16 %v530_v1 }
 0x6b7   :  { %v5053_v44 = vpack.c.bf16 %v4896_v42, %v4895_v20  ;;  %v6323_v24 = vmax.f32 %v5952_v32, 0.0  ;;  %v2616_v6 = vpop.f32.mrf.mxu0 }
 0x6b8   :  { %v4295_v61 = vpop.f32.mrf.mxu1  ;;  %8366 = vmatpush.bf16.msra.mxu3 %v12667_v18 }
 0x6b9   :  { %v6579_v31 = vpack.c.bf16 %v6323_v24, %v6323_v24  ;;  %9311 = vmatmul.msk.bf16.gmra.mxu2 %vm5110_vm1, %v5053_v44 }
 0x6ba   :  { %v8095_v19 = vpop.f32.mrf.mxu3  ;;  %9044 = vmatmul.msk.bf16.gmra.mxu0 %vm1727_vm0, %v1700_v30 }
 0x6bb   :  { %v8201_v62 = vunpack.c.l.b16 %v6579_v31  ;;  %v12796_v34 = vmax.f32 %v8045_v21, %v8095_v19  ;;  %9176 = vmatmul.msk.bf16.gmra.mxu1 %vm1727_vm0, %v3380_v37  ;;  %v4296_v21 = vadd.f32 %v4295_v61, %v2616_v6  ;;  %v3381_v6 = vpack.c.b16 %v3234_v46, %v3233_v17 }
 0x6bc   :  { %v5954_v4 = vpop.f32.mrf.mxu2  ;;  %8367 = vmatpush.bf16.msra.mxu3 %v12692_v5  ;;  %v3236_v17 = vunpack.c.l.b16 %v532_v36 }
 0x6bd   :  { %v8207_v28 = vpack.c.b16 %v8201_v62, %v8200_v63  ;;  %v5955_v40 = vadd.f32 %v12528_v3, %v5954_v4  ;;  %v4641_v60 = vadd.f32 %v12818_v49, %v4296_v21  ;;  %v787_v62 = vld [vmem:[%s13714_s1 + $0x6d0] sm:$0xff] }
 0x6be   :  { %v1043_v4 = vpack.c.bf16 %v787_v62, %v787_v62 }
 0x6bf   :  { %9446 = vmatmul.msk.bf16.gmra.mxu3 %vm5110_vm1, %v8207_v28  ;;  %v2618_v57 = vpop.f32.mrf.mxu0  ;;  %v6324_v45 = vmax.f32 %v5955_v40, 0.0  ;;  %v4897_v42 = vmax.f32 %v4641_v60, 0.0  ;;  %v531_v28 = vpack.c.bf16 %v275_v59, %v275_v59  ;;  %v1556_v60 = vunpack.c.l.b16 %v1044_v0 }
 0x6c0   :  { %v4297_v58 = vpop.f32.mrf.mxu1 }
 0x6c1   :  { %v4298_v16 = vadd.f32 %v4297_v58, %v2618_v57  ;;  %v6580_v44 = vpack.c.bf16 %v6324_v45, %v6324_v45  ;;  %v1555_v58 = vunpack.c.l.b16 %v1043_v4 }
 0x6c2   :  { %v8098_v54 = vpop.f32.mrf.mxu3 }
 0x6c3   :  { %v4642_v51 = vadd.f32 %v12818_v49, %v4298_v16  ;;  %v12825_v56 = vmax.f32 %v8046_v25, %v8098_v54  ;;  %v8202_v43 = vunpack.c.l.b16 %v6580_v44  ;;  %v3235_v16 = vunpack.c.l.b16 %v531_v28 }
 0x6c4   :  { %v5956_v20 = vpop.f32.mrf.mxu2 }
 0x6c5   :  { %v4898_v32 = vmax.f32 %v4642_v51, 0.0  ;;  %v5957_v30 = vadd.f32 %v12528_v3, %v5956_v20  ;;  %v3382_v44 = vpack.c.b16 %v3236_v17, %v3235_v16 }
 0x6c7   :  { %v5054_v24 = vpack.c.bf16 %v4898_v32, %v4897_v42  ;;  %v6325_v37 = vmax.f32 %v5957_v30, 0.0  ;;  %v2621_v61 = vpop.f32.mrf.mxu0  ;;  %v1702_v42 = vpack.c.b16 %v1556_v60, %v1555_v58 }
 0x6c8   :  { %v4300_v31 = vpop.f32.mrf.mxu1 }
 0x6c9   :  { %v6581_v19 = vpack.c.bf16 %v6325_v37, %v6325_v37  ;;  %9312 = vmatmul.msk.bf16.gmra.mxu2 %vm5110_vm1, %v5054_v24 }
 0x6ca   :  { %v8100_v63 = vpop.f32.mrf.mxu3  ;;  %9045 = vmatmul.msk.bf16.gmra.mxu0 %vm1727_vm0, %v1701_v23 }
 0x6cb   :  { %v8203_v9 = vunpack.c.l.b16 %v6581_v19  ;;  %v12832_v25 = vmax.f32 %v8047_v52, %v8100_v63  ;;  %9177 = vmatmul.msk.bf16.gmra.mxu1 %vm1727_vm0, %v3381_v6  ;;  %v4301_v52 = vadd.f32 %v4300_v31, %v2621_v61  ;;  %v789_v31 = vld [vmem:[%s13714_s1 + $0x6e0] sm:$0xff]  ;;  %v790_v19 = vld [vmem:[%s13714_s1 + $0x6e8] sm:$0xff] }
 0x6cc   :  { %v5959_v35 = vpop.f32.mrf.mxu2  ;;  %v277_v63 = vld [vmem:[%s13713_s0 + $0x6e0] sm:$0xff]  ;;  %v1046_v62 = vpack.c.bf16 %v790_v19, %v790_v19 }
 0x6cd   :  { %v8208_v22 = vpack.c.b16 %v8203_v9, %v8202_v43  ;;  %v5960_v21 = vadd.f32 %v12528_v3, %v5959_v35  ;;  %v4643_v40 = vadd.f32 %v12818_v49, %v4301_v52  ;;  %v1045_v9 = vpack.c.bf16 %v789_v31, %v789_v31 }
 0x6ce   :  { %v533_v38 = vpack.c.bf16 %v277_v63, %v277_v63  ;;  %v534_v35 = vpack.c.bf16 %v278_v2, %v278_v2 }
 0x6cf   :  { %9447 = vmatmul.msk.bf16.gmra.mxu3 %vm5110_vm1, %v8208_v22  ;;  %v2623_v39 = vpop.f32.mrf.mxu0  ;;  %v6326_v54 = vmax.f32 %v5960_v21, 0.0  ;;  %v4899_v51 = vmax.f32 %v4643_v40, 0.0  ;;  %v1557_v28 = vunpack.c.l.b16 %v1045_v9  ;;  %v1558_v21 = vunpack.c.l.b16 %v1046_v62 }
 0x6d0   :  { %v4302_v55 = vpop.f32.mrf.mxu1  ;;  %v3237_v36 = vunpack.c.l.b16 %v533_v38 }
 0x6d1   :  { %v4303_v1 = vadd.f32 %v4302_v55, %v2623_v39  ;;  %v6582_v32 = vpack.c.bf16 %v6326_v54, %v6326_v54  ;;  %v1703_v54 = vpack.c.b16 %v1558_v21, %v1557_v28 }
 0x6d2   :  { %v8103_v57 = vpop.f32.mrf.mxu3 }
 0x6d3   :  { %v4644_v47 = vadd.f32 %v12818_v49, %v4303_v1  ;;  %v12855_v8 = vmax.f32 %v8048_v7, %v8103_v57  ;;  %v8204_v15 = vunpack.c.l.b16 %v6582_v32  ;;  %v3238_v1 = vunpack.c.l.b16 %v534_v35 }
 0x6d4   :  { %v5961_v45 = vpop.f32.mrf.mxu2 }
 0x6d5   :  { %v4900_v46 = vmax.f32 %v4644_v47, 0.0  ;;  %v5962_v20 = vadd.f32 %v12528_v3, %v5961_v45 }
 0x6d7   :  { %v5055_v30 = vpack.c.bf16 %v4900_v46, %v4899_v51  ;;  %v6327_v23 = vmax.f32 %v5962_v20, 0.0  ;;  %v2626_v24 = vpop.f32.mrf.mxu0  ;;  %v3383_v51 = vpack.c.b16 %v3238_v1, %v3237_v36 }
 0x6d8   :  { %v4305_v37 = vpop.f32.mrf.mxu1 }
 0x6d9   :  { %v6583_v6 = vpack.c.bf16 %v6327_v23, %v6327_v23  ;;  %9313 = vmatmul.msk.bf16.gmra.mxu2 %vm5110_vm1, %v5055_v30  ;;  %v792_v30 = vld [vmem:[%s13714_s1 + $0x6f8] sm:$0xff]  ;;  %v279_v23 = vld [vmem:[%s13713_s0 + $0x6f0] sm:$0xff] }
 0x6da   :  { %v8105_v61 = vpop.f32.mrf.mxu3  ;;  %9046 = vmatmul.msk.bf16.gmra.mxu0 %vm1727_vm0, %v1702_v42 }
 0x6db   :  { %v8205_v26 = vunpack.c.l.b16 %v6583_v6  ;;  %v12862_v7 = vmax.f32 %v8049_v50, %v8105_v61  ;;  %9178 = vmatmul.msk.bf16.gmra.mxu1 %vm1727_vm0, %v3382_v44  ;;  %v4306_v50 = vadd.f32 %v4305_v37, %v2626_v24  ;;  %v1048_v37 = vpack.c.bf16 %v792_v30, %v792_v30  ;;  %v12911_v61 = vld [vmem:[%s13719_s6] ss:$0 sm:$0xff] }
 0x6dc   :  { %v5964_v43 = vpop.f32.mrf.mxu2  ;;  %v535_v6 = vpack.c.bf16 %v279_v23, %v279_v23 }
 0x6dd   :  { %v8209_v14 = vpack.c.b16 %v8205_v26, %v8204_v15  ;;  %v5965_v59 = vadd.f32 %v12528_v3, %v5964_v43  ;;  %v4645_v52 = vadd.f32 %v12818_v49, %v4306_v50  ;;  %v536_v26 = vpack.c.bf16 %v280_v13, %v280_v13 }
 0x6de   :  { %v1560_v50 = vunpack.c.l.b16 %v1048_v37  ;;  %v3239_v9 = vunpack.c.l.b16 %v535_v6 }
 0x6df   :  { %9448 = vmatmul.msk.bf16.gmra.mxu3 %vm5110_vm1, %v8209_v14  ;;  %v2628_v11 = vpop.f32.mrf.mxu0  ;;  %v6328_v39 = vmax.f32 %v5965_v59, 0.0  ;;  %v4901_v58 = vmax.f32 %v4645_v52, 0.0  ;;  %v3240_v35 = vunpack.c.l.b16 %v536_v26 }
 0x6e0   :  { %v4307_v22 = vpop.f32.mrf.mxu1 }
 0x6e1   :  { %v4308_v4 = vadd.f32 %v4307_v22, %v2628_v11  ;;  %v6584_v47 = vpack.c.bf16 %v6328_v39, %v6328_v39  ;;  %v3384_v36 = vpack.c.b16 %v3240_v35, %v3239_v9 }
 0x6e2   :  { %v8108_v0 = vpop.f32.mrf.mxu3 }
 0x6e3   :  { %v4646_v55 = vadd.f32 %v12818_v49, %v4308_v4  ;;  %v12885_v40 = vmax.f32 %v8050_v33, %v8108_v0  ;;  %v8267_v48 = vunpack.c.l.b16 %v6584_v47 }
 0x6e4   :  { %v5966_v57 = vpop.f32.mrf.mxu2 }
 0x6e5   :  { %v4902_v60 = vmax.f32 %v4646_v55, 0.0  ;;  %v5967_v16 = vadd.f32 %v12528_v3, %v5966_v57  ;;  %v791_v3 = vld [vmem:[%s13714_s1 + $0x6f0] sm:$0xff] }
 0x6e6   :  { %v1047_v24 = vpack.c.bf16 %v791_v3, %v791_v3 }
 0x6e7   :  { %v5056_v17 = vpack.c.bf16 %v4902_v60, %v4901_v58  ;;  %v6329_v45 = vmax.f32 %v5967_v16, 0.0  ;;  %v2631_v46 = vpop.f32.mrf.mxu0  ;;  %v793_v16 = vld [vmem:[%s13714_s1 + $0x700] sm:$0xff] }
 0x6e8   :  { %v4310_v20 = vpop.f32.mrf.mxu1  ;;  %v1559_v14 = vunpack.c.l.b16 %v1047_v24 }
 0x6e9   :  { %v6585_v42 = vpack.c.bf16 %v6329_v45, %v6329_v45  ;;  %9314 = vmatmul.msk.bf16.gmra.mxu2 %vm5110_vm1, %v5056_v17  ;;  %v282_v17 = vld [vmem:[%s13713_s0 + $0x708] sm:$0xff] }
 0x6ea   :  { %v8110_v32 = vpop.f32.mrf.mxu3  ;;  %9047 = vmatmul.msk.bf16.gmra.mxu0 %vm1727_vm0, %v1703_v54  ;;  %v1704_v4 = vpack.c.b16 %v1560_v50, %v1559_v14  ;;  %v281_v54 = vld [vmem:[%s13713_s0 + $0x700] sm:$0xff] }
 0x6eb   :  { %v8268_v29 = vunpack.c.l.b16 %v6585_v42  ;;  %v12892_v33 = vmax.f32 %v8051_v27, %v8110_v32  ;;  %9179 = vmatmul.msk.bf16.gmra.mxu1 %vm1727_vm0, %v3383_v51  ;;  %v4311_v27 = vadd.f32 %v4310_v20, %v2631_v46  ;;  %v1049_v46 = vpack.c.bf16 %v793_v16, %v793_v16 }
 0x6ec   :  { %v5969_v44 = vpop.f32.mrf.mxu2  ;;  %v537_v42 = vpack.c.bf16 %v281_v54, %v281_v54 }
 0x6ed   :  { %v8275_v10 = vpack.c.b16 %v8268_v29, %v8267_v48  ;;  %v5970_v15 = vadd.f32 %v12911_v61, %v5969_v44  ;;  %v4647_v63 = vadd.f32 %v12818_v49, %v4311_v27  ;;  %v538_v48 = vpack.c.bf16 %v282_v17, %v282_v17 }
 0x6ee   :  { %v1561_v13 = vunpack.c.l.b16 %v1049_v46 }
 0x6ef   :  { %9449 = vmatmul.msk.bf16.vlgmr.msrb.gmra.mxu3 %vm5110_vm1, %v8275_v10  ;;  %v2633_v31 = vpop.f32.mrf.mxu0  ;;  %v6330_v62 = vmax.f32 %v5970_v15, 0.0  ;;  %v4903_v22 = vmax.f32 %v4647_v63, 0.0  ;;  %v3242_v6 = vunpack.c.l.b16 %v538_v48 }
 0x6f0   :  { %v4312_v19 = vpop.f32.mrf.mxu1  ;;  %8433 = vmatpush.bf16.msrb.mxu3 %v12648_v12 }
 0x6f1   :  { %v4313_v43 = vadd.f32 %v4312_v19, %v2633_v31  ;;  %v6586_v0 = vpack.c.bf16 %v6330_v62, %v6330_v62 }
 0x6f2   :  { %v12917_v2 = vpop.f32.mrf.mxu3 }
 0x6f3   :  { %v4648_v38 = vadd.f32 %v12818_v49, %v4313_v43  ;;  %v8182_v59 = vmax.f32 %v12787_v53, %v12917_v2  ;;  %v8269_v58 = vunpack.c.l.b16 %v6586_v0  ;;  %v796_v0 = vld [vmem:[%s13714_s1 + $0x718] sm:$0xff] }
 0x6f4   :  { %v5971_v11 = vpop.f32.mrf.mxu2  ;;  %8434 = vmatpush.bf16.msrb.mxu3 %v12660_v41 }
 0x6f5   :  { %v4904_v12 = vmax.f32 %v4648_v38, 0.0  ;;  %v5972_v52 = vadd.f32 %v12911_v61, %v5971_v11 }
 0x6f7   :  { %v5057_v28 = vpack.c.bf16 %v4904_v12, %v4903_v22  ;;  %v6331_v21 = vmax.f32 %v5972_v52, 0.0  ;;  %v2636_v39 = vpop.f32.mrf.mxu0 }
 0x6f8   :  { %v4315_v55 = vpop.f32.mrf.mxu1  ;;  %8435 = vmatpush.bf16.msrb.mxu3 %v12667_v18  ;;  %v794_v18 = vld [vmem:[%s13714_s1 + $0x708] sm:$0xff] }
 0x6f9   :  { %v6587_v1 = vpack.c.bf16 %v6331_v21, %v6331_v21  ;;  %9315 = vmatmul.msk.bf16.gmra.mxu2 %vm5110_vm1, %v5057_v28  ;;  %v4316_v51 = vadd.f32 %v4315_v55, %v2636_v39  ;;  %v1050_v20 = vpack.c.bf16 %v794_v18, %v794_v18  ;;  %v283_v28 = vld [vmem:[%s13713_s0 + $0x710] sm:$0xff] }
 0x6fa   :  { %v12926_v57 = vpop.f32.mrf.mxu3  ;;  %9048 = vmatmul.msk.bf16.gmra.mxu0 %vm1727_vm0, %v1704_v4  ;;  %v795_v4 = vld [vmem:[%s13714_s1 + $0x710] sm:$0xff] }
 0x6fb   :  { %v8270_v41 = vunpack.c.l.b16 %v6587_v1  ;;  %v8183_v60 = vmax.f32 %v12796_v34, %v12926_v57  ;;  %9180 = vmatmul.msk.bf16.gmra.mxu1 %vm1727_vm0, %v3384_v36  ;;  %v4649_v30 = vadd.f32 %v12818_v49, %v4316_v51  ;;  %v1562_v10 = vunpack.c.l.b16 %v1050_v20  ;;  %v284_v36 = vld [vmem:[%s13713_s0 + $0x718] sm:$0xff]  ;;  %v290_v34 = vld [vmem:[%s13713_s0 + $0x748] sm:$0xff]  ;;  %v13080_v57 = vld [vmem:[%s13720_s7] sm:$0xff] }
 0x6fc   :  { %v5974_v47 = vpop.f32.mrf.mxu2  ;;  %8436 = vmatpush.bf16.msrb.mxu3 %v12692_v5  ;;  %v3241_v5 = vunpack.c.l.b16 %v537_v42  ;;  %v1051_v1 = vpack.c.bf16 %v795_v4, %v795_v4  ;;  %v540_v18 = vpack.c.bf16 %v284_v36, %v284_v36 }
 0x6fd   :  { %v8276_v45 = vpack.c.b16 %v8270_v41, %v8269_v58  ;;  %v5975_v32 = vadd.f32 %v12911_v61, %v5974_v47  ;;  %v4905_v26 = vmax.f32 %v4649_v30, 0.0  ;;  %v1705_v63 = vpack.c.b16 %v1562_v10, %v1561_v13 }
 0x6fe   :  { %v3385_v9 = vpack.c.b16 %v3242_v6, %v3241_v5  ;;  %v1052_v58 = vpack.c.bf16 %v796_v0, %v796_v0  ;;  %v539_v41 = vpack.c.bf16 %v283_v28, %v283_v28  ;;  %v1563_v46 = vunpack.c.l.b16 %v1051_v1 }
 0x6ff   :  { %9450 = vmatmul.msk.bf16.gmra.mxu3 %vm5110_vm1, %v8276_v45  ;;  %v2638_v29 = vpop.f32.mrf.mxu0  ;;  %v6332_v27 = vmax.f32 %v5975_v32, 0.0 }
 0x700   :  { %v4317_v3 = vpop.f32.mrf.mxu1  ;;  %v1564_v20 = vunpack.c.l.b16 %v1052_v58  ;;  %v3243_v42 = vunpack.c.l.b16 %v539_v41 }
 0x701   :  { %v4318_v23 = vadd.f32 %v4317_v3, %v2638_v29  ;;  %v6588_v43 = vpack.c.bf16 %v6332_v27, %v6332_v27  ;;  %v3244_v3 = vunpack.c.l.b16 %v540_v18 }
 0x702   :  { %v12948_v44 = vpop.f32.mrf.mxu3  ;;  %v1706_v5 = vpack.c.b16 %v1564_v20, %v1563_v46 }
 0x703   :  { %v4650_v24 = vadd.f32 %v12818_v49, %v4318_v23  ;;  %v8184_v37 = vmax.f32 %v12825_v56, %v12948_v44  ;;  %v8271_v22 = vunpack.c.l.b16 %v6588_v43 }
 0x704   :  { %v5976_v15 = vpop.f32.mrf.mxu2 }
 0x705   :  { %v4906_v31 = vmax.f32 %v4650_v24, 0.0  ;;  %v5977_v19 = vadd.f32 %v12911_v61, %v5976_v15  ;;  %v3386_v15 = vpack.c.b16 %v3244_v3, %v3243_v42 }
 0x707   :  { %v5058_v14 = vpack.c.bf16 %v4906_v31, %v4905_v26  ;;  %v6333_v50 = vmax.f32 %v5977_v19, 0.0  ;;  %v2641_v62 = vpop.f32.mrf.mxu0 }
 0x708   :  { %v4320_v38 = vpop.f32.mrf.mxu1 }
 0x709   :  { %v6589_v35 = vpack.c.bf16 %v6333_v50, %v6333_v50  ;;  %9316 = vmatmul.msk.bf16.gmra.mxu2 %vm5110_vm1, %v5058_v14  ;;  %v4321_v55 = vadd.f32 %v4320_v38, %v2641_v62  ;;  %v798_v62 = vld [vmem:[%s13714_s1 + $0x728] sm:$0xff]  ;;  %v285_v38 = vld [vmem:[%s13713_s0 + $0x720] sm:$0xff] }
 0x70a   :  { %v12955_v11 = vpop.f32.mrf.mxu3  ;;  %9049 = vmatmul.msk.bf16.gmra.mxu0 %vm1727_vm0, %v1705_v63  ;;  %v1054_v28 = vpack.c.bf16 %v798_v62, %v798_v62 }
 0x70b   :  { %v8272_v12 = vunpack.c.l.b16 %v6589_v35  ;;  %v8185_v52 = vmax.f32 %v12832_v25, %v12955_v11  ;;  %9181 = vmatmul.msk.bf16.gmra.mxu1 %vm1727_vm0, %v3385_v9  ;;  %v4651_v17 = vadd.f32 %v12818_v49, %v4321_v55  ;;  %v797_v9 = vld [vmem:[%s13714_s1 + $0x720] sm:$0xff]  ;;  %v292_v25 = vld [vmem:[%s13713_s0 + $0x758] sm:$0xff] }
 0x70c   :  { %v5979_v21 = vpop.f32.mrf.mxu2  ;;  %v1053_v0 = vpack.c.bf16 %v797_v9, %v797_v9  ;;  %v287_v9 = vld [vmem:[%s13713_s0 + $0x730] sm:$0xff] }
 0x70d   :  { %v8277_v39 = vpack.c.b16 %v8272_v12, %v8271_v22  ;;  %v5980_v16 = vadd.f32 %v12911_v61, %v5979_v21  ;;  %v4907_v23 = vmax.f32 %v4651_v17, 0.0  ;;  %v286_v22 = vld [vmem:[%s13713_s0 + $0x728] sm:$0xff]  ;;  %v541_v21 = vpack.c.bf16 %v285_v38, %v285_v38  ;;  %v288_v38 = vld [vmem:[%s13713_s0 + $0x738] sm:$0xff] }
 0x70e   :  { %v1565_v18 = vunpack.c.l.b16 %v1053_v0  ;;  %v543_v0 = vpack.c.bf16 %v287_v9, %v287_v9  ;;  %v801_v9 = vld [vmem:[%s13714_s1 + $0x740] sm:$0xff] }
 0x70f   :  { %9451 = vmatmul.msk.bf16.gmra.mxu3 %vm5110_vm1, %v8277_v39  ;;  %v2643_v54 = vpop.f32.mrf.mxu0  ;;  %v6334_v32 = vmax.f32 %v5980_v16, 0.0  ;;  %v542_v39 = vpack.c.bf16 %v286_v22, %v286_v22 }
 0x710   :  { %v4322_v47 = vpop.f32.mrf.mxu1 }
 0x711   :  { %v4323_v45 = vadd.f32 %v4322_v47, %v2643_v54  ;;  %v6590_v27 = vpack.c.bf16 %v6334_v32, %v6334_v32  ;;  %v1566_v54 = vunpack.c.l.b16 %v1054_v28  ;;  %v3245_v47 = vunpack.c.l.b16 %v541_v21 }
 0x712   :  { %v12976_v51 = vpop.f32.mrf.mxu3  ;;  %v3246_v20 = vunpack.c.l.b16 %v542_v39  ;;  %v544_v21 = vpack.c.bf16 %v288_v38, %v288_v38  ;;  %v289_v38 = vld [vmem:[%s13713_s0 + $0x740] sm:$0xff] }
 0x713   :  { %v4652_v48 = vadd.f32 %v12818_v49, %v4323_v45  ;;  %v8186_v29 = vmax.f32 %v12855_v8, %v12976_v51  ;;  %v8273_v43 = vunpack.c.l.b16 %v6590_v27 }
 0x714   :  { %v5981_v30 = vpop.f32.mrf.mxu2 }
 0x715   :  { %v4908_v13 = vmax.f32 %v4652_v48, 0.0  ;;  %v5982_v10 = vadd.f32 %v12911_v61, %v5981_v30  ;;  %v1707_v30 = vpack.c.b16 %v1566_v54, %v1565_v18 }
 0x717   :  { %v5059_v24 = vpack.c.bf16 %v4908_v13, %v4907_v23  ;;  %v6335_v6 = vmax.f32 %v5982_v10, 0.0  ;;  %v2646_v26 = vpop.f32.mrf.mxu0 }
 0x718   :  { %v4325_v31 = vpop.f32.mrf.mxu1 }
 0x719   :  { %v6591_v19 = vpack.c.bf16 %v6335_v6, %v6335_v6  ;;  %9317 = vmatmul.msk.bf16.gmra.mxu2 %vm5110_vm1, %v5059_v24  ;;  %v4326_v4 = vadd.f32 %v4325_v31, %v2646_v26 }
 0x71a   :  { %v12983_v63 = vpop.f32.mrf.mxu3  ;;  %9050 = vmatmul.msk.bf16.gmra.mxu0 %vm1727_vm0, %v1706_v5  ;;  %v3387_v5 = vpack.c.b16 %v3246_v20, %v3245_v47  ;;  %v3247_v47 = vunpack.c.l.b16 %v543_v0  ;;  %v545_v0 = vpack.c.bf16 %v289_v38, %v289_v38 }
 0x71b   :  { %v8274_v14 = vunpack.c.l.b16 %v6591_v19  ;;  %v8187_v50 = vmax.f32 %v12862_v7, %v12983_v63  ;;  %9182 = vmatmul.msk.bf16.gmra.mxu1 %vm1727_vm0, %v3386_v15  ;;  %v4653_v58 = vadd.f32 %v12818_v49, %v4326_v4  ;;  %v294_v7 = vld [vmem:[%s13713_s0 + $0x768] sm:$0xff] }
 0x71c   :  { %v5984_v35 = vpop.f32.mrf.mxu2 }
 0x71d   :  { %v8278_v12 = vpack.c.b16 %v8274_v14, %v8273_v43  ;;  %v5985_v36 = vadd.f32 %v12911_v61, %v5984_v35  ;;  %v4909_v32 = vmax.f32 %v4653_v58, 0.0  ;;  %v799_v43 = vld [vmem:[%s13714_s1 + $0x730] sm:$0xff]  ;;  %v800_v14 = vld [vmem:[%s13714_s1 + $0x738] sm:$0xff] }
 0x71e   :  { %v1056_v4 = vpack.c.bf16 %v800_v14, %v800_v14 }
 0x71f   :  { %9452 = vmatmul.msk.bf16.gmra.mxu3 %vm5110_vm1, %v8278_v12  ;;  %v2648_v55 = vpop.f32.mrf.mxu0  ;;  %v6336_v17 = vmax.f32 %v5985_v36, 0.0  ;;  %v1055_v12 = vpack.c.bf16 %v799_v43, %v799_v43 }
 0x720   :  { %v4327_v1 = vpop.f32.mrf.mxu1  ;;  %v1568_v54 = vunpack.c.l.b16 %v1056_v4 }
 0x721   :  { %v4328_v41 = vadd.f32 %v4327_v1, %v2648_v55  ;;  %v6592_v23 = vpack.c.bf16 %v6336_v17, %v6336_v17  ;;  %v13034_v55 = vld [vmem:[%s13720_s7 + $0x18] sm:$0xff]  ;;  %v1567_v18 = vunpack.c.l.b16 %v1055_v12  ;;  %v1057_v12 = vpack.c.bf16 %v801_v9, %v801_v9 }
 0x722   :  { %v13004_v16 = vpop.f32.mrf.mxu3  ;;  %v804_v9 = vld [vmem:[%s13714_s1 + $0x758] sm:$0xff] }
 0x723   :  { %v4654_v45 = vadd.f32 %v12818_v49, %v4328_v41  ;;  %v8188_v46 = vmax.f32 %v12885_v40, %v13004_v16  ;;  %v8336_v26 = vunpack.c.l.b16 %v6592_v23 }
 0x724   :  { %v5986_v42 = vpop.f32.mrf.mxu2 }
 0x725   :  { %v4910_v48 = vmax.f32 %v4654_v45, 0.0  ;;  %v5987_v3 = vadd.f32 %v12911_v61, %v5986_v42  ;;  %v3248_v42 = vunpack.c.l.b16 %v544_v21  ;;  %v546_v21 = vpack.c.bf16 %v290_v34, %v290_v34 }
 0x726   :  { %v1060_v34 = vpack.c.bf16 %v804_v9, %v804_v9 }
 0x727   :  { %v5060_v13 = vpack.c.bf16 %v4910_v48, %v4909_v32  ;;  %v6337_v10 = vmax.f32 %v5987_v3, 0.0  ;;  %v2651_v27 = vpop.f32.mrf.mxu0  ;;  %v13047_v48 = vld [vmem:[%s13720_s7 + $0x10] sm:$0xff]  ;;  %v3388_v53 = vpack.c.b16 %v3248_v42, %v3247_v47  ;;  %v3249_v47 = vunpack.c.l.b16 %v545_v0 }
 0x728   :  { %v4330_v24 = vpop.f32.mrf.mxu1 }
 0x729   :  { %v6593_v6 = vpack.c.bf16 %v6337_v10, %v6337_v10  ;;  %9318 = vmatmul.msk.bf16.gmra.mxu2 %vm5110_vm1, %v5060_v13  ;;  %v4331_v22 = vadd.f32 %v4330_v24, %v2651_v27  ;;  %v1708_v13 = vpack.c.b16 %v1568_v54, %v1567_v18  ;;  %v13054_v24 = vld [vmem:[%s13720_s7 + $0x8] sm:$0xff]  ;;  %v1569_v18 = vunpack.c.l.b16 %v1057_v12 }
 0x72a   :  { %v13011_v15 = vpop.f32.mrf.mxu3  ;;  %9051 = vmatmul.msk.bf16.gmra.mxu0 %vm1727_vm0, %v1707_v30  ;;  %v548_v12 = vpack.c.bf16 %v292_v25, %v292_v25 }
 0x72b   :  { %v8337_v31 = vunpack.c.l.b16 %v6593_v6  ;;  %v8189_v19 = vmax.f32 %v12892_v33, %v13011_v15  ;;  %9183 = vmatmul.msk.bf16.gmra.mxu1 %vm1727_vm0, %v3387_v5  ;;  %v4655_v1 = vadd.f32 %v12818_v49, %v4331_v22  ;;  %v296_v33 = vld [vmem:[%s13713_s0 + $0x778] sm:$0xff] }
 0x72c   :  { %v5989_v62 = vpop.f32.mrf.mxu2 }
 0x72d   :  { %v8344_v35 = vpack.c.b16 %v8337_v31, %v8336_v26  ;;  %v5990_v28 = vadd.f32 %v12911_v61, %v5989_v62  ;;  %v4911_v3 = vmax.f32 %v4655_v1, 0.0  ;;  %v802_v62 = vld [vmem:[%s13714_s1 + $0x748] sm:$0xff] }
 0x72e   :  { %v1058_v4 = vpack.c.bf16 %v802_v62, %v802_v62  ;;  %v291_v62 = vld [vmem:[%s13713_s0 + $0x750] sm:$0xff] }
 0x72f   :  { %9453 = vmatmul.msk.bf16.vlgmr.msra.gmra.mxu3 %vm5110_vm1, %v8344_v35  ;;  %v2653_v36 = vpop.f32.mrf.mxu0  ;;  %v6338_v17 = vmax.f32 %v5990_v28, 0.0 }
 0x730   :  { %v4332_v39 = vpop.f32.mrf.mxu1  ;;  %8502 = vmatpush.bf16.msra.mxu3 %v13034_v55  ;;  %v1570_v54 = vunpack.c.l.b16 %v1058_v4 }
 0x731   :  { %v4333_v58 = vadd.f32 %v4332_v39, %v2653_v36  ;;  %v6594_v10 = vpack.c.bf16 %v6338_v17, %v6338_v17 }
 0x732   :  { %v8231_v41 = vpop.f32.mrf.mxu3 }
 0x733   :  { %v4656_v45 = vadd.f32 %v12818_v49, %v4333_v58  ;;  %v13042_v20 = vmax.f32 %v8182_v59, %v8231_v41  ;;  %v8338_v31 = vunpack.c.l.b16 %v6594_v10  ;;  %v1709_v10 = vpack.c.b16 %v1570_v54, %v1569_v18 }
 0x734   :  { %v5991_v32 = vpop.f32.mrf.mxu2  ;;  %8503 = vmatpush.bf16.msra.mxu3 %v13047_v48 }
 0x735   :  { %v4912_v30 = vmax.f32 %v4656_v45, 0.0  ;;  %v5992_v23 = vadd.f32 %v12911_v61, %v5991_v32  ;;  %v3250_v32 = vunpack.c.l.b16 %v546_v21 }
 0x737   :  { %v5061_v5 = vpack.c.bf16 %v4912_v30, %v4911_v3  ;;  %v6339_v27 = vmax.f32 %v5992_v23, 0.0  ;;  %v2656_v2 = vpop.f32.mrf.mxu0 }
 0x738   :  { %v4335_v59 = vpop.f32.mrf.mxu1  ;;  %8504 = vmatpush.bf16.msra.mxu3 %v13054_v24 }
 0x739   :  { %v6595_v6 = vpack.c.bf16 %v6339_v27, %v6339_v27  ;;  %9319 = vmatmul.msk.bf16.gmra.mxu2 %vm5110_vm1, %v5061_v5  ;;  %v4336_v22 = vadd.f32 %v4335_v59, %v2656_v2  ;;  %v3389_v2 = vpack.c.b16 %v3250_v32, %v3249_v47  ;;  %v3252_v47 = vunpack.c.l.b16 %v548_v12 }
 0x73a   :  { %v8233_v26 = vpop.f32.mrf.mxu3  ;;  %9052 = vmatmul.msk.bf16.gmra.mxu0 %vm1727_vm0, %v1708_v13 }
 0x73b   :  { %v8339_v43 = vunpack.c.l.b16 %v6595_v6  ;;  %v13061_v14 = vmax.f32 %v8183_v60, %v8233_v26  ;;  %9184 = vmatmul.msk.bf16.gmra.mxu1 %vm1727_vm0, %v3388_v53  ;;  %v4657_v1 = vadd.f32 %v12818_v49, %v4336_v22 }
 0x73c   :  { %v5994_v35 = vpop.f32.mrf.mxu2  ;;  %8505 = vmatpush.bf16.msra.mxu3 %v13080_v57 }
 0x73d   :  { %v8345_v60 = vpack.c.b16 %v8339_v43, %v8338_v31  ;;  %v5995_v28 = vadd.f32 %v12911_v61, %v5994_v35  ;;  %v4913_v30 = vmax.f32 %v4657_v1, 0.0  ;;  %v803_v43 = vld [vmem:[%s13714_s1 + $0x750] sm:$0xff]  ;;  %v1572_v1 = vunpack.c.l.b16 %v1060_v34 }
 0x73e   :  { %v1059_v35 = vpack.c.bf16 %v803_v43, %v803_v43 }
 0x73f   :  { %9454 = vmatmul.msk.bf16.gmra.mxu3 %vm5110_vm1, %v8345_v60  ;;  %v2658_v36 = vpop.f32.mrf.mxu0  ;;  %v6340_v17 = vmax.f32 %v5995_v28, 0.0  ;;  %v547_v60 = vpack.c.bf16 %v291_v62, %v291_v62 }
 0x740   :  { %v4337_v39 = vpop.f32.mrf.mxu1 }
 0x741   :  { %v4338_v58 = vadd.f32 %v4337_v39, %v2658_v36  ;;  %v6596_v5 = vpack.c.bf16 %v6340_v17, %v6340_v17  ;;  %v1571_v39 = vunpack.c.l.b16 %v1059_v35 }
 0x742   :  { %v8236_v41 = vpop.f32.mrf.mxu3 }
 0x743   :  { %v4658_v45 = vadd.f32 %v12818_v49, %v4338_v58  ;;  %v13090_v42 = vmax.f32 %v8184_v37, %v8236_v41  ;;  %v8340_v56 = vunpack.c.l.b16 %v6596_v5  ;;  %v3251_v58 = vunpack.c.l.b16 %v547_v60 }
 0x744   :  { %v5996_v3 = vpop.f32.mrf.mxu2 }
 0x745   :  { %v4914_v23 = vmax.f32 %v4658_v45, 0.0  ;;  %v5997_v13 = vadd.f32 %v12911_v61, %v5996_v3  ;;  %v3390_v5 = vpack.c.b16 %v3252_v47, %v3251_v58 }
 0x747   :  { %v5062_v27 = vpack.c.bf16 %v4914_v23, %v4913_v30  ;;  %v6341_v53 = vmax.f32 %v5997_v13, 0.0  ;;  %v2661_v59 = vpop.f32.mrf.mxu0  ;;  %v1710_v30 = vpack.c.b16 %v1572_v1, %v1571_v39 }
 0x748   :  { %v4340_v6 = vpop.f32.mrf.mxu1 }
 0x749   :  { %v6597_v26 = vpack.c.bf16 %v6341_v53, %v6341_v53  ;;  %9320 = vmatmul.msk.bf16.gmra.mxu2 %vm5110_vm1, %v5062_v27 }
 0x74a   :  { %v8238_v31 = vpop.f32.mrf.mxu3  ;;  %9053 = vmatmul.msk.bf16.gmra.mxu0 %vm1727_vm0, %v1709_v10 }
 0x74b   :  { %v8341_v44 = vunpack.c.l.b16 %v6597_v26  ;;  %v13097_v37 = vmax.f32 %v8185_v52, %v8238_v31  ;;  %9185 = vmatmul.msk.bf16.gmra.mxu1 %vm1727_vm0, %v3389_v2  ;;  %v4341_v52 = vadd.f32 %v4340_v6, %v2661_v59  ;;  %v805_v6 = vld [vmem:[%s13714_s1 + $0x760] sm:$0xff]  ;;  %v806_v26 = vld [vmem:[%s13714_s1 + $0x768] sm:$0xff] }
 0x74c   :  { %v5999_v38 = vpop.f32.mrf.mxu2  ;;  %v293_v31 = vld [vmem:[%s13713_s0 + $0x760] sm:$0xff]  ;;  %v1062_v43 = vpack.c.bf16 %v806_v26, %v806_v26 }
 0x74d   :  { %v8346_v11 = vpack.c.b16 %v8341_v44, %v8340_v56  ;;  %v6000_v22 = vadd.f32 %v12911_v61, %v5999_v38  ;;  %v4659_v28 = vadd.f32 %v12818_v49, %v4341_v52  ;;  %v1061_v44 = vpack.c.bf16 %v805_v6, %v805_v6 }
 0x74e   :  { %v549_v9 = vpack.c.bf16 %v293_v31, %v293_v31  ;;  %v550_v38 = vpack.c.bf16 %v294_v7, %v294_v7 }
 0x74f   :  { %9455 = vmatmul.msk.bf16.gmra.mxu3 %vm5110_vm1, %v8346_v11  ;;  %v2663_v4 = vpop.f32.mrf.mxu0  ;;  %v6342_v41 = vmax.f32 %v6000_v22, 0.0  ;;  %v4915_v45 = vmax.f32 %v4659_v28, 0.0  ;;  %v1573_v60 = vunpack.c.l.b16 %v1061_v44  ;;  %v1574_v22 = vunpack.c.l.b16 %v1062_v43 }
 0x750   :  { %v4342_v0 = vpop.f32.mrf.mxu1  ;;  %v3253_v12 = vunpack.c.l.b16 %v549_v9 }
 0x751   :  { %v4343_v21 = vadd.f32 %v4342_v0, %v2663_v4  ;;  %v6598_v23 = vpack.c.bf16 %v6342_v41, %v6342_v41  ;;  %v1711_v41 = vpack.c.b16 %v1574_v22, %v1573_v60 }
 0x752   :  { %v8241_v36 = vpop.f32.mrf.mxu3 }
 0x753   :  { %v4660_v18 = vadd.f32 %v12818_v49, %v4343_v21  ;;  %v13120_v54 = vmax.f32 %v8186_v29, %v8241_v36  ;;  %v8342_v8 = vunpack.c.l.b16 %v6598_v23  ;;  %v3254_v21 = vunpack.c.l.b16 %v550_v38 }
 0x754   :  { %v6001_v17 = vpop.f32.mrf.mxu2 }
 0x755   :  { %v4916_v32 = vmax.f32 %v4660_v18, 0.0  ;;  %v6002_v3 = vadd.f32 %v12911_v61, %v6001_v17 }
 0x757   :  { %v5063_v13 = vpack.c.bf16 %v4916_v32, %v4915_v45  ;;  %v6343_v10 = vmax.f32 %v6002_v3, 0.0  ;;  %v2666_v27 = vpop.f32.mrf.mxu0  ;;  %v3391_v45 = vpack.c.b16 %v3254_v21, %v3253_v12 }
 0x758   :  { %v4345_v53 = vpop.f32.mrf.mxu1 }
 0x759   :  { %v6599_v2 = vpack.c.bf16 %v6343_v10, %v6343_v10  ;;  %9321 = vmatmul.msk.bf16.gmra.mxu2 %vm5110_vm1, %v5063_v13  ;;  %v807_v13 = vld [vmem:[%s13714_s1 + $0x770] sm:$0xff]  ;;  %v808_v10 = vld [vmem:[%s13714_s1 + $0x778] sm:$0xff] }
 0x75a   :  { %v8243_v59 = vpop.f32.mrf.mxu3  ;;  %9054 = vmatmul.msk.bf16.gmra.mxu0 %vm1727_vm0, %v1710_v30 }
 0x75b   :  { %v8343_v51 = vunpack.c.l.b16 %v6599_v2  ;;  %v13127_v29 = vmax.f32 %v8187_v50, %v8243_v59  ;;  %9186 = vmatmul.msk.bf16.gmra.mxu1 %vm1727_vm0, %v3390_v5  ;;  %v4346_v50 = vadd.f32 %v4345_v53, %v2666_v27  ;;  %v295_v5 = vld [vmem:[%s13713_s0 + $0x770] sm:$0xff]  ;;  %v1063_v53 = vpack.c.bf16 %v807_v13, %v807_v13 }
 0x75c   :  { %v6004_v56 = vpop.f32.mrf.mxu2  ;;  %v1064_v2 = vpack.c.bf16 %v808_v10, %v808_v10  ;;  %v551_v59 = vpack.c.bf16 %v295_v5, %v295_v5 }
 0x75d   :  { %v8347_v63 = vpack.c.b16 %v8343_v51, %v8342_v8  ;;  %v6005_v62 = vadd.f32 %v12911_v61, %v6004_v56  ;;  %v4661_v52 = vadd.f32 %v12818_v49, %v4346_v50  ;;  %v552_v51 = vpack.c.bf16 %v296_v33, %v296_v33 }
 0x75e   :  { %v1576_v50 = vunpack.c.l.b16 %v1064_v2  ;;  %v3255_v44 = vunpack.c.l.b16 %v551_v59 }
 0x75f   :  { %9456 = vmatmul.msk.bf16.gmra.mxu3 %vm5110_vm1, %v8347_v63  ;;  %v2668_v25 = vpop.f32.mrf.mxu0  ;;  %v6344_v4 = vmax.f32 %v6005_v62, 0.0  ;;  %v4917_v39 = vmax.f32 %v4661_v52, 0.0  ;;  %v1575_v63 = vunpack.c.l.b16 %v1063_v53  ;;  %v3256_v38 = vunpack.c.l.b16 %v552_v51 }
 0x760   :  { %v4347_v11 = vpop.f32.mrf.mxu1 }
 0x761   :  { %v4348_v35 = vadd.f32 %v4347_v11, %v2668_v25  ;;  %v6600_v18 = vpack.c.bf16 %v6344_v4, %v6344_v4  ;;  %v3392_v4 = vpack.c.b16 %v3256_v38, %v3255_v44 }
 0x762   :  { %v8246_v34 = vpop.f32.mrf.mxu3 }
 0x763   :  { %v4662_v0 = vadd.f32 %v12818_v49, %v4348_v35  ;;  %v13150_v28 = vmax.f32 %v8188_v46, %v8246_v34  ;;  %v8405_v40 = vunpack.c.l.b16 %v6600_v18  ;;  %v1712_v34 = vpack.c.b16 %v1576_v50, %v1575_v63  ;;  %v810_v18 = vld [vmem:[%s13714_s1 + $0x788] sm:$0xff] }
 0x764   :  { %v6006_v36 = vpop.f32.mrf.mxu2 }
 0x765   :  { %v4918_v1 = vmax.f32 %v4662_v0, 0.0  ;;  %v6007_v58 = vadd.f32 %v12911_v61, %v6006_v36 }
 0x767   :  { %v5064_v47 = vpack.c.bf16 %v4918_v1, %v4917_v39  ;;  %v6345_v17 = vmax.f32 %v6007_v58, 0.0  ;;  %v2671_v32 = vpop.f32.mrf.mxu0 }
 0x768   :  { %v4350_v3 = vpop.f32.mrf.mxu1 }
 0x769   :  { %v6601_v30 = vpack.c.bf16 %v6345_v17, %v6345_v17  ;;  %9322 = vmatmul.msk.bf16.gmra.mxu2 %vm5110_vm1, %v5064_v47  ;;  %v297_v47 = vld [vmem:[%s13713_s0 + $0x780] sm:$0xff] }
 0x76a   :  { %v8248_v23 = vpop.f32.mrf.mxu3  ;;  %9055 = vmatmul.msk.bf16.gmra.mxu0 %vm1727_vm0, %v1711_v41  ;;  %v809_v41 = vld [vmem:[%s13714_s1 + $0x780] sm:$0xff] }
 0x76b   :  { %v8406_v16 = vunpack.c.l.b16 %v6601_v30  ;;  %v13157_v46 = vmax.f32 %v8189_v19, %v8248_v23  ;;  %9187 = vmatmul.msk.bf16.gmra.mxu1 %vm1727_vm0, %v3391_v45  ;;  %v4351_v19 = vadd.f32 %v4350_v3, %v2671_v32  ;;  %v298_v45 = vld [vmem:[%s13713_s0 + $0x788] sm:$0xff]  ;;  %v1065_v30 = vpack.c.bf16 %v809_v41, %v809_v41 }
 0x76c   :  { %v6009_v27 = vpop.f32.mrf.mxu2  ;;  %v1066_v23 = vpack.c.bf16 %v810_v18, %v810_v18  ;;  %v554_v13 = vpack.c.bf16 %v298_v45, %v298_v45 }
 0x76d   :  { %v8413_v15 = vpack.c.b16 %v8406_v16, %v8405_v40  ;;  %v6010_v8 = vadd.f32 %v12911_v61, %v6009_v27  ;;  %v4663_v31 = vadd.f32 %v12818_v49, %v4351_v19  ;;  %v553_v40 = vpack.c.bf16 %v297_v47, %v297_v47  ;;  %v13210_v27 = vld [vmem:[%s13717_s4] ss:$0 sm:$0xff] }
 0x76e   :  { %v1577_v53 = vunpack.c.l.b16 %v1065_v30  ;;  %v1578_v2 = vunpack.c.l.b16 %v1066_v23 }
 0x76f   :  { %9457 = vmatmul.msk.bf16.vlgmr.msrb.gmra.mxu3 %vm5110_vm1, %v8413_v15  ;;  %v2673_v6 = vpop.f32.mrf.mxu0  ;;  %v6346_v43 = vmax.f32 %v6010_v8, 0.0  ;;  %v4919_v11 = vmax.f32 %v4663_v31, 0.0  ;;  %v3257_v59 = vunpack.c.l.b16 %v553_v40 }
 0x770   :  { %v4352_v26 = vpop.f32.mrf.mxu1  ;;  %8571 = vmatpush.bf16.msrb.mxu3 %v13034_v55  ;;  %v1713_v44 = vpack.c.b16 %v1578_v2, %v1577_v53 }
 0x771   :  { %v4353_v56 = vadd.f32 %v4352_v26, %v2673_v6  ;;  %v6602_v60 = vpack.c.bf16 %v6346_v43, %v6346_v43  ;;  %v3258_v26 = vunpack.c.l.b16 %v554_v13 }
 0x772   :  { %v13177_v7 = vpop.f32.mrf.mxu3 }
 0x773   :  { %v4664_v9 = vadd.f32 %v12818_v49, %v4353_v56  ;;  %v8320_v62 = vmax.f32 %v13042_v20, %v13177_v7  ;;  %v8407_v39 = vunpack.c.l.b16 %v6602_v60 }
 0x774   :  { %v6011_v25 = vpop.f32.mrf.mxu2  ;;  %8572 = vmatpush.bf16.msrb.mxu3 %v13047_v48 }
 0x775   :  { %v4920_v52 = vmax.f32 %v4664_v9, 0.0  ;;  %v6012_v35 = vadd.f32 %v12911_v61, %v6011_v25  ;;  %v3393_v25 = vpack.c.b16 %v3258_v26, %v3257_v59 }
 0x777   :  { %v5065_v22 = vpack.c.bf16 %v4920_v52, %v4919_v11  ;;  %v6347_v12 = vmax.f32 %v6012_v35, 0.0  ;;  %v2676_v0 = vpop.f32.mrf.mxu0 }
 0x778   :  { %v4355_v21 = vpop.f32.mrf.mxu1  ;;  %8573 = vmatpush.bf16.msrb.mxu3 %v13054_v24 }
 0x779   :  { %v6603_v49 = vpack.c.bf16 %v6347_v12, %v6347_v12  ;;  %9323 = vmatmul.msk.bf16.gmra.mxu2 %vm5110_vm1, %v5065_v22  ;;  %v4356_v3 = vadd.f32 %v4355_v21, %v2676_v0  ;;  %v812_v0 = vld [vmem:[%s13714_s1 + $0x798] sm:$0xff]  ;;  %v299_v21 = vld [vmem:[%s13713_s0 + $0x790] sm:$0xff] }
 0x77a   :  { %v13186_v36 = vpop.f32.mrf.mxu3  ;;  %9056 = vmatmul.msk.bf16.gmra.mxu0 %vm1727_vm0, %v1712_v34  ;;  %v1068_v47 = vpack.c.bf16 %v812_v0, %v812_v0 }
 0x77b   :  { %v8408_v1 = vunpack.c.l.b16 %v6603_v49  ;;  %v8321_v58 = vmax.f32 %v13061_v14, %v13186_v36  ;;  %9188 = vmatmul.msk.bf16.gmra.mxu1 %vm1727_vm0, %v3392_v4  ;;  %v4665_v33 = vadd.f32 %v13210_v27, %v4356_v3  ;;  %v811_v4 = vld [vmem:[%s13714_s1 + $0x790] sm:$0xff]  ;;  %v306_v14 = vld [vmem:[%s13713_s0 + $0x7c8] sm:$0xff] }
 0x77c   :  { %v6014_v17 = vpop.f32.mrf.mxu2  ;;  %8574 = vmatpush.bf16.msrb.mxu3 %v13080_v57  ;;  %v1067_v18 = vpack.c.bf16 %v811_v4, %v811_v4  ;;  %v301_v4 = vld [vmem:[%s13713_s0 + $0x7a0] sm:$0xff] }
 0x77d   :  { %v8414_v32 = vpack.c.b16 %v8408_v1, %v8407_v39  ;;  %v6015_v16 = vadd.f32 %v12911_v61, %v6014_v17  ;;  %v4921_v56 = vmax.f32 %v4665_v33, 0.0  ;;  %v300_v39 = vld [vmem:[%s13713_s0 + $0x798] sm:$0xff]  ;;  %v555_v17 = vpack.c.bf16 %v299_v21, %v299_v21  ;;  %v302_v21 = vld [vmem:[%s13713_s0 + $0x7a8] sm:$0xff] }
 0x77e   :  { %v1579_v13 = vunpack.c.l.b16 %v1067_v18  ;;  %v557_v18 = vpack.c.bf16 %v301_v4, %v301_v4  ;;  %v815_v4 = vld [vmem:[%s13714_s1 + $0x7b0] sm:$0xff] }
 0x77f   :  { %9458 = vmatmul.msk.bf16.gmra.mxu3 %vm5110_vm1, %v8414_v32  ;;  %v2678_v10 = vpop.f32.mrf.mxu0  ;;  %v6348_v8 = vmax.f32 %v6015_v16, 0.0  ;;  %v556_v32 = vpack.c.bf16 %v300_v39, %v300_v39 }
 0x780   :  { %v4357_v5 = vpop.f32.mrf.mxu1 }
 0x781   :  { %v4358_v15 = vadd.f32 %v4357_v5, %v2678_v10  ;;  %v6604_v43 = vpack.c.bf16 %v6348_v8, %v6348_v8  ;;  %v1580_v10 = vunpack.c.l.b16 %v1068_v47  ;;  %v3259_v5 = vunpack.c.l.b16 %v555_v17 }
 0x782   :  { %v13213_v19 = vpop.f32.mrf.mxu3  ;;  %v3260_v2 = vunpack.c.l.b16 %v556_v32  ;;  %v558_v17 = vpack.c.bf16 %v302_v21, %v302_v21  ;;  %v303_v21 = vld [vmem:[%s13713_s0 + $0x7b0] sm:$0xff] }
 0x783   :  { %v4666_v51 = vadd.f32 %v13210_v27, %v4358_v15  ;;  %v8322_v6 = vmax.f32 %v13090_v42, %v13213_v19  ;;  %v8409_v60 = vunpack.c.l.b16 %v6604_v43 }
 0x784   :  { %v6016_v31 = vpop.f32.mrf.mxu2 }
 0x785   :  { %v4922_v63 = vmax.f32 %v4666_v51, 0.0  ;;  %v6017_v50 = vadd.f32 %v12911_v61, %v6016_v31  ;;  %v1714_v31 = vpack.c.b16 %v1580_v10, %v1579_v13  ;;  %v3261_v10 = vunpack.c.l.b16 %v557_v18 }
 0x786   :  { %v1071_v18 = vpack.c.bf16 %v815_v4, %v815_v4 }
 0x787   :  { %v5066_v9 = vpack.c.bf16 %v4922_v63, %v4921_v56  ;;  %v6349_v38 = vmax.f32 %v6017_v50, 0.0  ;;  %v2681_v11 = vpop.f32.mrf.mxu0 }
 0x788   :  { %v4360_v52 = vpop.f32.mrf.mxu1 }
 0x789   :  { %v6605_v35 = vpack.c.bf16 %v6349_v38, %v6349_v38  ;;  %9324 = vmatmul.msk.bf16.gmra.mxu2 %vm5110_vm1, %v5066_v9  ;;  %v4361_v41 = vadd.f32 %v4360_v52, %v2681_v11 }
 0x78a   :  { %v13220_v34 = vpop.f32.mrf.mxu3  ;;  %9057 = vmatmul.msk.bf16.gmra.mxu0 %vm1727_vm0, %v1713_v44  ;;  %v3394_v44 = vpack.c.b16 %v3260_v2, %v3259_v5 }
 0x78b   :  { %v8410_v22 = vunpack.c.l.b16 %v6605_v35  ;;  %v8323_v12 = vmax.f32 %v13097_v37, %v13220_v34  ;;  %9189 = vmatmul.msk.bf16.gmra.mxu1 %vm1727_vm0, %v3393_v25  ;;  %v4667_v23 = vadd.f32 %v13210_v27, %v4361_v41  ;;  %v308_v37 = vld [vmem:[%s13713_s0 + $0x7d8] sm:$0xff] }
 0x78c   :  { %v6019_v49 = vpop.f32.mrf.mxu2 }
 0x78d   :  { %v8415_v1 = vpack.c.b16 %v8410_v22, %v8409_v60  ;;  %v6020_v45 = vadd.f32 %v12911_v61, %v6019_v49  ;;  %v4923_v8 = vmax.f32 %v4667_v23, 0.0  ;;  %v813_v60 = vld [vmem:[%s13714_s1 + $0x7a0] sm:$0xff]  ;;  %v814_v22 = vld [vmem:[%s13714_s1 + $0x7a8] sm:$0xff] }
 0x78e   :  { %v1070_v41 = vpack.c.bf16 %v814_v22, %v814_v22 }
 0x78f   :  { %9459 = vmatmul.msk.bf16.gmra.mxu3 %vm5110_vm1, %v8415_v1  ;;  %v2683_v3 = vpop.f32.mrf.mxu0  ;;  %v6350_v33 = vmax.f32 %v6020_v45, 0.0  ;;  %v1069_v1 = vpack.c.bf16 %v813_v60, %v813_v60 }
 0x790   :  { %v4362_v30 = vpop.f32.mrf.mxu1  ;;  %v1582_v13 = vunpack.c.l.b16 %v1070_v41 }
 0x791   :  { %v4363_v40 = vadd.f32 %v4362_v30, %v2683_v3  ;;  %v6606_v56 = vpack.c.bf16 %v6350_v33, %v6350_v33 }
 0x792   :  { %v13241_v16 = vpop.f32.mrf.mxu3 }
 0x793   :  { %v4668_v15 = vadd.f32 %v13210_v27, %v4363_v40  ;;  %v8324_v53 = vmax.f32 %v13120_v54, %v13241_v16  ;;  %v8411_v11 = vunpack.c.l.b16 %v6606_v56  ;;  %v1581_v40 = vunpack.c.l.b16 %v1069_v1 }
 0x794   :  { %v6021_v59 = vpop.f32.mrf.mxu2 }
 0x795   :  { %v4924_v51 = vmax.f32 %v4668_v15, 0.0  ;;  %v6022_v26 = vadd.f32 %v12911_v61, %v6021_v59 }
 0x797   :  { %v5067_v63 = vpack.c.bf16 %v4924_v51, %v4923_v8  ;;  %v6351_v50 = vmax.f32 %v6022_v26, 0.0  ;;  %v2686_v43 = vpop.f32.mrf.mxu0  ;;  %v13277_v51 = vld [vmem:[%s13719_s6] ss:$0 sm:$0xff] }
 0x798   :  { %v4365_v9 = vpop.f32.mrf.mxu1 }
 0x799   :  { %v6607_v38 = vpack.c.bf16 %v6351_v50, %v6351_v50  ;;  %9325 = vmatmul.msk.bf16.gmra.mxu2 %vm5110_vm1, %v5067_v63  ;;  %v4366_v39 = vadd.f32 %v4365_v9, %v2686_v43 }
 0x79a   :  { %v13248_v25 = vpop.f32.mrf.mxu3  ;;  %9058 = vmatmul.msk.bf16.gmra.mxu0 %vm1727_vm0, %v1714_v31  ;;  %v1715_v31 = vpack.c.b16 %v1582_v13, %v1581_v40 }
 0x79b   :  { %v8412_v52 = vunpack.c.l.b16 %v6607_v38  ;;  %v8325_v35 = vmax.f32 %v13127_v29, %v13248_v25  ;;  %9190 = vmatmul.msk.bf16.gmra.mxu1 %vm1727_vm0, %v3394_v44  ;;  %v4669_v3 = vadd.f32 %v13210_v27, %v4366_v39  ;;  %v304_v39 = vld [vmem:[%s13713_s0 + $0x7b8] sm:$0xff]  ;;  %v310_v29 = vld [vmem:[%s13713_s0 + $0x7e8] sm:$0xff] }
 0x79c   :  { %v6024_v0 = vpop.f32.mrf.mxu2 }
 0x79d   :  { %v8416_v49 = vpack.c.b16 %v8412_v52, %v8411_v11  ;;  %v6025_v47 = vadd.f32 %v12911_v61, %v6024_v0  ;;  %v3262_v61 = vunpack.c.l.b16 %v558_v17  ;;  %v4925_v59 = vmax.f32 %v4669_v3, 0.0  ;;  %v816_v0 = vld [vmem:[%s13714_s1 + $0x7b8] sm:$0xff] }
 0x79e   :  { %v559_v17 = vpack.c.bf16 %v303_v21, %v303_v21  ;;  %v305_v21 = vld [vmem:[%s13713_s0 + $0x7c0] sm:$0xff] }
 0x79f   :  { %9460 = vmatmul.msk.bf16.gmra.mxu3 %vm5110_vm1, %v8416_v49  ;;  %v2688_v45 = vpop.f32.mrf.mxu0  ;;  %v6352_v5 = vmax.f32 %v6025_v47, 0.0  ;;  %v3395_v44 = vpack.c.b16 %v3262_v61, %v3261_v10  ;;  %v1072_v47 = vpack.c.bf16 %v816_v0, %v816_v0  ;;  %v817_v0 = vld [vmem:[%s13714_s1 + $0x7c0] sm:$0xff] }
 0x7a0   :  { %v4367_v32 = vpop.f32.mrf.mxu1  ;;  %v3263_v61 = vunpack.c.l.b16 %v559_v17 }
 0x7a1   :  { %v4368_v30 = vadd.f32 %v4367_v32, %v2688_v45  ;;  %v6608_v56 = vpack.c.bf16 %v6352_v5, %v6352_v5  ;;  %v560_v32 = vpack.c.bf16 %v304_v39, %v304_v39  ;;  %v1583_v5 = vunpack.c.l.b16 %v1071_v18 }
 0x7a2   :  { %v13269_v23 = vpop.f32.mrf.mxu3  ;;  %v1073_v39 = vpack.c.bf16 %v817_v0, %v817_v0 }
 0x7a3   :  { %v4670_v33 = vadd.f32 %v13210_v27, %v4368_v30  ;;  %v8326_v15 = vmax.f32 %v13150_v28, %v13269_v23  ;;  %v8474_v52 = vunpack.c.l.b16 %v6608_v56 }
 0x7a4   :  { %v6026_v2 = vpop.f32.mrf.mxu2 }
 0x7a5   :  { %v4926_v8 = vmax.f32 %v4670_v33, 0.0  ;;  %v6027_v26 = vadd.f32 %v13277_v51, %v6026_v2  ;;  %v1584_v33 = vunpack.c.l.b16 %v1072_v47  ;;  %v562_v47 = vpack.c.bf16 %v306_v14, %v306_v14 }
 0x7a7   :  { %v5068_v63 = vpack.c.bf16 %v4926_v8, %v4925_v59  ;;  %v6353_v50 = vmax.f32 %v6027_v26, 0.0  ;;  %v2691_v43 = vpop.f32.mrf.mxu0  ;;  %v3264_v26 = vunpack.c.l.b16 %v560_v32 }
 0x7a8   :  { %v4370_v9 = vpop.f32.mrf.mxu1 }
 0x7a9   :  { %v6609_v38 = vpack.c.bf16 %v6353_v50, %v6353_v50  ;;  %9326 = vmatmul.msk.bf16.gmra.mxu2 %vm5110_vm1, %v5068_v63  ;;  %v4371_v41 = vadd.f32 %v4370_v9, %v2691_v43  ;;  %v1716_v50 = vpack.c.b16 %v1584_v33, %v1583_v5 }
 0x7aa   :  { %v13281_v11 = vpop.f32.mrf.mxu3  ;;  %9059 = vmatmul.msk.bf16.gmra.mxu0 %vm1727_vm0, %v1715_v31 }
 0x7ab   :  { %v8475_v60 = vunpack.c.l.b16 %v6609_v38  ;;  %v8327_v22 = vmax.f32 %v13157_v46, %v13281_v11  ;;  %9191 = vmatmul.msk.bf16.gmra.mxu1 %vm1727_vm0, %v3395_v44  ;;  %v4671_v40 = vadd.f32 %v13210_v27, %v4371_v41  ;;  %v3396_v38 = vpack.c.b16 %v3264_v26, %v3263_v61  ;;  %v312_v46 = vld [vmem:[%s13713_s0 + $0x7f8] sm:$0xff] }
 0x7ac   :  { %v6029_v49 = vpop.f32.mrf.mxu2  ;;  %v561_v41 = vpack.c.bf16 %v305_v21, %v305_v21  ;;  %v3266_v61 = vunpack.c.l.b16 %v562_v47 }
 0x7ad   :  { %v8482_v1 = vpack.c.b16 %v8475_v60, %v8474_v52  ;;  %v6030_v45 = vadd.f32 %v13277_v51, %v6029_v49 }
 0x7af   :  { %9461 = vmatmul.msk.bf16.vlgmr.msra.gmra.mxu3 %vm5110_vm1, %v8482_v1  ;;  %v2693_v3 = vpop.f32.mrf.mxu0  ;;  %v6354_v2 = vmax.f32 %v6030_v45, 0.0 }
 0x7b0   :  { %v4372_v30 = vpop.f32.mrf.mxu1  ;;  %8640 = vmatpush.bf16.msra.mxu3 %v13034_v55  ;;  %v4927_v55 = vmax.f32 %v4671_v40, 0.0  ;;  %v1585_v40 = vunpack.c.l.b16 %v1073_v39 }
 0x7b1   :  { %v4373_v13 = vadd.f32 %v4372_v30, %v2693_v3  ;;  %v6610_v44 = vpack.c.bf16 %v6354_v2, %v6354_v2 }
 0x7b2   :  { %v8369_v10 = vpop.f32.mrf.mxu3 }
 0x7b3   :  { %v4672_v59 = vadd.f32 %v13210_v27, %v4373_v13  ;;  %v13307_v8 = vmax.f32 %v8320_v62, %v8369_v10  ;;  %v8476_v62 = vunpack.c.l.b16 %v6610_v44  ;;  %v3265_v10 = vunpack.c.l.b16 %v561_v41 }
 0x7b4   :  { %v6031_v31 = vpop.f32.mrf.mxu2  ;;  %8641 = vmatpush.bf16.msra.mxu3 %v13047_v48 }
 0x7b5   :  { %v4928_v56 = vmax.f32 %v4672_v59, 0.0  ;;  %v6032_v63 = vadd.f32 %v13277_v51, %v6031_v31  ;;  %v3397_v44 = vpack.c.b16 %v3266_v61, %v3265_v10 }
 0x7b7   :  { %v5069_v43 = vpack.c.bf16 %v4928_v56, %v4927_v55  ;;  %v6355_v9 = vmax.f32 %v6032_v63, 0.0  ;;  %v2696_v52 = vpop.f32.mrf.mxu0 }
 0x7b8   :  { %v4375_v60 = vpop.f32.mrf.mxu1  ;;  %8642 = vmatpush.bf16.msra.mxu3 %v13054_v24  ;;  %v818_v24 = vld [vmem:[%s13714_s1 + $0x7c8] sm:$0xff] }
 0x7b9   :  { %v6611_v20 = vpack.c.bf16 %v6355_v9, %v6355_v9  ;;  %9327 = vmatmul.msk.bf16.gmra.mxu2 %vm5110_vm1, %v5069_v43  ;;  %v1074_v1 = vpack.c.bf16 %v818_v24, %v818_v24 }
 0x7ba   :  { %v8371_v7 = vpop.f32.mrf.mxu3  ;;  %9060 = vmatmul.msk.bf16.gmra.mxu0 %vm1727_vm0, %v1716_v50 }
 0x7bb   :  { %v8477_v4 = vunpack.c.l.b16 %v6611_v20  ;;  %v13316_v48 = vmax.f32 %v8321_v58, %v8371_v7  ;;  %9192 = vmatmul.msk.bf16.gmra.mxu1 %vm1727_vm0, %v3396_v38  ;;  %v4376_v58 = vadd.f32 %v4375_v60, %v2696_v52  ;;  %v1586_v13 = vunpack.c.l.b16 %v1074_v1  ;;  %v819_v60 = vld [vmem:[%s13714_s1 + $0x7d0] sm:$0xff]  ;;  %v820_v20 = vld [vmem:[%s13714_s1 + $0x7d8] sm:$0xff] }
 0x7bc   :  { %v6034_v49 = vpop.f32.mrf.mxu2  ;;  %8643 = vmatpush.bf16.msra.mxu3 %v13080_v57  ;;  %v307_v7 = vld [vmem:[%s13713_s0 + $0x7d0] sm:$0xff]  ;;  %v1076_v0 = vpack.c.bf16 %v820_v20, %v820_v20 }
 0x7bd   :  { %v8483_v36 = vpack.c.b16 %v8477_v4, %v8476_v62  ;;  %v6035_v18 = vadd.f32 %v13277_v51, %v6034_v49  ;;  %v4673_v32 = vadd.f32 %v13210_v27, %v4376_v58  ;;  %v1717_v55 = vpack.c.b16 %v1586_v13, %v1585_v40 }
 0x7be   :  { %v1075_v4 = vpack.c.bf16 %v819_v60, %v819_v60  ;;  %v563_v24 = vpack.c.bf16 %v307_v7, %v307_v7  ;;  %v564_v49 = vpack.c.bf16 %v308_v37, %v308_v37 }
 0x7bf   :  { %9462 = vmatmul.msk.bf16.gmra.mxu3 %vm5110_vm1, %v8483_v36  ;;  %v2698_v17 = vpop.f32.mrf.mxu0  ;;  %v6356_v57 = vmax.f32 %v6035_v18, 0.0  ;;  %v4929_v59 = vmax.f32 %v4673_v32, 0.0  ;;  %v1588_v18 = vunpack.c.l.b16 %v1076_v0 }
 0x7c0   :  { %v4377_v45 = vpop.f32.mrf.mxu1  ;;  %v1587_v41 = vunpack.c.l.b16 %v1075_v4  ;;  %v3267_v47 = vunpack.c.l.b16 %v563_v24 }
 0x7c1   :  { %v4378_v3 = vadd.f32 %v4377_v45, %v2698_v17  ;;  %v6612_v56 = vpack.c.bf16 %v6356_v57, %v6356_v57 }
 0x7c2   :  { %v8374_v30 = vpop.f32.mrf.mxu3  ;;  %v1718_v57 = vpack.c.b16 %v1588_v18, %v1587_v41 }
 0x7c3   :  { %v4674_v5 = vadd.f32 %v13210_v27, %v4378_v3  ;;  %v13340_v33 = vmax.f32 %v8322_v6, %v8374_v30  ;;  %v8478_v42 = vunpack.c.l.b16 %v6612_v56  ;;  %v3268_v3 = vunpack.c.l.b16 %v564_v49 }
 0x7c4   :  { %v6036_v2 = vpop.f32.mrf.mxu2 }
 0x7c5   :  { %v4930_v26 = vmax.f32 %v4674_v5, 0.0  ;;  %v6037_v31 = vadd.f32 %v13277_v51, %v6036_v2 }
 0x7c7   :  { %v5070_v63 = vpack.c.bf16 %v4930_v26, %v4929_v59  ;;  %v6357_v50 = vmax.f32 %v6037_v31, 0.0  ;;  %v2701_v43 = vpop.f32.mrf.mxu0  ;;  %v3398_v59 = vpack.c.b16 %v3268_v3, %v3267_v47 }
 0x7c8   :  { %v4380_v9 = vpop.f32.mrf.mxu1 }
 0x7c9   :  { %v6613_v38 = vpack.c.bf16 %v6357_v50, %v6357_v50  ;;  %9328 = vmatmul.msk.bf16.gmra.mxu2 %vm5110_vm1, %v5070_v63  ;;  %v821_v63 = vld [vmem:[%s13714_s1 + $0x7e0] sm:$0xff]  ;;  %v822_v50 = vld [vmem:[%s13714_s1 + $0x7e8] sm:$0xff] }
 0x7ca   :  { %v8376_v52 = vpop.f32.mrf.mxu3  ;;  %9061 = vmatmul.msk.bf16.gmra.mxu0 %vm1727_vm0, %v1717_v55 }
 0x7cb   :  { %v8479_v19 = vunpack.c.l.b16 %v6613_v38  ;;  %v13347_v6 = vmax.f32 %v8323_v12, %v8376_v52  ;;  %9193 = vmatmul.msk.bf16.gmra.mxu1 %vm1727_vm0, %v3397_v44  ;;  %v4381_v12 = vadd.f32 %v4380_v9, %v2701_v43  ;;  %v309_v44 = vld [vmem:[%s13713_s0 + $0x7e0] sm:$0xff]  ;;  %v1077_v9 = vpack.c.bf16 %v821_v63, %v821_v63 }
 0x7cc   :  { %v6039_v62 = vpop.f32.mrf.mxu2  ;;  %v1078_v38 = vpack.c.bf16 %v822_v50, %v822_v50  ;;  %v565_v52 = vpack.c.bf16 %v309_v44, %v309_v44 }
 0x7cd   :  { %v8484_v34 = vpack.c.b16 %v8479_v19, %v8478_v42  ;;  %v6040_v21 = vadd.f32 %v13277_v51, %v6039_v62  ;;  %v4675_v58 = vadd.f32 %v13210_v27, %v4381_v12  ;;  %v566_v19 = vpack.c.bf16 %v310_v29, %v310_v29 }
 0x7ce   :  { %v1590_v12 = vunpack.c.l.b16 %v1078_v38  ;;  %v3269_v4 = vunpack.c.l.b16 %v565_v52 }
 0x7cf   :  { %9463 = vmatmul.msk.bf16.gmra.mxu3 %vm5110_vm1, %v8484_v34  ;;  %v2703_v14 = vpop.f32.mrf.mxu0  ;;  %v6358_v17 = vmax.f32 %v6040_v21, 0.0  ;;  %v4931_v40 = vmax.f32 %v4675_v58, 0.0  ;;  %v1589_v34 = vunpack.c.l.b16 %v1077_v9  ;;  %v3270_v49 = vunpack.c.l.b16 %v566_v19 }
 0x7d0   :  { %v4382_v36 = vpop.f32.mrf.mxu1 }
 0x7d1   :  { %v4383_v39 = vadd.f32 %v4382_v36, %v2703_v14  ;;  %v6614_v5 = vpack.c.bf16 %v6358_v17, %v6358_v17  ;;  %v3399_v17 = vpack.c.b16 %v3270_v49, %v3269_v4 }
 0x7d2   :  { %v8379_v1 = vpop.f32.mrf.mxu3 }
 0x7d3   :  { %v4676_v45 = vadd.f32 %v13210_v27, %v4383_v39  ;;  %v13370_v32 = vmax.f32 %v8324_v53, %v8379_v1  ;;  %v8480_v54 = vunpack.c.l.b16 %v6614_v5  ;;  %v1719_v1 = vpack.c.b16 %v1590_v12, %v1589_v34 }
 0x7d4   :  { %v6041_v30 = vpop.f32.mrf.mxu2 }
 0x7d5   :  { %v4932_v13 = vmax.f32 %v4676_v45, 0.0  ;;  %v6042_v10 = vadd.f32 %v13277_v51, %v6041_v30 }
 0x7d7   :  { %v5071_v61 = vpack.c.bf16 %v4932_v13, %v4931_v40  ;;  %v6359_v2 = vmax.f32 %v6042_v10, 0.0  ;;  %v2706_v26 = vpop.f32.mrf.mxu0  ;;  %v823_v13 = vld [vmem:[%s13714_s1 + $0x7f0] sm:$0xff]  ;;  %v824_v10 = vld [vmem:[%s13714_s1 + $0x7f8] sm:$0xff] }
 0x7d8   :  { %v4385_v31 = vpop.f32.mrf.mxu1 }
 0x7d9   :  { %v6615_v55 = vpack.c.bf16 %v6359_v2, %v6359_v2  ;;  %9329 = vmatmul.msk.bf16.gmra.mxu2 %vm5110_vm1, %v5071_v61  ;;  %v1079_v61 = vpack.c.bf16 %v823_v13, %v823_v13  ;;  %v1080_v2 = vpack.c.bf16 %v824_v10, %v824_v10 }
 0x7da   :  { %v8381_v56 = vpop.f32.mrf.mxu3  ;;  %9062 = vmatmul.msk.bf16.gmra.mxu0 %vm1727_vm0, %v1718_v57  ;;  %v311_v57 = vld [vmem:[%s13713_s0 + $0x7f0] sm:$0xff] }
 0x7db   :  { %v8481_v16 = vunpack.c.l.b16 %v6615_v55  ;;  %v13377_v53 = vmax.f32 %v8325_v35, %v8381_v56  ;;  %9194 = vmatmul.msk.bf16.gmra.mxu1 %vm1727_vm0, %v3398_v59  ;;  %v4386_v35 = vadd.f32 %v4385_v31, %v2706_v26  ;;  %v567_v59 = vpack.c.bf16 %v311_v57, %v311_v57 }
 0x7dc   :  { %v6044_v43 = vpop.f32.mrf.mxu2  ;;  %v568_v31 = vpack.c.bf16 %v312_v46, %v312_v46  ;;  %v1591_v44 = vunpack.c.l.b16 %v1079_v61 }
 0x7dd   :  { %v8485_v25 = vpack.c.b16 %v8481_v16, %v8480_v54  ;;  %v6045_v42 = vadd.f32 %v13277_v51, %v6044_v43  ;;  %v4677_v7 = vadd.f32 %v13210_v27, %v4386_v35  ;;  %v13428_v54 = vld [vmem:[%s13720_s7 + $0x18] sm:$0xff]  ;;  %v1592_v43 = vunpack.c.l.b16 %v1080_v2 }
 0x7de   :  { %v3271_v29 = vunpack.c.l.b16 %v567_v59  ;;  %v3272_v38 = vunpack.c.l.b16 %v568_v31 }
 0x7df   :  { %9464 = vmatmul.msk.bf16.gmra.mxu3 %vm5110_vm1, %v8485_v25  ;;  %v2708_v60 = vpop.f32.mrf.mxu0  ;;  %v6360_v0 = vmax.f32 %v6045_v42, 0.0  ;;  %v4933_v36 = vmax.f32 %v4677_v7, 0.0  ;;  %v13440_v42 = vld [vmem:[%s13720_s7 + $0x10] sm:$0xff]  ;;  %v1720_v7 = vpack.c.b16 %v1592_v43, %v1591_v44 }
 0x7e0   :  { %v4387_v20 = vpop.f32.mrf.mxu1  ;;  %v3400_v12 = vpack.c.b16 %v3272_v38, %v3271_v29 }
 0x7e1   :  { %v4388_v62 = vadd.f32 %v4387_v20, %v2708_v60  ;;  %v6616_v41 = vpack.c.bf16 %v6360_v0, %v6360_v0 }
 0x7e2   :  { %v8384_v37 = vpop.f32.mrf.mxu3 }
 0x7e3   :  { %v4678_v24 = vadd.f32 %v13210_v27, %v4388_v62  ;;  %v13400_v21 = vmax.f32 %v8326_v15, %v8384_v37  ;;  %v8543_v28 = vunpack.c.l.b16 %v6616_v41  ;;  %v13460_v41 = vld [vmem:[%s13720_s7] sm:$0xff] }
 0x7e4   :  { %v6046_v14 = vpop.f32.mrf.mxu2 }
 0x7e5   :  { %v4934_v58 = vmax.f32 %v4678_v24, 0.0  ;;  %v6047_v39 = vadd.f32 %v13277_v51, %v6046_v14  ;;  %v13447_v24 = vld [vmem:[%s13720_s7 + $0x8] sm:$0xff] }
 0x7e7   :  { %v5072_v18 = vpack.c.bf16 %v4934_v58, %v4933_v36  ;;  %v6361_v47 = vmax.f32 %v6047_v39, 0.0  ;;  %v2711_v45 = vpop.f32.mrf.mxu0 }
 0x7e8   :  { %v4390_v3 = vpop.f32.mrf.mxu1 }
 0x7e9   :  { %v6617_v30 = vpack.c.bf16 %v6361_v47, %v6361_v47  ;;  %9330 = vmatmul.msk.bf16.gmra.mxu2 %vm5110_vm1, %v5072_v18 }
 0x7ea   :  { %v8386_v40 = vpop.f32.mrf.mxu3  ;;  %9063 = vmatmul.msk.bf16.gmra.mxu0 %vm1727_vm0, %v1719_v1 }
 0x7eb   :  { %v8544_v23 = vunpack.c.l.b16 %v6617_v30  ;;  %v13407_v15 = vmax.f32 %v8327_v22, %v8386_v40  ;;  %9195 = vmatmul.msk.bf16.gmra.mxu1 %vm1727_vm0, %v3399_v17  ;;  %v4391_v22 = vadd.f32 %v4390_v3, %v2711_v45 }
 0x7ec   :  { %v6049_v5 = vpop.f32.mrf.mxu2 }
 0x7ed   :  { %v8551_v11 = vpack.c.b16 %v8544_v23, %v8543_v28  ;;  %v6050_v26 = vadd.f32 %v13277_v51, %v6049_v5  ;;  %v4679_v16 = vadd.f32 %v13210_v27, %v4391_v22 }
 0x7ef   :  { %9465 = vmatmul.msk.bf16.vlgmr.msrb.gmra.mxu3 %vm5110_vm1, %v8551_v11  ;;  %v2713_v55 = vpop.f32.mrf.mxu0  ;;  %v6362_v25 = vmax.f32 %v6050_v26, 0.0  ;;  %v4935_v19 = vmax.f32 %v4679_v16, 0.0 }
 0x7f0   :  { %v4392_v56 = vpop.f32.mrf.mxu1  ;;  %8709 = vmatpush.bf16.msrb.mxu3 %v13428_v54 }
 0x7f1   :  { %v4393_v63 = vadd.f32 %v4392_v56, %v2713_v55  ;;  %v6618_v62 = vpack.c.bf16 %v6362_v25, %v6362_v25 }
 0x7f2   :  { %v13432_v50 = vpop.f32.mrf.mxu3 }
 0x7f3   :  { %v4680_v35 = vadd.f32 %v13210_v27, %v4393_v63  ;;  %v8458_v9 = vmax.f32 %v13307_v8, %v13432_v50  ;;  %v8545_v36 = vunpack.c.l.b16 %v6618_v62 }
 0x7f4   :  { %v6051_v52 = vpop.f32.mrf.mxu2  ;;  %8710 = vmatpush.bf16.msrb.mxu3 %v13440_v42 }
 0x7f5   :  { %v4936_v60 = vmax.f32 %v4680_v35, 0.0  ;;  %v6052_v20 = vadd.f32 %v13277_v51, %v6051_v52 }
 0x7f7   :  { %v5073_v37 = vpack.c.bf16 %v4936_v60, %v4935_v19  ;;  %v6363_v34 = vmax.f32 %v6052_v20, 0.0  ;;  %v2716_v4 = vpop.f32.mrf.mxu0 }
 0x7f8   :  { %v4395_v0 = vpop.f32.mrf.mxu1  ;;  %8711 = vmatpush.bf16.msrb.mxu3 %v13447_v24 }
 0x7f9   :  { %v6619_v49 = vpack.c.bf16 %v6363_v34, %v6363_v34  ;;  %9331 = vmatmul.msk.bf16.gmra.mxu2 %vm5110_vm1, %v5073_v37  ;;  %v4396_v47 = vadd.f32 %v4395_v0, %v2716_v4 }
 0x7fa   :  { %v13451_v14 = vpop.f32.mrf.mxu3  ;;  %9064 = vmatmul.msk.bf16.gmra.mxu0 %vm1727_vm0, %v1720_v7 }
 0x7fb   :  { %v8546_v58 = vunpack.c.l.b16 %v6619_v49  ;;  %v8459_v39 = vmax.f32 %v13316_v48, %v13451_v14  ;;  %9196 = vmatmul.msk.bf16.gmra.mxu1 %vm1727_vm0, %v3400_v12  ;;  %v4681_v30 = vadd.f32 %v13210_v27, %v4396_v47 }
 0x7fc   :  { %v6054_v1 = vpop.f32.mrf.mxu2  ;;  %8712 = vmatpush.bf16.msrb.mxu3 %v13460_v41 }
 0x7fd   :  { %v8552_v18 = vpack.c.b16 %v8546_v58, %v8545_v36  ;;  %v6055_v17 = vadd.f32 %v13277_v51, %v6054_v1  ;;  %v4937_v5 = vmax.f32 %v4681_v30, 0.0 }
 0x7ff   :  { %9466 = vmatmul.msk.bf16.gmra.mxu3 %vm5110_vm1, %v8552_v18  ;;  %v2718_v45 = vpop.f32.mrf.mxu0  ;;  %v6364_v23 = vmax.f32 %v6055_v17, 0.0 }
 0x800   :  { %v4397_v3 = vpop.f32.mrf.mxu1 }
 0x801   :  { %v4398_v40 = vadd.f32 %v4397_v3, %v2718_v45  ;;  %v6620_v22 = vpack.c.bf16 %v6364_v23, %v6364_v23 }
 0x802   :  { %v13466_v28 = vpop.f32.mrf.mxu3 }
 0x803   :  { %v4682_v13 = vadd.f32 %v13210_v27, %v4398_v40  ;;  %v8460_v10 = vmax.f32 %v13340_v33, %v13466_v28  ;;  %v8547_v56 = vunpack.c.l.b16 %v6620_v22 }
 0x804   :  { %v6056_v57 = vpop.f32.mrf.mxu2 }
 0x805   :  { %v4938_v46 = vmax.f32 %v4682_v13, 0.0  ;;  %v6057_v11 = vadd.f32 %v13277_v51, %v6056_v57 }
 0x807   :  { %v5074_v61 = vpack.c.bf16 %v4938_v46, %v4937_v5  ;;  %v6365_v2 = vmax.f32 %v6057_v11, 0.0  ;;  %v2721_v59 = vpop.f32.mrf.mxu0 }
 0x808   :  { %v4400_v26 = vpop.f32.mrf.mxu1 }
 0x809   :  { %v6621_v31 = vpack.c.bf16 %v6365_v2, %v6365_v2  ;;  %9332 = vmatmul.msk.bf16.gmra.mxu2 %vm5110_vm1, %v5074_v61  ;;  %v4401_v29 = vadd.f32 %v4400_v26, %v2721_v59 }
 0x80a   :  { %v13473_v55 = vpop.f32.mrf.mxu3 }
 0x80b   :  { %v8548_v16 = vunpack.c.l.b16 %v6621_v31  ;;  %v8461_v63 = vmax.f32 %v13347_v6, %v13473_v55  ;;  %v4683_v52 = vadd.f32 %v13210_v27, %v4401_v29 }
 0x80c   :  { %v6059_v44 = vpop.f32.mrf.mxu2 }
 0x80d   :  { %v8553_v43 = vpack.c.b16 %v8548_v16, %v8547_v56  ;;  %v6060_v25 = vadd.f32 %v13277_v51, %v6059_v44  ;;  %v4939_v34 = vmax.f32 %v4683_v52, 0.0 }
 0x80f   :  { %9467 = vmatmul.msk.bf16.gmra.mxu3 %vm5110_vm1, %v8553_v43  ;;  %v2723_v35 = vpop.f32.mrf.mxu0  ;;  %v6366_v20 = vmax.f32 %v6060_v25, 0.0 }
 0x810   :  { %v4402_v38 = vpop.f32.mrf.mxu1 }
 0x811   :  { %v4403_v19 = vadd.f32 %v4402_v38, %v2723_v35  ;;  %v6622_v0 = vpack.c.bf16 %v6366_v20, %v6366_v20 }
 0x812   :  { %v13480_v60 = vpop.f32.mrf.mxu3 }
 0x813   :  { %v4684_v7 = vadd.f32 %v13210_v27, %v4403_v19  ;;  %v8462_v62 = vmax.f32 %v13370_v32, %v13480_v60  ;;  %v8549_v17 = vunpack.c.l.b16 %v6622_v0 }
 0x814   :  { %v6061_v37 = vpop.f32.mrf.mxu2 }
 0x815   :  { %v4940_v12 = vmax.f32 %v4684_v7, 0.0  ;;  %v6062_v4 = vadd.f32 %v13277_v51, %v6061_v37 }
 0x817   :  { %v5075_v49 = vpack.c.bf16 %v4940_v12, %v4939_v34  ;;  %v6367_v36 = vmax.f32 %v6062_v4, 0.0  ;;  %v2726_v58 = vpop.f32.mrf.mxu0 }
 0x818   :  { %v4405_v1 = vpop.f32.mrf.mxu1 }
 0x819   :  { %v6623_v18 = vpack.c.bf16 %v6367_v36, %v6367_v36  ;;  %9333 = vmatmul.msk.bf16.gmra.mxu2 %vm5110_vm1, %v5075_v49  ;;  %v4406_v23 = vadd.f32 %v4405_v1, %v2726_v58 }
 0x81a   :  { %v13487_v47 = vpop.f32.mrf.mxu3 }
 0x81b   :  { %v8550_v45 = vunpack.c.l.b16 %v6623_v18  ;;  %v8463_v3 = vmax.f32 %v13377_v53, %v13487_v47  ;;  %v4685_v46 = vadd.f32 %v13210_v27, %v4406_v23 }
 0x81c   :  { %v6064_v30 = vpop.f32.mrf.mxu2 }
 0x81d   :  { %v8554_v40 = vpack.c.b16 %v8550_v45, %v8549_v17  ;;  %v6065_v13 = vadd.f32 %v13277_v51, %v6064_v30  ;;  %v4941_v31 = vmax.f32 %v4685_v46, 0.0 }
 0x81f   :  { %9468 = vmatmul.msk.bf16.gmra.mxu3 %vm5110_vm1, %v8554_v40  ;;  %v2728_v57 = vpop.f32.mrf.mxu0  ;;  %v6368_v61 = vmax.f32 %v6065_v13, 0.0 }
 0x820   :  { %v4407_v5 = vpop.f32.mrf.mxu1 }
 0x821   :  { %v4408_v11 = vadd.f32 %v4407_v5, %v2728_v57  ;;  %v6624_v44 = vpack.c.bf16 %v6368_v61, %v6368_v61 }
 0x822   :  { %v13494_v22 = vpop.f32.mrf.mxu3 }
 0x823   :  { %v4686_v2 = vadd.f32 %v13210_v27, %v4408_v11  ;;  %v8464_v59 = vmax.f32 %v13400_v21, %v13494_v22  ;;  %v8612_v19 = vunpack.c.l.b16 %v6624_v44 }
 0x824   :  { %v6066_v26 = vpop.f32.mrf.mxu2 }
 0x825   :  { %v4942_v56 = vmax.f32 %v4686_v2, 0.0  ;;  %v6067_v16 = vadd.f32 %v13277_v51, %v6066_v26 }
 0x827   :  { %v5076_v43 = vpack.c.bf16 %v4942_v56, %v4941_v31  ;;  %v6369_v29 = vmax.f32 %v6067_v16, 0.0  ;;  %v2731_v25 = vpop.f32.mrf.mxu0 }
 0x828   :  { %v4410_v35 = vpop.f32.mrf.mxu1 }
 0x829   :  { %v6625_v38 = vpack.c.bf16 %v6369_v29, %v6369_v29  ;;  %9334 = vmatmul.msk.bf16.gmra.mxu2 %vm5110_vm1, %v5076_v43  ;;  %v4411_v12 = vadd.f32 %v4410_v35, %v2731_v25 }
 0x82a   :  { %v13501_v52 = vpop.f32.mrf.mxu3 }
 0x82b   :  { %v8613_v20 = vunpack.c.l.b16 %v6625_v38  ;;  %v8465_v7 = vmax.f32 %v13407_v15, %v13501_v52  ;;  %v4687_v36 = vadd.f32 %v13210_v27, %v4411_v12 }
 0x82c   :  { %v6069_v37 = vpop.f32.mrf.mxu2 }
 0x82d   :  { %v8620_v34 = vpack.c.b16 %v8613_v20, %v8612_v19  ;;  %v6070_v4 = vadd.f32 %v13277_v51, %v6069_v37  ;;  %v4943_v40 = vmax.f32 %v4687_v36, 0.0 }
 0x82f   :  { %9469 = vmatmul.msk.bf16.vlgmr.msra.gmra.mxu3 %vm5110_vm1, %v8620_v34  ;;  %v2733_v0 = vpop.f32.mrf.mxu0  ;;  %v6370_v18 = vmax.f32 %v6070_v4, 0.0 }
 0x830   :  { %v4412_v49 = vpop.f32.mrf.mxu1  ;;  %8778 = vmatpush.bf16.msra.mxu3 %v13428_v54 }
 0x831   :  { %v4413_v58 = vadd.f32 %v4412_v49, %v2733_v0  ;;  %v6626_v57 = vpack.c.bf16 %v6370_v18, %v6370_v18 }
 0x832   :  { %v8507_v1 = vpop.f32.mrf.mxu3 }
 0x833   :  { %v4688_v17 = vadd.f32 %v13210_v27, %v4413_v58  ;;  %v13513_v45 = vmax.f32 %v8458_v9, %v8507_v1  ;;  %v8614_v50 = vunpack.c.l.b16 %v6626_v57 }
 0x834   :  { %v6071_v30 = vpop.f32.mrf.mxu2  ;;  %8779 = vmatpush.bf16.msra.mxu3 %v13440_v42 }
 0x835   :  { %v4944_v23 = vmax.f32 %v4688_v17, 0.0  ;;  %v6072_v13 = vadd.f32 %v13277_v51, %v6071_v30 }
 0x837   :  { %v5077_v5 = vpack.c.bf16 %v4944_v23, %v4943_v40  ;;  %v6371_v46 = vmax.f32 %v6072_v13, 0.0  ;;  %v2736_v11 = vpop.f32.mrf.mxu0 }
 0x838   :  { %v4415_v61 = vpop.f32.mrf.mxu1  ;;  %8780 = vmatpush.bf16.msra.mxu3 %v13447_v24 }
 0x839   :  { %v6627_v2 = vpack.c.bf16 %v6371_v46, %v6371_v46  ;;  %9335 = vmatmul.msk.bf16.gmra.mxu2 %vm5110_vm1, %v5077_v5  ;;  %v4416_v16 = vadd.f32 %v4415_v61, %v2736_v11 }
 0x83a   :  { %v8509_v8 = vpop.f32.mrf.mxu3 }
 0x83b   :  { %v8615_v9 = vunpack.c.l.b16 %v6627_v2  ;;  %v13522_v26 = vmax.f32 %v8459_v39, %v8509_v8  ;;  %v4689_v25 = vadd.f32 %v13210_v27, %v4416_v16 }
 0x83c   :  { %v6074_v31 = vpop.f32.mrf.mxu2  ;;  %8781 = vmatpush.bf16.msra.mxu3 %v13460_v41 }
 0x83d   :  { %v8621_v56 = vpack.c.b16 %v8615_v9, %v8614_v50  ;;  %v6075_v44 = vadd.f32 %v13277_v51, %v6074_v31  ;;  %v4945_v20 = vmax.f32 %v4689_v25, 0.0 }
 0x83f   :  { %9470 = vmatmul.msk.bf16.gmra.mxu3 %vm5110_vm1, %v8621_v56  ;;  %v2738_v43 = vpop.f32.mrf.mxu0  ;;  %v6372_v19 = vmax.f32 %v6075_v44, 0.0 }
 0x840   :  { %v4417_v29 = vpop.f32.mrf.mxu1 }
 0x841   :  { %v4418_v35 = vadd.f32 %v4417_v29, %v2738_v43  ;;  %v6628_v12 = vpack.c.bf16 %v6372_v19, %v6372_v19 }
 0x842   :  { %v8512_v38 = vpop.f32.mrf.mxu3 }
 0x843   :  { %v4690_v48 = vadd.f32 %v13210_v27, %v4418_v35  ;;  %v13532_v14 = vmax.f32 %v8460_v10, %v8512_v38  ;;  %v8616_v18 = vunpack.c.l.b16 %v6628_v12 }
 0x844   :  { %v6076_v39 = vpop.f32.mrf.mxu2 }
 0x845   :  { %v4946_v37 = vmax.f32 %v4690_v48, 0.0  ;;  %v6077_v34 = vadd.f32 %v13277_v51, %v6076_v39  ;;  %v13562_v48 = vld [vmem:[%s13717_s4] ss:$0 sm:$0xff] }
 0x847   :  { %v5078_v4 = vpack.c.bf16 %v4946_v37, %v4945_v20  ;;  %v6373_v0 = vmax.f32 %v6077_v34, 0.0  ;;  %v2741_v49 = vpop.f32.mrf.mxu0 }
 0x848   :  { %v4420_v36 = vpop.f32.mrf.mxu1 }
 0x849   :  { %v6629_v58 = vpack.c.bf16 %v6373_v0, %v6373_v0  ;;  %9336 = vmatmul.msk.bf16.gmra.mxu2 %vm5110_vm1, %v5078_v4  ;;  %v4421_v30 = vadd.f32 %v4420_v36, %v2741_v49 }
 0x84a   :  { %v8514_v1 = vpop.f32.mrf.mxu3 }
 0x84b   :  { %v8617_v17 = vunpack.c.l.b16 %v6629_v58  ;;  %v13539_v33 = vmax.f32 %v8461_v63, %v8514_v1  ;;  %v4691_v57 = vadd.f32 %v13210_v27, %v4421_v30 }
 0x84c   :  { %v6079_v28 = vpop.f32.mrf.mxu2 }
 0x84d   :  { %v8622_v10 = vpack.c.b16 %v8617_v17, %v8616_v18  ;;  %v6080_v40 = vadd.f32 %v13277_v51, %v6079_v28  ;;  %v4947_v63 = vmax.f32 %v4691_v57, 0.0 }
 0x84f   :  { %9471 = vmatmul.msk.bf16.gmra.mxu3 %vm5110_vm1, %v8622_v10  ;;  %v2743_v23 = vpop.f32.mrf.mxu0  ;;  %v6374_v11 = vmax.f32 %v6080_v40, 0.0 }
 0x850   :  { %v4422_v13 = vpop.f32.mrf.mxu1 }
 0x851   :  { %v4423_v5 = vadd.f32 %v4422_v13, %v2743_v23  ;;  %v6630_v50 = vpack.c.bf16 %v6374_v11, %v6374_v11 }
 0x852   :  { %v8517_v46 = vpop.f32.mrf.mxu3 }
 0x853   :  { %v4692_v61 = vadd.f32 %v13210_v27, %v4423_v5  ;;  %v13548_v6 = vmax.f32 %v8462_v62, %v8517_v46  ;;  %v8618_v27 = vunpack.c.l.b16 %v6630_v50 }
 0x854   :  { %v6081_v55 = vpop.f32.mrf.mxu2 }
 0x855   :  { %v4948_v2 = vmax.f32 %v4692_v61, 0.0  ;;  %v6082_v8 = vadd.f32 %v13277_v51, %v6081_v55 }
 0x857   :  { %v5079_v9 = vpack.c.bf16 %v4948_v2, %v4947_v63  ;;  %v6375_v31 = vmax.f32 %v6082_v8, 0.0  ;;  %v2746_v56 = vpop.f32.mrf.mxu0 }
 0x858   :  { %v4425_v16 = vpop.f32.mrf.mxu1 }
 0x859   :  { %v6631_v44 = vpack.c.bf16 %v6375_v31, %v6375_v31  ;;  %9337 = vmatmul.msk.bf16.gmra.mxu2 %vm5110_vm1, %v5079_v9  ;;  %v4426_v25 = vadd.f32 %v4425_v16, %v2746_v56 }
 0x85a   :  { %v8519_v43 = vpop.f32.mrf.mxu3 }
 0x85b   :  { %v8619_v29 = vunpack.c.l.b16 %v6631_v44  ;;  %v13555_v32 = vmax.f32 %v8463_v3, %v8519_v43  ;;  %v4693_v39 = vadd.f32 %v13562_v48, %v4426_v25 }
 0x85c   :  { %v6084_v60 = vpop.f32.mrf.mxu2 }
 0x85d   :  { %v8623_v62 = vpack.c.b16 %v8619_v29, %v8618_v27  ;;  %v6085_v35 = vadd.f32 %v13277_v51, %v6084_v60  ;;  %v4949_v12 = vmax.f32 %v4693_v39, 0.0 }
 0x85f   :  { %9472 = vmatmul.msk.bf16.gmra.mxu3 %vm5110_vm1, %v8623_v62  ;;  %v2748_v38 = vpop.f32.mrf.mxu0  ;;  %v6376_v47 = vmax.f32 %v6085_v35, 0.0 }
 0x860   :  { %v4427_v19 = vpop.f32.mrf.mxu1 }
 0x861   :  { %v4428_v20 = vadd.f32 %v4427_v19, %v2748_v38  ;;  %v6632_v49 = vpack.c.bf16 %v6376_v47, %v6376_v47 }
 0x862   :  { %v8522_v53 = vpop.f32.mrf.mxu3 }
 0x863   :  { %v4694_v3 = vadd.f32 %v13562_v48, %v4428_v20  ;;  %v13569_v37 = vmax.f32 %v8464_v59, %v8522_v53  ;;  %v8681_v10 = vunpack.c.l.b16 %v6632_v49 }
 0x864   :  { %v6086_v34 = vpop.f32.mrf.mxu2 }
 0x865   :  { %v4950_v4 = vmax.f32 %v4694_v3, 0.0  ;;  %v6087_v0 = vadd.f32 %v13277_v51, %v6086_v34 }
 0x867   :  { %v5080_v36 = vpack.c.bf16 %v4950_v4, %v4949_v12  ;;  %v6377_v58 = vmax.f32 %v6087_v0, 0.0  ;;  %v2751_v1 = vpop.f32.mrf.mxu0 }
 0x868   :  { %v4430_v18 = vpop.f32.mrf.mxu1 }
 0x869   :  { %v6633_v17 = vpack.c.bf16 %v6377_v58, %v6377_v58  ;;  %9338 = vmatmul.msk.bf16.gmra.mxu2 %vm5110_vm1, %v5080_v36  ;;  %v4431_v40 = vadd.f32 %v4430_v18, %v2751_v1 }
 0x86a   :  { %v8524_v28 = vpop.f32.mrf.mxu3 }
 0x86b   :  { %v8682_v30 = vunpack.c.l.b16 %v6633_v17  ;;  %v13576_v21 = vmax.f32 %v8465_v7, %v8524_v28  ;;  %v4695_v5 = vadd.f32 %v13562_v48, %v4431_v40 }
 0x86c   :  { %v6089_v22 = vpop.f32.mrf.mxu2 }
 0x86d   :  { %v8689_v59 = vpack.c.b16 %v8682_v30, %v8681_v10  ;;  %v6090_v23 = vadd.f32 %v13277_v51, %v6089_v22  ;;  %v4951_v55 = vmax.f32 %v4695_v5, 0.0 }
 0x86f   :  { %9473 = vmatmul.msk.bf16.vlgmr.msrb.gmra.mxu3 %vm5110_vm1, %v8689_v59  ;;  %v2753_v13 = vpop.f32.mrf.mxu0  ;;  %v6378_v61 = vmax.f32 %v6090_v23, 0.0 }
 0x870   :  { %v4432_v57 = vpop.f32.mrf.mxu1  ;;  %8847 = vmatpush.bf16.msrb.mxu3 %v13428_v54 }
 0x871   :  { %v4433_v46 = vadd.f32 %v4432_v57, %v2753_v13  ;;  %v6634_v8 = vpack.c.bf16 %v6378_v61, %v6378_v61 }
 0x872   :  { %v13582_v11 = vpop.f32.mrf.mxu3 }
 0x873   :  { %v4696_v15 = vadd.f32 %v13562_v48, %v4433_v46  ;;  %v8596_v52 = vmax.f32 %v13513_v45, %v13582_v11  ;;  %v8683_v44 = vunpack.c.l.b16 %v6634_v8 }
 0x874   :  { %v6091_v7 = vpop.f32.mrf.mxu2  ;;  %8848 = vmatpush.bf16.msrb.mxu3 %v13440_v42 }
 0x875   :  { %v4952_v63 = vmax.f32 %v4696_v15, 0.0  ;;  %v6092_v2 = vadd.f32 %v13277_v51, %v6091_v7 }
 0x877   :  { %v5081_v54 = vpack.c.bf16 %v4952_v63, %v4951_v55  ;;  %v6379_v50 = vmax.f32 %v6092_v2, 0.0  ;;  %v2756_v9 = vpop.f32.mrf.mxu0  ;;  %v13624_v63 = vld [vmem:[%s13719_s6] ss:$0 sm:$0xff] }
 0x878   :  { %v4435_v31 = vpop.f32.mrf.mxu1  ;;  %8849 = vmatpush.bf16.msrb.mxu3 %v13447_v24 }
 0x879   :  { %v6635_v56 = vpack.c.bf16 %v6379_v50, %v6379_v50  ;;  %9339 = vmatmul.msk.bf16.gmra.mxu2 %vm5110_vm1, %v5081_v54  ;;  %v4436_v60 = vadd.f32 %v4435_v31, %v2756_v9 }
 0x87a   :  { %v13591_v16 = vpop.f32.mrf.mxu3 }
 0x87b   :  { %v8684_v43 = vunpack.c.l.b16 %v6635_v56  ;;  %v8597_v42 = vmax.f32 %v13522_v26, %v13591_v16  ;;  %v4697_v35 = vadd.f32 %v13562_v48, %v4436_v60 }
 0x87c   :  { %v6094_v27 = vpop.f32.mrf.mxu2  ;;  %8850 = vmatpush.bf16.msrb.mxu3 %v13460_v41 }
 0x87d   :  { %v8690_v29 = vpack.c.b16 %v8684_v43, %v8683_v44  ;;  %v6095_v62 = vadd.f32 %v13277_v51, %v6094_v27  ;;  %v4953_v47 = vmax.f32 %v4697_v35, 0.0 }
 0x87f   :  { %9474 = vmatmul.msk.bf16.gmra.mxu3 %vm5110_vm1, %v8690_v29  ;;  %v2758_v24 = vpop.f32.mrf.mxu0  ;;  %v6380_v39 = vmax.f32 %v6095_v62, 0.0 }
 0x880   :  { %v4437_v25 = vpop.f32.mrf.mxu1 }
 0x881   :  { %v4438_v38 = vadd.f32 %v4437_v25, %v2758_v24  ;;  %v6636_v12 = vpack.c.bf16 %v6380_v39, %v6380_v39 }
 0x882   :  { %v13599_v19 = vpop.f32.mrf.mxu3 }
 0x883   :  { %v4698_v20 = vadd.f32 %v13562_v48, %v4438_v38  ;;  %v8598_v53 = vmax.f32 %v13532_v14, %v13599_v19  ;;  %v8685_v58 = vunpack.c.l.b16 %v6636_v12 }
 0x884   :  { %v6096_v41 = vpop.f32.mrf.mxu2 }
 0x885   :  { %v4954_v3 = vmax.f32 %v4698_v20, 0.0  ;;  %v6097_v34 = vadd.f32 %v13277_v51, %v6096_v41 }
 0x887   :  { %v5082_v4 = vpack.c.bf16 %v4954_v3, %v4953_v47  ;;  %v6381_v0 = vmax.f32 %v6097_v34, 0.0 }
 0x889   :  { %v6637_v49 = vpack.c.bf16 %v6381_v0, %v6381_v0  ;;  %9340 = vmatmul.msk.bf16.gmra.mxu2 %vm5110_vm1, %v5082_v4 }
 0x88a   :  { %v13606_v36 = vpop.f32.mrf.mxu3 }
 0x88b   :  { %v8686_v1 = vunpack.c.l.b16 %v6637_v49  ;;  %v8599_v48 = vmax.f32 %v13539_v33, %v13606_v36 }
 0x88c   :  { %v6099_v18 = vpop.f32.mrf.mxu2 }
 0x88d   :  { %v8691_v17 = vpack.c.b16 %v8686_v1, %v8685_v58  ;;  %v6100_v28 = vadd.f32 %v13277_v51, %v6099_v18 }
 0x88f   :  { %9475 = vmatmul.msk.bf16.gmra.mxu3 %vm5110_vm1, %v8691_v17  ;;  %v6382_v30 = vmax.f32 %v6100_v28, 0.0 }
 0x891   :  { %v6638_v23 = vpack.c.bf16 %v6382_v30, %v6382_v30 }
 0x892   :  { %v13612_v10 = vpop.f32.mrf.mxu3 }
 0x893   :  { %v8600_v22 = vmax.f32 %v13548_v6, %v13612_v10  ;;  %v8687_v46 = vunpack.c.l.b16 %v6638_v23 }
 0x894   :  { %v6101_v59 = vpop.f32.mrf.mxu2 }
 0x895   :  { %v6102_v40 = vadd.f32 %v13277_v51, %v6101_v59 }
 0x897   :  { %v6383_v13 = vmax.f32 %v6102_v40, 0.0 }
 0x899   :  { %v6639_v57 = vpack.c.bf16 %v6383_v13, %v6383_v13 }
 0x89a   :  { %v13617_v5 = vpop.f32.mrf.mxu3 }
 0x89b   :  { %v8688_v61 = vunpack.c.l.b16 %v6639_v57  ;;  %v8601_v15 = vmax.f32 %v13555_v32, %v13617_v5 }
 0x89c   :  { %v6104_v7 = vpop.f32.mrf.mxu2 }
 0x89d   :  { %v8692_v55 = vpack.c.b16 %v8688_v61, %v8687_v46  ;;  %v6105_v2 = vadd.f32 %v13624_v63, %v6104_v7 }
 0x89f   :  { %9476 = vmatmul.msk.bf16.gmra.mxu3 %vm5110_vm1, %v8692_v55  ;;  %v6384_v8 = vmax.f32 %v6105_v2, 0.0 }
 0x8a1   :  { %v6640_v31 = vpack.c.bf16 %v6384_v8, %v6384_v8 }
 0x8a2   :  { %v13628_v51 = vpop.f32.mrf.mxu3 }
 0x8a3   :  { %v8602_v54 = vmax.f32 %v13569_v37, %v13628_v51  ;;  %v8750_v27 = vunpack.c.l.b16 %v6640_v31 }
 0x8a4   :  { %v6106_v50 = vpop.f32.mrf.mxu2 }
 0x8a5   :  { %v6107_v9 = vadd.f32 %v13624_v63, %v6106_v50 }
 0x8a7   :  { %v6385_v56 = vmax.f32 %v6107_v9, 0.0 }
 0x8a9   :  { %v6641_v44 = vpack.c.bf16 %v6385_v56, %v6385_v56 }
 0x8aa   :  { %v13633_v43 = vpop.f32.mrf.mxu3 }
 0x8ab   :  { %v8751_v29 = vunpack.c.l.b16 %v6641_v44  ;;  %v8603_v60 = vmax.f32 %v13576_v21, %v13633_v43 }
 0x8ac   :  { %v6109_v62 = vpop.f32.mrf.mxu2 }
 0x8ad   :  { %v8758_v24 = vpack.c.b16 %v8751_v29, %v8750_v27  ;;  %v6110_v25 = vadd.f32 %v13624_v63, %v6109_v62 }
 0x8af   :  { %9477 = vmatmul.msk.bf16.vlgmr.msra.gmra.mxu3 %vm5110_vm1, %v8758_v24  ;;  %v6386_v38 = vmax.f32 %v6110_v25, 0.0 }
 0x8b1   :  { %v6642_v47 = vpack.c.bf16 %v6386_v38, %v6386_v38 }
 0x8b2   :  { %v8645_v35 = vpop.f32.mrf.mxu3 }
 0x8b3   :  { %v13642_v39 = vmax.f32 %v8596_v52, %v8645_v35  ;;  %v8752_v4 = vunpack.c.l.b16 %v6642_v47 }
 0x8b4   :  { %v6111_v20 = vpop.f32.mrf.mxu2 }
 0x8b5   :  { %v6112_v41 = vadd.f32 %v13624_v63, %v6111_v20 }
 0x8b7   :  { %v6387_v3 = vmax.f32 %v6112_v41, 0.0 }
 0x8b9   :  { %v6643_v34 = vpack.c.bf16 %v6387_v3, %v6387_v3 }
 0x8ba   :  { %v8647_v12 = vpop.f32.mrf.mxu3 }
 0x8bb   :  { %v8753_v0 = vunpack.c.l.b16 %v6643_v34  ;;  %v13648_v49 = vmax.f32 %v8597_v42, %v8647_v12 }
 0x8bc   :  { %v6114_v58 = vpop.f32.mrf.mxu2 }
 0x8bd   :  { %v8759_v1 = vpack.c.b16 %v8753_v0, %v8752_v4  ;;  %v6115_v45 = vadd.f32 %v13624_v63, %v6114_v58 }
 0x8bf   :  { %9478 = vmatmul.msk.bf16.gmra.mxu3 %vm5110_vm1, %v8759_v1  ;;  %v6388_v52 = vmax.f32 %v6115_v45, 0.0 }
 0x8c1   :  { %v6644_v30 = vpack.c.bf16 %v6388_v52, %v6388_v52 }
 0x8c2   :  { %v8650_v11 = vpop.f32.mrf.mxu3 }
 0x8c3   :  { %v13655_v18 = vmax.f32 %v8598_v53, %v8650_v11  ;;  %v8754_v59 = vunpack.c.l.b16 %v6644_v30 }
 0x8c4   :  { %v6116_v17 = vpop.f32.mrf.mxu2 }
 0x8c5   :  { %v6117_v28 = vadd.f32 %v13624_v63, %v6116_v17 }
 0x8c7   :  { %v6389_v26 = vmax.f32 %v6117_v28, 0.0 }
 0x8c9   :  { %v6645_v16 = vpack.c.bf16 %v6389_v26, %v6389_v26 }
 0x8ca   :  { %v8652_v42 = vpop.f32.mrf.mxu3 }
 0x8cb   :  { %v8755_v40 = vunpack.c.l.b16 %v6645_v16  ;;  %v13661_v23 = vmax.f32 %v8599_v48, %v8652_v42 }
 0x8cc   :  { %v6119_v13 = vpop.f32.mrf.mxu2 }
 0x8cd   :  { %v8760_v57 = vpack.c.b16 %v8755_v40, %v8754_v59  ;;  %v6120_v14 = vadd.f32 %v13624_v63, %v6119_v13 }
 0x8cf   :  { %9479 = vmatmul.msk.bf16.gmra.mxu3 %vm5110_vm1, %v8760_v57  ;;  %v6390_v53 = vmax.f32 %v6120_v14, 0.0 }
 0x8d1   :  { %v6646_v55 = vpack.c.bf16 %v6390_v53, %v6390_v53 }
 0x8d2   :  { %v8655_v19 = vpop.f32.mrf.mxu3 }
 0x8d3   :  { %v13668_v46 = vmax.f32 %v8600_v22, %v8655_v19  ;;  %v8756_v2 = vunpack.c.l.b16 %v6646_v55 }
 0x8d4   :  { %v6121_v61 = vpop.f32.mrf.mxu2 }
 0x8d5   :  { %v6122_v7 = vadd.f32 %v13624_v63, %v6121_v61 }
 0x8d7   :  { %v6391_v33 = vmax.f32 %v6122_v7, 0.0 }
 0x8d9   :  { %v6647_v36 = vpack.c.bf16 %v6391_v33, %v6391_v33 }
 0x8da   :  { %v8657_v48 = vpop.f32.mrf.mxu3 }
 0x8db   :  { %v8757_v8 = vunpack.c.l.b16 %v6647_v36  ;;  %v13674_v50 = vmax.f32 %v8601_v15, %v8657_v48 }
 0x8dc   :  { %v6124_v9 = vpop.f32.mrf.mxu2 }
 0x8dd   :  { %v8761_v31 = vpack.c.b16 %v8757_v8, %v8756_v2  ;;  %v6125_v6 = vadd.f32 %v13624_v63, %v6124_v9 }
 0x8df   :  { %9480 = vmatmul.msk.bf16.gmra.mxu3 %vm5110_vm1, %v8761_v31  ;;  %v6392_v22 = vmax.f32 %v6125_v6, 0.0 }
 0x8e1   :  { %v6648_v29 = vpack.c.bf16 %v6392_v22, %v6392_v22 }
 0x8e2   :  { %v8660_v10 = vpop.f32.mrf.mxu3 }
 0x8e3   :  { %v13681_v56 = vmax.f32 %v8602_v54, %v8660_v10  ;;  %v8819_v62 = vunpack.c.l.b16 %v6648_v29 }
 0x8e4   :  { %v6126_v44 = vpop.f32.mrf.mxu2 }
 0x8e5   :  { %v6127_v27 = vadd.f32 %v13624_v63, %v6126_v44 }
 0x8e7   :  { %v6393_v32 = vmax.f32 %v6127_v27, 0.0 }
 0x8e9   :  { %v6649_v5 = vpack.c.bf16 %v6393_v32, %v6393_v32 }
 0x8ea   :  { %v8662_v15 = vpop.f32.mrf.mxu3 }
 0x8eb   :  { %v8820_v24 = vunpack.c.l.b16 %v6649_v5  ;;  %v13687_v25 = vmax.f32 %v8603_v60, %v8662_v15 }
 0x8ec   :  { %v6129_v35 = vpop.f32.mrf.mxu2 }
 0x8ed   :  { %v8827_v38 = vpack.c.b16 %v8820_v24, %v8819_v62  ;;  %v6130_v37 = vadd.f32 %v13624_v63, %v6129_v35 }
 0x8ef   :  { %9481 = vmatmul.msk.bf16.vlgmr.msrb.gmra.mxu3 %vm5110_vm1, %v8827_v38  ;;  %v6394_v54 = vmax.f32 %v6130_v37, 0.0 }
 0x8f1   :  { %v6650_v3 = vpack.c.bf16 %v6394_v54, %v6394_v54 }
 0x8f2   :  { %v8714_v51 = vpop.f32.mrf.mxu3 }
 0x8f3   :  { %v8734_v20 = vmax.f32 %v13642_v39, %v8714_v51  ;;  %v8821_v21 = vunpack.c.l.b16 %v6650_v3 }
 0x8f4   :  { %v6131_v41 = vpop.f32.mrf.mxu2 }
 0x8f5   :  { %v6132_v47 = vadd.f32 %v13624_v63, %v6131_v41 }
 0x8f7   :  { %v6395_v34 = vmax.f32 %v6132_v47, 0.0 }
 0x8f9   :  { %v6651_v12 = vpack.c.bf16 %v6395_v34, %v6395_v34 }
 0x8fa   :  { %v8716_v4 = vpop.f32.mrf.mxu3 }
 0x8fb   :  { %v8822_v43 = vunpack.c.l.b16 %v6651_v12  ;;  %v8735_v60 = vmax.f32 %v13648_v49, %v8716_v4 }
 0x8fc   :  { %v6134_v0 = vpop.f32.mrf.mxu2 }
 0x8fd   :  { %v8828_v58 = vpack.c.b16 %v8822_v43, %v8821_v21  ;;  %v6135_v1 = vadd.f32 %v13624_v63, %v6134_v0 }
 0x8ff   :  { %9482 = vmatmul.msk.bf16.gmra.mxu3 %vm5110_vm1, %v8828_v58  ;;  %v6396_v11 = vmax.f32 %v6135_v1, 0.0 }
 0x901   :  { %v6652_v28 = vpack.c.bf16 %v6396_v11, %v6396_v11 }
 0x902   :  { %v8719_v45 = vpop.f32.mrf.mxu3 }
 0x903   :  { %v8736_v39 = vmax.f32 %v13655_v18, %v8719_v45  ;;  %v8823_v42 = vunpack.c.l.b16 %v6652_v28 }
 0x904   :  { %v6136_v52 = vpop.f32.mrf.mxu2 }
 0x905   :  { %v6137_v17 = vadd.f32 %v13624_v63, %v6136_v52 }
 0x907   :  { %v6397_v30 = vmax.f32 %v6137_v17, 0.0 }
 0x909   :  { %v6653_v26 = vpack.c.bf16 %v6397_v30, %v6397_v30 }
 0x90a   :  { %v8721_v16 = vpop.f32.mrf.mxu3 }
 0x90b   :  { %v8824_v59 = vunpack.c.l.b16 %v6653_v26  ;;  %v8737_v49 = vmax.f32 %v13661_v23, %v8721_v16 }
 0x90c   :  { %v6139_v40 = vpop.f32.mrf.mxu2 }
 0x90d   :  { %v8829_v13 = vpack.c.b16 %v8824_v59, %v8823_v42  ;;  %v6140_v57 = vadd.f32 %v13624_v63, %v6139_v40 }
 0x90f   :  { %9483 = vmatmul.msk.bf16.gmra.mxu3 %vm5110_vm1, %v8829_v13  ;;  %v6398_v19 = vmax.f32 %v6140_v57, 0.0 }
 0x911   :  { %v6654_v7 = vpack.c.bf16 %v6398_v19, %v6398_v19 }
 0x912   :  { %v8724_v14 = vpop.f32.mrf.mxu3 }
 0x913   :  { %v8738_v18 = vmax.f32 %v13668_v46, %v8724_v14  ;;  %v8825_v48 = vunpack.c.l.b16 %v6654_v7 }
 0x914   :  { %v6141_v53 = vpop.f32.mrf.mxu2 }
 0x915   :  { %v6142_v61 = vadd.f32 %v13624_v63, %v6141_v53 }
 0x917   :  { %v6399_v55 = vmax.f32 %v6142_v61, 0.0 }
 0x919   :  { %v6655_v33 = vpack.c.bf16 %v6399_v55, %v6399_v55 }
 0x91a   :  { %v8726_v36 = vpop.f32.mrf.mxu3 }
 0x91b   :  { %v8826_v2 = vunpack.c.l.b16 %v6655_v33  ;;  %v8739_v23 = vmax.f32 %v13674_v50, %v8726_v36 }
 0x91d   :  { %v8830_v8 = vpack.c.b16 %v8826_v2, %v8825_v48 }
 0x91f   :  { %9484 = vmatmul.msk.bf16.gmra.mxu3 %vm5110_vm1, %v8830_v8 }
 0x922   :  { %v8729_v9 = vpop.f32.mrf.mxu3 }
 0x923   :  { %v8740_v31 = vmax.f32 %v13681_v56, %v8729_v9  ;;  %v9523_v56 = vld [vmem:[%s13721_s8] ss:$0 sm:$0xff]  ;;  %s9606_s8 = smov [#allocation2]  }
 0x924   :  { %s8919_s17 = sshll.u32 %s9606_s8, 4  ;;  %s8920_s17 = int_to_ptr.vmem [resolvable:$true] %s8919_s17 }
 0x92a   :  { %v8731_v6 = vpop.f32.mrf.mxu3 }
 0x92b   :  { %v8741_v46 = vmax.f32 %v13687_v25, %v8731_v6 }
 0x932   :  { %v8783_v10 = vpop.f32.mrf.mxu3 }
 0x933   :  { %v8803_v22 = vmax.f32 %v8734_v20, %v8783_v10 }
 0x93a   :  { %v8785_v63 = vpop.f32.mrf.mxu3 }
 0x93b   :  { %v8804_v37 = vmax.f32 %v8735_v60, %v8785_v63 }
 0x942   :  { %v8788_v44 = vpop.f32.mrf.mxu3 }
 0x943   :  { %v8805_v27 = vmax.f32 %v8736_v39, %v8788_v44 }
 0x94a   :  { %v8790_v29 = vpop.f32.mrf.mxu3 }
 0x94b   :  { %v8806_v4 = vmax.f32 %v8737_v49, %v8790_v29 }
 0x952   :  { %v8793_v32 = vpop.f32.mrf.mxu3 }
 0x953   :  { %v8807_v5 = vmax.f32 %v8738_v18, %v8793_v32 }
 0x95a   :  { %v8795_v15 = vpop.f32.mrf.mxu3 }
 0x95b   :  { %v8808_v52 = vmax.f32 %v8739_v23, %v8795_v15 }
 0x962   :  { %v8798_v62 = vpop.f32.mrf.mxu3 }
 0x963   :  { %v8809_v50 = vmax.f32 %v8740_v31, %v8798_v62 }
 0x96a   :  { %v8800_v24 = vpop.f32.mrf.mxu3 }
 0x96b   :  { %v8810_v13 = vmax.f32 %v8741_v46, %v8800_v24 }
 0x972   :  { %v8852_v35 = vpop.f32.mrf.mxu3 }
 0x973   :  { %v8872_v38 = vmax.f32 %v8803_v22, %v8852_v35 }
 0x975   :  { %v8883_v51 = vadd.f32 %v9523_v56, %v8872_v38 }
 0x977   :  { %v8891_v41 = vmax.f32 %v8883_v51, 0.0 }
 0x97a   :  { %v8854_v25 = vpop.f32.mrf.mxu3 }
 0x97b   :  { %v8873_v54 = vmax.f32 %v8804_v37, %v8854_v25 }
 0x97d   :  { %v8884_v20 = vadd.f32 %v9523_v56, %v8873_v54 }
 0x97f   :  { %v8892_v47 = vmax.f32 %v8884_v20, 0.0 }
 0x981   :  { %v9498_v3 = vpack.c.bf16 %v8892_v47, %v8891_v41 }
 0x982   :  { %v8857_v34 = vpop.f32.mrf.mxu3 }
 0x983   :  { %9499 = vst [vmem:[#allocation2] sm:$0xff] %v9498_v3   ;;  %v8874_v12 = vmax.f32 %v8805_v27, %v8857_v34 }
 0x985   :  { %v8885_v43 = vadd.f32 %v9523_v56, %v8874_v12 }
 0x987   :  { %v8893_v1 = vmax.f32 %v8885_v43, 0.0 }
 0x98a   :  { %v8859_v21 = vpop.f32.mrf.mxu3 }
 0x98b   :  { %v8875_v0 = vmax.f32 %v8806_v4, %v8859_v21 }
 0x98d   :  { %v8886_v58 = vadd.f32 %v9523_v56, %v8875_v0 }
 0x98f   :  { %v8894_v45 = vmax.f32 %v8886_v58, 0.0 }
 0x991   :  { %v9503_v11 = vpack.c.bf16 %v8894_v45, %v8893_v1 }
 0x992   :  { %v8862_v39 = vpop.f32.mrf.mxu3 }
 0x993   :  { %9515 = vst [vmem:[#allocation2 + $0x8] sm:$0xff] %v9503_v11   ;;  %v8876_v60 = vmax.f32 %v8807_v5, %v8862_v39 }
 0x995   :  { %v8887_v28 = vadd.f32 %v9523_v56, %v8876_v60 }
 0x997   :  { %v8895_v16 = vmax.f32 %v8887_v28, 0.0 }
 0x99a   :  { %v8864_v17 = vpop.f32.mrf.mxu3 }
 0x99b   :  { %v8877_v30 = vmax.f32 %v8808_v52, %v8864_v17 }
 0x99d   :  { %v8888_v26 = vadd.f32 %v9523_v56, %v8877_v30 }
 0x99f   :  { %v8896_v42 = vmax.f32 %v8888_v26, 0.0 }
 0x9a1   :  { %v9508_v59 = vpack.c.bf16 %v8896_v42, %v8895_v16 }
 0x9a2   :  { %v8867_v40 = vpop.f32.mrf.mxu3 }
 0x9a3   :  { %9516 = vst [vmem:[#allocation2 + $0x10] sm:$0xff] %v9508_v59   ;;  %v8878_v49 = vmax.f32 %v8809_v50, %v8867_v40 }
 0x9a5   :  { %v8889_v14 = vadd.f32 %v9523_v56, %v8878_v49 }
 0x9a7   :  { %v8897_v53 = vmax.f32 %v8889_v14, 0.0 }
 0x9aa   :  { %v8869_v57 = vpop.f32.mrf.mxu3 }
 0x9ab   :  { %v8879_v19 = vmax.f32 %v8810_v13, %v8869_v57 }
 0x9ad   :  { %v8890_v18 = vadd.f32 %v9523_v56, %v8879_v19 }
 0x9af   :  { %v8898_v61 = vmax.f32 %v8890_v18, 0.0 }
 0x9b1   :  { %v9513_v7 = vpack.c.bf16 %v8898_v61, %v8897_v53 }
 0x9b3   :  { %9517 = vst [vmem:[#allocation2 + $0x18] sm:$0xff] %v9513_v7  }
 0x9b4   :  { %8927 = dma.vmem_to_hbm [thread:$0]  %s8920_s17, 512, %s8922_s20, [#allocation3], %s9607_s2, %s9607_s2, %s9608_s5  }
 0x9b5   :  { %9604 = dma.done.wait [#allocation3], 512  }
 0x9b6   :  { %9605 = vsyncadd [#allocation3], 4294966784 }
 0x9b7   :  { %8932 = vsyncpa [#allocation3], 1 }

</bundles_post_ra>
